<compile_context>
chip_gen: v7x
topology: tpu7x:2x2x1
jax: 0.10.0
libtpu: 0.0.40
codegen_flags: <defaults>
</compile_context>

<pallas_src>
import numpy as np
import jax
import jax.numpy as jnp
from jax import lax
from jax.experimental import pallas as pl
from jax.experimental.pallas import tpu as pltpu


def _round_up(x, m):
    return (x + m - 1) // m * m


def _tap_offsets(Hp, Wp):
    # Flat offsets in the zero-padded (Dp, Hp, Wp) volume, ordered kd,kh,kw.
    offs = []
    for kd in (-1, 0, 1):
        for kh in (-1, 0, 1):
            for kw in (-1, 0, 1):
                offs.append(kd * Hp * Wp + kh * Wp + kw)
    return offs


def _make_rdb_kernel(*, in_ch, C, growth, S_N, LPAD, offs):
    n_taps = len(offs)
    c_tot = in_ch + C * growth

    def kernel(*refs):
        mask_ref = refs[0]                       # (1, S_N)  interior mask
        x_ref = refs[1]                          # (1, in_ch, S_N)
        w_refs = [refs[2 + 2 * i] for i in range(C)]       # (growth, 27*cin_i)
        b_refs = [refs[2 + 2 * i + 1] for i in range(C)]   # (growth, 1)
        wl_ref = refs[2 + 2 * C]                 # (in_ch, c_tot)
        bl_ref = refs[3 + 2 * C]                 # (in_ch, 1)
        o_ref = refs[4 + 2 * C]                  # (1, in_ch, S_N)
        feat_ref = refs[5 + 2 * C]               # (c_tot, LPAD + S_N + LPAD)
        col_ref = refs[6 + 2 * C]                # (27*cin_max, S_N)

        # Zero ONLY the halo margins.  The middle [LPAD, LPAD+S_N) columns are
        # always fully written before being read (x staging / per-layer y
        # stores with masked pad columns).  Done every grid step so it stays
        # correct when the parallel batch axis is sharded across TensorCores.
        feat_ref[:, 0:LPAD] = jnp.zeros((c_tot, LPAD), jnp.float32)
        feat_ref[:, LPAD + S_N:LPAD + S_N + LPAD] = jnp.zeros(
            (c_tot, LPAD), jnp.float32)

        # Stage this batch element's padded, flattened volume.
        x_blk = x_ref[0].astype(jnp.float32)
        feat_ref[0:in_ch, LPAD:LPAD + S_N] = x_blk

        mask = mask_ref[...]                     # hoisted out of the layer loop

        # im2col block for the input channels (27 constant-lane-shift copies).
        for k in range(n_taps):
            start = LPAD + offs[k]
            col_ref[k * in_ch:(k + 1) * in_ch, :] = (
                feat_ref[0:in_ch, start:start + S_N])

        cur = in_ch
        for i in range(C):
            cin = in_ch + i * growth
            kcols = n_taps * cin
            # Single wide-K MXU matmul for the whole 3x3x3 conv; col rows for
            # channels 0:cin are already valid from previous layers.
            y = jnp.dot(w_refs[i][...], col_ref[0:kcols, :],
                        preferred_element_type=jnp.float32)
            # Bias + ReLU, then zero non-interior columns with one multiply so
            # the next layer sees correct zero padding.
            y = jnp.maximum(y + b_refs[i][...], 0.0) * mask
            feat_ref[cur:cur + growth, LPAD:LPAD + S_N] = y
            # Incrementally append ONLY the new channels' tap rows (skip after
            # the last dense layer: the 1x1 conv reads feat, not col).
            if i + 1 < C:
                base = kcols
                for k in range(n_taps):
                    start = LPAD + offs[k]
                    col_ref[base + k * growth:base + (k + 1) * growth, :] = (
                        feat_ref[cur:cur + growth, start:start + S_N])
            cur += growth

        # Fused 1x1x1 conv + bias + residual add (one matmul).
        feat_all = feat_ref[0:c_tot, LPAD:LPAD + S_N]
        out = jnp.dot(wl_ref[...], feat_all, preferred_element_type=jnp.float32)
        out = out + bl_ref[...] + x_blk
        o_ref[0] = out.astype(o_ref.dtype)

    return kernel


@jax.jit
def rdb3d_forward(params, x):
    # x: (N, Cin, D, H, W)  -- PyTorch NCDHW layout (already channels-first).
    N, in_ch, D, H, W = x.shape
    C = len(params["dense"])
    growth = params["dense"][0][0].shape[0]
    c_tot = in_ch + C * growth
    cin_max = in_ch + (C - 1) * growth

    Dp, Hp, Wp = D + 2, H + 2, W + 2
    S_pad = Dp * Hp * Wp
    S_N = _round_up(S_pad, 128)                  # lane-dense spatial width
    margin = Hp * Wp + Wp + 1                    # |max tap offset|
    LPAD = _round_up(margin, 128)                # halo margin (lane aligned)
    S_BUF = LPAD + S_N + LPAD
    offs = _tap_offsets(Hp, Wp)

    # Zero-pad spatially, flatten spatial, pad lanes to a multiple of 128.
    xp = jnp.pad(x, ((0, 0), (0, 0), (1, 1), (1, 1), (1, 1)))
    xp = xp.reshape(N, in_ch, S_pad)
    xp = jnp.pad(xp, ((0, 0), (0, 0), (0, S_N - S_pad)))

    # Interior mask over padded-flat positions (1.0 at real output voxels).
    idx = np.arange(S_N)
    d = idx // (Hp * Wp)
    r = idx % (Hp * Wp)
    h = r // Wp
    w_ = r % Wp
    interior = ((idx < S_pad) & (d >= 1) & (d <= D) &
                (h >= 1) & (h <= H) & (w_ >= 1) & (w_ <= W))
    mask = jnp.asarray(interior.astype(np.float32)).reshape(1, S_N)

    kernel = _make_rdb_kernel(in_ch=in_ch, C=C, growth=growth,
                              S_N=S_N, LPAD=LPAD, offs=offs)

    in_specs = [
        pl.BlockSpec((1, S_N), lambda n: (0, 0)),             # mask
        pl.BlockSpec((1, in_ch, S_N), lambda n: (n, 0, 0)),   # x
    ]
    operands = [mask, xp]
    for (w_i, b_i) in params["dense"]:
        in_specs.append(pl.BlockSpec(w_i.shape, lambda n: (0, 0)))
        in_specs.append(pl.BlockSpec(b_i.shape, lambda n: (0, 0)))
        operands += [w_i, b_i]
    in_specs.append(pl.BlockSpec(params["last_w"].shape, lambda n: (0, 0)))
    in_specs.append(pl.BlockSpec(params["last_b"].shape, lambda n: (0, 0)))
    operands += [params["last_w"], params["last_b"]]

    scratch = [
        pltpu.VMEM((c_tot, S_BUF), jnp.float32),          # resident feat
        pltpu.VMEM((27 * cin_max, S_N), jnp.float32),     # incremental im2col
    ]

    # Need-based VMEM budget: persistent scratch + double-buffered x/out
    # blocks + mask + weights, with headroom.  Capped at 100 MiB (v5e/v6e have
    # 128 MiB physical); v7x-scale volumes need the spatial-tiling TODO first.
    scratch_bytes = 4 * (c_tot * S_BUF + 27 * cin_max * S_N)
    io_bytes = 4 * (2 * 2 * in_ch * S_N + 2 * S_N)
    w_bytes = 4 * sum(int(np.prod(o.shape)) for o in operands[2:])
    vmem_limit = min(int(1.25 * (scratch_bytes + io_bytes + 2 * w_bytes))
                     + (8 << 20), 100 << 20)

    out = pl.pallas_call(
        kernel,
        out_shape=jax.ShapeDtypeStruct((N, in_ch, S_N), x.dtype),
        grid_spec=pltpu.PrefetchScalarGridSpec(
            num_scalar_prefetch=0,
            grid=(N,),
            in_specs=in_specs,
            out_specs=pl.BlockSpec((1, in_ch, S_N), lambda n: (n, 0, 0)),
            scratch_shapes=scratch,
        ),
        compiler_params=pltpu.CompilerParams(
            dimension_semantics=("parallel",),
            vmem_limit_bytes=vmem_limit,
        ),
    )(*operands)

    # Drop the lane padding and the spatial zero-padding border.
    out = out[:, :, :S_pad].reshape(N, in_ch, Dp, Hp, Wp)
    return out[:, :, 1:-1, 1:-1, 1:-1]


# ----------------------------------------------------------------------------
# Parameter init: weights stored in the fused-kernel (block, tap-major) layout
# ----------------------------------------------------------------------------
def _to_block_layout(w5, in_channels, growth):
    # w5: (g_out, cin, 3, 3, 3) PyTorch layout ->
    # (g_out, 27*cin) with columns grouped per channel block
    # [x | dense0 | dense1 | ...] and ordered (tap, local-channel) inside each
    # block: column = block_offset + k*block_width + c_local, k = kd*9+kh*3+kw.
    g_out, cin = w5.shape[0], w5.shape[1]
    widths = [in_channels] + [growth] * ((cin - in_channels) // growth)
    blocks, c0 = [], 0
    for wdt in widths:
        blk = w5[:, c0:c0 + wdt].reshape(g_out, wdt, 27)       # taps last
        blk = jnp.transpose(blk, (0, 2, 1)).reshape(g_out, 27 * wdt)
        blocks.append(blk)
        c0 += wdt
    return jnp.concatenate(blocks, axis=1)


def init_rdb3d_params(key, in_channels, C, growth, dtype=jnp.float32):
    params = {"dense": [], "dense_w5": []}
    for i in range(C):
        cin = in_channels + i * growth
        key, kw, kb = jax.random.split(key, 3)
        w5 = jax.random.normal(kw, (growth, cin, 3, 3, 3), dtype) * 0.1
        b = jax.random.normal(kb, (growth, 1), dtype) * 0.1
        params["dense_w5"].append(w5)
        params["dense"].append((_to_block_layout(w5, in_channels, growth), b))
    cin = in_channels + C * growth
    key, kw, kb = jax.random.split(key, 3)
    params["last_w"] = jax.random.normal(kw, (in_channels, cin), dtype) * 0.1
    params["last_b"] = jax.random.normal(kb, (in_channels, 1), dtype) * 0.1
    return params


# ----------------------------------------------------------------------------
# Pure-JAX reference (for correctness check), NCDHW layout
# ----------------------------------------------------------------------------
def rdb3d_ref(params, x):
    N, in_ch, D, H, W = x.shape
    feat = x
    for w5, (_, b) in zip(params["dense_w5"], params["dense"]):
        growth = w5.shape[0]
        w = jnp.transpose(w5, (2, 3, 4, 1, 0))          # (kd,kh,kw,cin,out)
        y = lax.conv_general_dilated(
            feat, w, window_strides=(1, 1, 1), padding="SAME",
            dimension_numbers=("NCDHW", "DHWIO", "NCDHW"),
            precision=lax.Precision.HIGHEST)
        y = jnp.maximum(y + b.reshape(1, growth, 1, 1, 1), 0.0)
        feat = jnp.concatenate([feat, y], axis=1)
    y = jnp.einsum("ncdhw,oc->nodhw", feat, params["last_w"],
                   precision=lax.Precision.HIGHEST)
    y = y + params["last_b"].reshape(1, in_ch, 1, 1, 1)
    return x + y


if __name__ == "__main__":
    key = jax.random.PRNGKey(0)
    in_channels, C, growth = 4, 2, 4
    N, D, H, W = 2, 8, 8, 8

    kx, kp = jax.random.split(key)
    x = jax.random.normal(kx, (N, in_channels, D, H, W), jnp.float32)
    params = init_rdb3d_params(kp, in_channels, C, growth)

    out = jax.block_until_ready(rdb3d_forward(params, x))
    ref = jax.block_until_ready(rdb3d_ref(params, x))

    assert out.shape == x.shape, (out.shape, x.shape)
    err = float(jnp.max(jnp.abs(out - ref)))
    assert jnp.allclose(out, ref, atol=1e-3, rtol=1e-3), f"max abs err {err}"
    print("KERNEL_OK")
</pallas_src>

<mosaic_0001>
module attributes {stable_mosaic.version = 11 : i64} {
  func.func @kernel(%arg0: i32, %arg1: memref<1x1024xf32, #tpu.memory_space<vmem>>, %arg2: memref<1x4x1024xf32, #tpu.memory_space<vmem>>, %arg3: memref<4x108xf32, #tpu.memory_space<vmem>>, %arg4: memref<4x1xf32, #tpu.memory_space<vmem>>, %arg5: memref<4x216xf32, #tpu.memory_space<vmem>>, %arg6: memref<4x1xf32, #tpu.memory_space<vmem>>, %arg7: memref<4x12xf32, #tpu.memory_space<vmem>>, %arg8: memref<4x1xf32, #tpu.memory_space<vmem>>, %arg9: memref<1x4x1024xf32, #tpu.memory_space<vmem>>, %arg10: memref<12x1280xf32, #tpu.memory_space<vmem>>, %arg11: memref<216x1024xf32, #tpu.memory_space<vmem>>) attributes {dimension_semantics = [#tpu.dimension_semantics<parallel>], iteration_bounds = array<i64: 2>, scalar_prefetch = 0 : i64, scratch_operands = 2 : i64, tpu.core_type = #tpu.core_type<tc>, window_params = [{pipeline_mode = #tpu.pipeline_mode<synchronous>, transform_indices = @transform_0, window_bounds = array<i64: 1, 1024>}, {transform_indices = @transform_1, window_bounds = array<i64: 1, 4, 1024>}, {pipeline_mode = #tpu.pipeline_mode<synchronous>, transform_indices = @transform_2, window_bounds = array<i64: 4, 108>}, {pipeline_mode = #tpu.pipeline_mode<synchronous>, transform_indices = @transform_3, window_bounds = array<i64: 4, 1>}, {pipeline_mode = #tpu.pipeline_mode<synchronous>, transform_indices = @transform_4, window_bounds = array<i64: 4, 216>}, {pipeline_mode = #tpu.pipeline_mode<synchronous>, transform_indices = @transform_5, window_bounds = array<i64: 4, 1>}, {pipeline_mode = #tpu.pipeline_mode<synchronous>, transform_indices = @transform_6, window_bounds = array<i64: 4, 12>}, {pipeline_mode = #tpu.pipeline_mode<synchronous>, transform_indices = @transform_7, window_bounds = array<i64: 4, 1>}, {transform_indices = @transform_8, window_bounds = array<i64: 1, 4, 1024>}]} {
    %cst = arith.constant 0.000000e+00 : f32
    %0 = vector.broadcast %cst : f32 to vector<12x128xf32>
    %c0 = arith.constant 0 : index
    %c0_0 = arith.constant 0 : index
    %1 = vector.load %arg10[%c0, %c0_0] : memref<12x1280xf32, #tpu.memory_space<vmem>>, vector<12x128xf32>
    tpu.vector_store %arg10[%c0, %c0_0], %0 {strides = array<i32>} : memref<12x1280xf32, #tpu.memory_space<vmem>>, vector<12x128xf32>,
    %cst_1 = arith.constant 0.000000e+00 : f32
    %2 = vector.broadcast %cst_1 : f32 to vector<12x128xf32>
    %c0_2 = arith.constant 0 : index
    %c1152 = arith.constant 1152 : index
    %3 = vector.load %arg10[%c0_2, %c1152] : memref<12x1280xf32, #tpu.memory_space<vmem>>, vector<12x128xf32>
    tpu.vector_store %arg10[%c0_2, %c1152], %2 {strides = array<i32>} : memref<12x1280xf32, #tpu.memory_space<vmem>>, vector<12x128xf32>,
    %c0_3 = arith.constant 0 : index
    %c0_4 = arith.constant 0 : index
    %c0_5 = arith.constant 0 : index
    %4 = vector.load %arg2[%c0_3, %c0_4, %c0_5] : memref<1x4x1024xf32, #tpu.memory_space<vmem>>, vector<1x4x1024xf32>
    %5 = vector.shape_cast %4 : vector<1x4x1024xf32> to vector<4x1024xf32>
    %c0_6 = arith.constant 0 : index
    %c128 = arith.constant 128 : index
    %6 = vector.load %arg10[%c0_6, %c128] : memref<12x1280xf32, #tpu.memory_space<vmem>>, vector<4x1024xf32>
    tpu.vector_store %arg10[%c0_6, %c128], %5 {strides = array<i32>} : memref<12x1280xf32, #tpu.memory_space<vmem>>, vector<4x1024xf32>,
    %c0_7 = arith.constant 0 : index
    %c0_8 = arith.constant 0 : index
    %7 = vector.load %arg1[%c0_7, %c0_8] : memref<1x1024xf32, #tpu.memory_space<vmem>>, vector<1x1024xf32>
    %c0_9 = arith.constant 0 : index
    %c17 = arith.constant 17 : index
    %8 = vector.load %arg10[%c0_9, %c17] : memref<12x1280xf32, #tpu.memory_space<vmem>>, vector<4x1024xf32>
    %c0_10 = arith.constant 0 : index
    %c0_11 = arith.constant 0 : index
    %9 = vector.load %arg11[%c0_10, %c0_11] : memref<216x1024xf32, #tpu.memory_space<vmem>>, vector<4x1024xf32>
    tpu.vector_store %arg11[%c0_10, %c0_11], %8 {strides = array<i32>} : memref<216x1024xf32, #tpu.memory_space<vmem>>, vector<4x1024xf32>,
    %c0_12 = arith.constant 0 : index
    %c18 = arith.constant 18 : index
    %10 = vector.load %arg10[%c0_12, %c18] : memref<12x1280xf32, #tpu.memory_space<vmem>>, vector<4x1024xf32>
    %c4 = arith.constant 4 : index
    %c0_13 = arith.constant 0 : index
    %11 = vector.load %arg11[%c4, %c0_13] : memref<216x1024xf32, #tpu.memory_space<vmem>>, vector<4x1024xf32>
    tpu.vector_store %arg11[%c4, %c0_13], %10 {strides = array<i32>} : memref<216x1024xf32, #tpu.memory_space<vmem>>, vector<4x1024xf32>,
    %c0_14 = arith.constant 0 : index
    %c19 = arith.constant 19 : index
    %12 = vector.load %arg10[%c0_14, %c19] : memref<12x1280xf32, #tpu.memory_space<vmem>>, vector<4x1024xf32>
    %c8 = arith.constant 8 : index
    %c0_15 = arith.constant 0 : index
    %13 = vector.load %arg11[%c8, %c0_15] : memref<216x1024xf32, #tpu.memory_space<vmem>>, vector<4x1024xf32>
    tpu.vector_store %arg11[%c8, %c0_15], %12 {strides = array<i32>} : memref<216x1024xf32, #tpu.memory_space<vmem>>, vector<4x1024xf32>,
    %c0_16 = arith.constant 0 : index
    %c27 = arith.constant 27 : index
    %14 = vector.load %arg10[%c0_16, %c27] : memref<12x1280xf32, #tpu.memory_space<vmem>>, vector<4x1024xf32>
    %c12 = arith.constant 12 : index
    %c0_17 = arith.constant 0 : index
    %15 = vector.load %arg11[%c12, %c0_17] : memref<216x1024xf32, #tpu.memory_space<vmem>>, vector<4x1024xf32>
    tpu.vector_store %arg11[%c12, %c0_17], %14 {strides = array<i32>} : memref<216x1024xf32, #tpu.memory_space<vmem>>, vector<4x1024xf32>,
    %c0_18 = arith.constant 0 : index
    %c28 = arith.constant 28 : index
    %16 = vector.load %arg10[%c0_18, %c28] : memref<12x1280xf32, #tpu.memory_space<vmem>>, vector<4x1024xf32>
    %c16 = arith.constant 16 : index
    %c0_19 = arith.constant 0 : index
    %17 = vector.load %arg11[%c16, %c0_19] : memref<216x1024xf32, #tpu.memory_space<vmem>>, vector<4x1024xf32>
    tpu.vector_store %arg11[%c16, %c0_19], %16 {strides = array<i32>} : memref<216x1024xf32, #tpu.memory_space<vmem>>, vector<4x1024xf32>,
    %c0_20 = arith.constant 0 : index
    %c29 = arith.constant 29 : index
    %18 = vector.load %arg10[%c0_20, %c29] : memref<12x1280xf32, #tpu.memory_space<vmem>>, vector<4x1024xf32>
    %c20 = arith.constant 20 : index
    %c0_21 = arith.constant 0 : index
    %19 = vector.load %arg11[%c20, %c0_21] : memref<216x1024xf32, #tpu.memory_space<vmem>>, vector<4x1024xf32>
    tpu.vector_store %arg11[%c20, %c0_21], %18 {strides = array<i32>} : memref<216x1024xf32, #tpu.memory_space<vmem>>, vector<4x1024xf32>,
    %c0_22 = arith.constant 0 : index
    %c37 = arith.constant 37 : index
    %20 = vector.load %arg10[%c0_22, %c37] : memref<12x1280xf32, #tpu.memory_space<vmem>>, vector<4x1024xf32>
    %c24 = arith.constant 24 : index
    %c0_23 = arith.constant 0 : index
    %21 = vector.load %arg11[%c24, %c0_23] : memref<216x1024xf32, #tpu.memory_space<vmem>>, vector<4x1024xf32>
    tpu.vector_store %arg11[%c24, %c0_23], %20 {strides = array<i32>} : memref<216x1024xf32, #tpu.memory_space<vmem>>, vector<4x1024xf32>,
    %c0_24 = arith.constant 0 : index
    %c38 = arith.constant 38 : index
    %22 = vector.load %arg10[%c0_24, %c38] : memref<12x1280xf32, #tpu.memory_space<vmem>>, vector<4x1024xf32>
    %c28_25 = arith.constant 28 : index
    %c0_26 = arith.constant 0 : index
    %23 = vector.load %arg11[%c28_25, %c0_26] : memref<216x1024xf32, #tpu.memory_space<vmem>>, vector<4x1024xf32>
    tpu.vector_store %arg11[%c28_25, %c0_26], %22 {strides = array<i32>} : memref<216x1024xf32, #tpu.memory_space<vmem>>, vector<4x1024xf32>,
    %c0_27 = arith.constant 0 : index
    %c39 = arith.constant 39 : index
    %24 = vector.load %arg10[%c0_27, %c39] : memref<12x1280xf32, #tpu.memory_space<vmem>>, vector<4x1024xf32>
    %c32 = arith.constant 32 : index
    %c0_28 = arith.constant 0 : index
    %25 = vector.load %arg11[%c32, %c0_28] : memref<216x1024xf32, #tpu.memory_space<vmem>>, vector<4x1024xf32>
    tpu.vector_store %arg11[%c32, %c0_28], %24 {strides = array<i32>} : memref<216x1024xf32, #tpu.memory_space<vmem>>, vector<4x1024xf32>,
    %c0_29 = arith.constant 0 : index
    %c117 = arith.constant 117 : index
    %26 = vector.load %arg10[%c0_29, %c117] : memref<12x1280xf32, #tpu.memory_space<vmem>>, vector<4x1024xf32>
    %c36 = arith.constant 36 : index
    %c0_30 = arith.constant 0 : index
    %27 = vector.load %arg11[%c36, %c0_30] : memref<216x1024xf32, #tpu.memory_space<vmem>>, vector<4x1024xf32>
    tpu.vector_store %arg11[%c36, %c0_30], %26 {strides = array<i32>} : memref<216x1024xf32, #tpu.memory_space<vmem>>, vector<4x1024xf32>,
    %c0_31 = arith.constant 0 : index
    %c118 = arith.constant 118 : index
    %28 = vector.load %arg10[%c0_31, %c118] : memref<12x1280xf32, #tpu.memory_space<vmem>>, vector<4x1024xf32>
    %c40 = arith.constant 40 : index
    %c0_32 = arith.constant 0 : index
    %29 = vector.load %arg11[%c40, %c0_32] : memref<216x1024xf32, #tpu.memory_space<vmem>>, vector<4x1024xf32>
    tpu.vector_store %arg11[%c40, %c0_32], %28 {strides = array<i32>} : memref<216x1024xf32, #tpu.memory_space<vmem>>, vector<4x1024xf32>,
    %c0_33 = arith.constant 0 : index
    %c119 = arith.constant 119 : index
    %30 = vector.load %arg10[%c0_33, %c119] : memref<12x1280xf32, #tpu.memory_space<vmem>>, vector<4x1024xf32>
    %c44 = arith.constant 44 : index
    %c0_34 = arith.constant 0 : index
    %31 = vector.load %arg11[%c44, %c0_34] : memref<216x1024xf32, #tpu.memory_space<vmem>>, vector<4x1024xf32>
    tpu.vector_store %arg11[%c44, %c0_34], %30 {strides = array<i32>} : memref<216x1024xf32, #tpu.memory_space<vmem>>, vector<4x1024xf32>,
    %c0_35 = arith.constant 0 : index
    %c127 = arith.constant 127 : index
    %32 = vector.load %arg10[%c0_35, %c127] : memref<12x1280xf32, #tpu.memory_space<vmem>>, vector<4x1024xf32>
    %c48 = arith.constant 48 : index
    %c0_36 = arith.constant 0 : index
    %33 = vector.load %arg11[%c48, %c0_36] : memref<216x1024xf32, #tpu.memory_space<vmem>>, vector<4x1024xf32>
    tpu.vector_store %arg11[%c48, %c0_36], %32 {strides = array<i32>} : memref<216x1024xf32, #tpu.memory_space<vmem>>, vector<4x1024xf32>,
    %c0_37 = arith.constant 0 : index
    %c128_38 = arith.constant 128 : index
    %34 = vector.load %arg10[%c0_37, %c128_38] : memref<12x1280xf32, #tpu.memory_space<vmem>>, vector<4x1024xf32>
    %c52 = arith.constant 52 : index
    %c0_39 = arith.constant 0 : index
    %35 = vector.load %arg11[%c52, %c0_39] : memref<216x1024xf32, #tpu.memory_space<vmem>>, vector<4x1024xf32>
    tpu.vector_store %arg11[%c52, %c0_39], %34 {strides = array<i32>} : memref<216x1024xf32, #tpu.memory_space<vmem>>, vector<4x1024xf32>,
    %c0_40 = arith.constant 0 : index
    %c129 = arith.constant 129 : index
    %36 = vector.load %arg10[%c0_40, %c129] : memref<12x1280xf32, #tpu.memory_space<vmem>>, vector<4x1024xf32>
    %c56 = arith.constant 56 : index
    %c0_41 = arith.constant 0 : index
    %37 = vector.load %arg11[%c56, %c0_41] : memref<216x1024xf32, #tpu.memory_space<vmem>>, vector<4x1024xf32>
    tpu.vector_store %arg11[%c56, %c0_41], %36 {strides = array<i32>} : memref<216x1024xf32, #tpu.memory_space<vmem>>, vector<4x1024xf32>,
    %c0_42 = arith.constant 0 : index
    %c137 = arith.constant 137 : index
    %38 = vector.load %arg10[%c0_42, %c137] : memref<12x1280xf32, #tpu.memory_space<vmem>>, vector<4x1024xf32>
    %c60 = arith.constant 60 : index
    %c0_43 = arith.constant 0 : index
    %39 = vector.load %arg11[%c60, %c0_43] : memref<216x1024xf32, #tpu.memory_space<vmem>>, vector<4x1024xf32>
    tpu.vector_store %arg11[%c60, %c0_43], %38 {strides = array<i32>} : memref<216x1024xf32, #tpu.memory_space<vmem>>, vector<4x1024xf32>,
    %c0_44 = arith.constant 0 : index
    %c138 = arith.constant 138 : index
    %40 = vector.load %arg10[%c0_44, %c138] : memref<12x1280xf32, #tpu.memory_space<vmem>>, vector<4x1024xf32>
    %c64 = arith.constant 64 : index
    %c0_45 = arith.constant 0 : index
    %41 = vector.load %arg11[%c64, %c0_45] : memref<216x1024xf32, #tpu.memory_space<vmem>>, vector<4x1024xf32>
    tpu.vector_store %arg11[%c64, %c0_45], %40 {strides = array<i32>} : memref<216x1024xf32, #tpu.memory_space<vmem>>, vector<4x1024xf32>,
    %c0_46 = arith.constant 0 : index
    %c139 = arith.constant 139 : index
    %42 = vector.load %arg10[%c0_46, %c139] : memref<12x1280xf32, #tpu.memory_space<vmem>>, vector<4x1024xf32>
    %c68 = arith.constant 68 : index
    %c0_47 = arith.constant 0 : index
    %43 = vector.load %arg11[%c68, %c0_47] : memref<216x1024xf32, #tpu.memory_space<vmem>>, vector<4x1024xf32>
    tpu.vector_store %arg11[%c68, %c0_47], %42 {strides = array<i32>} : memref<216x1024xf32, #tpu.memory_space<vmem>>, vector<4x1024xf32>,
    %c0_48 = arith.constant 0 : index
    %c217 = arith.constant 217 : index
    %44 = vector.load %arg10[%c0_48, %c217] : memref<12x1280xf32, #tpu.memory_space<vmem>>, vector<4x1024xf32>
    %c72 = arith.constant 72 : index
    %c0_49 = arith.constant 0 : index
    %45 = vector.load %arg11[%c72, %c0_49] : memref<216x1024xf32, #tpu.memory_space<vmem>>, vector<4x1024xf32>
    tpu.vector_store %arg11[%c72, %c0_49], %44 {strides = array<i32>} : memref<216x1024xf32, #tpu.memory_space<vmem>>, vector<4x1024xf32>,
    %c0_50 = arith.constant 0 : index
    %c218 = arith.constant 218 : index
    %46 = vector.load %arg10[%c0_50, %c218] : memref<12x1280xf32, #tpu.memory_space<vmem>>, vector<4x1024xf32>
    %c76 = arith.constant 76 : index
    %c0_51 = arith.constant 0 : index
    %47 = vector.load %arg11[%c76, %c0_51] : memref<216x1024xf32, #tpu.memory_space<vmem>>, vector<4x1024xf32>
    tpu.vector_store %arg11[%c76, %c0_51], %46 {strides = array<i32>} : memref<216x1024xf32, #tpu.memory_space<vmem>>, vector<4x1024xf32>,
    %c0_52 = arith.constant 0 : index
    %c219 = arith.constant 219 : index
    %48 = vector.load %arg10[%c0_52, %c219] : memref<12x1280xf32, #tpu.memory_space<vmem>>, vector<4x1024xf32>
    %c80 = arith.constant 80 : index
    %c0_53 = arith.constant 0 : index
    %49 = vector.load %arg11[%c80, %c0_53] : memref<216x1024xf32, #tpu.memory_space<vmem>>, vector<4x1024xf32>
    tpu.vector_store %arg11[%c80, %c0_53], %48 {strides = array<i32>} : memref<216x1024xf32, #tpu.memory_space<vmem>>, vector<4x1024xf32>,
    %c0_54 = arith.constant 0 : index
    %c227 = arith.constant 227 : index
    %50 = vector.load %arg10[%c0_54, %c227] : memref<12x1280xf32, #tpu.memory_space<vmem>>, vector<4x1024xf32>
    %c84 = arith.constant 84 : index
    %c0_55 = arith.constant 0 : index
    %51 = vector.load %arg11[%c84, %c0_55] : memref<216x1024xf32, #tpu.memory_space<vmem>>, vector<4x1024xf32>
    tpu.vector_store %arg11[%c84, %c0_55], %50 {strides = array<i32>} : memref<216x1024xf32, #tpu.memory_space<vmem>>, vector<4x1024xf32>,
    %c0_56 = arith.constant 0 : index
    %c228 = arith.constant 228 : index
    %52 = vector.load %arg10[%c0_56, %c228] : memref<12x1280xf32, #tpu.memory_space<vmem>>, vector<4x1024xf32>
    %c88 = arith.constant 88 : index
    %c0_57 = arith.constant 0 : index
    %53 = vector.load %arg11[%c88, %c0_57] : memref<216x1024xf32, #tpu.memory_space<vmem>>, vector<4x1024xf32>
    tpu.vector_store %arg11[%c88, %c0_57], %52 {strides = array<i32>} : memref<216x1024xf32, #tpu.memory_space<vmem>>, vector<4x1024xf32>,
    %c0_58 = arith.constant 0 : index
    %c229 = arith.constant 229 : index
    %54 = vector.load %arg10[%c0_58, %c229] : memref<12x1280xf32, #tpu.memory_space<vmem>>, vector<4x1024xf32>
    %c92 = arith.constant 92 : index
    %c0_59 = arith.constant 0 : index
    %55 = vector.load %arg11[%c92, %c0_59] : memref<216x1024xf32, #tpu.memory_space<vmem>>, vector<4x1024xf32>
    tpu.vector_store %arg11[%c92, %c0_59], %54 {strides = array<i32>} : memref<216x1024xf32, #tpu.memory_space<vmem>>, vector<4x1024xf32>,
    %c0_60 = arith.constant 0 : index
    %c237 = arith.constant 237 : index
    %56 = vector.load %arg10[%c0_60, %c237] : memref<12x1280xf32, #tpu.memory_space<vmem>>, vector<4x1024xf32>
    %c96 = arith.constant 96 : index
    %c0_61 = arith.constant 0 : index
    %57 = vector.load %arg11[%c96, %c0_61] : memref<216x1024xf32, #tpu.memory_space<vmem>>, vector<4x1024xf32>
    tpu.vector_store %arg11[%c96, %c0_61], %56 {strides = array<i32>} : memref<216x1024xf32, #tpu.memory_space<vmem>>, vector<4x1024xf32>,
    %c0_62 = arith.constant 0 : index
    %c238 = arith.constant 238 : index
    %58 = vector.load %arg10[%c0_62, %c238] : memref<12x1280xf32, #tpu.memory_space<vmem>>, vector<4x1024xf32>
    %c100 = arith.constant 100 : index
    %c0_63 = arith.constant 0 : index
    %59 = vector.load %arg11[%c100, %c0_63] : memref<216x1024xf32, #tpu.memory_space<vmem>>, vector<4x1024xf32>
    tpu.vector_store %arg11[%c100, %c0_63], %58 {strides = array<i32>} : memref<216x1024xf32, #tpu.memory_space<vmem>>, vector<4x1024xf32>,
    %c0_64 = arith.constant 0 : index
    %c239 = arith.constant 239 : index
    %60 = vector.load %arg10[%c0_64, %c239] : memref<12x1280xf32, #tpu.memory_space<vmem>>, vector<4x1024xf32>
    %c104 = arith.constant 104 : index
    %c0_65 = arith.constant 0 : index
    %61 = vector.load %arg11[%c104, %c0_65] : memref<216x1024xf32, #tpu.memory_space<vmem>>, vector<4x1024xf32>
    tpu.vector_store %arg11[%c104, %c0_65], %60 {strides = array<i32>} : memref<216x1024xf32, #tpu.memory_space<vmem>>, vector<4x1024xf32>,
    %c0_66 = arith.constant 0 : index
    %c0_67 = arith.constant 0 : index
    %62 = vector.load %arg3[%c0_66, %c0_67] : memref<4x108xf32, #tpu.memory_space<vmem>>, vector<4x108xf32>
    %c0_68 = arith.constant 0 : index
    %c0_69 = arith.constant 0 : index
    %63 = vector.load %arg11[%c0_68, %c0_69] : memref<216x1024xf32, #tpu.memory_space<vmem>>, vector<108x1024xf32>
    %cst_70 = arith.constant dense<0.000000e+00> : vector<4x1024xf32>
    %64 = tpu.matmul %62, %63, %cst_70 {dimension_numbers = #tpu.dot_dimension_numbers<[1], [0], [0], [1], [0, 0, 1, 1], [], []>} : vector<4x108xf32>, vector<108x1024xf32>, vector<4x1024xf32> -> vector<4x1024xf32>
    %c0_71 = arith.constant 0 : index
    %c0_72 = arith.constant 0 : index
    %65 = vector.load %arg4[%c0_71, %c0_72] : memref<4x1xf32, #tpu.memory_space<vmem>>, vector<4x1xf32>
    %66 = vector.broadcast %65 : vector<4x1xf32> to vector<4x1024xf32>
    %67 = arith.addf %64, %66 : vector<4x1024xf32>
    %cst_73 = arith.constant 0.000000e+00 : f32
    %68 = vector.broadcast %cst_73 : f32 to vector<4x1024xf32>
    %69 = arith.maximumf %67, %68 : vector<4x1024xf32>
    %70 = vector.broadcast %7 : vector<1x1024xf32> to vector<4x1024xf32>
    %71 = arith.mulf %69, %70 : vector<4x1024xf32>
    %c4_74 = arith.constant 4 : index
    %c128_75 = arith.constant 128 : index
    %72 = vector.load %arg10[%c4_74, %c128_75] : memref<12x1280xf32, #tpu.memory_space<vmem>>, vector<4x1024xf32>
    tpu.vector_store %arg10[%c4_74, %c128_75], %71 {strides = array<i32>} : memref<12x1280xf32, #tpu.memory_space<vmem>>, vector<4x1024xf32>,
    %c4_76 = arith.constant 4 : index
    %c17_77 = arith.constant 17 : index
    %73 = vector.load %arg10[%c4_76, %c17_77] : memref<12x1280xf32, #tpu.memory_space<vmem>>, vector<4x1024xf32>
    %c108 = arith.constant 108 : index
    %c0_78 = arith.constant 0 : index
    %74 = vector.load %arg11[%c108, %c0_78] : memref<216x1024xf32, #tpu.memory_space<vmem>>, vector<4x1024xf32>
    tpu.vector_store %arg11[%c108, %c0_78], %73 {strides = array<i32>} : memref<216x1024xf32, #tpu.memory_space<vmem>>, vector<4x1024xf32>,
    %c4_79 = arith.constant 4 : index
    %c18_80 = arith.constant 18 : index
    %75 = vector.load %arg10[%c4_79, %c18_80] : memref<12x1280xf32, #tpu.memory_space<vmem>>, vector<4x1024xf32>
    %c112 = arith.constant 112 : index
    %c0_81 = arith.constant 0 : index
    %76 = vector.load %arg11[%c112, %c0_81] : memref<216x1024xf32, #tpu.memory_space<vmem>>, vector<4x1024xf32>
    tpu.vector_store %arg11[%c112, %c0_81], %75 {strides = array<i32>} : memref<216x1024xf32, #tpu.memory_space<vmem>>, vector<4x1024xf32>,
    %c4_82 = arith.constant 4 : index
    %c19_83 = arith.constant 19 : index
    %77 = vector.load %arg10[%c4_82, %c19_83] : memref<12x1280xf32, #tpu.memory_space<vmem>>, vector<4x1024xf32>
    %c116 = arith.constant 116 : index
    %c0_84 = arith.constant 0 : index
    %78 = vector.load %arg11[%c116, %c0_84] : memref<216x1024xf32, #tpu.memory_space<vmem>>, vector<4x1024xf32>
    tpu.vector_store %arg11[%c116, %c0_84], %77 {strides = array<i32>} : memref<216x1024xf32, #tpu.memory_space<vmem>>, vector<4x1024xf32>,
    %c4_85 = arith.constant 4 : index
    %c27_86 = arith.constant 27 : index
    %79 = vector.load %arg10[%c4_85, %c27_86] : memref<12x1280xf32, #tpu.memory_space<vmem>>, vector<4x1024xf32>
    %c120 = arith.constant 120 : index
    %c0_87 = arith.constant 0 : index
    %80 = vector.load %arg11[%c120, %c0_87] : memref<216x1024xf32, #tpu.memory_space<vmem>>, vector<4x1024xf32>
    tpu.vector_store %arg11[%c120, %c0_87], %79 {strides = array<i32>} : memref<216x1024xf32, #tpu.memory_space<vmem>>, vector<4x1024xf32>,
    %c4_88 = arith.constant 4 : index
    %c28_89 = arith.constant 28 : index
    %81 = vector.load %arg10[%c4_88, %c28_89] : memref<12x1280xf32, #tpu.memory_space<vmem>>, vector<4x1024xf32>
    %c124 = arith.constant 124 : index
    %c0_90 = arith.constant 0 : index
    %82 = vector.load %arg11[%c124, %c0_90] : memref<216x1024xf32, #tpu.memory_space<vmem>>, vector<4x1024xf32>
    tpu.vector_store %arg11[%c124, %c0_90], %81 {strides = array<i32>} : memref<216x1024xf32, #tpu.memory_space<vmem>>, vector<4x1024xf32>,
    %c4_91 = arith.constant 4 : index
    %c29_92 = arith.constant 29 : index
    %83 = vector.load %arg10[%c4_91, %c29_92] : memref<12x1280xf32, #tpu.memory_space<vmem>>, vector<4x1024xf32>
    %c128_93 = arith.constant 128 : index
    %c0_94 = arith.constant 0 : index
    %84 = vector.load %arg11[%c128_93, %c0_94] : memref<216x1024xf32, #tpu.memory_space<vmem>>, vector<4x1024xf32>
    tpu.vector_store %arg11[%c128_93, %c0_94], %83 {strides = array<i32>} : memref<216x1024xf32, #tpu.memory_space<vmem>>, vector<4x1024xf32>,
    %c4_95 = arith.constant 4 : index
    %c37_96 = arith.constant 37 : index
    %85 = vector.load %arg10[%c4_95, %c37_96] : memref<12x1280xf32, #tpu.memory_space<vmem>>, vector<4x1024xf32>
    %c132 = arith.constant 132 : index
    %c0_97 = arith.constant 0 : index
    %86 = vector.load %arg11[%c132, %c0_97] : memref<216x1024xf32, #tpu.memory_space<vmem>>, vector<4x1024xf32>
    tpu.vector_store %arg11[%c132, %c0_97], %85 {strides = array<i32>} : memref<216x1024xf32, #tpu.memory_space<vmem>>, vector<4x1024xf32>,
    %c4_98 = arith.constant 4 : index
    %c38_99 = arith.constant 38 : index
    %87 = vector.load %arg10[%c4_98, %c38_99] : memref<12x1280xf32, #tpu.memory_space<vmem>>, vector<4x1024xf32>
    %c136 = arith.constant 136 : index
    %c0_100 = arith.constant 0 : index
    %88 = vector.load %arg11[%c136, %c0_100] : memref<216x1024xf32, #tpu.memory_space<vmem>>, vector<4x1024xf32>
    tpu.vector_store %arg11[%c136, %c0_100], %87 {strides = array<i32>} : memref<216x1024xf32, #tpu.memory_space<vmem>>, vector<4x1024xf32>,
    %c4_101 = arith.constant 4 : index
    %c39_102 = arith.constant 39 : index
    %89 = vector.load %arg10[%c4_101, %c39_102] : memref<12x1280xf32, #tpu.memory_space<vmem>>, vector<4x1024xf32>
    %c140 = arith.constant 140 : index
    %c0_103 = arith.constant 0 : index
    %90 = vector.load %arg11[%c140, %c0_103] : memref<216x1024xf32, #tpu.memory_space<vmem>>, vector<4x1024xf32>
    tpu.vector_store %arg11[%c140, %c0_103], %89 {strides = array<i32>} : memref<216x1024xf32, #tpu.memory_space<vmem>>, vector<4x1024xf32>,
    %c4_104 = arith.constant 4 : index
    %c117_105 = arith.constant 117 : index
    %91 = vector.load %arg10[%c4_104, %c117_105] : memref<12x1280xf32, #tpu.memory_space<vmem>>, vector<4x1024xf32>
    %c144 = arith.constant 144 : index
    %c0_106 = arith.constant 0 : index
    %92 = vector.load %arg11[%c144, %c0_106] : memref<216x1024xf32, #tpu.memory_space<vmem>>, vector<4x1024xf32>
    tpu.vector_store %arg11[%c144, %c0_106], %91 {strides = array<i32>} : memref<216x1024xf32, #tpu.memory_space<vmem>>, vector<4x1024xf32>,
    %c4_107 = arith.constant 4 : index
    %c118_108 = arith.constant 118 : index
    %93 = vector.load %arg10[%c4_107, %c118_108] : memref<12x1280xf32, #tpu.memory_space<vmem>>, vector<4x1024xf32>
    %c148 = arith.constant 148 : index
    %c0_109 = arith.constant 0 : index
    %94 = vector.load %arg11[%c148, %c0_109] : memref<216x1024xf32, #tpu.memory_space<vmem>>, vector<4x1024xf32>
    tpu.vector_store %arg11[%c148, %c0_109], %93 {strides = array<i32>} : memref<216x1024xf32, #tpu.memory_space<vmem>>, vector<4x1024xf32>,
    %c4_110 = arith.constant 4 : index
    %c119_111 = arith.constant 119 : index
    %95 = vector.load %arg10[%c4_110, %c119_111] : memref<12x1280xf32, #tpu.memory_space<vmem>>, vector<4x1024xf32>
    %c152 = arith.constant 152 : index
    %c0_112 = arith.constant 0 : index
    %96 = vector.load %arg11[%c152, %c0_112] : memref<216x1024xf32, #tpu.memory_space<vmem>>, vector<4x1024xf32>
    tpu.vector_store %arg11[%c152, %c0_112], %95 {strides = array<i32>} : memref<216x1024xf32, #tpu.memory_space<vmem>>, vector<4x1024xf32>,
    %c4_113 = arith.constant 4 : index
    %c127_114 = arith.constant 127 : index
    %97 = vector.load %arg10[%c4_113, %c127_114] : memref<12x1280xf32, #tpu.memory_space<vmem>>, vector<4x1024xf32>
    %c156 = arith.constant 156 : index
    %c0_115 = arith.constant 0 : index
    %98 = vector.load %arg11[%c156, %c0_115] : memref<216x1024xf32, #tpu.memory_space<vmem>>, vector<4x1024xf32>
    tpu.vector_store %arg11[%c156, %c0_115], %97 {strides = array<i32>} : memref<216x1024xf32, #tpu.memory_space<vmem>>, vector<4x1024xf32>,
    %c4_116 = arith.constant 4 : index
    %c128_117 = arith.constant 128 : index
    %99 = vector.load %arg10[%c4_116, %c128_117] : memref<12x1280xf32, #tpu.memory_space<vmem>>, vector<4x1024xf32>
    %c160 = arith.constant 160 : index
    %c0_118 = arith.constant 0 : index
    %100 = vector.load %arg11[%c160, %c0_118] : memref<216x1024xf32, #tpu.memory_space<vmem>>, vector<4x1024xf32>
    tpu.vector_store %arg11[%c160, %c0_118], %99 {strides = array<i32>} : memref<216x1024xf32, #tpu.memory_space<vmem>>, vector<4x1024xf32>,
    %c4_119 = arith.constant 4 : index
    %c129_120 = arith.constant 129 : index
    %101 = vector.load %arg10[%c4_119, %c129_120] : memref<12x1280xf32, #tpu.memory_space<vmem>>, vector<4x1024xf32>
    %c164 = arith.constant 164 : index
    %c0_121 = arith.constant 0 : index
    %102 = vector.load %arg11[%c164, %c0_121] : memref<216x1024xf32, #tpu.memory_space<vmem>>, vector<4x1024xf32>
    tpu.vector_store %arg11[%c164, %c0_121], %101 {strides = array<i32>} : memref<216x1024xf32, #tpu.memory_space<vmem>>, vector<4x1024xf32>,
    %c4_122 = arith.constant 4 : index
    %c137_123 = arith.constant 137 : index
    %103 = vector.load %arg10[%c4_122, %c137_123] : memref<12x1280xf32, #tpu.memory_space<vmem>>, vector<4x1024xf32>
    %c168 = arith.constant 168 : index
    %c0_124 = arith.constant 0 : index
    %104 = vector.load %arg11[%c168, %c0_124] : memref<216x1024xf32, #tpu.memory_space<vmem>>, vector<4x1024xf32>
    tpu.vector_store %arg11[%c168, %c0_124], %103 {strides = array<i32>} : memref<216x1024xf32, #tpu.memory_space<vmem>>, vector<4x1024xf32>,
    %c4_125 = arith.constant 4 : index
    %c138_126 = arith.constant 138 : index
    %105 = vector.load %arg10[%c4_125, %c138_126] : memref<12x1280xf32, #tpu.memory_space<vmem>>, vector<4x1024xf32>
    %c172 = arith.constant 172 : index
    %c0_127 = arith.constant 0 : index
    %106 = vector.load %arg11[%c172, %c0_127] : memref<216x1024xf32, #tpu.memory_space<vmem>>, vector<4x1024xf32>
    tpu.vector_store %arg11[%c172, %c0_127], %105 {strides = array<i32>} : memref<216x1024xf32, #tpu.memory_space<vmem>>, vector<4x1024xf32>,
    %c4_128 = arith.constant 4 : index
    %c139_129 = arith.constant 139 : index
    %107 = vector.load %arg10[%c4_128, %c139_129] : memref<12x1280xf32, #tpu.memory_space<vmem>>, vector<4x1024xf32>
    %c176 = arith.constant 176 : index
    %c0_130 = arith.constant 0 : index
    %108 = vector.load %arg11[%c176, %c0_130] : memref<216x1024xf32, #tpu.memory_space<vmem>>, vector<4x1024xf32>
    tpu.vector_store %arg11[%c176, %c0_130], %107 {strides = array<i32>} : memref<216x1024xf32, #tpu.memory_space<vmem>>, vector<4x1024xf32>,
    %c4_131 = arith.constant 4 : index
    %c217_132 = arith.constant 217 : index
    %109 = vector.load %arg10[%c4_131, %c217_132] : memref<12x1280xf32, #tpu.memory_space<vmem>>, vector<4x1024xf32>
    %c180 = arith.constant 180 : index
    %c0_133 = arith.constant 0 : index
    %110 = vector.load %arg11[%c180, %c0_133] : memref<216x1024xf32, #tpu.memory_space<vmem>>, vector<4x1024xf32>
    tpu.vector_store %arg11[%c180, %c0_133], %109 {strides = array<i32>} : memref<216x1024xf32, #tpu.memory_space<vmem>>, vector<4x1024xf32>,
    %c4_134 = arith.constant 4 : index
    %c218_135 = arith.constant 218 : index
    %111 = vector.load %arg10[%c4_134, %c218_135] : memref<12x1280xf32, #tpu.memory_space<vmem>>, vector<4x1024xf32>
    %c184 = arith.constant 184 : index
    %c0_136 = arith.constant 0 : index
    %112 = vector.load %arg11[%c184, %c0_136] : memref<216x1024xf32, #tpu.memory_space<vmem>>, vector<4x1024xf32>
    tpu.vector_store %arg11[%c184, %c0_136], %111 {strides = array<i32>} : memref<216x1024xf32, #tpu.memory_space<vmem>>, vector<4x1024xf32>,
    %c4_137 = arith.constant 4 : index
    %c219_138 = arith.constant 219 : index
    %113 = vector.load %arg10[%c4_137, %c219_138] : memref<12x1280xf32, #tpu.memory_space<vmem>>, vector<4x1024xf32>
    %c188 = arith.constant 188 : index
    %c0_139 = arith.constant 0 : index
    %114 = vector.load %arg11[%c188, %c0_139] : memref<216x1024xf32, #tpu.memory_space<vmem>>, vector<4x1024xf32>
    tpu.vector_store %arg11[%c188, %c0_139], %113 {strides = array<i32>} : memref<216x1024xf32, #tpu.memory_space<vmem>>, vector<4x1024xf32>,
    %c4_140 = arith.constant 4 : index
    %c227_141 = arith.constant 227 : index
    %115 = vector.load %arg10[%c4_140, %c227_141] : memref<12x1280xf32, #tpu.memory_space<vmem>>, vector<4x1024xf32>
    %c192 = arith.constant 192 : index
    %c0_142 = arith.constant 0 : index
    %116 = vector.load %arg11[%c192, %c0_142] : memref<216x1024xf32, #tpu.memory_space<vmem>>, vector<4x1024xf32>
    tpu.vector_store %arg11[%c192, %c0_142], %115 {strides = array<i32>} : memref<216x1024xf32, #tpu.memory_space<vmem>>, vector<4x1024xf32>,
    %c4_143 = arith.constant 4 : index
    %c228_144 = arith.constant 228 : index
    %117 = vector.load %arg10[%c4_143, %c228_144] : memref<12x1280xf32, #tpu.memory_space<vmem>>, vector<4x1024xf32>
    %c196 = arith.constant 196 : index
    %c0_145 = arith.constant 0 : index
    %118 = vector.load %arg11[%c196, %c0_145] : memref<216x1024xf32, #tpu.memory_space<vmem>>, vector<4x1024xf32>
    tpu.vector_store %arg11[%c196, %c0_145], %117 {strides = array<i32>} : memref<216x1024xf32, #tpu.memory_space<vmem>>, vector<4x1024xf32>,
    %c4_146 = arith.constant 4 : index
    %c229_147 = arith.constant 229 : index
    %119 = vector.load %arg10[%c4_146, %c229_147] : memref<12x1280xf32, #tpu.memory_space<vmem>>, vector<4x1024xf32>
    %c200 = arith.constant 200 : index
    %c0_148 = arith.constant 0 : index
    %120 = vector.load %arg11[%c200, %c0_148] : memref<216x1024xf32, #tpu.memory_space<vmem>>, vector<4x1024xf32>
    tpu.vector_store %arg11[%c200, %c0_148], %119 {strides = array<i32>} : memref<216x1024xf32, #tpu.memory_space<vmem>>, vector<4x1024xf32>,
    %c4_149 = arith.constant 4 : index
    %c237_150 = arith.constant 237 : index
    %121 = vector.load %arg10[%c4_149, %c237_150] : memref<12x1280xf32, #tpu.memory_space<vmem>>, vector<4x1024xf32>
    %c204 = arith.constant 204 : index
    %c0_151 = arith.constant 0 : index
    %122 = vector.load %arg11[%c204, %c0_151] : memref<216x1024xf32, #tpu.memory_space<vmem>>, vector<4x1024xf32>
    tpu.vector_store %arg11[%c204, %c0_151], %121 {strides = array<i32>} : memref<216x1024xf32, #tpu.memory_space<vmem>>, vector<4x1024xf32>,
    %c4_152 = arith.constant 4 : index
    %c238_153 = arith.constant 238 : index
    %123 = vector.load %arg10[%c4_152, %c238_153] : memref<12x1280xf32, #tpu.memory_space<vmem>>, vector<4x1024xf32>
    %c208 = arith.constant 208 : index
    %c0_154 = arith.constant 0 : index
    %124 = vector.load %arg11[%c208, %c0_154] : memref<216x1024xf32, #tpu.memory_space<vmem>>, vector<4x1024xf32>
    tpu.vector_store %arg11[%c208, %c0_154], %123 {strides = array<i32>} : memref<216x1024xf32, #tpu.memory_space<vmem>>, vector<4x1024xf32>,
    %c4_155 = arith.constant 4 : index
    %c239_156 = arith.constant 239 : index
    %125 = vector.load %arg10[%c4_155, %c239_156] : memref<12x1280xf32, #tpu.memory_space<vmem>>, vector<4x1024xf32>
    %c212 = arith.constant 212 : index
    %c0_157 = arith.constant 0 : index
    %126 = vector.load %arg11[%c212, %c0_157] : memref<216x1024xf32, #tpu.memory_space<vmem>>, vector<4x1024xf32>
    tpu.vector_store %arg11[%c212, %c0_157], %125 {strides = array<i32>} : memref<216x1024xf32, #tpu.memory_space<vmem>>, vector<4x1024xf32>,
    %c0_158 = arith.constant 0 : index
    %c0_159 = arith.constant 0 : index
    %127 = vector.load %arg5[%c0_158, %c0_159] : memref<4x216xf32, #tpu.memory_space<vmem>>, vector<4x216xf32>
    %c0_160 = arith.constant 0 : index
    %c0_161 = arith.constant 0 : index
    %128 = vector.load %arg11[%c0_160, %c0_161] : memref<216x1024xf32, #tpu.memory_space<vmem>>, vector<216x1024xf32>
    %cst_162 = arith.constant dense<0.000000e+00> : vector<4x1024xf32>
    %129 = tpu.matmul %127, %128, %cst_162 {dimension_numbers = #tpu.dot_dimension_numbers<[1], [0], [0], [1], [0, 0, 1, 1], [], []>} : vector<4x216xf32>, vector<216x1024xf32>, vector<4x1024xf32> -> vector<4x1024xf32>
    %c0_163 = arith.constant 0 : index
    %c0_164 = arith.constant 0 : index
    %130 = vector.load %arg6[%c0_163, %c0_164] : memref<4x1xf32, #tpu.memory_space<vmem>>, vector<4x1xf32>
    %131 = vector.broadcast %130 : vector<4x1xf32> to vector<4x1024xf32>
    %132 = arith.addf %129, %131 : vector<4x1024xf32>
    %cst_165 = arith.constant 0.000000e+00 : f32
    %133 = vector.broadcast %cst_165 : f32 to vector<4x1024xf32>
    %134 = arith.maximumf %132, %133 : vector<4x1024xf32>
    %135 = vector.broadcast %7 : vector<1x1024xf32> to vector<4x1024xf32>
    %136 = arith.mulf %134, %135 : vector<4x1024xf32>
    %c8_166 = arith.constant 8 : index
    %c128_167 = arith.constant 128 : index
    %137 = vector.load %arg10[%c8_166, %c128_167] : memref<12x1280xf32, #tpu.memory_space<vmem>>, vector<4x1024xf32>
    tpu.vector_store %arg10[%c8_166, %c128_167], %136 {strides = array<i32>} : memref<12x1280xf32, #tpu.memory_space<vmem>>, vector<4x1024xf32>,
    %c0_168 = arith.constant 0 : index
    %c128_169 = arith.constant 128 : index
    %138 = vector.load %arg10[%c0_168, %c128_169] : memref<12x1280xf32, #tpu.memory_space<vmem>>, vector<12x1024xf32>
    %c0_170 = arith.constant 0 : index
    %c0_171 = arith.constant 0 : index
    %139 = vector.load %arg7[%c0_170, %c0_171] : memref<4x12xf32, #tpu.memory_space<vmem>>, vector<4x12xf32>
    %cst_172 = arith.constant dense<0.000000e+00> : vector<4x1024xf32>
    %140 = tpu.matmul %139, %138, %cst_172 {dimension_numbers = #tpu.dot_dimension_numbers<[1], [0], [0], [1], [0, 0, 1, 1], [], []>} : vector<4x12xf32>, vector<12x1024xf32>, vector<4x1024xf32> -> vector<4x1024xf32>
    %c0_173 = arith.constant 0 : index
    %c0_174 = arith.constant 0 : index
    %141 = vector.load %arg8[%c0_173, %c0_174] : memref<4x1xf32, #tpu.memory_space<vmem>>, vector<4x1xf32>
    %142 = vector.broadcast %141 : vector<4x1xf32> to vector<4x1024xf32>
    %143 = arith.addf %140, %142 : vector<4x1024xf32>
    %144 = arith.addf %143, %5 : vector<4x1024xf32>
    %c0_175 = arith.constant 0 : index
    %c0_176 = arith.constant 0 : index
    %c0_177 = arith.constant 0 : index
    %145 = vector.load %arg9[%c0_175, %c0_176, %c0_177] : memref<1x4x1024xf32, #tpu.memory_space<vmem>>, vector<1x4x1024xf32>
    %146 = vector.shape_cast %145 : vector<1x4x1024xf32> to vector<4x1024xf32>
    %147 = vector.shape_cast %144 : vector<4x1024xf32> to vector<1x4x1024xf32>
    tpu.vector_store %arg9[%c0_175, %c0_176, %c0_177], %147 {strides = array<i32>} : memref<1x4x1024xf32, #tpu.memory_space<vmem>>, vector<1x4x1024xf32>,
    return
  }
  func.func @transform_0(%arg0: i32) -> (i32, i32) {
    %c0_i32 = arith.constant 0 : i32
    %c0_i32_0 = arith.constant 0 : i32
    %c0_i32_1 = arith.constant 0 : i32
    return %c0_i32, %c0_i32_0 : i32, i32
  }
  func.func @transform_1(%arg0: i32) -> (i32, i32, i32) {
    %c0_i32 = arith.constant 0 : i32
    %c0_i32_0 = arith.constant 0 : i32
    %c0_i32_1 = arith.constant 0 : i32
    return %arg0, %c0_i32, %c0_i32_0 : i32, i32, i32
  }
  func.func @transform_2(%arg0: i32) -> (i32, i32) {
    %c0_i32 = arith.constant 0 : i32
    %c0_i32_0 = arith.constant 0 : i32
    %c0_i32_1 = arith.constant 0 : i32
    return %c0_i32, %c0_i32_0 : i32, i32
  }
  func.func @transform_3(%arg0: i32) -> (i32, i32) {
    %c0_i32 = arith.constant 0 : i32
    %c0_i32_0 = arith.constant 0 : i32
    %c0_i32_1 = arith.constant 0 : i32
    return %c0_i32, %c0_i32_0 : i32, i32
  }
  func.func @transform_4(%arg0: i32) -> (i32, i32) {
    %c0_i32 = arith.constant 0 : i32
    %c0_i32_0 = arith.constant 0 : i32
    %c0_i32_1 = arith.constant 0 : i32
    return %c0_i32, %c0_i32_0 : i32, i32
  }
  func.func @transform_5(%arg0: i32) -> (i32, i32) {
    %c0_i32 = arith.constant 0 : i32
    %c0_i32_0 = arith.constant 0 : i32
    %c0_i32_1 = arith.constant 0 : i32
    return %c0_i32, %c0_i32_0 : i32, i32
  }
  func.func @transform_6(%arg0: i32) -> (i32, i32) {
    %c0_i32 = arith.constant 0 : i32
    %c0_i32_0 = arith.constant 0 : i32
    %c0_i32_1 = arith.constant 0 : i32
    return %c0_i32, %c0_i32_0 : i32, i32
  }
  func.func @transform_7(%arg0: i32) -> (i32, i32) {
    %c0_i32 = arith.constant 0 : i32
    %c0_i32_0 = arith.constant 0 : i32
    %c0_i32_1 = arith.constant 0 : i32
    return %c0_i32, %c0_i32_0 : i32, i32
  }
  func.func @transform_8(%arg0: i32) -> (i32, i32, i32) {
    %c0_i32 = arith.constant 0 : i32
    %c0_i32_0 = arith.constant 0 : i32
    %c0_i32_1 = arith.constant 0 : i32
    return %arg0, %c0_i32, %c0_i32_0 : i32, i32, i32
  }
}

</mosaic_0001>

<bundles_post_ra>
// kernel: rdb3d_forward.1
= control target key start
LH: loop header
LB: loop body
LE: loop exit
PB: predicated region body
PF: predicated region fallthrough
CT: control target
= control target key end

     0   :  { %s5795_s27 = smov 0   ;;  %s7437_s0 = inlined_call_operand.vmem [shape: f32[1,1024], index: 0, kind: input, shape index: {}]   ;;  %s7438_s1 = inlined_call_operand.vmem [shape: f32[2,4,1024], index: 1, kind: input, shape index: {}]   ;;  %s7439_s2 = inlined_call_operand.vmem [shape: f32[4,108], index: 2, kind: input, shape index: {}]   ;;  %s7440_s3 = inlined_call_operand.vmem [shape: f32[4,1], index: 3, kind: input, shape index: {}]   ;;  %s7441_s4 = inlined_call_operand.vmem [shape: f32[4,216], index: 4, kind: input, shape index: {}]   ;;  %s7442_s5 = inlined_call_operand.vmem [shape: f32[4,1], index: 5, kind: input, shape index: {}]   ;;  %s7443_s6 = inlined_call_operand.vmem [shape: f32[4,12], index: 6, kind: input, shape index: {}]   ;;  %s7444_s7 = inlined_call_operand.vmem [shape: f32[4,1], index: 7, kind: input, shape index: {}]   ;;  %s7445_s8 = inlined_call_operand.vmem [shape: f32[2,4,1024], index: 8, kind: output, shape index: {}]  }
   0x1   :  { %7519 = sst [smem:[#allocation8_spill]] %s7437_s0 }
   0x2   :  { %7520 = sst [smem:[#allocation9_spill]] %s7438_s1 }
   0x3   :  { %7521 = sst [smem:[#allocation10_spill]] %s7439_s2 }
   0x4   :  { %7522 = sst [smem:[#allocation11_spill]] %s7440_s3 }
   0x5   :  { %7523 = sst [smem:[#allocation12_spill]] %s7444_s7 }
   0x6   :  { %7524 = sst [smem:[#allocation13_spill]] %s7445_s8 }
   0x7 LB: > { %7525 = sst [smem:[#allocation4_spill]] %s5719_s27  ;;  %s5252_s28 = sadd.s32 4294967295, %s5719_s27   ;;  %s5719_s27 = sphi %s5795_s27, %s18_s27  }
   0x8   : > { %p5256_p0 = scmp.ge.s32.totalorder %s5719_s27, 1  ;;  %p262_p1 = scmp.lt.s32.totalorder %s5719_s27, 3 }
   0xa   : > { %p263_p2 = pnand %p5256_p0, %p262_p1 }
   0xc   : > { %266 = sbr.rel (%p263_p2) target bundleno = 1729 (0x6c1), region = 52 }
  0x13   : > { %v5721_v0 = vmov 0.0   ;;  %p296_p3 = scmp.lt.s32.totalorder %s5252_s28, 1  ;;  %s7527_s1 = sld [smem:[#allocation9_spill]]  ;;  %vm7488_vm0 = vcmask 908288   ;;  %vm7460_vm1 = vcmask 891904   ;;  %vm7461_vm2 = vcmask 900096  }
  0x14   : > { %306 = vst [vmem:[#allocation2] sm:$0xff] %v5721_v0  ;;  %308 = vst [vmem:[#allocation2 + $0x48] sm:$0xff] %v5721_v0  ;;  %2281 = vmatprep.mubr.f32.mxu0 %v5721_v0  ;;  %2352 = vmatprep.mubr.f32.mxu1 %v5721_v0  ;;  %s7468_s11 = smov 111   ;;  %s7466_s12 = smov 110   ;;  %vm7459_vm3 = vcmask 826368   ;;  %vm7473_vm4 = vcmask 818176  }
  0x15   : > { %s7758_s28 = smov (!%p296_p3, %s5252_s28), 1  ;;  %s7464_s13 = smov 109   ;;  %vm7472_vm5 = vcmask 809984   ;;  %vm7471_vm6 = vcmask 744448   ;;  %vm7470_vm7 = vcmask 736256   ;;  %vm7481_vm8 = vcmask 728064  }
  0x16   : > { %7526 = sst [smem:[#allocation5_spill]] %s7758_s28  ;;  %s7446_s29 = sshll.u32 %s7758_s28, 5  ;;  %vm7480_vm9 = vcmask 89088   ;;  %vm7479_vm10 = vcmask 80896   ;;  %vm7478_vm11 = vcmask 72704   ;;  %vm1157_vm12 = vcmask 7168  }
  0x17   : > { %s7462_s14 = smov 101   ;;  %s7453_s15 = smov 100   ;;  %vm1258_vm13 = vcmask 1039360   ;;  %vm1328_vm14 = vcmask 973824   ;;  %vm1389_vm15 = vcmask 965632  }
  0x18   : > { %s7451_s16 = smov 99   ;;  %s7449_s17 = smov 91  }
  0x19   : > { %s5811_s10 = scalar_lea.vmem %s7527_s1, %s7446_s29  ;;  %s7447_s18 = smov 90  }
  0x1a   : > { %v5814_v1 = vld [vmem:[%s5811_s10] sm:$0xff]  ;;  %v5817_v2 = vld [vmem:[%s5811_s10 + $0x8] sm:$0xff]  ;;  %s7474_s19 = smov 89   ;;  %s7476_s20 = smov 11  }
  0x1b   : > { %v335_v3 = vld [vmem:[#allocation2] sm:$0xf]  ;;  %v2590_v4 = vld [vmem:[#allocation2] sm:$0xf0]  ;;  %326 = vst [vmem:[#allocation2 + $0x8] sm:$0xf] %v5814_v1  ;;  %v5822_v6 = vcombine.high %v5814_v1, %v5814_v1  ;;  %v5827_v7 = vcombine.high %v5817_v2, %v5817_v2 }
  0x1c   : > { %v396_v5 = vld [vmem:[#allocation2] sm:$0xf]  ;;  %328 = vst [vmem:[#allocation2 + $0x18] sm:$0xf] %v5817_v2  ;;  %v5682_v8 = vpack.i.bf16 %v2590_v4, %v335_v3  ;;  %v2650_v10 = vld [vmem:[#allocation2] sm:$0xf0] }
  0x1d   : > { %v414_v9 = vrot.slane %v396_v5, 4  ;;  %v2668_v11 = vrot.slane %v2650_v10, 4  ;;  %327 = vst [vmem:[#allocation2 + $0x10] sm:$0xf] %v5822_v6  ;;  %329 = vst [vmem:[#allocation2 + $0x20] sm:$0xf] %v5827_v7 }
  0x1e   : > { %5683 = vrot.lane.b32.xlu0 %v5682_v8, %s7468_s11  ;;  %v466_v24 = vld [vmem:[#allocation2] sm:$0xf]  ;;  %v2719_v25 = vld [vmem:[#allocation2] sm:$0xf0]  ;;  %s7457_s21 = smov 10   ;;  %s7455_s22 = smov 9  }
  0x1f   : > { %v5687_v12 = vpack.i.bf16 %v2668_v11, %v414_v9  ;;  %v527_v27 = vld [vmem:[#allocation2] sm:$0xf]  ;;  %v5692_v28 = vpack.i.bf16 %v2719_v25, %v466_v24  ;;  %v2848_v42 = vld [vmem:[#allocation2] sm:$0xf0]  ;;  %v5866_v10 = vld [vmem:[%s5811_s10 + $0x10] sm:$0xff]  ;;  %s7512_s23 = smov 1  }
  0x20   : > { %v545_v29 = vrot.slane %v527_v27, 4  ;;  %v597_v41 = vld [vmem:[#allocation2] sm:$0xf]  ;;  %330 = vst [vmem:[#allocation2 + $0x28] sm:$0xf] %v5866_v10  ;;  %s7510_s24 = smov 127  }
  0x21   : > { %5688 = vrot.lane.b32.xlu1 %v5687_v12, %s7466_s12  ;;  %v658_v44 = vld [vmem:[#allocation2] sm:$0xf]  ;;  %v5697_v45 = vpack.i.bf16 %v2848_v42, %v597_v41  ;;  %s7508_s25 = smov 119   ;;  %s7498_s26 = smov 118  }
  0x22   : > { %v336_v13 = vld [vmem:[#allocation2 + $0x8] sm:$0xf]  ;;  %v676_v46 = vrot.slane %v658_v44, 4  ;;  %v789_v47 = vld [vmem:[#allocation2] sm:$0xf]  ;;  %s7500_s30 = smov 117  }
  0x23   : > { %v467_v14 = vld [vmem:[#allocation2 + $0x8] sm:$0xf]  ;;  %355 = vrot.lane.b32.xlu0 %v336_v13, %s7468_s11  ;;  %v728_v48 = vld [vmem:[#allocation2] sm:$0xf]  ;;  %v807_v49 = vrot.slane %v789_v47, 4  ;;  %s7486_s9 = smov 39  }
  0x24   : > { %v468_v15 = vld [vmem:[#allocation2 + $0x10] sm:$0xf]  ;;  %v397_v18 = vld [vmem:[#allocation2 + $0x8] sm:$0xf]  ;;  %v920_v62 = vld [vmem:[#allocation2] sm:$0xf] }
  0x25   : > { %v398_v16 = vld [vmem:[#allocation2 + $0x10] sm:$0xf]  ;;  %486 = vrot.lane.b32.xlu1 %v467_v14, %s7464_s13  ;;  %v415_v21 = vrot.slane %v397_v18, 4  ;;  %v528_v22 = vld [vmem:[#allocation2 + $0x8] sm:$0xf]  ;;  %v938_v4 = vrot.slane %v920_v62, 4 }
  0x26   : > { %v337_v17 = vld [vmem:[#allocation2 + $0x10] sm:$0xf]  ;;  %v416_v19 = vrot.slane %v398_v16, 4  ;;  %v546_v26 = vrot.slane %v528_v22, 4  ;;  %v598_v30 = vld [vmem:[#allocation2 + $0x8] sm:$0xf] }
  0x27   : > { %488 = vrot.lane.b32.xlu0 %v468_v15, %s7464_s13  ;;  %v529_v20 = vld [vmem:[#allocation2 + $0x10] sm:$0xf]  ;;  %v659_v31 = vld [vmem:[#allocation2 + $0x8] sm:$0xf]  ;;  %v859_v3 = vld [vmem:[#allocation2] sm:$0xf] }
  0x28   : > { %v547_v23 = vrot.slane %v529_v20, 4  ;;  %v599_v32 = vld [vmem:[#allocation2 + $0x10] sm:$0xf]  ;;  %v677_v34 = vrot.slane %v659_v31, 4  ;;  %v729_v36 = vld [vmem:[#allocation2 + $0x8] sm:$0xf] }
  0x29   : > { %357 = vrot.lane.b32.xlu1 %v337_v17, %s7468_s11  ;;  %v660_v33 = vld [vmem:[#allocation2 + $0x10] sm:$0xf]  ;;  %v790_v37 = vld [vmem:[#allocation2 + $0x8] sm:$0xf]  ;;  %v1051_v5 = vld [vmem:[#allocation2] sm:$0xf] }
  0x2a   : > { %v678_v35 = vrot.slane %v660_v33, 4  ;;  %v730_v38 = vld [vmem:[#allocation2 + $0x10] sm:$0xf]  ;;  %v808_v40 = vrot.slane %v790_v37, 4  ;;  %v860_v50 = vld [vmem:[#allocation2 + $0x8] sm:$0xf] }
  0x2b   : > { %427 = vrot.lane.b32.xlu0 %v416_v19, %s7466_s12  ;;  %v791_v39 = vld [vmem:[#allocation2 + $0x10] sm:$0xf]  ;;  %v921_v51 = vld [vmem:[#allocation2 + $0x8] sm:$0xf]  ;;  %v990_v8 = vld [vmem:[#allocation2] sm:$0xf]  ;;  %v5878_v19 = vcombine.high %v5866_v10, %v5866_v10 }
  0x2c   : > { %v809_v43 = vrot.slane %v791_v39, 4  ;;  %v861_v52 = vld [vmem:[#allocation2 + $0x10] sm:$0xf]  ;;  %v939_v54 = vrot.slane %v921_v51, 4  ;;  %v991_v56 = vld [vmem:[#allocation2 + $0x8] sm:$0xf] }
  0x2d   : > { %425 = vrot.lane.b32.xlu1 %v415_v21, %s7466_s12  ;;  %v922_v53 = vld [vmem:[#allocation2 + $0x10] sm:$0xf]  ;;  %v1052_v57 = vld [vmem:[#allocation2 + $0x8] sm:$0xf]  ;;  %v1069_v9 = vrot.slane %v1051_v5, 4  ;;  %s7484_s29 = smov 38  }
  0x2e   : > { %v940_v55 = vrot.slane %v922_v53, 4  ;;  %v992_v58 = vld [vmem:[#allocation2 + $0x10] sm:$0xf]  ;;  %v1070_v60 = vrot.slane %v1052_v57, 4  ;;  %v1122_v11 = vld [vmem:[#allocation2 + $0x8] sm:$0xf] }
  0x2f   : > { %558 = vrot.lane.b32.xlu0 %v547_v23, %s7462_s14  ;;  %v1053_v59 = vld [vmem:[#allocation2 + $0x10] sm:$0xf]  ;;  %v1224_v15 = vld [vmem:[#allocation2 + $0x18] sm:$0xf]  ;;  %331 = vst [vmem:[#allocation2 + $0x30] sm:$0xf] %v5878_v19 }
  0x30   : > { %v1071_v61 = vrot.slane %v1053_v59, 4  ;;  %v1183_v63 = vld [vmem:[#allocation2 + $0x10] sm:$0xf]  ;;  %v1285_v16 = vld [vmem:[#allocation2 + $0x18] sm:$0xf]  ;;  %s7541_s2 = sld [smem:[#allocation10_spill]] }
  0x31   : > { %556 = vrot.lane.b32.xlu1 %v546_v26, %s7462_s14  ;;  %v1199_v0 = vrot.slane %v1183_v63, 4  ;;  %v1123_v12 = vld [vmem:[#allocation2 + $0x10] sm:$0xf]  ;;  %v1303_v18 = vrot.slane %v1285_v16, 4  ;;  %v338_v20 = vld [vmem:[#allocation2 + $0x18] sm:$0xf] }
  0x32   : > { %v1223_v13 = vld [vmem:[#allocation2 + $0x10] sm:$0xf]  ;;  %v399_v21 = vld [vmem:[#allocation2 + $0x18] sm:$0xf]  ;;  %v339_v22 = vld [vmem:[#allocation2 + $0x20] sm:$0xf] }
  0x33   : > { %5693 = vrot.lane.b32.xlu0 %v5692_v28, %s7464_s13  ;;  %1215 = vst [vmem:[#allocation3 + $0x188] sm:$0xf0] %v1199_v0  ;;  %v1284_v14 = vld [vmem:[#allocation2 + $0x10] sm:$0xf]  ;;  %v400_v23 = vld [vmem:[#allocation2 + $0x20] sm:$0xf] }
  0x34   : > { %v1302_v17 = vrot.slane %v1284_v14, 4  ;;  %v417_v24 = vrot.slane %v399_v21, 4  ;;  %v1182_v25 = vld [vmem:[#allocation2 + $0x8] sm:$0xf]  ;;  %v418_v26 = vrot.slane %v400_v23, 4  ;;  %s7583_s3 = sld [smem:[#allocation11_spill]] }
  0x35   : > { %554 = vrot.lane.b32.xlu1 %v545_v29, %s7462_s14  ;;  %v1198_v27 = vrot.slane %v1182_v25, 4  ;;  %v469_v28 = vld [vmem:[#allocation2 + $0x18] sm:$0xf]  ;;  %v531_v31 = vld [vmem:[#allocation2 + $0x20] sm:$0xf]  ;;  %s7616_s0 = sld [smem:[#allocation8_spill]] }
  0x36   : > { %v530_v29 = vld [vmem:[#allocation2 + $0x18] sm:$0xf]  ;;  %v549_v33 = vrot.slane %v531_v31, 4  ;;  %v1415_v39 = vld [vmem:[#allocation2 + $0x10] sm:$0xf]  ;;  %s7619_s1 = smov 1  }
  0x37   : > { %617 = vrot.lane.b32.xlu0 %v598_v30, %s7453_s15  ;;  %1214 = vst [vmem:[#allocation3 + $0x180] sm:$0xf0] %v1198_v27  ;;  %v470_v30 = vld [vmem:[#allocation2 + $0x20] sm:$0xf]  ;;  %v1416_v41 = vld [vmem:[#allocation2 + $0x18] sm:$0xf] }
  0x38   : > { %v1433_v42 = vrot.slane %v1415_v39, 4  ;;  %v1485_v44 = vld [vmem:[#allocation2 + $0x10] sm:$0xf]  ;;  %v1486_v47 = vld [vmem:[#allocation2 + $0x18] sm:$0xf]  ;;  %s7657_s27 = smov 29  }
  0x39   : > { %619 = vrot.lane.b32.xlu1 %v599_v32, %s7453_s15  ;;  %v548_v32 = vrot.slane %v530_v29, 4  ;;  %v662_v59 = vld [vmem:[#allocation2 + $0x20] sm:$0xf]  ;;  %v1353_v25 = vld [vmem:[#allocation2 + $0x8] sm:$0xf]  ;;  %s7661_s8 = smov 28  }
  0x3a   : > { %v680_v0 = vrot.slane %v662_v59, 4  ;;  %v732_v14 = vld [vmem:[#allocation2 + $0x20] sm:$0xf] }
  0x3b   : > { %687 = vrot.lane.b32.xlu0 %v677_v34, %s7451_s16  ;;  %v1121_v34 = vld [vmem:[#allocation2] sm:$0xf] }
  0x3d   : > { %689 = vrot.lane.b32.xlu1 %v678_v35, %s7451_s16  ;;  %v1283_v35 = vld [vmem:[#allocation2 + $0x8] sm:$0xf] }
  0x3e   : > { %v1301_v37 = vrot.slane %v1283_v35, 4 }
  0x3f   : > { %748 = vrot.lane.b32.xlu0 %v729_v36, %s7449_s17  ;;  %v1222_v36 = vld [vmem:[#allocation2 + $0x8] sm:$0xf] }
  0x41   : > { %750 = vrot.lane.b32.xlu1 %v730_v38, %s7449_s17  ;;  %v1354_v38 = vld [vmem:[#allocation2 + $0x10] sm:$0xf] }
  0x43   : > { %818 = vrot.lane.b32.xlu0 %v808_v40, %s7447_s18  ;;  %v1355_v40 = vld [vmem:[#allocation2 + $0x18] sm:$0xf] }
  0x45   : > { %820 = vrot.lane.b32.xlu1 %v809_v43, %s7447_s18  ;;  %v1434_v43 = vrot.slane %v1416_v41, 4  ;;  %v1677_v41 = vld [vmem:[#allocation2 + $0x10] sm:$0xf] }
  0x47   : > { %5698 = vrot.lane.b32.xlu0 %v5697_v45, %s7453_s15  ;;  %v1546_v45 = vld [vmem:[#allocation2 + $0x10] sm:$0xf] }
  0x49   : > { %685 = vrot.lane.b32.xlu1 %v676_v46, %s7451_s16 }
  0x4b   : > { %746 = vrot.lane.b32.xlu0 %v728_v48, %s7449_s17  ;;  %v1547_v48 = vld [vmem:[#allocation2 + $0x18] sm:$0xf] }
  0x4d   : > { %816 = vrot.lane.b32.xlu1 %v807_v49, %s7447_s18  ;;  %v1564_v49 = vrot.slane %v1546_v45, 4 }
  0x4f   : > { %879 = vrot.lane.b32.xlu0 %v860_v50, %s7474_s19 }
  0x51   : > { %881 = vrot.lane.b32.xlu1 %v861_v52, %s7474_s19  ;;  %v1565_v52 = vrot.slane %v1547_v48, 4  ;;  %v1678_v48 = vld [vmem:[#allocation2 + $0x18] sm:$0xf] }
  0x53   : > { %949 = vrot.lane.b32.xlu0 %v939_v54, %s7476_s20 }
  0x55   : > { %951 = vrot.lane.b32.xlu1 %v940_v55, %s7476_s20  ;;  %v600_v55 = vld [vmem:[#allocation2 + $0x18] sm:$0xf] }
  0x57   : > { %1010 = vrot.lane.b32.xlu0 %v991_v56, %s7457_s21  ;;  %v661_v56 = vld [vmem:[#allocation2 + $0x18] sm:$0xf] }
  0x59   : > { %1012 = vrot.lane.b32.xlu1 %v992_v58, %s7457_s21  ;;  %v601_v58 = vld [vmem:[#allocation2 + $0x20] sm:$0xf] }
  0x5b   : > { %1080 = vrot.lane.b32.xlu0 %v1070_v60, %s7455_s22 }
  0x5d   : > { %1082 = vrot.lane.b32.xlu1 %v1071_v61, %s7455_s22  ;;  %v679_v61 = vrot.slane %v661_v56, 4 }
  0x5f   : > { %877 = vrot.lane.b32.xlu0 %v859_v3, %s7474_s19 }
  0x61   : > { %947 = vrot.lane.b32.xlu1 %v938_v4, %s7476_s20 }
  0x63   : > { %1008 = vrot.lane.b32.xlu0 %v990_v8, %s7457_s21  ;;  %v731_v8 = vld [vmem:[#allocation2 + $0x18] sm:$0xf] }
  0x65   : > { %1078 = vrot.lane.b32.xlu1 %v1069_v9, %s7455_s22  ;;  %v792_v9 = vld [vmem:[#allocation2 + $0x18] sm:$0xf] }
  0x67   : > { %1141 = vrot.lane.b32.xlu0 %v1122_v11, %s7512_s23 }
  0x69   : > { %1143 = vrot.lane.b32.xlu1 %v1123_v12, %s7512_s23 }
  0x6b   : > { %1242 = vrot.lane.b32.xlu0 %v1223_v13, %s7510_s24 }
  0x6d   : > { %1244 = vrot.lane.b32.xlu1 %v1224_v15, %s7510_s24  ;;  %v793_v15 = vld [vmem:[#allocation2 + $0x20] sm:$0xf] }
  0x6f   : > { %1312 = vrot.lane.b32.xlu0 %v1302_v17, %s7508_s25  ;;  %v810_v17 = vrot.slane %v792_v9, 4 }
  0x71   : > { %1314 = vrot.lane.b32.xlu1 %v1303_v18, %s7508_s25 }
  0x73   : > { %359 = vrot.lane.b32.xlu0 %v338_v20, %s7468_s11  ;;  %v811_v20 = vrot.slane %v793_v15, 4 }
  0x75   : > { %361 = vrot.lane.b32.xlu1 %v339_v22, %s7468_s11  ;;  %v1414_v22 = vld [vmem:[#allocation2 + $0x8] sm:$0xf] }
  0x76   : > { %v1432_v27 = vrot.slane %v1414_v22, 4 }
  0x77   : > { %429 = vrot.lane.b32.xlu0 %v417_v24, %s7466_s12 }
  0x79   : > { %431 = vrot.lane.b32.xlu1 %v418_v26, %s7466_s12 }
  0x7b   : > { %490 = vrot.lane.b32.xlu0 %v469_v28, %s7464_s13 }
  0x7d   : > { %492 = vrot.lane.b32.xlu1 %v470_v30, %s7464_s13  ;;  %v1545_v30 = vld [vmem:[#allocation2 + $0x8] sm:$0xf] }
  0x7f   : > { %560 = vrot.lane.b32.xlu0 %v548_v32, %s7462_s14  ;;  %v1484_v32 = vld [vmem:[#allocation2 + $0x8] sm:$0xf] }
  0x81   : > { %562 = vrot.lane.b32.xlu1 %v549_v33, %s7462_s14 }
  0x83   : > { %1139 = vrot.lane.b32.xlu0 %v1121_v34, %s7512_s23  ;;  %v1563_v34 = vrot.slane %v1545_v30, 4 }
  0x85   : > { %1240 = vrot.lane.b32.xlu1 %v1222_v36, %s7510_s24 }
  0x87   : > { %1310 = vrot.lane.b32.xlu0 %v1301_v37, %s7508_s25 }
  0x89   : > { %1373 = vrot.lane.b32.xlu1 %v1354_v38, %s7498_s26 }
  0x8b   : > { %1375 = vrot.lane.b32.xlu0 %v1355_v40, %s7498_s26  ;;  %v1616_v40 = vld [vmem:[#allocation2 + $0x10] sm:$0xf] }
  0x8d   : > { %1443 = vrot.lane.b32.xlu1 %v1433_v42, %s7500_s30 }
  0x8f   : > { %1445 = vrot.lane.b32.xlu0 %v1434_v43, %s7500_s30  ;;  %v1617_v43 = vld [vmem:[#allocation2 + $0x18] sm:$0xf] }
  0x90   : > { %v5897_v46 = vpop.permute.xlu0 %5683 }
  0x91   : > { %1504 = vrot.lane.b32.xlu1 %v1485_v44, %s7486_s9  ;;  %v5685_v50 = vunpack.i.l.bf16 %v5897_v46 }
  0x93   : > { %v5901_v51 = vpop.permute.xlu1 %5688  ;;  %1506 = vrot.lane.b32.xlu0 %v1486_v47, %s7486_s9 }
  0x94   : > { %v5690_v5 = vunpack.i.l.bf16 %v5901_v51 }
  0x95   : > { %v356_v53 = vpop.permute.xlu0 %355  ;;  %1574 = vrot.lane.b32.xlu1 %v1564_v49, %s7484_s29 }
  0x96   : > { %v372_v54 = vsel %vm7488_vm0, %v5685_v50, %v356_v53 }
  0x97   : > { %388 = vst [vmem:[#allocation3] sm:$0xf] %v372_v54  ;;  %v487_v57 = vpop.permute.xlu1 %486  ;;  %1576 = vrot.lane.b32.xlu0 %v1565_v52, %s7484_s29  ;;  %v1695_v52 = vrot.slane %v1677_v41, 4  ;;  %v1696_v54 = vrot.slane %v1678_v48, 4 }
  0x99   : > { %v5907_v60 = vpop.permute.xlu0 %488  ;;  %621 = vrot.lane.b32.xlu1 %v600_v55, %s7453_s15 }
  0x9a   : > { %v504_v62 = vsel %vm7460_vm1, %v487_v57, %v5907_v60 }
  0x9b   : > { %520 = vst [vmem:[#allocation3 + $0x48] sm:$0xf] %v504_v62  ;;  %623 = vrot.lane.b32.xlu0 %v601_v58, %s7453_s15  ;;  %v5913_v63 = vpop.permute.xlu1 %357  ;;  %v1808_v58 = vld [vmem:[#allocation2 + $0x10] sm:$0xf]  ;;  %v1748_v62 = vld [vmem:[#allocation2 + $0x18] sm:$0xf] }
  0x9c   : > { %v373_v3 = vsel %vm7488_vm0, %v356_v53, %v5913_v63  ;;  %s7496_s15 = smov 27  }
  0x9d   : > { %389 = vst [vmem:[#allocation3 + $0x8] sm:$0xf] %v373_v3  ;;  %v5917_v4 = vpop.permute.xlu0 %427  ;;  %691 = vrot.lane.b32.xlu1 %v679_v61, %s7451_s16 }
  0x9f   : > { %693 = vrot.lane.b32.xlu0 %v680_v0, %s7451_s16  ;;  %v426_v11 = vpop.permute.xlu1 %425  ;;  %v1809_v0 = vld [vmem:[#allocation2 + $0x18] sm:$0xf]  ;;  %s7504_s16 = smov 28  }
  0xa0   : > { %v442_v12 = vsel %vm7461_vm2, %v5690_v5, %v426_v11  ;;  %v443_v13 = vsel %vm7461_vm2, %v426_v11, %v5917_v4  ;;  %v1826_v5 = vrot.slane %v1808_v58, 4  ;;  %v1827_v11 = vrot.slane %v1809_v0, 4 }
  0xa1   : > { %458 = vst [vmem:[#allocation3] sm:$0xf0] %v442_v12  ;;  %459 = vst [vmem:[#allocation3 + $0x8] sm:$0xf0] %v443_v13  ;;  %v5925_v16 = vpop.permute.xlu0 %558  ;;  %752 = vrot.lane.b32.xlu1 %v731_v8, %s7449_s17 }
  0xa3   : > { %754 = vrot.lane.b32.xlu0 %v732_v14, %s7449_s17  ;;  %v557_v18 = vpop.permute.xlu1 %556  ;;  %s7502_s17 = smov 29  }
  0xa4   : > { %v574_v21 = vsel %vm7459_vm3, %v557_v18, %v5925_v16 }
  0xa5   : > { %590 = vst [vmem:[#allocation3 + $0x48] sm:$0xf0] %v574_v21  ;;  %v5931_v23 = vpop.permute.xlu0 %5693  ;;  %822 = vrot.lane.b32.xlu1 %v810_v17, %s7447_s18  ;;  %v862_v17 = vld [vmem:[#allocation2 + $0x18] sm:$0xf]  ;;  %v863_v21 = vld [vmem:[#allocation2 + $0x20] sm:$0xf] }
  0xa6   : > { %v5695_v24 = vunpack.i.l.bf16 %v5931_v23 }
  0xa7   : > { %824 = vrot.lane.b32.xlu0 %v811_v20, %s7447_s18  ;;  %v555_v26 = vpop.permute.xlu1 %554  ;;  %s7506_s18 = smov 37  }
  0xa8   : > { %v503_v28 = vsel %vm7460_vm1, %v5695_v24, %v487_v57  ;;  %v573_v29 = vsel %vm7459_vm3, %v555_v26, %v557_v18  ;;  %v2071_v36 = vld [vmem:[#allocation3 + $0x8] sm:$0xff]  ;;  %v2070_v45 = vld [vmem:[#allocation3] sm:$0xff]  ;;  %v1747_v57 = vld [vmem:[#allocation2 + $0x10] sm:$0xf] }
  0xa9   : > { %519 = vst [vmem:[#allocation3 + $0x40] sm:$0xf] %v503_v28  ;;  %589 = vst [vmem:[#allocation3 + $0x40] sm:$0xf0] %v573_v29  ;;  %v618_v31 = vpop.permute.xlu0 %617  ;;  %1371 = vrot.lane.b32.xlu1 %v1353_v25, %s7498_s26  ;;  %v923_v18 = vld [vmem:[#allocation2 + $0x18] sm:$0xf] }
  0xaa   : > { %v924_v26 = vld [vmem:[#allocation2 + $0x20] sm:$0xf]  ;;  %v941_v29 = vrot.slane %v923_v18, 4  ;;  %v1184_v18 = vld [vmem:[#allocation2 + $0x18] sm:$0xf] }
  0xab   : > { %1441 = vrot.lane.b32.xlu0 %v1432_v27, %s7500_s30  ;;  %v5940_v33 = vpop.permute.xlu1 %619 }
  0xac   : > { %v635_v35 = vsel %vm7473_vm4, %v618_v31, %v5940_v33  ;;  %v2079_v37 = vld [vmem:[#allocation3 + $0x48] sm:$0xff] }
  0xad   : > { %651 = vst [vmem:[#allocation3 + $0x88] sm:$0xf] %v635_v35  ;;  %v688_v38 = vpop.permute.xlu0 %687  ;;  %1502 = vrot.lane.b32.xlu1 %v1484_v32, %s7486_s9  ;;  %v5293_v39 = vpack.c.bf16 %v2079_v37, %v2071_v36  ;;  %v993_v35 = vld [vmem:[#allocation2 + $0x18] sm:$0xf] }
  0xae   : > { %v1054_v36 = vld [vmem:[#allocation2 + $0x18] sm:$0xf] }
  0xaf   : > { %1572 = vrot.lane.b32.xlu0 %v1563_v34, %s7484_s29  ;;  %5294 = vmatprep.subr.bf16.mxu0 %v5293_v39  ;;  %v5946_v42 = vpop.permute.xlu1 %689 }
  0xb0   : > { %v705_v44 = vsel %vm7472_vm5, %v688_v38, %v5946_v42  ;;  %v2078_v47 = vld [vmem:[#allocation3 + $0x40] sm:$0xff] }
  0xb1   : > { %721 = vst [vmem:[#allocation3 + $0x88] sm:$0xf0] %v705_v44  ;;  %v749_v49 = vpop.permute.xlu0 %748  ;;  %1635 = vrot.lane.b32.xlu1 %v1616_v40, %s7506_s18  ;;  %v5295_v50 = vpack.c.bf16 %v2078_v47, %v2070_v45  ;;  %v1072_v47 = vrot.slane %v1054_v36, 4 }
  0xb3   : > { %1637 = vrot.lane.b32.xlu0 %v1617_v43, %s7506_s18  ;;  %5296 = vmatpush1.bf16.msra.mxu0 %v5295_v50  ;;  %v5952_v53 = vpop.permute.xlu1 %750  ;;  %v1055_v43 = vld [vmem:[#allocation2 + $0x20] sm:$0xf] }
  0xb4   : > { %v766_v55 = vsel %vm7471_vm6, %v749_v49, %v5952_v53 }
  0xb5   : > { %782 = vst [vmem:[#allocation3 + $0xc8] sm:$0xf] %v766_v55  ;;  %v819_v56 = vpop.permute.xlu0 %818  ;;  %1705 = vrot.lane.b32.xlu1 %v1695_v52, %s7502_s17  ;;  %v1676_v52 = vld [vmem:[#allocation2 + $0x8] sm:$0xf] }
  0xb6   : > { %v1615_v55 = vld [vmem:[#allocation2 + $0x8] sm:$0xf] }
  0xb7   : > { %1707 = vrot.lane.b32.xlu0 %v1696_v54, %s7502_s17  ;;  %v5958_v59 = vpop.permute.xlu1 %820 }
  0xb8   : > { %v836_v61 = vsel %vm7470_vm7, %v819_v56, %v5958_v59  ;;  %v2087_v24 = vld [vmem:[#allocation3 + $0x88] sm:$0xff] }
  0xb9   : > { %852 = vst [vmem:[#allocation3 + $0xc8] sm:$0xf0] %v836_v61  ;;  %v5962_v3 = vpop.permute.xlu0 %5698  ;;  %1766 = vrot.lane.b32.xlu1 %v1747_v57, %s7504_s16  ;;  %v1694_v57 = vrot.slane %v1676_v52, 4  ;;  %v1807_v61 = vld [vmem:[#allocation2 + $0x8] sm:$0xf] }
  0xba   : > { %v5700_v8 = vunpack.i.l.bf16 %v5962_v3  ;;  %v1124_v52 = vld [vmem:[#allocation2 + $0x18] sm:$0xf] }
  0xbb   : > { %1768 = vrot.lane.b32.xlu0 %v1748_v62, %s7504_s16  ;;  %v686_v9 = vpop.permute.xlu1 %685  ;;  %v5998_v62 = vld [vmem:[%s5811_s10 + $0x18] sm:$0xff]  ;;  %s7494_s10 = smov 19  }
  0xbc   : > { %v634_v12 = vsel %vm7473_vm4, %v5700_v8, %v618_v31  ;;  %v704_v13 = vsel %vm7472_vm5, %v686_v9, %v688_v38  ;;  %v942_v31 = vrot.slane %v924_v26, 4  ;;  %v994_v38 = vld [vmem:[#allocation2 + $0x20] sm:$0xf]  ;;  %7528 = vst [vmem:[#allocation6_spill] sm:$0xff] %v5998_v62  ;;  %332 = vst [vmem:[#allocation2 + $0x38] sm:$0xf] %v5998_v62 }
  0xbd   : > { %650 = vst [vmem:[#allocation3 + $0x80] sm:$0xf] %v634_v12  ;;  %720 = vst [vmem:[#allocation3 + $0x80] sm:$0xf0] %v704_v13  ;;  %v747_v14 = vpop.permute.xlu0 %746  ;;  %1836 = vrot.lane.b32.xlu1 %v1826_v5, %s7496_s15  ;;  %v1746_v8 = vld [vmem:[#allocation2 + $0x8] sm:$0xf] }
  0xbe   : > { %v765_v15 = vsel %vm7471_vm6, %v747_v14, %v749_v49  ;;  %v1073_v49 = vrot.slane %v1055_v43, 4  ;;  %v1878_v14 = vld [vmem:[#allocation2 + $0x10] sm:$0xf] }
  0xbf   : > { %781 = vst [vmem:[#allocation3 + $0xc0] sm:$0xf] %v765_v15  ;;  %1838 = vrot.lane.b32.xlu0 %v1827_v11, %s7496_s15  ;;  %v817_v20 = vpop.permute.xlu1 %816  ;;  %v1825_v11 = vrot.slane %v1807_v61, 4 }
  0xc0   : > { %v835_v22 = vsel %vm7470_vm7, %v817_v20, %v819_v56  ;;  %v2095_v25 = vld [vmem:[#allocation3 + $0xc8] sm:$0xff] }
  0xc1   : > { %851 = vst [vmem:[#allocation3 + $0xc0] sm:$0xf0] %v835_v22  ;;  %v880_v27 = vpop.permute.xlu0 %879  ;;  %883 = vrot.lane.b32.xlu1 %v862_v17, %s7474_s19  ;;  %v5297_v28 = vpack.c.bf16 %v2095_v25, %v2087_v24  ;;  %v1939_v17 = vld [vmem:[#allocation2 + $0x10] sm:$0xf]  ;;  %v1200_v22 = vrot.slane %v1184_v18, 4 }
  0xc3   : > { %885 = vrot.lane.b32.xlu0 %v863_v21, %s7474_s19  ;;  %5298 = vmatprep.subr.bf16.mxu0 %v5297_v28  ;;  %v5975_v30 = vpop.permute.xlu1 %881  ;;  %v1879_v21 = vld [vmem:[#allocation2 + $0x18] sm:$0xf]  ;;  %1216 = vst [vmem:[#allocation3 + $0x190] sm:$0xf0] %v1200_v22  ;;  %v1938_v22 = vld [vmem:[#allocation2 + $0x8] sm:$0xf] }
  0xc4   : > { %v897_v32 = vsel %vm7481_vm8, %v880_v27, %v5975_v30  ;;  %v2086_v40 = vld [vmem:[#allocation3 + $0x80] sm:$0xff] }
  0xc5   : > { %913 = vst [vmem:[#allocation3 + $0x108] sm:$0xf] %v897_v32  ;;  %v950_v34 = vpop.permute.xlu0 %949  ;;  %953 = vrot.lane.b32.xlu1 %v941_v29, %s7476_s20  ;;  %v1185_v32 = vld [vmem:[#allocation2 + $0x20] sm:$0xf] }
  0xc7   : > { %955 = vrot.lane.b32.xlu0 %v942_v31, %s7476_s20  ;;  %v5981_v37 = vpop.permute.xlu1 %951  ;;  %v1957_v31 = vrot.slane %v1939_v17, 4 }
  0xc8   : > { %v967_v39 = vsel %vm7480_vm9, %v950_v34, %v5981_v37  ;;  %v2094_v41 = vld [vmem:[#allocation3 + $0xc0] sm:$0xff] }
  0xc9   : > { %983 = vst [vmem:[#allocation3 + $0x108] sm:$0xf0] %v967_v39  ;;  %v1011_v44 = vpop.permute.xlu0 %1010  ;;  %1014 = vrot.lane.b32.xlu1 %v993_v35, %s7457_s21  ;;  %v5299_v45 = vpack.c.bf16 %v2094_v41, %v2086_v40  ;;  %v2009_v40 = vld [vmem:[#allocation2 + $0x10] sm:$0xf] }
  0xcb   : > { %1016 = vrot.lane.b32.xlu0 %v994_v38, %s7457_s21  ;;  %5300 = vmatpush1.bf16.msra.mxu0 %v5299_v45  ;;  %v5987_v48 = vpop.permute.xlu1 %1012  ;;  %s7490_s21 = smov 17  }
  0xcc   : > { %v1028_v50 = vsel %vm7479_vm10, %v1011_v44, %v5987_v48 }
  0xcd   : > { %1044 = vst [vmem:[#allocation3 + $0x148] sm:$0xf] %v1028_v50  ;;  %v1081_v54 = vpop.permute.xlu0 %1080  ;;  %1084 = vrot.lane.b32.xlu1 %v1072_v47, %s7455_s22 }
  0xcf   : > { %1086 = vrot.lane.b32.xlu0 %v1073_v49, %s7455_s22  ;;  %v5993_v56 = vpop.permute.xlu1 %1082  ;;  %s7492_s22 = smov 18  }
  0xd0   : > { %v1098_v58 = vsel %vm7478_vm11, %v1081_v54, %v5993_v56  ;;  %v2103_v25 = vld [vmem:[#allocation3 + $0x108] sm:$0xff] }
  0xd1   : > { %1114 = vst [vmem:[#allocation3 + $0x148] sm:$0xf0] %v1098_v58  ;;  %v878_v0 = vpop.permute.xlu0 %877  ;;  %1633 = vrot.lane.b32.xlu1 %v1615_v55, %s7506_s18 }
  0xd2   : > { %v896_v5 = vsel %vm7481_vm8, %v878_v0, %v880_v27  ;;  %v1940_v27 = vld [vmem:[#allocation2 + $0x18] sm:$0xf]  ;;  %v1225_v0 = vld [vmem:[#allocation2 + $0x20] sm:$0xf] }
  0xd3   : > { %912 = vst [vmem:[#allocation3 + $0x100] sm:$0xf] %v896_v5  ;;  %1703 = vrot.lane.b32.xlu0 %v1694_v57, %s7502_s17  ;;  %v948_v9 = vpop.permute.xlu1 %947  ;;  %v1958_v36 = vrot.slane %v1940_v27, 4  ;;  %v1125_v57 = vld [vmem:[#allocation2 + $0x20] sm:$0xf] }
  0xd4   : > { %v966_v12 = vsel %vm7480_vm9, %v948_v9, %v950_v34  ;;  %v1201_v34 = vrot.slane %v1185_v32, 4  ;;  %v1286_v5 = vld [vmem:[#allocation2 + $0x20] sm:$0xf] }
  0xd5   : > { %982 = vst [vmem:[#allocation3 + $0x100] sm:$0xf0] %v966_v12  ;;  %v1009_v13 = vpop.permute.xlu0 %1008  ;;  %1764 = vrot.lane.b32.xlu1 %v1746_v8, %s7504_s16  ;;  %v1287_v12 = vld [vmem:[#allocation2 + $0x28] sm:$0xf] }
  0xd6   : > { %v1027_v15 = vsel %vm7479_vm10, %v1009_v13, %v1011_v44  ;;  %1217 = vst [vmem:[#allocation3 + $0x198] sm:$0xf0] %v1201_v34  ;;  %v2010_v44 = vld [vmem:[#allocation2 + $0x18] sm:$0xf]  ;;  %v1305_v17 = vrot.slane %v1287_v12, 4 }
  0xd7   : > { %1043 = vst [vmem:[#allocation3 + $0x140] sm:$0xf] %v1027_v15  ;;  %1834 = vrot.lane.b32.xlu0 %v1825_v11, %s7496_s15  ;;  %v1079_v20 = vpop.permute.xlu1 %1078  ;;  %v1226_v11 = vld [vmem:[#allocation2 + $0x28] sm:$0xf] }
  0xd8   : > { %v1097_v24 = vsel %vm7478_vm11, %v1079_v20, %v1081_v54  ;;  %v2111_v26 = vld [vmem:[#allocation3 + $0x148] sm:$0xff] }
  0xd9   : > { %1113 = vst [vmem:[#allocation3 + $0x140] sm:$0xf0] %v1097_v24  ;;  %v6009_v28 = vpop.permute.xlu0 %1141  ;;  %1897 = vrot.lane.b32.xlu1 %v1878_v14, %s7494_s10  ;;  %v5301_v29 = vpack.c.bf16 %v2111_v26, %v2103_v25  ;;  %v1304_v14 = vrot.slane %v1286_v5, 4  ;;  %v1877_v26 = vld [vmem:[#allocation2 + $0x8] sm:$0xf] }
  0xda   : > { %v532_v12 = vld [vmem:[#allocation2 + $0x28] sm:$0xf] }
  0xdb   : > { %1899 = vrot.lane.b32.xlu0 %v1879_v21, %s7494_s10  ;;  %5302 = vmatprep.subr.bf16.mxu0 %v5301_v29  ;;  %v6013_v35 = vpop.permute.xlu1 %1143  ;;  %v1956_v29 = vrot.slane %v1938_v22, 4 }
  0xdc   : > { %v1159_v38 = vsel %vm1157_vm12, %v6009_v28, %v6013_v35  ;;  %v2102_v45 = vld [vmem:[#allocation3 + $0x100] sm:$0xff] }
  0xdd   : > { %1175 = vst [vmem:[#allocation3 + $0x188] sm:$0xf] %v1159_v38  ;;  %v6018_v39 = vpop.permute.xlu0 %1242  ;;  %1967 = vrot.lane.b32.xlu1 %v1957_v31, %s7492_s22 }
  0xdf   : > { %1969 = vrot.lane.b32.xlu0 %v1958_v36, %s7492_s22  ;;  %v6022_v41 = vpop.permute.xlu1 %1244  ;;  %v2008_v36 = vld [vmem:[#allocation2 + $0x8] sm:$0xf] }
  0xe0   : > { %v1260_v43 = vsel %vm1258_vm13, %v6018_v39, %v6022_v41  ;;  %v2110_v47 = vld [vmem:[#allocation3 + $0x140] sm:$0xff] }
  0xe1   : > { %1276 = vst [vmem:[#allocation3 + $0x1c8] sm:$0xf] %v1260_v43  ;;  %v6027_v49 = vpop.permute.xlu0 %1312  ;;  %2028 = vrot.lane.b32.xlu1 %v2009_v40, %s7490_s21  ;;  %v5303_v50 = vpack.c.bf16 %v2110_v47, %v2102_v45  ;;  %v340_v40 = vld [vmem:[#allocation2 + $0x28] sm:$0xf]  ;;  %v341_v47 = vld [vmem:[#allocation2 + $0x30] sm:$0xf] }
  0xe2   : > { %v401_v43 = vld [vmem:[#allocation2 + $0x28] sm:$0xf] }
  0xe3   : > { %2030 = vrot.lane.b32.xlu0 %v2010_v44, %s7490_s21  ;;  %5304 = vmatpush1.bf16.msra.mxu0 %v5303_v50  ;;  %v6031_v54 = vpop.permute.xlu1 %1314 }
  0xe4   : > { %v1330_v55 = vsel %vm1328_vm14, %v6027_v49, %v6031_v54  ;;  %v2119_v20 = vld [vmem:[#allocation3 + $0x188] sm:$0xff] }
  0xe5   : > { %1346 = vst [vmem:[#allocation3 + $0x1c8] sm:$0xf0] %v1330_v55  ;;  %v360_v58 = vpop.permute.xlu0 %359  ;;  %1145 = vrot.lane.b32.xlu1 %v1124_v52, %s7512_s23  ;;  %v419_v52 = vrot.slane %v401_v43, 4  ;;  %v1357_v43 = vld [vmem:[#allocation2 + $0x28] sm:$0xf] }
  0xe6   : > { %v374_v61 = vsel %vm7488_vm0, %v5913_v63, %v360_v58 }
  0xe7   : > { %390 = vst [vmem:[#allocation3 + $0x10] sm:$0xf] %v374_v61  ;;  %1147 = vrot.lane.b32.xlu0 %v1125_v57, %s7512_s23  ;;  %v6040_v8 = vpop.permute.xlu1 %361 }
  0xe8   : > { %v375_v9 = vsel %vm7488_vm0, %v360_v58, %v6040_v8 }
  0xe9   : > { %391 = vst [vmem:[#allocation3 + $0x18] sm:$0xf] %v375_v9  ;;  %v430_v13 = vpop.permute.xlu0 %429  ;;  %1246 = vrot.lane.b32.xlu1 %v1225_v0, %s7510_s24  ;;  %v471_v0 = vld [vmem:[#allocation2 + $0x28] sm:$0xf] }
  0xea   : > { %v444_v63 = vsel %vm7461_vm2, %v5917_v4, %v430_v13 }
  0xeb   : > { %460 = vst [vmem:[#allocation3 + $0x10] sm:$0xf0] %v444_v63  ;;  %1248 = vrot.lane.b32.xlu0 %v1226_v11, %s7510_s24  ;;  %v6048_v15 = vpop.permute.xlu1 %431 }
  0xec   : > { %v445_v18 = vsel %vm7461_vm2, %v430_v13, %v6048_v15  ;;  %v2127_v21 = vld [vmem:[#allocation3 + $0x1c8] sm:$0xff]  ;;  %vm7489_vm2 = vcmask 310272  }
  0xed   : > { %461 = vst [vmem:[#allocation3 + $0x18] sm:$0xf0] %v445_v18  ;;  %v491_v24 = vpop.permute.xlu0 %490  ;;  %1316 = vrot.lane.b32.xlu1 %v1304_v14, %s7508_s25  ;;  %v5305_v25 = vpack.c.bf16 %v2127_v21, %v2119_v20  ;;  %v533_v18 = vld [vmem:[#allocation2 + $0x30] sm:$0xf]  ;;  %v550_v21 = vrot.slane %v532_v12, 4 }
  0xee   : > { %v505_v4 = vsel %vm7460_vm1, %v5907_v60, %v491_v24 }
  0xef   : > { %521 = vst [vmem:[#allocation3 + $0x50] sm:$0xf] %v505_v4  ;;  %1318 = vrot.lane.b32.xlu0 %v1305_v17, %s7508_s25  ;;  %5306 = vmatprep.subr.bf16.mxu0 %v5305_v25  ;;  %v6056_v27 = vpop.permute.xlu1 %492  ;;  %v472_v17 = vld [vmem:[#allocation2 + $0x30] sm:$0xf] }
  0xf0   : > { %v506_v31 = vsel %vm7460_vm1, %v491_v24, %v6056_v27  ;;  %v551_v24 = vrot.slane %v533_v18, 4  ;;  %vm1520_vm1 = vcmask 318464  }
  0xf1   : > { %522 = vst [vmem:[#allocation3 + $0x58] sm:$0xf] %v506_v31  ;;  %v561_v32 = vpop.permute.xlu0 %560  ;;  %1895 = vrot.lane.b32.xlu1 %v1877_v26, %s7494_s10 }
  0xf2   : > { %v575_v34 = vsel %vm7459_vm3, %v5925_v16, %v561_v32  ;;  %v402_v16 = vld [vmem:[#allocation2 + $0x30] sm:$0xf] }
  0xf3   : > { %591 = vst [vmem:[#allocation3 + $0x50] sm:$0xf0] %v575_v34  ;;  %1965 = vrot.lane.b32.xlu0 %v1956_v29, %s7492_s22  ;;  %v6064_v60 = vpop.permute.xlu1 %562  ;;  %v420_v58 = vrot.slane %v402_v16, 4  ;;  %v2072_v14 = vld [vmem:[#allocation3 + $0x10] sm:$0xff]  ;;  %v1356_v34 = vld [vmem:[#allocation2 + $0x20] sm:$0xf] }
  0xf4   : > { %v576_v38 = vsel %vm7459_vm3, %v561_v32, %v6064_v60  ;;  %v2073_v9 = vld [vmem:[#allocation3 + $0x18] sm:$0xff]  ;;  %vm1459_vm3 = vcmask 957440   ;;  %v6100_v32 = vcombine.high %v5998_v62, %v5998_v62 }
  0xf5   : > { %592 = vst [vmem:[#allocation3 + $0x58] sm:$0xf0] %v576_v38  ;;  %v1140_v44 = vpop.permute.xlu0 %1139  ;;  %2026 = vrot.lane.b32.xlu1 %v2008_v36, %s7490_s21  ;;  %v1417_v36 = vld [vmem:[#allocation2 + $0x20] sm:$0xf] }
  0xf6   : > { %v1158_v45 = vsel %vm1157_vm12, %v1140_v44, %v6009_v28  ;;  %7529 = vst [vmem:[#allocation7_spill] sm:$0xff] %v6100_v32  ;;  %333 = vst [vmem:[#allocation2 + $0x40] sm:$0xf] %v6100_v32  ;;  %v1418_v44 = vld [vmem:[#allocation2 + $0x28] sm:$0xf] }
  0xf7   : > { %1174 = vst [vmem:[#allocation3 + $0x180] sm:$0xf] %v1158_v45  ;;  %363 = vrot.lane.b32.xlu0 %v340_v40, %s7468_s11  ;;  %v1241_v50 = vpop.permute.xlu1 %1240 }
  0xf8   : > { %v1259_v55 = vsel %vm1258_vm13, %v1241_v50, %v6018_v39  ;;  %v1436_v50 = vrot.slane %v1418_v44, 4 }
  0xf9   : > { %1275 = vst [vmem:[#allocation3 + $0x1c0] sm:$0xf] %v1259_v55  ;;  %v1311_v57 = vpop.permute.xlu0 %1310  ;;  %365 = vrot.lane.b32.xlu1 %v341_v47, %s7468_s11  ;;  %v1435_v47 = vrot.slane %v1417_v36, 4  ;;  %v664_v36 = vld [vmem:[#allocation2 + $0x30] sm:$0xf]  ;;  %s7533_s11 = smov 90  }
  0xfa   : > { %v1329_v61 = vsel %vm1328_vm14, %v1311_v57, %v6027_v49  ;;  %v2080_v5 = vld [vmem:[#allocation3 + $0x50] sm:$0xff] }
  0xfb   : > { %1345 = vst [vmem:[#allocation3 + $0x1c0] sm:$0xf0] %v1329_v61  ;;  %433 = vrot.lane.b32.xlu0 %v419_v52, %s7466_s12  ;;  %v6078_v28 = vpop.permute.xlu1 %1373  ;;  %v5325_v63 = vpack.c.bf16 %v2080_v5, %v2072_v14  ;;  %v1548_v61 = vld [vmem:[#allocation2 + $0x20] sm:$0xf] }
  0xfc   : > { %v2081_v11 = vld [vmem:[#allocation3 + $0x58] sm:$0xff] }
  0xfd   : > { %v6080_v39 = vpop.permute.xlu0 %1375  ;;  %435 = vrot.lane.b32.xlu1 %v420_v58, %s7466_s12  ;;  %v5323_v13 = vpack.c.bf16 %v2081_v11, %v2073_v9  ;;  %v1487_v58 = vld [vmem:[#allocation2 + $0x20] sm:$0xf]  ;;  %v1488_v9 = vld [vmem:[#allocation2 + $0x28] sm:$0xf]  ;;  %s7532_s12 = smov 91  }
  0xfe   : > { %v1391_v49 = vsel %vm1389_vm15, %v6078_v28, %v6080_v39  ;;  %v2118_v4 = vld [vmem:[#allocation3 + $0x180] sm:$0xff]  ;;  %v1549_v11 = vld [vmem:[#allocation2 + $0x28] sm:$0xf] }
  0xff   : > { %1407 = vst [vmem:[#allocation3 + $0x208] sm:$0xf] %v1391_v49  ;;  %494 = vrot.lane.b32.xlu0 %v471_v0, %s7464_s13  ;;  %5324 = vmatprep.subr.bf16.mxu1 %v5323_v13  ;;  %v6087_v20 = vpop.permute.xlu1 %1443  ;;  %v1566_v13 = vrot.slane %v1548_v61, 4  ;;  %v1567_v49 = vrot.slane %v1549_v11, 4 }
 0x100   : > { %5326 = vmatpush1.bf16.msra.mxu1 %v5325_v63 }
 0x101   : > { %v6089_v22 = vpop.permute.xlu0 %1445  ;;  %496 = vrot.lane.b32.xlu1 %v472_v17, %s7464_s13  ;;  %s7531_s13 = smov 99  }
 0x102   : > { %v1461_v25 = vsel %vm1459_vm3, %v6087_v20, %v6089_v22  ;;  %v2126_v26 = vld [vmem:[#allocation3 + $0x1c0] sm:$0xff] }
 0x103   : > { %1477 = vst [vmem:[#allocation3 + $0x208] sm:$0xf0] %v1461_v25  ;;  %564 = vrot.lane.b32.xlu0 %v550_v21, %s7462_s14  ;;  %v6096_v29 = vpop.permute.xlu1 %1504  ;;  %v5307_v31 = vpack.c.bf16 %v2126_v26, %v2118_v4  ;;  %v663_v4 = vld [vmem:[#allocation2 + $0x28] sm:$0xf] }
 0x105   : > { %v6102_v38 = vpop.permute.xlu0 %1506  ;;  %566 = vrot.lane.b32.xlu1 %v551_v24, %s7462_s14  ;;  %5308 = vmatpush1.bf16.msra.mxu0 %v5307_v31  ;;  %s7530_s14 = smov 100  }
 0x106   : > { %v1522_v40 = vsel %vm1520_vm1, %v6096_v29, %v6102_v38 }
 0x107   : > { %1538 = vst [vmem:[#allocation3 + $0x248] sm:$0xf] %v1522_v40  ;;  %1377 = vrot.lane.b32.xlu0 %v1356_v34, %s7498_s26  ;;  %v6110_v45 = vpop.permute.xlu1 %1574  ;;  %v603_v34 = vld [vmem:[#allocation2 + $0x30] sm:$0xf] }
 0x109   : > { %v6112_v16 = vpop.permute.xlu0 %1576  ;;  %1379 = vrot.lane.b32.xlu1 %v1357_v43, %s7498_s26  ;;  %v681_v43 = vrot.slane %v663_v4, 4 }
 0x10a   : > { %v1592_v52 = vsel %vm7489_vm2, %v6110_v45, %v6112_v16  ;;  %v2135_v17 = vld [vmem:[#allocation3 + $0x208] sm:$0xff] }
 0x10b   : > { %1608 = vst [vmem:[#allocation3 + $0x248] sm:$0xf0] %v1592_v52  ;;  %1447 = vrot.lane.b32.xlu0 %v1435_v47, %s7500_s30  ;;  %v622_v55 = vpop.permute.xlu1 %621  ;;  %v682_v47 = vrot.slane %v664_v36, 4 }
 0x10c   : > { %v636_v57 = vsel %vm7473_vm4, %v5940_v33, %v622_v55 }
 0x10d   : > { %652 = vst [vmem:[#allocation3 + $0x90] sm:$0xf] %v636_v57  ;;  %v6121_v0 = vpop.permute.xlu0 %623  ;;  %1449 = vrot.lane.b32.xlu1 %v1436_v50, %s7500_s30  ;;  %v733_v57 = vld [vmem:[#allocation2 + $0x28] sm:$0xf] }
 0x10e   : > { %v637_v5 = vsel %vm7473_vm4, %v622_v55, %v6121_v0  ;;  %vm7482_vm4 = vcmask 220160  }
 0x10f   : > { %653 = vst [vmem:[#allocation3 + $0x98] sm:$0xf] %v637_v5  ;;  %1508 = vrot.lane.b32.xlu0 %v1487_v58, %s7486_s9  ;;  %v692_v12 = vpop.permute.xlu1 %691  ;;  %v794_v58 = vld [vmem:[#allocation2 + $0x28] sm:$0xf]  ;;  %v734_v5 = vld [vmem:[#allocation2 + $0x30] sm:$0xf] }
 0x110   : > { %v706_v33 = vsel %vm7472_vm5, %v5946_v42, %v692_v12  ;;  %v602_v42 = vld [vmem:[#allocation2 + $0x28] sm:$0xf] }
 0x111   : > { %722 = vst [vmem:[#allocation3 + $0x90] sm:$0xf0] %v706_v33  ;;  %v6129_v14 = vpop.permute.xlu0 %693  ;;  %1510 = vrot.lane.b32.xlu1 %v1488_v9, %s7486_s9  ;;  %v795_v9 = vld [vmem:[#allocation2 + $0x30] sm:$0xf] }
 0x112   : > { %v707_v63 = vsel %vm7472_vm5, %v692_v12, %v6129_v14  ;;  %v2143_v18 = vld [vmem:[#allocation3 + $0x248] sm:$0xff]  ;;  %v812_v12 = vrot.slane %v794_v58, 4  ;;  %v813_v33 = vrot.slane %v795_v9, 4  ;;  %vm7483_vm5 = vcmask 228352   ;;  %v1749_v58 = vld [vmem:[#allocation2 + $0x20] sm:$0xf] }
 0x113   : > { %723 = vst [vmem:[#allocation3 + $0x98] sm:$0xf0] %v707_v63  ;;  %1578 = vrot.lane.b32.xlu0 %v1566_v13, %s7484_s29  ;;  %v753_v21 = vpop.permute.xlu1 %752  ;;  %v5309_v24 = vpack.c.bf16 %v2143_v18, %v2135_v17  ;;  %v1750_v9 = vld [vmem:[#allocation2 + $0x28] sm:$0xf] }
 0x114   : > { %v767_v25 = vsel %vm7471_vm6, %v5952_v53, %v753_v21 }
 0x115   : > { %783 = vst [vmem:[#allocation3 + $0xd0] sm:$0xf] %v767_v25  ;;  %v6137_v26 = vpop.permute.xlu0 %754  ;;  %1580 = vrot.lane.b32.xlu1 %v1567_v49, %s7484_s29  ;;  %5310 = vmatprep.subr.bf16.mxu0 %v5309_v24  ;;  %v1618_v25 = vld [vmem:[#allocation2 + $0x20] sm:$0xf] }
 0x116   : > { %v768_v31 = vsel %vm7471_vm6, %v753_v21, %v6137_v26  ;;  %vm1721_vm6 = vcmask 236544  }
 0x117   : > { %784 = vst [vmem:[#allocation3 + $0xd8] sm:$0xf] %v768_v31  ;;  %625 = vrot.lane.b32.xlu0 %v602_v42, %s7530_s14  ;;  %v823_v40 = vpop.permute.xlu1 %822  ;;  %v1679_v42 = vld [vmem:[#allocation2 + $0x20] sm:$0xf]  ;;  %v1619_v31 = vld [vmem:[#allocation2 + $0x28] sm:$0xf] }
 0x118   : > { %v837_v53 = vsel %vm7470_vm7, %v5958_v59, %v823_v40  ;;  %v2088_v24 = vld [vmem:[#allocation3 + $0x90] sm:$0xff] }
 0x119   : > { %853 = vst [vmem:[#allocation3 + $0xd0] sm:$0xf0] %v837_v53  ;;  %v6145_v44 = vpop.permute.xlu0 %824  ;;  %627 = vrot.lane.b32.xlu1 %v603_v34, %s7530_s14  ;;  %v1680_v34 = vld [vmem:[#allocation2 + $0x28] sm:$0xf] }
 0x11a   : > { %v838_v50 = vsel %vm7470_vm7, %v823_v40, %v6145_v44  ;;  %vm1651_vm7 = vcmask 302080   ;;  %v1697_v40 = vrot.slane %v1679_v42, 4  ;;  %v1698_v53 = vrot.slane %v1680_v34, 4  ;;  %v926_v42 = vld [vmem:[#allocation2 + $0x30] sm:$0xf] }
 0x11b   : > { %854 = vst [vmem:[#allocation3 + $0xd8] sm:$0xf0] %v838_v50  ;;  %695 = vrot.lane.b32.xlu0 %v681_v43, %s7531_s13  ;;  %v1372_v52 = vpop.permute.xlu1 %1371 }
 0x11c   : > { %v1390_v55 = vsel %vm1389_vm15, %v1372_v52, %v6078_v28 }
 0x11d   : > { %1406 = vst [vmem:[#allocation3 + $0x200] sm:$0xf] %v1390_v55  ;;  %v1442_v59 = vpop.permute.xlu0 %1441  ;;  %697 = vrot.lane.b32.xlu1 %v682_v47, %s7531_s13 }
 0x11e   : > { %v1460_v61 = vsel %vm1459_vm3, %v1442_v59, %v6087_v20  ;;  %v2089_v20 = vld [vmem:[#allocation3 + $0x98] sm:$0xff]  ;;  %v1810_v59 = vld [vmem:[#allocation2 + $0x20] sm:$0xf] }
 0x11f   : > { %1476 = vst [vmem:[#allocation3 + $0x200] sm:$0xf0] %v1460_v61  ;;  %756 = vrot.lane.b32.xlu0 %v733_v57, %s7532_s12  ;;  %v1503_v11 = vpop.permute.xlu1 %1502 }
 0x120   : > { %v1521_v13 = vsel %vm1520_vm1, %v1503_v11, %v6096_v29  ;;  %v2096_v49 = vld [vmem:[#allocation3 + $0xd0] sm:$0xff]  ;;  %v1811_v11 = vld [vmem:[#allocation2 + $0x28] sm:$0xf] }
 0x121   : > { %1537 = vst [vmem:[#allocation3 + $0x240] sm:$0xf] %v1521_v13  ;;  %v1573_v28 = vpop.permute.xlu0 %1572  ;;  %758 = vrot.lane.b32.xlu1 %v734_v5, %s7532_s12  ;;  %v5329_v29 = vpack.c.bf16 %v2096_v49, %v2088_v24  ;;  %v1828_v13 = vrot.slane %v1810_v59, 4  ;;  %v1056_v59 = vld [vmem:[#allocation2 + $0x28] sm:$0xf] }
 0x122   : > { %v1591_v63 = vsel %vm7489_vm2, %v1573_v28, %v6110_v45  ;;  %v2097_v17 = vld [vmem:[#allocation3 + $0xd8] sm:$0xff] }
 0x123   : > { %1607 = vst [vmem:[#allocation3 + $0x240] sm:$0xf0] %v1591_v63  ;;  %826 = vrot.lane.b32.xlu0 %v812_v12, %s7533_s11  ;;  %v6163_v18 = vpop.permute.xlu1 %1635  ;;  %v5327_v21 = vpack.c.bf16 %v2097_v17, %v2089_v20  ;;  %v864_v17 = vld [vmem:[#allocation2 + $0x28] sm:$0xf] }
 0x125   : > { %v6165_v4 = vpop.permute.xlu0 %1637  ;;  %828 = vrot.lane.b32.xlu1 %v813_v33, %s7533_s11  ;;  %5328 = vmatprep.subr.bf16.mxu1 %v5327_v21  ;;  %v1829_v33 = vrot.slane %v1811_v11, 4  ;;  %v925_v21 = vld [vmem:[#allocation2 + $0x28] sm:$0xf]  ;;  %v996_v11 = vld [vmem:[#allocation2 + $0x30] sm:$0xf] }
 0x126   : > { %v1653_v45 = vsel %vm1651_vm7, %v6163_v18, %v6165_v4  ;;  %5330 = vmatpush1.bf16.msra.mxu1 %v5329_v29  ;;  %v2134_v50 = vld [vmem:[#allocation3 + $0x200] sm:$0xff] }
 0x127   : > { %1669 = vst [vmem:[#allocation3 + $0x288] sm:$0xf] %v1653_v45  ;;  %1639 = vrot.lane.b32.xlu0 %v1618_v25, %s7506_s18  ;;  %v6172_v36 = vpop.permute.xlu1 %1705  ;;  %v865_v25 = vld [vmem:[#allocation2 + $0x30] sm:$0xf] }
 0x129   : > { %v6174_v43 = vpop.permute.xlu0 %1707  ;;  %1641 = vrot.lane.b32.xlu1 %v1619_v31, %s7506_s18  ;;  %v943_v31 = vrot.slane %v925_v21, 4 }
 0x12a   : > { %v1723_v47 = vsel %vm1721_vm6, %v6172_v36, %v6174_v43  ;;  %v2142_v52 = vld [vmem:[#allocation3 + $0x240] sm:$0xff] }
 0x12b   : > { %1739 = vst [vmem:[#allocation3 + $0x288] sm:$0xf0] %v1723_v47  ;;  %1709 = vrot.lane.b32.xlu0 %v1697_v40, %s7502_s17  ;;  %v6181_v55 = vpop.permute.xlu1 %1766  ;;  %v5311_v57 = vpack.c.bf16 %v2142_v52, %v2134_v50  ;;  %v944_v40 = vrot.slane %v926_v42, 4  ;;  %v1941_v42 = vld [vmem:[#allocation2 + $0x20] sm:$0xf] }
 0x12d   : > { %v6183_v61 = vpop.permute.xlu0 %1768  ;;  %1711 = vrot.lane.b32.xlu1 %v1698_v53, %s7502_s17  ;;  %5312 = vmatpush1.bf16.msra.mxu0 %v5311_v57 }
 0x12e   : > { %v1784_v5 = vsel %vm7483_vm5, %v6181_v55, %v6183_v61 }
 0x12f   : > { %1800 = vst [vmem:[#allocation3 + $0x2c8] sm:$0xf] %v1784_v5  ;;  %1770 = vrot.lane.b32.xlu0 %v1749_v58, %s7504_s16  ;;  %v6190_v12 = vpop.permute.xlu1 %1836 }
 0x131   : > { %v6192_v28 = vpop.permute.xlu0 %1838  ;;  %1772 = vrot.lane.b32.xlu1 %v1750_v9, %s7504_s16 }
 0x132   : > { %v1854_v49 = vsel %vm7482_vm4, %v6190_v12, %v6192_v28  ;;  %v2151_v47 = vld [vmem:[#allocation3 + $0x288] sm:$0xff] }
 0x133   : > { %1870 = vst [vmem:[#allocation3 + $0x2c8] sm:$0xf0] %v1854_v49  ;;  %1840 = vrot.lane.b32.xlu0 %v1828_v13, %s7496_s15  ;;  %v884_v63 = vpop.permute.xlu1 %883  ;;  %v1057_v13 = vld [vmem:[#allocation2 + $0x30] sm:$0xf]  ;;  %v1074_v49 = vrot.slane %v1056_v59, 4 }
 0x134   : > { %v898_v20 = vsel %vm7481_vm8, %v5975_v30, %v884_v63 }
 0x135   : > { %914 = vst [vmem:[#allocation3 + $0x110] sm:$0xf] %v898_v20  ;;  %v6201_v24 = vpop.permute.xlu0 %885  ;;  %1842 = vrot.lane.b32.xlu1 %v1829_v33, %s7496_s15  ;;  %v1075_v20 = vrot.slane %v1057_v13, 4 }
 0x136   : > { %v899_v29 = vsel %vm7481_vm8, %v884_v63, %v6201_v24  ;;  %vm2192_vm8 = vcmask 1043456  }
 0x137   : > { %915 = vst [vmem:[#allocation3 + $0x118] sm:$0xf] %v899_v29  ;;  %887 = vrot.lane.b32.xlu0 %v864_v17, %s7474_s19  ;;  %v954_v45 = vpop.permute.xlu1 %953 }
 0x138   : > { %v968_v30 = vsel %vm7480_vm9, %v5981_v37, %v954_v45  ;;  %v995_v37 = vld [vmem:[#allocation2 + $0x28] sm:$0xf] }
 0x139   : > { %984 = vst [vmem:[#allocation3 + $0x110] sm:$0xf0] %v968_v30  ;;  %v6209_v34 = vpop.permute.xlu0 %955  ;;  %889 = vrot.lane.b32.xlu1 %v865_v25, %s7474_s19  ;;  %s7534_s19 = smov 10   ;;  %v1880_v25 = vld [vmem:[#allocation2 + $0x20] sm:$0xf] }
 0x13a   : > { %v969_v53 = vsel %vm7480_vm9, %v954_v45, %v6209_v34  ;;  %v2159_v50 = vld [vmem:[#allocation3 + $0x2c8] sm:$0xff]  ;;  %vm7514_vm9 = vcmask 138240  }
 0x13b   : > { %985 = vst [vmem:[#allocation3 + $0x118] sm:$0xf0] %v969_v53  ;;  %957 = vrot.lane.b32.xlu0 %v943_v31, %s7476_s20  ;;  %v1015_v52 = vpop.permute.xlu1 %1014  ;;  %v5313_v57 = vpack.c.bf16 %v2159_v50, %v2151_v47  ;;  %v1186_v45 = vld [vmem:[#allocation2 + $0x28] sm:$0xf]  ;;  %v1959_v50 = vrot.slane %v1941_v42, 4 }
 0x13c   : > { %v1029_v58 = vsel %vm7479_vm10, %v5987_v48, %v1015_v52  ;;  %v1202_v31 = vrot.slane %v1186_v45, 4  ;;  %v1942_v53 = vld [vmem:[#allocation2 + $0x28] sm:$0xf]  ;;  %v1127_v45 = vld [vmem:[#allocation2 + $0x30] sm:$0xf] }
 0x13d   : > { %1045 = vst [vmem:[#allocation3 + $0x150] sm:$0xf] %v1029_v58  ;;  %v6217_v5 = vpop.permute.xlu0 %1016  ;;  %959 = vrot.lane.b32.xlu1 %v944_v40, %s7476_s20  ;;  %5314 = vmatprep.subr.bf16.mxu0 %v5313_v57  ;;  %s7535_s20 = smov 9   ;;  %v1881_v40 = vld [vmem:[#allocation2 + $0x28] sm:$0xf]  ;;  %v1960_v57 = vrot.slane %v1942_v53, 4 }
 0x13e   : > { %v1030_v9 = vsel %vm7479_vm10, %v1015_v52, %v6217_v5  ;;  %1218 = vst [vmem:[#allocation3 + $0x1a0] sm:$0xf0] %v1202_v31  ;;  %vm1983_vm10 = vcmask 146432   ;;  %v1227_v53 = vld [vmem:[#allocation2 + $0x30] sm:$0xf] }
 0x13f   : > { %1046 = vst [vmem:[#allocation3 + $0x158] sm:$0xf] %v1030_v9  ;;  %1018 = vrot.lane.b32.xlu0 %v995_v37, %s7534_s19  ;;  %v1085_v33 = vpop.permute.xlu1 %1084 }
 0x140   : > { %v1099_v48 = vsel %vm7478_vm11, %v5993_v56, %v1085_v33  ;;  %v2104_v13 = vld [vmem:[#allocation3 + $0x110] sm:$0xff] }
 0x141   : > { %1115 = vst [vmem:[#allocation3 + $0x150] sm:$0xf0] %v1099_v48  ;;  %v6225_v63 = vpop.permute.xlu0 %1086  ;;  %1020 = vrot.lane.b32.xlu1 %v996_v11, %s7534_s19  ;;  %v2012_v48 = vld [vmem:[#allocation2 + $0x28] sm:$0xf] }
 0x142   : > { %v1100_v17 = vsel %vm7478_vm11, %v1085_v33, %v6225_v63  ;;  %v2105_v37 = vld [vmem:[#allocation3 + $0x118] sm:$0xff]  ;;  %vm1913_vm11 = vcmask 154624   ;;  %v2011_v33 = vld [vmem:[#allocation2 + $0x20] sm:$0xf] }
 0x143   : > { %1116 = vst [vmem:[#allocation3 + $0x158] sm:$0xf0] %v1100_v17  ;;  %1088 = vrot.lane.b32.xlu0 %v1074_v49, %s7535_s20  ;;  %v1634_v21 = vpop.permute.xlu1 %1633 }
 0x144   : > { %v1652_v29 = vsel %vm1651_vm7, %v1634_v21, %v6163_v18 }
 0x145   : > { %1668 = vst [vmem:[#allocation3 + $0x280] sm:$0xf] %v1652_v29  ;;  %v1704_v56 = vpop.permute.xlu0 %1703  ;;  %1090 = vrot.lane.b32.xlu1 %v1075_v20, %s7535_s20  ;;  %v1187_v20 = vld [vmem:[#allocation2 + $0x30] sm:$0xf]  ;;  %v1126_v29 = vld [vmem:[#allocation2 + $0x28] sm:$0xf] }
 0x146   : > { %v1722_v30 = vsel %vm1721_vm6, %v1704_v56, %v6172_v36  ;;  %v1203_v21 = vrot.slane %v1187_v20, 4  ;;  %v1359_v20 = vld [vmem:[#allocation2 + $0x38] sm:$0xf] }
 0x147   : > { %1738 = vst [vmem:[#allocation3 + $0x280] sm:$0xf0] %v1722_v30  ;;  %1901 = vrot.lane.b32.xlu0 %v1880_v25, %s7494_s10  ;;  %v1765_v47 = vpop.permute.xlu1 %1764 }
 0x148   : > { %v1783_v18 = vsel %vm7483_vm5, %v1765_v47, %v6181_v55  ;;  %v2112_v58 = vld [vmem:[#allocation3 + $0x150] sm:$0xff]  ;;  %1219 = vst [vmem:[#allocation3 + $0x1a8] sm:$0xf0] %v1203_v21 }
 0x149   : > { %1799 = vst [vmem:[#allocation3 + $0x2c0] sm:$0xf] %v1783_v18  ;;  %v1835_v52 = vpop.permute.xlu0 %1834  ;;  %1903 = vrot.lane.b32.xlu1 %v1881_v40, %s7494_s10  ;;  %v5333_v55 = vpack.c.bf16 %v2112_v58, %v2104_v13  ;;  %v1288_v47 = vld [vmem:[#allocation2 + $0x30] sm:$0xf] }
 0x14a   : > { %v1853_v36 = vsel %vm7482_vm4, %v1835_v52, %v6190_v12  ;;  %v2113_v59 = vld [vmem:[#allocation3 + $0x158] sm:$0xff]  ;;  %vm5748_vm4 = vmmov 1  }
 0x14b   : > { %1869 = vst [vmem:[#allocation3 + $0x2c0] sm:$0xf0] %v1853_v36  ;;  %1971 = vrot.lane.b32.xlu0 %v1959_v50, %s7492_s22  ;;  %v6243_v9 = vpop.permute.xlu1 %1897  ;;  %v5331_v11 = vpack.c.bf16 %v2113_v59, %v2105_v37  ;;  %v1228_v52 = vld [vmem:[#allocation2 + $0x38] sm:$0xf]  ;;  %v1306_v36 = vrot.slane %v1288_v47, 4  ;;  %vm6283_vm5 = vmpackc.low %vm2192_vm8, %vm5748_vm4  ;;  %vm7538_vm4 = vcmask 900096  }
 0x14c   : > { %vm7539_vm8 = vmmov %vm7538_vm4 }
 0x14d   : > { %v6245_v49 = vpop.permute.xlu0 %1899  ;;  %1973 = vrot.lane.b32.xlu1 %v1960_v57, %s7492_s22  ;;  %5332 = vmatprep.subr.bf16.mxu1 %v5331_v11  ;;  %v1289_v57 = vld [vmem:[#allocation2 + $0x38] sm:$0xf] }
 0x14e   : > { %v1915_v12 = vsel %vm1913_vm11, %v6243_v9, %v6245_v49  ;;  %5334 = vmatpush1.bf16.msra.mxu1 %v5333_v55  ;;  %v2150_v56 = vld [vmem:[#allocation3 + $0x280] sm:$0xff]  ;;  %v1307_v11 = vrot.slane %v1289_v57, 4 }
 0x14f   : > { %1931 = vst [vmem:[#allocation3 + $0x308] sm:$0xf] %v1915_v12  ;;  %2032 = vrot.lane.b32.xlu0 %v2011_v33, %s7490_s21  ;;  %v6252_v17 = vpop.permute.xlu1 %1967  ;;  %v1358_v12 = vld [vmem:[#allocation2 + $0x30] sm:$0xf] }
 0x151   : > { %v6254_v25 = vpop.permute.xlu0 %1969  ;;  %2034 = vrot.lane.b32.xlu1 %v2012_v48, %s7490_s21  ;;  %v1419_v48 = vld [vmem:[#allocation2 + $0x30] sm:$0xf] }
 0x152   : > { %v1985_v42 = vsel %vm1983_vm10, %v6252_v17, %v6254_v25  ;;  %v2158_v31 = vld [vmem:[#allocation3 + $0x2c0] sm:$0xff] }
 0x153   : > { %2001 = vst [vmem:[#allocation3 + $0x308] sm:$0xf0] %v1985_v42  ;;  %1149 = vrot.lane.b32.xlu0 %v1126_v29, %s7512_s23  ;;  %v6261_v30 = vpop.permute.xlu1 %2028  ;;  %v5315_v40 = vpack.c.bf16 %v2158_v31, %v2150_v56  ;;  %v1420_v56 = vld [vmem:[#allocation2 + $0x38] sm:$0xf] }
 0x155   : > { %v6263_v50 = vpop.permute.xlu0 %2030  ;;  %1151 = vrot.lane.b32.xlu1 %v1127_v45, %s7512_s23  ;;  %5316 = vmatpush1.bf16.msra.mxu0 %v5315_v40  ;;  %v1437_v40 = vrot.slane %v1419_v48, 4 }
 0x156   : > { %v2046_v18 = vsel %vm7514_vm9, %v6261_v30, %v6263_v50 }
 0x157   : > { %2062 = vst [vmem:[#allocation3 + $0x348] sm:$0xf] %v2046_v18  ;;  %1250 = vrot.lane.b32.xlu0 %v1227_v53, %s7510_s24  ;;  %v1146_v58 = vpop.permute.xlu1 %1145  ;;  %v1438_v18 = vrot.slane %v1420_v56, 4 }
 0x158   : > { %v1160_v37 = vsel %vm1157_vm12, %v6013_v35, %v1146_v58 }
 0x159   : > { %1176 = vst [vmem:[#allocation3 + $0x190] sm:$0xf] %v1160_v37  ;;  %v6272_v59 = vpop.permute.xlu0 %1147  ;;  %1252 = vrot.lane.b32.xlu1 %v1228_v52, %s7510_s24 }
 0x15a   : > { %v1161_v13 = vsel %vm1157_vm12, %v1146_v58, %v6272_v59  ;;  %v2167_v42 = vld [vmem:[#allocation3 + $0x308] sm:$0xff] }
 0x15b   : > { %1177 = vst [vmem:[#allocation3 + $0x198] sm:$0xf] %v1161_v13  ;;  %1320 = vrot.lane.b32.xlu0 %v1306_v36, %s7508_s25  ;;  %v1247_v55 = vpop.permute.xlu1 %1246  ;;  %v1550_v36 = vld [vmem:[#allocation2 + $0x30] sm:$0xf]  ;;  %v1490_v13 = vld [vmem:[#allocation2 + $0x38] sm:$0xf] }
 0x15c   : > { %v1261_v33 = vsel %vm1258_vm13, %v6022_v41, %v1247_v55 }
 0x15d   : > { %1277 = vst [vmem:[#allocation3 + $0x1d0] sm:$0xf] %v1261_v33  ;;  %v6280_v35 = vpop.permute.xlu0 %1248  ;;  %1322 = vrot.lane.b32.xlu1 %v1307_v11, %s7508_s25 }
 0x15e   : > { %v1262_v29 = vsel %vm1258_vm13, %v1247_v55, %v6280_v35  ;;  %v2175_v45 = vld [vmem:[#allocation3 + $0x348] sm:$0xf]  ;;  %v1551_v55 = vld [vmem:[#allocation2 + $0x38] sm:$0xf] }
 0x15f   : > { %1278 = vst [vmem:[#allocation3 + $0x1d8] sm:$0xf] %v1262_v29  ;;  %1381 = vrot.lane.b32.xlu0 %v1358_v12, %s7498_s26  ;;  %v1317_v41 = vpop.permute.xlu1 %1316  ;;  %v5317_v31 = vpack.c.bf16 %v2175_v45, %v2167_v42  ;;  %v1568_v12 = vrot.slane %v1550_v36, 4 }
 0x160   : > { %v1331_v53 = vsel %vm1328_vm14, %v6031_v54, %v1317_v41  ;;  %v1489_v54 = vld [vmem:[#allocation2 + $0x30] sm:$0xf] }
 0x161   : > { %1347 = vst [vmem:[#allocation3 + $0x1d0] sm:$0xf0] %v1331_v53  ;;  %v6292_v47 = vpop.permute.xlu0 %1318  ;;  %1383 = vrot.lane.b32.xlu1 %v1359_v20, %s7498_s26  ;;  %5319 = vmatprep.subr.msk.bf16.mxu0 %vm6283_vm5, %v5317_v31  ;;  %v1569_v20 = vrot.slane %v1551_v55, 4  ;;  %v2120_v31 = vld [vmem:[#allocation3 + $0x190] sm:$0xff] }
 0x162   : > { %v1332_v52 = vsel %vm1328_vm14, %v1317_v41, %v6292_v47  ;;  %v1620_v53 = vld [vmem:[#allocation2 + $0x30] sm:$0xf] }
 0x163   : > { %1348 = vst [vmem:[#allocation3 + $0x1d8] sm:$0xf0] %v1332_v52  ;;  %1451 = vrot.lane.b32.xlu0 %v1437_v40, %s7500_s30  ;;  %v1896_v57 = vpop.permute.xlu1 %1895 }
 0x164   : > { %v1914_v58 = vsel %vm1913_vm11, %v1896_v57, %v6243_v9  ;;  %v1621_v57 = vld [vmem:[#allocation2 + $0x38] sm:$0xf] }
 0x165   : > { %1930 = vst [vmem:[#allocation3 + $0x300] sm:$0xf] %v1914_v58  ;;  %v1966_v37 = vpop.permute.xlu0 %1965  ;;  %1453 = vrot.lane.b32.xlu1 %v1438_v18, %s7500_s30  ;;  %v1681_v18 = vld [vmem:[#allocation2 + $0x30] sm:$0xf]  ;;  %v1682_v58 = vld [vmem:[#allocation2 + $0x38] sm:$0xf] }
 0x166   : > { %v1984_v11 = vsel %vm1983_vm10, %v1966_v37, %v6252_v17  ;;  %v2121_v17 = vld [vmem:[#allocation3 + $0x198] sm:$0xff]  ;;  %v1699_v36 = vrot.slane %v1681_v18, 4 }
 0x167   : > { %2000 = vst [vmem:[#allocation3 + $0x300] sm:$0xf0] %v1984_v11  ;;  %1512 = vrot.lane.b32.xlu0 %v1489_v54, %s7486_s9  ;;  %v2027_v33 = vpop.permute.xlu1 %2026 }
 0x168   : > { %v2045_v48 = vsel %vm7514_vm9, %v2027_v33, %v6261_v30  ;;  %v2128_v29 = vld [vmem:[#allocation3 + $0x1d0] sm:$0xff] }
 0x169   : > { %2061 = vst [vmem:[#allocation3 + $0x340] sm:$0xf] %v2045_v48  ;;  %v364_v9 = vpop.permute.xlu0 %363  ;;  %1514 = vrot.lane.b32.xlu1 %v1490_v13, %s7486_s9  ;;  %v5337_v40 = vpack.c.bf16 %v2128_v29, %v2120_v31  ;;  %v5749_v48 = vmov 0   ;;  %v1751_v29 = vld [vmem:[#allocation2 + $0x30] sm:$0xf]  ;;  %s7549_s9 = smov 110  }
 0x16a   : > { %v376_v42 = vsel %vm7488_vm0, %v6040_v8, %v364_v9  ;;  %v2129_v45 = vld [vmem:[#allocation3 + $0x1d8] sm:$0xff]  ;;  %5702 = vset.pattern.permute.xlu0 %v5749_v48  ;;  %5703 = vset.pattern.permute.xlu1 %v5749_v48 }
 0x16b   : > { %392 = vst [vmem:[#allocation3 + $0x20] sm:$0xf] %v376_v42  ;;  %1582 = vrot.lane.b32.xlu0 %v1568_v12, %s7484_s29  ;;  %v6312_v56 = vpop.permute.xlu1 %365  ;;  %v5335_v41 = vpack.c.bf16 %v2129_v45, %v2121_v17  ;;  %v1812_v42 = vld [vmem:[#allocation2 + $0x30] sm:$0xf]  ;;  %v1813_v31 = vld [vmem:[#allocation2 + $0x38] sm:$0xf] }
 0x16c   : > { %v377_v30 = vsel %vm7488_vm0, %v364_v9, %v6312_v56 }
 0x16d   : > { %393 = vst [vmem:[#allocation3 + $0x28] sm:$0xf] %v377_v30  ;;  %v434_v52 = vpop.permute.xlu0 %433  ;;  %1584 = vrot.lane.b32.xlu1 %v1569_v20, %s7484_s29  ;;  %5336 = vmatprep.subr.bf16.mxu1 %v5335_v41  ;;  %v6335_v20 = vld [vmem:[%s7541_s2] sm:$0xf]  ;;  %v1752_v41 = vld [vmem:[#allocation2 + $0x38] sm:$0xf] }
 0x16e   : > { %v446_v8 = vsel %vm7538_vm4, %v6048_v15, %v434_v52  ;;  %5338 = vmatpush1.bf16.msra.mxu1 %v5337_v40  ;;  %v2166_v11 = vld [vmem:[#allocation3 + $0x300] sm:$0xff]  ;;  %v1700_v15 = vrot.slane %v1682_v58, 4  ;;  %vm7540_vm4 = vcmask 891904   ;;  %v1830_v40 = vrot.slane %v1812_v42, 4  ;;  %s7546_s29 = smov 111  }
 0x16f   : > { %462 = vst [vmem:[#allocation3 + $0x20] sm:$0xf0] %v446_v8  ;;  %1643 = vrot.lane.b32.xlu0 %v1620_v53, %s7506_s18  ;;  %v6320_v54 = vpop.permute.xlu1 %435  ;;  %vm7542_vm0 = vmmov %vm7540_vm4  ;;  %v6347_v53 = vld [vmem:[#allocation2] sm:$0xff] }
 0x170   : > { %v447_v37 = vsel %vm7539_vm8, %v434_v52, %v6320_v54  ;;  %v2174_v13 = vld [vmem:[#allocation3 + $0x340] sm:$0xf]  ;;  %vm2188_vm8 = vcmask 883712   ;;  %v1831_v52 = vrot.slane %v1813_v31, 4 }
 0x171   : > { %463 = vst [vmem:[#allocation3 + $0x28] sm:$0xf0] %v447_v37  ;;  %v495_v55 = vpop.permute.xlu0 %494  ;;  %1645 = vrot.lane.b32.xlu1 %v1621_v57, %s7506_s18  ;;  %v5320_v33 = vpack.c.bf16 %v2174_v13, %v2166_v11  ;;  %v1943_v37 = vld [vmem:[#allocation2 + $0x30] sm:$0xf] }
 0x172   : > { %v507_v12 = vsel %vm7540_vm4, %v6056_v27, %v495_v55  ;;  %vm7543_vm4 = vcmask 826368  }
 0x173   : > { %523 = vst [vmem:[#allocation3 + $0x60] sm:$0xf] %v507_v12  ;;  %1713 = vrot.lane.b32.xlu0 %v1699_v36, %s7502_s17  ;;  %5322 = vmatpush1.bf16.msk.msra.mxu0 %vm6283_vm5, %v5320_v33  ;;  %v6330_v9 = vpop.permute.xlu1 %496  ;;  %v1882_v36 = vld [vmem:[#allocation2 + $0x30] sm:$0xf]  ;;  %v1944_v33 = vld [vmem:[#allocation2 + $0x38] sm:$0xf] }
 0x174   : > { %v508_v27 = vsel %vm7542_vm0, %v495_v55, %v6330_v9  ;;  %vm7544_vm0 = vmmov %vm7543_vm4  ;;  %v1883_v55 = vld [vmem:[#allocation2 + $0x38] sm:$0xf] }
 0x175   : > { %524 = vst [vmem:[#allocation3 + $0x68] sm:$0xf] %v508_v27  ;;  %v565_v17 = vpop.permute.xlu0 %564  ;;  %1715 = vrot.lane.b32.xlu1 %v1700_v15, %s7502_s17  ;;  %v1961_v15 = vrot.slane %v1943_v37, 4  ;;  %v342_v37 = vld [vmem:[#allocation2 + $0x38] sm:$0xf] }
 0x176   : > { %v577_v45 = vsel %vm7543_vm4, %v6064_v60, %v565_v17  ;;  %5263 = vmatmul.mubr.msk.f32.vlgmr.msra.gmra.mrb[0].mxu0 %vm2188_vm8, %v6335_v20  ;;  %vm7545_vm4 = vcmask 818176  }
 0x177   : > { %593 = vst [vmem:[#allocation3 + $0x60] sm:$0xf0] %v577_v45  ;;  %1774 = vrot.lane.b32.xlu0 %v1751_v29, %s7504_s16  ;;  %v6345_v30 = vpop.permute.xlu1 %566  ;;  %2423 = vmatprep.mubr.f32.mxu0 %v6347_v53  ;;  %v1962_v45 = vrot.slane %v1944_v33, 4  ;;  %v343_v33 = vld [vmem:[#allocation2 + $0x40] sm:$0xf] }
 0x178   : > { %v578_v18 = vsel %vm7544_vm0, %v565_v17, %v6345_v30  ;;  %v2075_v27 = vld [vmem:[#allocation3 + $0x28] sm:$0xff]  ;;  %vm7547_vm0 = vmmov %vm7545_vm4 }
 0x179   : > { %594 = vst [vmem:[#allocation3 + $0x68] sm:$0xf0] %v578_v18  ;;  %v1378_v60 = vpop.permute.xlu0 %1377  ;;  %1776 = vrot.lane.b32.xlu1 %v1752_v41, %s7504_s16 }
 0x17a   : > { %v1392_v8 = vsel %vm1389_vm15, %v6080_v39, %v1378_v60 }
 0x17b   : > { %1408 = vst [vmem:[#allocation3 + $0x210] sm:$0xf] %v1392_v8  ;;  %1844 = vrot.lane.b32.xlu0 %v1830_v40, %s7496_s15  ;;  %v6356_v57 = vpop.permute.xlu1 %1379 }
 0x17c   : > { %v1393_v58 = vsel %vm1389_vm15, %v1378_v60, %v6356_v57  ;;  %v2013_v60 = vld [vmem:[#allocation2 + $0x30] sm:$0xf] }
 0x17d   : > { %1409 = vst [vmem:[#allocation3 + $0x218] sm:$0xf] %v1393_v58  ;;  %v1448_v11 = vpop.permute.xlu0 %1447  ;;  %1846 = vrot.lane.b32.xlu1 %v1831_v52, %s7496_s15  ;;  %s7565_s15 = smov 11  }
 0x17e   : > { %v1462_v13 = vsel %vm1459_vm3, %v6089_v22, %v1448_v11  ;;  %v2082_v12 = vld [vmem:[#allocation3 + $0x60] sm:$0xff] }
 0x17f   : > { %1478 = vst [vmem:[#allocation3 + $0x210] sm:$0xf0] %v1462_v13  ;;  %1905 = vrot.lane.b32.xlu0 %v1882_v36, %s7494_s10  ;;  %v6364_v39 = vpop.permute.xlu1 %1449  ;;  %v2074_v22 = vld [vmem:[#allocation3 + $0x20] sm:$0xff] }
 0x180   : > { %v1463_v48 = vsel %vm1459_vm3, %v1448_v11, %v6364_v39  ;;  %v2083_v29 = vld [vmem:[#allocation3 + $0x68] sm:$0xff]  ;;  %v5355_v31 = vpack.c.bf16 %v2082_v12, %v2074_v22  ;;  %v403_v11 = vld [vmem:[#allocation2 + $0x38] sm:$0xf] }
 0x181   : > { %1479 = vst [vmem:[#allocation3 + $0x218] sm:$0xf0] %v1463_v48  ;;  %v1509_v42 = vpop.permute.xlu0 %1508  ;;  %1907 = vrot.lane.b32.xlu1 %v1883_v55, %s7494_s10  ;;  %v5353_v17 = vpack.c.bf16 %v2083_v29, %v2075_v27  ;;  %v421_v12 = vrot.slane %v403_v11, 4  ;;  %s7562_s10 = smov 89  }
 0x182   : > { %v1523_v41 = vsel %vm1520_vm1, %v6102_v38, %v1509_v42  ;;  %v2014_v38 = vld [vmem:[#allocation2 + $0x38] sm:$0xf] }
 0x183   : > { %1539 = vst [vmem:[#allocation3 + $0x250] sm:$0xf] %v1523_v41  ;;  %1975 = vrot.lane.b32.xlu0 %v1961_v15, %s7492_s22  ;;  %5354 = vmatprep.subr.bf16.mxu0 %v5353_v17  ;;  %v6372_v40 = vpop.permute.xlu1 %1510  ;;  %v473_v17 = vld [vmem:[#allocation2 + $0x38] sm:$0xf] }
 0x184   : > { %v1524_v18 = vsel %vm1520_vm1, %v1509_v42, %v6372_v40  ;;  %5356 = vmatpush1.bf16.msra.mxu0 %v5355_v31 }
 0x185   : > { %1540 = vst [vmem:[#allocation3 + $0x258] sm:$0xf] %v1524_v18  ;;  %v1579_v52 = vpop.permute.xlu0 %1578  ;;  %1977 = vrot.lane.b32.xlu1 %v1962_v45, %s7492_s22  ;;  %v534_v18 = vld [vmem:[#allocation2 + $0x38] sm:$0xf]  ;;  %s7555_s22 = smov 101  }
 0x186   : > { %v1593_v8 = vsel %vm7489_vm2, %v6112_v16, %v1579_v52  ;;  %v404_v16 = vld [vmem:[#allocation2 + $0x40] sm:$0xf] }
 0x187   : > { %1609 = vst [vmem:[#allocation3 + $0x250] sm:$0xf0] %v1593_v8  ;;  %2036 = vrot.lane.b32.xlu0 %v2013_v60, %s7490_s21  ;;  %v6380_v58 = vpop.permute.xlu1 %1580  ;;  %v422_v29 = vrot.slane %v404_v16, 4  ;;  %v2136_v8 = vld [vmem:[#allocation3 + $0x210] sm:$0xff] }
 0x188   : > { %v1594_v36 = vsel %vm7489_vm2, %v1579_v52, %v6380_v58  ;;  %vm7548_vm2 = vcmask 809984   ;;  %v2137_v41 = vld [vmem:[#allocation3 + $0x218] sm:$0xff] }
 0x189   : > { %1610 = vst [vmem:[#allocation3 + $0x258] sm:$0xf0] %v1594_v36  ;;  %v626_v13 = vpop.permute.xlu0 %625  ;;  %2038 = vrot.lane.b32.xlu1 %v2014_v38, %s7490_s21  ;;  %v474_v36 = vld [vmem:[#allocation2 + $0x40] sm:$0xf]  ;;  %s7552_s21 = smov 109  }
 0x18a   : > { %v638_v55 = vsel %vm7545_vm4, %v6121_v0, %v626_v13  ;;  %vm7550_vm4 = vmmov %vm7548_vm2 }
 0x18b   : > { %654 = vst [vmem:[#allocation3 + $0xa0] sm:$0xf] %v638_v55  ;;  %367 = vrot.lane.b32.xlu0 %v342_v37, %s7546_s29  ;;  %v6388_v15 = vpop.permute.xlu1 %627  ;;  %v535_v37 = vld [vmem:[#allocation2 + $0x40] sm:$0xf] }
 0x18c   : > { %v639_v48 = vsel %vm7547_vm0, %v626_v13, %v6388_v15  ;;  %v552_v13 = vrot.slane %v534_v18, 4  ;;  %v553_v16 = vrot.slane %v535_v37, 4 }
 0x18d   : > { %655 = vst [vmem:[#allocation3 + $0xa8] sm:$0xf] %v639_v48  ;;  %v696_v27 = vpop.permute.xlu0 %695  ;;  %369 = vrot.lane.b32.xlu1 %v343_v33, %s7546_s29 }
 0x18e   : > { %v708_v42 = vsel %vm7548_vm2, %v6129_v14, %v696_v27  ;;  %v2144_v22 = vld [vmem:[#allocation3 + $0x250] sm:$0xff]  ;;  %vm7551_vm2 = vcmask 744448  }
 0x18f   : > { %724 = vst [vmem:[#allocation3 + $0xa0] sm:$0xf0] %v708_v42  ;;  %437 = vrot.lane.b32.xlu0 %v421_v12, %s7549_s9  ;;  %v6396_v0 = vpop.permute.xlu1 %697  ;;  %v5341_v38 = vpack.c.bf16 %v2144_v22, %v2136_v8  ;;  %vm7553_vm0 = vmmov %vm7551_vm2  ;;  %v605_v22 = vld [vmem:[#allocation2 + $0x40] sm:$0xf]  ;;  %v735_v8 = vld [vmem:[#allocation2 + $0x38] sm:$0xf] }
 0x190   : > { %v709_v45 = vsel %vm7550_vm4, %v696_v27, %v6396_v0  ;;  %v2145_v31 = vld [vmem:[#allocation3 + $0x258] sm:$0xff]  ;;  %vm7554_vm4 = vcmask 736256  }
 0x191   : > { %725 = vst [vmem:[#allocation3 + $0xa8] sm:$0xf0] %v709_v45  ;;  %v757_v60 = vpop.permute.xlu0 %756  ;;  %439 = vrot.lane.b32.xlu1 %v422_v29, %s7549_s9  ;;  %v5339_v52 = vpack.c.bf16 %v2145_v31, %v2137_v41  ;;  %v604_v27 = vld [vmem:[#allocation2 + $0x38] sm:$0xf]  ;;  %v666_v45 = vld [vmem:[#allocation2 + $0x40] sm:$0xf] }
 0x192   : > { %v769_v14 = vsel %vm7551_vm2, %v6137_v26, %v757_v60  ;;  %vm7556_vm2 = vmmov %vm7554_vm4  ;;  %v665_v29 = vld [vmem:[#allocation2 + $0x38] sm:$0xf] }
 0x193   : > { %785 = vst [vmem:[#allocation3 + $0xe0] sm:$0xf] %v769_v14  ;;  %498 = vrot.lane.b32.xlu0 %v473_v17, %s7552_s21  ;;  %5340 = vmatprep.subr.bf16.mxu1 %v5339_v52  ;;  %v6404_v11 = vpop.permute.xlu1 %758  ;;  %v683_v41 = vrot.slane %v665_v29, 4 }
 0x194   : > { %v770_v55 = vsel %vm7553_vm0, %v757_v60, %v6404_v11  ;;  %5342 = vmatpush1.bf16.msra.mxu1 %v5341_v38  ;;  %v684_v60 = vrot.slane %v666_v45, 4  ;;  %vm7557_vm0 = vcmask 228352  }
 0x195   : > { %786 = vst [vmem:[#allocation3 + $0xe8] sm:$0xf] %v770_v55  ;;  %v827_v33 = vpop.permute.xlu0 %826  ;;  %500 = vrot.lane.b32.xlu1 %v474_v36, %s7552_s21 }
 0x196   : > { %v839_v26 = vsel %vm7554_vm4, %v6145_v44, %v827_v33  ;;  %vm7558_vm4 = vmmov %vm7557_vm0 }
 0x197   : > { %855 = vst [vmem:[#allocation3 + $0xe0] sm:$0xf0] %v839_v26  ;;  %568 = vrot.lane.b32.xlu0 %v552_v13, %s7555_s22  ;;  %v6412_v12 = vpop.permute.xlu1 %828  ;;  %v796_v13 = vld [vmem:[#allocation2 + $0x38] sm:$0xf] }
 0x198   : > { %v840_v48 = vsel %vm7556_vm2, %v827_v33, %v6412_v12  ;;  %v2091_v36 = vld [vmem:[#allocation3 + $0xa8] sm:$0xff]  ;;  %vm7559_vm2 = vcmask 220160  }
 0x199   : > { %856 = vst [vmem:[#allocation3 + $0xe8] sm:$0xf0] %v840_v48  ;;  %v1640_v42 = vpop.permute.xlu0 %1639  ;;  %570 = vrot.lane.b32.xlu1 %v553_v16, %s7555_s22  ;;  %v2090_v16 = vld [vmem:[#allocation3 + $0xa0] sm:$0xff] }
 0x19a   : > { %v1654_v17 = vsel %vm1651_vm7, %v6165_v4, %v1640_v42  ;;  %v736_v48 = vld [vmem:[#allocation2 + $0x40] sm:$0xf] }
 0x19b   : > { %1670 = vst [vmem:[#allocation3 + $0x290] sm:$0xf] %v1654_v17  ;;  %629 = vrot.lane.b32.xlu0 %v604_v27, %s7530_s14  ;;  %v6420_v44 = vpop.permute.xlu1 %1641  ;;  %v797_v27 = vld [vmem:[#allocation2 + $0x40] sm:$0xf] }
 0x19c   : > { %v1655_v31 = vsel %vm1651_vm7, %v1640_v42, %v6420_v44  ;;  %v814_v42 = vrot.slane %v796_v13, 4  ;;  %v815_v45 = vrot.slane %v797_v27, 4 }
 0x19d   : > { %1671 = vst [vmem:[#allocation3 + $0x298] sm:$0xf] %v1655_v31  ;;  %v1710_v18 = vpop.permute.xlu0 %1709  ;;  %631 = vrot.lane.b32.xlu1 %v605_v22, %s7530_s14 }
 0x19e   : > { %v1724_v52 = vsel %vm1721_vm6, %v6174_v43, %v1710_v18  ;;  %v2098_v14 = vld [vmem:[#allocation3 + $0xe0] sm:$0xff] }
 0x19f   : > { %1740 = vst [vmem:[#allocation3 + $0x290] sm:$0xf0] %v1724_v52  ;;  %699 = vrot.lane.b32.xlu0 %v683_v41, %s7531_s13  ;;  %v6428_v4 = vpop.permute.xlu1 %1711  ;;  %v5359_v26 = vpack.c.bf16 %v2098_v14, %v2090_v16  ;;  %v867_v14 = vld [vmem:[#allocation2 + $0x40] sm:$0xf] }
 0x1a0   : > { %v1725_v38 = vsel %vm1721_vm6, %v1710_v18, %v6428_v4  ;;  %v2099_v37 = vld [vmem:[#allocation3 + $0xe8] sm:$0xff]  ;;  %v866_v18 = vld [vmem:[#allocation2 + $0x38] sm:$0xf] }
 0x1a1   : > { %1741 = vst [vmem:[#allocation3 + $0x298] sm:$0xf0] %v1725_v38  ;;  %v1771_v55 = vpop.permute.xlu0 %1770  ;;  %701 = vrot.lane.b32.xlu1 %v684_v60, %s7531_s13  ;;  %v5357_v33 = vpack.c.bf16 %v2099_v37, %v2091_v36  ;;  %v927_v60 = vld [vmem:[#allocation2 + $0x38] sm:$0xf]  ;;  %v928_v38 = vld [vmem:[#allocation2 + $0x40] sm:$0xf] }
 0x1a2   : > { %v1785_v43 = vsel %vm7557_vm0, %v6183_v61, %v1771_v55  ;;  %vm7560_vm0 = vmmov %vm7559_vm2  ;;  %v945_v36 = vrot.slane %v927_v60, 4  ;;  %v998_v60 = vld [vmem:[#allocation2 + $0x40] sm:$0xf] }
 0x1a3   : > { %1801 = vst [vmem:[#allocation3 + $0x2d0] sm:$0xf] %v1785_v43  ;;  %760 = vrot.lane.b32.xlu0 %v735_v8, %s7532_s12  ;;  %5358 = vmatprep.subr.bf16.mxu0 %v5357_v33  ;;  %v6436_v29 = vpop.permute.xlu1 %1772  ;;  %v1188_v33 = vld [vmem:[#allocation2 + $0x38] sm:$0xf] }
 0x1a4   : > { %v1786_v17 = vsel %vm7558_vm4, %v1771_v55, %v6436_v29  ;;  %5360 = vmatpush1.bf16.msra.mxu0 %v5359_v26  ;;  %vm7561_vm4 = vcmask 728064   ;;  %v946_v55 = vrot.slane %v928_v38, 4  ;;  %v1204_v16 = vrot.slane %v1188_v33, 4  ;;  %v997_v26 = vld [vmem:[#allocation2 + $0x38] sm:$0xf] }
 0x1a5   : > { %1802 = vst [vmem:[#allocation3 + $0x2d8] sm:$0xf] %v1786_v17  ;;  %v1841_v22 = vpop.permute.xlu0 %1840  ;;  %762 = vrot.lane.b32.xlu1 %v736_v48, %s7532_s12 }
 0x1a6   : > { %v1855_v61 = vsel %vm7559_vm2, %v6192_v28, %v1841_v22  ;;  %vm7563_vm2 = vmmov %vm7561_vm4  ;;  %1220 = vst [vmem:[#allocation3 + $0x1b0] sm:$0xf0] %v1204_v16 }
 0x1a7   : > { %1871 = vst [vmem:[#allocation3 + $0x2d0] sm:$0xf0] %v1855_v61  ;;  %830 = vrot.lane.b32.xlu0 %v814_v42, %s7533_s11  ;;  %v6444_v41 = vpop.permute.xlu1 %1842  ;;  %v2152_v61 = vld [vmem:[#allocation3 + $0x290] sm:$0xff] }
 0x1a8   : > { %v1856_v31 = vsel %vm7560_vm0, %v1841_v22, %v6444_v41  ;;  %vm7564_vm0 = vcmask 89088   ;;  %v2153_v42 = vld [vmem:[#allocation3 + $0x298] sm:$0xff] }
 0x1a9   : > { %1872 = vst [vmem:[#allocation3 + $0x2d8] sm:$0xf0] %v1856_v31  ;;  %v888_v52 = vpop.permute.xlu0 %887  ;;  %832 = vrot.lane.b32.xlu1 %v815_v45, %s7533_s11  ;;  %v1058_v22 = vld [vmem:[#allocation2 + $0x38] sm:$0xf] }
 0x1aa   : > { %v900_v8 = vsel %vm7561_vm4, %v6201_v24, %v888_v52  ;;  %vm7566_vm4 = vmmov %vm7564_vm0 }
 0x1ab   : > { %916 = vst [vmem:[#allocation3 + $0x120] sm:$0xf] %v900_v8  ;;  %891 = vrot.lane.b32.xlu0 %v866_v18, %s7562_s10  ;;  %v6452_v28 = vpop.permute.xlu1 %889 }
 0x1ac   : > { %v901_v37 = vsel %vm7563_vm2, %v888_v52, %v6452_v28  ;;  %vm7567_vm2 = vcmask 80896   ;;  %v1059_v52 = vld [vmem:[#allocation2 + $0x40] sm:$0xf] }
 0x1ad   : > { %917 = vst [vmem:[#allocation3 + $0x128] sm:$0xf] %v901_v37  ;;  %v958_v13 = vpop.permute.xlu0 %957  ;;  %893 = vrot.lane.b32.xlu1 %v867_v14, %s7562_s10  ;;  %v1076_v14 = vrot.slane %v1058_v22, 4  ;;  %v1077_v37 = vrot.slane %v1059_v52, 4  ;;  %v1290_v22 = vld [vmem:[#allocation2 + $0x40] sm:$0xf] }
 0x1ae   : > { %v970_v24 = vsel %vm7564_vm0, %v6209_v34, %v958_v13  ;;  %v2160_v48 = vld [vmem:[#allocation3 + $0x2d0] sm:$0xff]  ;;  %vm7568_vm0 = vmmov %vm7567_vm2 }
 0x1af   : > { %986 = vst [vmem:[#allocation3 + $0x120] sm:$0xf0] %v970_v24  ;;  %961 = vrot.lane.b32.xlu0 %v945_v36, %s7565_s15  ;;  %v6460_v43 = vpop.permute.xlu1 %959  ;;  %v5345_v18 = vpack.c.bf16 %v2160_v48, %v2152_v61  ;;  %v1128_v24 = vld [vmem:[#allocation2 + $0x38] sm:$0xf]  ;;  %v1291_v61 = vld [vmem:[#allocation2 + $0x48] sm:$0xf] }
 0x1b0   : > { %v971_v27 = vsel %vm7566_vm4, %v958_v13, %v6460_v43  ;;  %v2161_v17 = vld [vmem:[#allocation3 + $0x2d8] sm:$0xff]  ;;  %vm7569_vm4 = vcmask 72704  }
 0x1b1   : > { %987 = vst [vmem:[#allocation3 + $0x128] sm:$0xf0] %v971_v27  ;;  %v1019_v45 = vpop.permute.xlu0 %1018  ;;  %963 = vrot.lane.b32.xlu1 %v946_v55, %s7565_s15  ;;  %v5343_v34 = vpack.c.bf16 %v2161_v17, %v2153_v42  ;;  %v1189_v55 = vld [vmem:[#allocation2 + $0x40] sm:$0xf] }
 0x1b2   : > { %v1031_v31 = vsel %vm7567_vm2, %v6217_v5, %v1019_v45  ;;  %vm7570_vm2 = vmmov %vm7569_vm4  ;;  %v1205_v16 = vrot.slane %v1189_v55, 4  ;;  %v1129_v27 = vld [vmem:[#allocation2 + $0x40] sm:$0xf] }
 0x1b3   : > { %1047 = vst [vmem:[#allocation3 + $0x160] sm:$0xf] %v1031_v31  ;;  %1022 = vrot.lane.b32.xlu0 %v997_v26, %s7534_s19  ;;  %5344 = vmatprep.subr.bf16.mxu1 %v5343_v34  ;;  %v6468_v8 = vpop.permute.xlu1 %1020  ;;  %v1229_v17 = vld [vmem:[#allocation2 + $0x40] sm:$0xf] }
 0x1b4   : > { %v1032_v38 = vsel %vm7568_vm0, %v1019_v45, %v6468_v8  ;;  %5346 = vmatpush1.bf16.msra.mxu1 %v5345_v18  ;;  %1221 = vst [vmem:[#allocation3 + $0x1b8] sm:$0xf0] %v1205_v16  ;;  %v1308_v18 = vrot.slane %v1290_v22, 4  ;;  %vm7573_vm0 = vcmask 310272  }
 0x1b5   : > { %1048 = vst [vmem:[#allocation3 + $0x168] sm:$0xf] %v1032_v38  ;;  %v1089_v36 = vpop.permute.xlu0 %1088  ;;  %1024 = vrot.lane.b32.xlu1 %v998_v60, %s7534_s19 }
 0x1b6   : > { %v1101_v5 = vsel %vm7569_vm4, %v6225_v63, %v1089_v36  ;;  %vm7574_vm4 = vmmov %vm7573_vm0 }
 0x1b7   : > { %1117 = vst [vmem:[#allocation3 + $0x160] sm:$0xf0] %v1101_v5  ;;  %1092 = vrot.lane.b32.xlu0 %v1076_v14, %s7535_s20  ;;  %v6476_v13 = vpop.permute.xlu1 %1090  ;;  %v1309_v5 = vrot.slane %v1291_v61, 4 }
 0x1b8   : > { %v1102_v33 = vsel %vm7570_vm2, %v1089_v36, %v6476_v13  ;;  %v2107_v14 = vld [vmem:[#allocation3 + $0x128] sm:$0xff]  ;;  %vm7577_vm2 = vcmask 228352  }
 0x1b9   : > { %1118 = vst [vmem:[#allocation3 + $0x168] sm:$0xf0] %v1102_v33  ;;  %v1902_v26 = vpop.permute.xlu0 %1901  ;;  %1094 = vrot.lane.b32.xlu1 %v1077_v37, %s7535_s20 }
 0x1ba   : > { %v1916_v48 = vsel %vm1913_vm11, %v6245_v49, %v1902_v26  ;;  %v1230_v49 = vld [vmem:[#allocation2 + $0x48] sm:$0xf] }
 0x1bb   : > { %1932 = vst [vmem:[#allocation3 + $0x310] sm:$0xf] %v1916_v48  ;;  %1153 = vrot.lane.b32.xlu0 %v1128_v24, %s7512_s23  ;;  %v6484_v63 = vpop.permute.xlu1 %1903  ;;  %v1421_v48 = vld [vmem:[#allocation2 + $0x40] sm:$0xf] }
 0x1bc   : > { %v1917_v42 = vsel %vm1913_vm11, %v1902_v26, %v6484_v63  ;;  %v1360_v26 = vld [vmem:[#allocation2 + $0x40] sm:$0xf] }
 0x1bd   : > { %1933 = vst [vmem:[#allocation3 + $0x318] sm:$0xf] %v1917_v42  ;;  %v1972_v45 = vpop.permute.xlu0 %1971  ;;  %1155 = vrot.lane.b32.xlu1 %v1129_v27, %s7512_s23  ;;  %v1361_v42 = vld [vmem:[#allocation2 + $0x48] sm:$0xf]  ;;  %s7627_s23 = smov 119  }
 0x1be   : > { %v1986_v34 = vsel %vm1983_vm10, %v6254_v25, %v1972_v45  ;;  %v2114_v60 = vld [vmem:[#allocation3 + $0x160] sm:$0xff] }
 0x1bf   : > { %2002 = vst [vmem:[#allocation3 + $0x310] sm:$0xf0] %v1986_v34  ;;  %1254 = vrot.lane.b32.xlu0 %v1229_v17, %s7510_s24  ;;  %v6492_v31 = vpop.permute.xlu1 %1973  ;;  %v2106_v25 = vld [vmem:[#allocation3 + $0x120] sm:$0xff]  ;;  %v1422_v17 = vld [vmem:[#allocation2 + $0x48] sm:$0xf] }
 0x1c0   : > { %v1987_v52 = vsel %vm1983_vm10, %v1972_v45, %v6492_v31  ;;  %v2115_v38 = vld [vmem:[#allocation3 + $0x168] sm:$0xff]  ;;  %v5363_v33 = vpack.c.bf16 %v2114_v60, %v2106_v25  ;;  %v1439_v45 = vrot.slane %v1421_v48, 4  ;;  %v1440_v61 = vrot.slane %v1422_v17, 4  ;;  %v1491_v60 = vld [vmem:[#allocation2 + $0x40] sm:$0xf] }
 0x1c1   : > { %2003 = vst [vmem:[#allocation3 + $0x318] sm:$0xf0] %v1987_v52  ;;  %v2033_v36 = vpop.permute.xlu0 %2032  ;;  %1256 = vrot.lane.b32.xlu1 %v1230_v49, %s7510_s24  ;;  %v5361_v37 = vpack.c.bf16 %v2115_v38, %v2107_v14  ;;  %s7632_s24 = smov 118   ;;  %v4343_v62 = vld [vmem:[#allocation3 + $0x160] sm:$0xff] }
 0x1c2   : > { %v2047_v55 = vsel %vm7514_vm9, %v6263_v50, %v2033_v36 }
 0x1c3   : > { %2063 = vst [vmem:[#allocation3 + $0x350] sm:$0xf] %v2047_v55  ;;  %1324 = vrot.lane.b32.xlu0 %v1308_v18, %s7508_s25  ;;  %5362 = vmatprep.subr.bf16.mxu0 %v5361_v37  ;;  %v6500_v24 = vpop.permute.xlu1 %2034  ;;  %v1552_v37 = vld [vmem:[#allocation2 + $0x40] sm:$0xf] }
 0x1c4   : > { %v2048_v16 = vsel %vm7514_vm9, %v2033_v36, %v6500_v24  ;;  %5364 = vmatpush1.bf16.msra.mxu0 %v5363_v33 }
 0x1c5   : > { %2064 = vst [vmem:[#allocation3 + $0x358] sm:$0xf] %v2048_v16  ;;  %v1150_v27 = vpop.permute.xlu0 %1149  ;;  %1326 = vrot.lane.b32.xlu1 %v1309_v5, %s7508_s25  ;;  %v1492_v16 = vld [vmem:[#allocation2 + $0x48] sm:$0xf]  ;;  %s7581_s25 = smov 17  }
 0x1c6   : > { %v1162_v50 = vsel %vm1157_vm12, %v6272_v59, %v1150_v27  ;;  %v2168_v55 = vld [vmem:[#allocation3 + $0x310] sm:$0xff] }
 0x1c7   : > { %1178 = vst [vmem:[#allocation3 + $0x1a0] sm:$0xf] %v1162_v50  ;;  %1385 = vrot.lane.b32.xlu0 %v1360_v26, %s7498_s26  ;;  %v6508_v22 = vpop.permute.xlu1 %1151  ;;  %v1553_v26 = vld [vmem:[#allocation2 + $0x48] sm:$0xf] }
 0x1c8   : > { %v1163_v34 = vsel %vm1157_vm12, %v1150_v27, %v6508_v22  ;;  %v2169_v38 = vld [vmem:[#allocation3 + $0x318] sm:$0xff]  ;;  %v1570_v27 = vrot.slane %v1552_v37, 4 }
 0x1c9   : > { %1179 = vst [vmem:[#allocation3 + $0x1a8] sm:$0xf] %v1163_v34  ;;  %v1251_v49 = vpop.permute.xlu0 %1250  ;;  %1387 = vrot.lane.b32.xlu1 %v1361_v42, %s7498_s26  ;;  %s7571_s26 = smov 39   ;;  %v1571_v42 = vrot.slane %v1553_v26, 4 }
 0x1ca   : > { %v1263_v18 = vsel %vm1258_vm13, %v6280_v35, %v1251_v49  ;;  %v2176_v52 = vld [vmem:[#allocation3 + $0x350] sm:$0xf] }
 0x1cb   : > { %1279 = vst [vmem:[#allocation3 + $0x1e0] sm:$0xf] %v1263_v18  ;;  %1455 = vrot.lane.b32.xlu0 %v1439_v45, %s7500_s30  ;;  %v6516_v59 = vpop.permute.xlu1 %1252  ;;  %v5350_v33 = vpack.c.bf16 %v2176_v52, %v2168_v55 }
 0x1cc   : > { %v1264_v14 = vsel %vm1258_vm13, %v1251_v49, %v6516_v59  ;;  %v2177_v36 = vld [vmem:[#allocation3 + $0x358] sm:$0xf]  ;;  %v1622_v49 = vld [vmem:[#allocation2 + $0x40] sm:$0xf] }
 0x1cd   : > { %1280 = vst [vmem:[#allocation3 + $0x1e8] sm:$0xf] %v1264_v14  ;;  %v1321_v25 = vpop.permute.xlu0 %1320  ;;  %1457 = vrot.lane.b32.xlu1 %v1440_v61, %s7500_s30  ;;  %v5347_v5 = vpack.c.bf16 %v2177_v36, %v2169_v38  ;;  %s7572_s30 = smov 38   ;;  %v1683_v61 = vld [vmem:[#allocation2 + $0x40] sm:$0xf] }
 0x1ce   : > { %v1333_v35 = vsel %vm1328_vm14, %v6292_v47, %v1321_v25  ;;  %v1684_v14 = vld [vmem:[#allocation2 + $0x48] sm:$0xf]  ;;  %v1701_v36 = vrot.slane %v1683_v61, 4 }
 0x1cf   : > { %1349 = vst [vmem:[#allocation3 + $0x1e0] sm:$0xf0] %v1333_v35  ;;  %1516 = vrot.lane.b32.xlu0 %v1491_v60, %s7571_s26  ;;  %5349 = vmatprep.subr.msk.bf16.mxu1 %vm6283_vm5, %v5347_v5  ;;  %v6526_v48 = vpop.permute.xlu1 %1322  ;;  %v1623_v60 = vld [vmem:[#allocation2 + $0x48] sm:$0xf]  ;;  %v1702_v35 = vrot.slane %v1684_v14, 4 }
 0x1d0   : > { %v1334_v50 = vsel %vm1328_vm14, %v1321_v25, %v6526_v48  ;;  %5352 = vmatpush1.bf16.msk.msra.mxu1 %vm6283_vm5, %v5350_v33  ;;  %v2123_v52 = vld [vmem:[#allocation3 + $0x1a8] sm:$0xff] }
 0x1d1   : > { %1350 = vst [vmem:[#allocation3 + $0x1e8] sm:$0xf0] %v1334_v50  ;;  %v1382_v47 = vpop.permute.xlu0 %1381  ;;  %1518 = vrot.lane.b32.xlu1 %v1492_v16, %s7571_s26  ;;  %v1753_v50 = vld [vmem:[#allocation2 + $0x40] sm:$0xf] }
 0x1d2   : > { %v1394_v17 = vsel %vm1389_vm15, %v6356_v57, %v1382_v47 }
 0x1d3   : > { %1410 = vst [vmem:[#allocation3 + $0x220] sm:$0xf] %v1394_v17  ;;  %1586 = vrot.lane.b32.xlu0 %v1570_v27, %s7572_s30  ;;  %5266 = vmatmul.mubr.msk.f32.vlgmr.msra.gmra.mrb[0].mxu1 %vm2188_vm8, %v6335_v20  ;;  %v6538_v45 = vpop.permute.xlu1 %1383  ;;  %v1754_v17 = vld [vmem:[#allocation2 + $0x48] sm:$0xf] }
 0x1d4   : > { %v1395_v34 = vsel %vm1389_vm15, %v1382_v47, %v6538_v45  ;;  %2494 = vmatprep.mubr.f32.mxu1 %v6347_v53  ;;  %v1814_v47 = vld [vmem:[#allocation2 + $0x40] sm:$0xf] }
 0x1d5   : > { %1411 = vst [vmem:[#allocation3 + $0x228] sm:$0xf] %v1395_v34  ;;  %v1452_v18 = vpop.permute.xlu0 %1451  ;;  %1588 = vrot.lane.b32.xlu1 %v1571_v42, %s7572_s30  ;;  %v1815_v34 = vld [vmem:[#allocation2 + $0x48] sm:$0xf]  ;;  %v1832_v61 = vrot.slane %v1814_v47, 4 }
 0x1d6   : > { %v1464_v57 = vsel %vm1459_vm3, %v6364_v39, %v1452_v18  ;;  %v2130_v37 = vld [vmem:[#allocation3 + $0x1e0] sm:$0xff] }
 0x1d7   : > { %1480 = vst [vmem:[#allocation3 + $0x220] sm:$0xf0] %v1464_v57  ;;  %1647 = vrot.lane.b32.xlu0 %v1622_v49, %s7506_s18  ;;  %v6547_v38 = vpop.permute.xlu1 %1453  ;;  %v2122_v39 = vld [vmem:[#allocation3 + $0x1a0] sm:$0xff] }
 0x1d8   : > { %v1465_v53 = vsel %vm1459_vm3, %v1452_v18, %v6547_v38  ;;  %v2131_v25 = vld [vmem:[#allocation3 + $0x1e8] sm:$0xff]  ;;  %v5367_v16 = vpack.c.bf16 %v2130_v37, %v2122_v39  ;;  %v1945_v37 = vld [vmem:[#allocation2 + $0x40] sm:$0xf] }
 0x1d9   : > { %1481 = vst [vmem:[#allocation3 + $0x228] sm:$0xf0] %v1465_v53  ;;  %v1513_v5 = vpop.permute.xlu0 %1512  ;;  %1649 = vrot.lane.b32.xlu1 %v1623_v60, %s7506_s18  ;;  %v5365_v55 = vpack.c.bf16 %v2131_v25, %v2123_v52  ;;  %v1833_v60 = vrot.slane %v1815_v34, 4  ;;  %s7578_s18 = smov 18  }
 0x1da   : > { %v1525_v33 = vsel %vm1520_vm1, %v6372_v40, %v1513_v5 }
 0x1db   : > { %1541 = vst [vmem:[#allocation3 + $0x260] sm:$0xf] %v1525_v33  ;;  %1717 = vrot.lane.b32.xlu0 %v1701_v36, %s7502_s17  ;;  %5366 = vmatprep.subr.bf16.mxu0 %v5365_v55  ;;  %v6555_v26 = vpop.permute.xlu1 %1514  ;;  %v1884_v36 = vld [vmem:[#allocation2 + $0x40] sm:$0xf] }
 0x1dc   : > { %v1526_v27 = vsel %vm1520_vm1, %v1513_v5, %v6555_v26  ;;  %5368 = vmatpush1.bf16.msra.mxu0 %v5367_v16  ;;  %v1885_v5 = vld [vmem:[#allocation2 + $0x48] sm:$0xf] }
 0x1dd   : > { %1542 = vst [vmem:[#allocation3 + $0x268] sm:$0xf] %v1526_v27  ;;  %v1583_v42 = vpop.permute.xlu0 %1582  ;;  %1719 = vrot.lane.b32.xlu1 %v1702_v35, %s7502_s17  ;;  %s7575_s17 = smov 27   ;;  %v1963_v35 = vrot.slane %v1945_v37, 4 }
 0x1de   : > { %v1595_v40 = vsel %vm7573_vm0, %v6380_v58, %v1583_v42  ;;  %vm7579_vm0 = vmmov %vm7577_vm2 }
 0x1df   : > { %1611 = vst [vmem:[#allocation3 + $0x260] sm:$0xf0] %v1595_v40  ;;  %1778 = vrot.lane.b32.xlu0 %v1753_v50, %s7504_s16  ;;  %v6563_v49 = vpop.permute.xlu1 %1584 }
 0x1e0   : > { %v1596_v18 = vsel %vm7574_vm4, %v1583_v42, %v6563_v49  ;;  %v2139_v55 = vld [vmem:[#allocation3 + $0x228] sm:$0xff]  ;;  %vm7580_vm4 = vcmask 220160  }
 0x1e1   : > { %1612 = vst [vmem:[#allocation3 + $0x268] sm:$0xf0] %v1596_v18  ;;  %v1644_v57 = vpop.permute.xlu0 %1643  ;;  %1780 = vrot.lane.b32.xlu1 %v1754_v17, %s7504_s16  ;;  %s7576_s16 = smov 19   ;;  %v2015_v18 = vld [vmem:[#allocation2 + $0x40] sm:$0xf] }
 0x1e2   : > { %v1656_v52 = vsel %vm1651_vm7, %v6420_v44, %v1644_v57  ;;  %v1946_v44 = vld [vmem:[#allocation2 + $0x48] sm:$0xf] }
 0x1e3   : > { %1672 = vst [vmem:[#allocation3 + $0x2a0] sm:$0xf] %v1656_v52  ;;  %1848 = vrot.lane.b32.xlu0 %v1832_v61, %s7575_s17  ;;  %v6571_v58 = vpop.permute.xlu1 %1645  ;;  %v1964_v42 = vrot.slane %v1946_v44, 4 }
 0x1e4   : > { %v1657_v14 = vsel %vm1651_vm7, %v1644_v57, %v6571_v58 }
 0x1e5   : > { %1673 = vst [vmem:[#allocation3 + $0x2a8] sm:$0xf] %v1657_v14  ;;  %v1714_v53 = vpop.permute.xlu0 %1713  ;;  %1850 = vrot.lane.b32.xlu1 %v1833_v60, %s7575_s17 }
 0x1e6   : > { %v1726_v25 = vsel %vm1721_vm6, %v6428_v4, %v1714_v53  ;;  %v2146_v33 = vld [vmem:[#allocation3 + $0x260] sm:$0xff] }
 0x1e7   : > { %1742 = vst [vmem:[#allocation3 + $0x2a0] sm:$0xf0] %v1726_v25  ;;  %1909 = vrot.lane.b32.xlu0 %v1884_v36, %s7576_s16  ;;  %v6579_v39 = vpop.permute.xlu1 %1715  ;;  %v2138_v4 = vld [vmem:[#allocation3 + $0x220] sm:$0xff] }
 0x1e8   : > { %v1727_v16 = vsel %vm1721_vm6, %v1714_v53, %v6579_v39  ;;  %v2147_v27 = vld [vmem:[#allocation3 + $0x268] sm:$0xff]  ;;  %v5371_v17 = vpack.c.bf16 %v2146_v33, %v2138_v4  ;;  %v2182_v36 = vld [vmem:[%s7583_s3] sm:$0xf]  ;;  %s7622_s3 = smov 127  }
 0x1e9   : > { %1743 = vst [vmem:[#allocation3 + $0x2a8] sm:$0xf0] %v1727_v16  ;;  %v1775_v50 = vpop.permute.xlu0 %1774  ;;  %1911 = vrot.lane.b32.xlu1 %v1885_v5, %s7576_s16  ;;  %v5369_v47 = vpack.c.bf16 %v2147_v27, %v2139_v55 }
 0x1ea   : > { %v1787_v40 = vsel %vm7577_vm2, %v6436_v29, %v1775_v50  ;;  %v2016_v29 = vld [vmem:[#allocation2 + $0x48] sm:$0xf]  ;;  %vm7582_vm2 = vmmov %vm7580_vm4 }
 0x1eb   : > { %1803 = vst [vmem:[#allocation3 + $0x2e0] sm:$0xf] %v1787_v40  ;;  %1979 = vrot.lane.b32.xlu0 %v1963_v35, %s7578_s18  ;;  %5370 = vmatprep.subr.bf16.mxu0 %v5369_v47  ;;  %v6587_v34 = vpop.permute.xlu1 %1776 }
 0x1ec   : > { %v1788_v61 = vsel %vm7579_vm0, %v1775_v50, %v6587_v34  ;;  %5372 = vmatpush1.bf16.msra.mxu0 %v5371_v17  ;;  %vm7584_vm0 = vcmask 908288  }
 0x1ed   : > { %1804 = vst [vmem:[#allocation3 + $0x2e8] sm:$0xf] %v1788_v61  ;;  %v1845_v57 = vpop.permute.xlu0 %1844  ;;  %1981 = vrot.lane.b32.xlu1 %v1964_v42, %s7578_s18 }
 0x1ee   : > { %v1857_v60 = vsel %vm7580_vm4, %v6444_v41, %v1845_v57  ;;  %v2154_v47 = vld [vmem:[#allocation3 + $0x2a0] sm:$0xff]  ;;  %vm7585_vm4 = vmmov %vm7584_vm0 }
 0x1ef   : > { %1873 = vst [vmem:[#allocation3 + $0x2e0] sm:$0xf0] %v1857_v60  ;;  %2040 = vrot.lane.b32.xlu0 %v2015_v18, %s7581_s25  ;;  %v6595_v52 = vpop.permute.xlu1 %1846 }
 0x1f0   : > { %v1858_v14 = vsel %vm7582_vm2, %v1845_v57, %v6595_v52  ;;  %v2155_v44 = vld [vmem:[#allocation3 + $0x2a8] sm:$0xff]  ;;  %vm7586_vm2 = vcmask 900096  }
 0x1f1   : > { %1874 = vst [vmem:[#allocation3 + $0x2e8] sm:$0xf0] %v1858_v14  ;;  %v1906_v37 = vpop.permute.xlu0 %1905  ;;  %2042 = vrot.lane.b32.xlu1 %v2016_v29, %s7581_s25 }
 0x1f2   : > { %v1918_v41 = vsel %vm1913_vm11, %v6484_v63, %v1906_v37 }
 0x1f3   : > { %1934 = vst [vmem:[#allocation3 + $0x320] sm:$0xf] %v1918_v41  ;;  %2185 = vperm.xlu0 %5702, %v2182_v36   ;;  %v6605_v53 = vpop.permute.xlu1 %1907 }
 0x1f4   : > { %v1919_v25 = vsel %vm1913_vm11, %v1906_v37, %v6605_v53 }
 0x1f5   : > { %1935 = vst [vmem:[#allocation3 + $0x328] sm:$0xf] %v1919_v25  ;;  %v1976_v5 = vpop.permute.xlu0 %1975  ;;  %v4308_v25 = vld [vmem:[#allocation3 + $0x48] sm:$0xff] }
 0x1f6   : > { %v1988_v55 = vsel %vm1983_vm10, %v6492_v31, %v1976_v5  ;;  %v2162_v33 = vld [vmem:[#allocation3 + $0x2e0] sm:$0xff] }
 0x1f7   : > { %2004 = vst [vmem:[#allocation3 + $0x320] sm:$0xf0] %v1988_v55  ;;  %v6611_v35 = vpop.permute.xlu1 %1977  ;;  %v5375_v42 = vpack.c.bf16 %v2162_v33, %v2154_v47  ;;  %v4324_v47 = vld [vmem:[#allocation3 + $0xc8] sm:$0xff] }
 0x1f8   : > { %v1989_v63 = vsel %vm1983_vm10, %v1976_v5, %v6611_v35  ;;  %v2163_v16 = vld [vmem:[#allocation3 + $0x2e8] sm:$0xff] }
 0x1f9   : > { %2005 = vst [vmem:[#allocation3 + $0x328] sm:$0xf0] %v1989_v63  ;;  %v2037_v27 = vpop.permute.xlu0 %2036  ;;  %v5373_v50 = vpack.c.bf16 %v2163_v16, %v2155_v44  ;;  %v4300_v63 = vld [vmem:[#allocation3 + $0x8] sm:$0xff] }
 0x1fa   : > { %v2049_v4 = vsel %vm7514_vm9, %v6500_v24, %v2037_v27  ;;  %v5413_v16 = vpack.c.bf16 %v4308_v25, %v4300_v63 }
 0x1fb   : > { %2065 = vst [vmem:[#allocation3 + $0x360] sm:$0xf] %v2049_v4  ;;  %5374 = vmatprep.subr.bf16.mxu0 %v5373_v50  ;;  %v6617_v31 = vpop.permute.xlu1 %2038 }
 0x1fc   : > { %v2050_v40 = vsel %vm7514_vm9, %v2037_v27, %v6617_v31  ;;  %5376 = vmatpush1.bf16.msra.mxu0 %v5375_v42  ;;  %vm7587_vm9 = vmmov %vm7586_vm2  ;;  %v4307_v27 = vld [vmem:[#allocation3 + $0x40] sm:$0xff] }
 0x1fd   : > { %2066 = vst [vmem:[#allocation3 + $0x368] sm:$0xf] %v2050_v40  ;;  %v368_v17 = vpop.permute.xlu0 %367  ;;  %v4299_v42 = vld [vmem:[#allocation3] sm:$0xff] }
 0x1fe   : > { %v378_v61 = vsel %vm7584_vm0, %v6312_v56, %v368_v17  ;;  %v2170_v55 = vld [vmem:[#allocation3 + $0x320] sm:$0xff]  ;;  %vm7588_vm0 = vcmask 891904   ;;  %v5415_v40 = vpack.c.bf16 %v4307_v27, %v4299_v42 }
 0x1ff   : > { %394 = vst [vmem:[#allocation3 + $0x30] sm:$0xf] %v378_v61  ;;  %v370_v18 = vpop.permute.xlu1 %369 }
 0x200   : > { %v379_v57 = vsel %vm7585_vm4, %v368_v17, %v370_v18  ;;  %v2171_v29 = vld [vmem:[#allocation3 + $0x328] sm:$0xff]  ;;  %vm7589_vm4 = vmmov %vm7588_vm0 }
 0x201   : > { %395 = vst [vmem:[#allocation3 + $0x38] sm:$0xf] %v379_v57  ;;  %v438_v24 = vpop.permute.xlu0 %437  ;;  %v4316_v17 = vld [vmem:[#allocation3 + $0x88] sm:$0xff]  ;;  %v4323_v57 = vld [vmem:[#allocation3 + $0xc0] sm:$0xff] }
 0x202   : > { %v448_v60 = vsel %vm7586_vm2, %v6320_v54, %v438_v24  ;;  %v2178_v36 = vld [vmem:[#allocation3 + $0x360] sm:$0xf]  ;;  %v5417_v18 = vpack.c.bf16 %v4324_v47, %v4316_v17 }
 0x203   : > { %464 = vst [vmem:[#allocation3 + $0x30] sm:$0xf0] %v448_v60  ;;  %v440_v14 = vpop.permute.xlu1 %439  ;;  %v5380_v33 = vpack.c.bf16 %v2178_v36, %v2170_v55  ;;  %v4340_v60 = vld [vmem:[#allocation3 + $0x148] sm:$0xff]  ;;  %v4355_v47 = vld [vmem:[#allocation3 + $0x1c0] sm:$0xff] }
 0x204   : > { %v449_v37 = vsel %vm7587_vm9, %v438_v24, %v440_v14  ;;  %v2179_v41 = vld [vmem:[#allocation3 + $0x368] sm:$0xf]  ;;  %vm7590_vm9 = vcmask 826368   ;;  %v4315_v14 = vld [vmem:[#allocation3 + $0x80] sm:$0xff] }
 0x205   : > { %465 = vst [vmem:[#allocation3 + $0x38] sm:$0xf0] %v449_v37  ;;  %v499_v5 = vpop.permute.xlu0 %498  ;;  %v5377_v56 = vpack.c.bf16 %v2179_v41, %v2171_v29  ;;  %vm7591_vm2 = vmmov %vm7590_vm9  ;;  %v5419_v36 = vpack.c.bf16 %v4323_v57, %v4315_v14  ;;  %v4332_v37 = vld [vmem:[#allocation3 + $0x108] sm:$0xff] }
 0x206   : > { %v509_v44 = vsel %vm7588_vm0, %v6330_v9, %v499_v5  ;;  %vm7592_vm0 = vcmask 818176   ;;  %v5421_v25 = vpack.c.bf16 %v4340_v60, %v4332_v37  ;;  %v4364_v60 = vld [vmem:[#allocation3 + $0x208] sm:$0xff] }
 0x207   : > { %525 = vst [vmem:[#allocation3 + $0x70] sm:$0xf] %v509_v44  ;;  %5379 = vmatprep.subr.msk.bf16.mxu0 %vm6283_vm5, %v5377_v56  ;;  %v501_v54 = vpop.permute.xlu1 %500  ;;  %v4356_v56 = vld [vmem:[#allocation3 + $0x1c8] sm:$0xff]  ;;  %v4331_v44 = vld [vmem:[#allocation3 + $0x100] sm:$0xff] }
 0x208   : > { %v510_v50 = vsel %vm7589_vm4, %v499_v5, %v501_v54  ;;  %5382 = vmatpush1.bf16.msk.msra.mxu0 %vm6283_vm5, %v5380_v33  ;;  %vm7593_vm4 = vmmov %vm7592_vm0  ;;  %v4348_v54 = vld [vmem:[#allocation3 + $0x188] sm:$0xff] }
 0x209   : > { %526 = vst [vmem:[#allocation3 + $0x78] sm:$0xf] %v510_v50  ;;  %v569_v4 = vpop.permute.xlu0 %568  ;;  %5414 = vmatprep.subr.bf16.mxu0 %v5413_v16  ;;  %v5425_v27 = vpack.c.bf16 %v4356_v56, %v4348_v54  ;;  %v4388_v37 = vld [vmem:[#allocation3 + $0x2c8] sm:$0xff]  ;;  %v4379_v54 = vld [vmem:[#allocation3 + $0x280] sm:$0xff] }
 0x20a   : > { %v579_v9 = vsel %vm7590_vm9, %v6345_v30, %v569_v4  ;;  %vm7594_vm9 = vcmask 809984  }
 0x20b   : > { %595 = vst [vmem:[#allocation3 + $0x70] sm:$0xf0] %v579_v9  ;;  %5269 = vmatmul.mubr.msk.f32.vlgmr.msra.gmra.mrb[2].mxu0 %vm2188_vm8, %v6335_v20  ;;  %v571_v61 = vpop.permute.xlu1 %570  ;;  %v4339_v20 = vld [vmem:[#allocation3 + $0x140] sm:$0xff]  ;;  %v4372_v9 = vld [vmem:[#allocation3 + $0x248] sm:$0xff] }
 0x20c   : > { %v580_v24 = vsel %vm7591_vm2, %v569_v4, %v571_v61  ;;  %5416 = vmatpush1.bf16.msra.mxu0 %v5415_v40  ;;  %v5423_v63 = vpack.c.bf16 %v4339_v20, %v4331_v44  ;;  %vm7595_vm2 = vmmov %vm7594_vm9  ;;  %v2076_v61 = vld [vmem:[#allocation3 + $0x30] sm:$0xff]  ;;  %v5429_v14 = vpack.c.bf16 %v4372_v9, %v4364_v60  ;;  %v4387_v44 = vld [vmem:[#allocation3 + $0x2c0] sm:$0xff] }
 0x20d   : > { %596 = vst [vmem:[#allocation3 + $0x78] sm:$0xf0] %v580_v24  ;;  %v630_v29 = vpop.permute.xlu0 %629  ;;  %5418 = vmatprep.subr.bf16.mxu0 %v5417_v18  ;;  %v4347_v18 = vld [vmem:[#allocation3 + $0x180] sm:$0xff] }
 0x20e   : > { %v640_v30 = vsel %vm7592_vm0, %v6388_v15, %v630_v29  ;;  %v2077_v15 = vld [vmem:[#allocation3 + $0x38] sm:$0xff]  ;;  %vm7596_vm0 = vcmask 744448   ;;  %v5427_v24 = vpack.c.bf16 %v4355_v47, %v4347_v18 }
 0x20f   : > { %656 = vst [vmem:[#allocation3 + $0xb0] sm:$0xf] %v640_v30  ;;  %v632_v41 = vpop.permute.xlu1 %631  ;;  %v4371_v30 = vld [vmem:[#allocation3 + $0x240] sm:$0xff] }
 0x210   : > { %v641_v5 = vsel %vm7593_vm4, %v630_v29, %v632_v41  ;;  %5420 = vmatpush1.bf16.msra.mxu0 %v5419_v36  ;;  %vm7597_vm4 = vmmov %vm7596_vm0 }
 0x211   : > { %657 = vst [vmem:[#allocation3 + $0xb8] sm:$0xf] %v641_v5  ;;  %v700_v55 = vpop.permute.xlu0 %699  ;;  %5422 = vmatprep.subr.bf16.mxu0 %v5421_v25  ;;  %v4363_v25 = vld [vmem:[#allocation3 + $0x200] sm:$0xff]  ;;  %v4380_v5 = vld [vmem:[#allocation3 + $0x288] sm:$0xff] }
 0x212   : > { %v710_v33 = vsel %vm7594_vm9, %v6396_v0, %v700_v55  ;;  %v2084_v50 = vld [vmem:[#allocation3 + $0x70] sm:$0xff]  ;;  %vm7598_vm9 = vcmask 736256   ;;  %v5431_v20 = vpack.c.bf16 %v4371_v30, %v4363_v25 }
 0x213   : > { %726 = vst [vmem:[#allocation3 + $0xb0] sm:$0xf0] %v710_v33  ;;  %v702_v16 = vpop.permute.xlu1 %701  ;;  %v5385_v57 = vpack.c.bf16 %v2084_v50, %v2076_v61 }
 0x214   : > { %v711_v4 = vsel %vm7595_vm2, %v700_v55, %v702_v16  ;;  %5424 = vmatpush1.bf16.msra.mxu0 %v5423_v63  ;;  %v2085_v42 = vld [vmem:[#allocation3 + $0x78] sm:$0xff]  ;;  %v5433_v55 = vpack.c.bf16 %v4388_v37, %v4380_v5  ;;  %vm7599_vm2 = vmmov %vm7598_vm9  ;;  %v5435_v16 = vpack.c.bf16 %v4387_v44, %v4379_v54 }
 0x215   : > { %727 = vst [vmem:[#allocation3 + $0xb8] sm:$0xf0] %v711_v4  ;;  %v761_v40 = vpop.permute.xlu0 %760  ;;  %5426 = vmatprep.subr.bf16.mxu0 %v5425_v27  ;;  %v5383_v17 = vpack.c.bf16 %v2085_v42, %v2077_v15 }
 0x216   : > { %v771_v0 = vsel %vm7596_vm0, %v6404_v11, %v761_v40  ;;  %vm7600_vm0 = vcmask 728064  }
 0x217   : > { %787 = vst [vmem:[#allocation3 + $0xf0] sm:$0xf] %v771_v0  ;;  %5384 = vmatprep.subr.bf16.mxu1 %v5383_v17  ;;  %v763_v29 = vpop.permute.xlu1 %762 }
 0x218   : > { %v772_v36 = vsel %vm7597_vm4, %v761_v40, %v763_v29  ;;  %5386 = vmatpush1.bf16.msra.mxu1 %v5385_v57  ;;  %5428 = vmatpush1.bf16.msra.mxu0 %v5427_v24  ;;  %vm7601_vm4 = vmmov %vm7600_vm0 }
 0x219   : > { %788 = vst [vmem:[#allocation3 + $0xf8] sm:$0xf] %v772_v36  ;;  %v831_v41 = vpop.permute.xlu0 %830  ;;  %5430 = vmatprep.subr.bf16.mxu0 %v5429_v14 }
 0x21a   : > { %v841_v11 = vsel %vm7598_vm9, %v6412_v12, %v831_v41  ;;  %vm7602_vm9 = vcmask 89088   ;;  %v2092_v18 = vld [vmem:[#allocation3 + $0xb0] sm:$0xff] }
 0x21b   : > { %857 = vst [vmem:[#allocation3 + $0xf0] sm:$0xf0] %v841_v11  ;;  %v833_v56 = vpop.permute.xlu1 %832 }
 0x21c   : > { %v842_v33 = vsel %vm7599_vm2, %v831_v41, %v833_v56  ;;  %5432 = vmatpush1.bf16.msra.mxu0 %v5431_v20  ;;  %v2093_v4 = vld [vmem:[#allocation3 + $0xb8] sm:$0xff]  ;;  %vm7603_vm2 = vmmov %vm7602_vm9 }
 0x21d   : > { %858 = vst [vmem:[#allocation3 + $0xf8] sm:$0xf0] %v842_v33  ;;  %v892_v63 = vpop.permute.xlu0 %891  ;;  %5434 = vmatprep.subr.bf16.mxu0 %v5433_v55 }
 0x21e   : > { %v902_v15 = vsel %vm7600_vm0, %v6452_v28, %v892_v63  ;;  %vm7604_vm0 = vcmask 80896  }
 0x21f   : > { %918 = vst [vmem:[#allocation3 + $0x130] sm:$0xf] %v902_v15  ;;  %v894_v27 = vpop.permute.xlu1 %893 }
 0x220   : > { %v903_v12 = vsel %vm7601_vm4, %v892_v63, %v894_v27  ;;  %5436 = vmatpush1.bf16.msra.mxu0 %v5435_v16  ;;  %vm7605_vm4 = vmmov %vm7604_vm0 }
 0x221   : > { %919 = vst [vmem:[#allocation3 + $0x138] sm:$0xf] %v903_v12  ;;  %v962_v50 = vpop.permute.xlu0 %961 }
 0x222   : > { %v972_v47 = vsel %vm7602_vm9, %v6460_v43, %v962_v50  ;;  %v2100_v9 = vld [vmem:[#allocation3 + $0xf0] sm:$0xff]  ;;  %vm7606_vm9 = vcmask 72704  }
 0x223   : > { %988 = vst [vmem:[#allocation3 + $0x130] sm:$0xf0] %v972_v47  ;;  %v964_v42 = vpop.permute.xlu1 %963  ;;  %v5389_v57 = vpack.c.bf16 %v2100_v9, %v2092_v18 }
 0x224   : > { %v973_v40 = vsel %vm7603_vm2, %v962_v50, %v964_v42  ;;  %v2101_v17 = vld [vmem:[#allocation3 + $0xf8] sm:$0xff]  ;;  %vm7607_vm2 = vmmov %vm7606_vm9 }
 0x225   : > { %989 = vst [vmem:[#allocation3 + $0x138] sm:$0xf0] %v973_v40  ;;  %v1023_v28 = vpop.permute.xlu0 %1022  ;;  %v5387_v61 = vpack.c.bf16 %v2101_v17, %v2093_v4 }
 0x226   : > { %v1033_v0 = vsel %vm7604_vm0, %v6468_v8, %v1023_v28  ;;  %vm7608_vm0 = vcmask 310272  }
 0x227   : > { %1049 = vst [vmem:[#allocation3 + $0x170] sm:$0xf] %v1033_v0  ;;  %5388 = vmatprep.subr.bf16.mxu1 %v5387_v61  ;;  %v1025_v24 = vpop.permute.xlu1 %1024 }
 0x228   : > { %v1034_v43 = vsel %vm7605_vm4, %v1023_v28, %v1025_v24  ;;  %5390 = vmatpush1.bf16.msra.mxu1 %v5389_v57  ;;  %vm7609_vm4 = vmmov %vm7608_vm0 }
 0x229   : > { %1050 = vst [vmem:[#allocation3 + $0x178] sm:$0xf] %v1034_v43  ;;  %v1093_v60 = vpop.permute.xlu0 %1092 }
 0x22a   : > { %v1103_v29 = vsel %vm7606_vm9, %v6476_v13, %v1093_v60  ;;  %vm7610_vm9 = vcmask 228352  }
 0x22b   : > { %1119 = vst [vmem:[#allocation3 + $0x170] sm:$0xf0] %v1103_v29  ;;  %v1095_v14 = vpop.permute.xlu1 %1094 }
 0x22c   : > { %v1104_v30 = vsel %vm7607_vm2, %v1093_v60, %v1095_v14  ;;  %v2109_v20 = vld [vmem:[#allocation3 + $0x138] sm:$0xff]  ;;  %vm7611_vm2 = vmmov %vm7610_vm9 }
 0x22d   : > { %1120 = vst [vmem:[#allocation3 + $0x178] sm:$0xf0] %v1104_v30  ;;  %v1154_v36 = vpop.permute.xlu0 %1153 }
 0x22e   : > { %v1164_v8 = vsel %vm1157_vm12, %v6508_v22, %v1154_v36  ;;  %v2108_v22 = vld [vmem:[#allocation3 + $0x130] sm:$0xff] }
 0x22f   : > { %1180 = vst [vmem:[#allocation3 + $0x1b0] sm:$0xf] %v1164_v8  ;;  %v1156_v37 = vpop.permute.xlu1 %1155 }
 0x230   : > { %v1165_v41 = vsel %vm1157_vm12, %v1154_v36, %v1156_v37 }
 0x231   : > { %1181 = vst [vmem:[#allocation3 + $0x1b8] sm:$0xf] %v1165_v41  ;;  %v1255_v25 = vpop.permute.xlu0 %1254 }
 0x232   : > { %v1265_v11 = vsel %vm1258_vm13, %v6516_v59, %v1255_v25  ;;  %v2116_v5 = vld [vmem:[#allocation3 + $0x170] sm:$0xff] }
 0x233   : > { %1281 = vst [vmem:[#allocation3 + $0x1f0] sm:$0xf] %v1265_v11  ;;  %v1257_v13 = vpop.permute.xlu1 %1256  ;;  %v5393_v54 = vpack.c.bf16 %v2116_v5, %v2108_v22 }
 0x234   : > { %v1266_v56 = vsel %vm1258_vm13, %v1255_v25, %v1257_v13  ;;  %v2117_v55 = vld [vmem:[#allocation3 + $0x178] sm:$0xff] }
 0x235   : > { %1282 = vst [vmem:[#allocation3 + $0x1f8] sm:$0xf] %v1266_v56  ;;  %v1325_v44 = vpop.permute.xlu0 %1324  ;;  %v5391_v33 = vpack.c.bf16 %v2117_v55, %v2109_v20 }
 0x236   : > { %v1335_v63 = vsel %vm1328_vm14, %v6526_v48, %v1325_v44 }
 0x237   : > { %1351 = vst [vmem:[#allocation3 + $0x1f0] sm:$0xf0] %v1335_v63  ;;  %5392 = vmatprep.subr.bf16.mxu1 %v5391_v33  ;;  %v1327_v15 = vpop.permute.xlu1 %1326 }
 0x238   : > { %v1336_v59 = vsel %vm1328_vm14, %v1325_v44, %v1327_v15  ;;  %5394 = vmatpush1.bf16.msra.mxu1 %v5393_v54  ;;  %v2125_v4 = vld [vmem:[#allocation3 + $0x1b8] sm:$0xff] }
 0x239   : > { %1352 = vst [vmem:[#allocation3 + $0x1f8] sm:$0xf0] %v1336_v59  ;;  %v1386_v16 = vpop.permute.xlu0 %1385 }
 0x23a   : > { %v1396_v27 = vsel %vm1389_vm15, %v6538_v45, %v1386_v16  ;;  %v2124_v45 = vld [vmem:[#allocation3 + $0x1b0] sm:$0xff] }
 0x23b   : > { %1412 = vst [vmem:[#allocation3 + $0x230] sm:$0xf] %v1396_v27  ;;  %v1388_v12 = vpop.permute.xlu1 %1387 }
 0x23c   : > { %v1397_v50 = vsel %vm1389_vm15, %v1386_v16, %v1388_v12 }
 0x23d   : > { %1413 = vst [vmem:[#allocation3 + $0x238] sm:$0xf] %v1397_v50  ;;  %v1456_v47 = vpop.permute.xlu0 %1455 }
 0x23e   : > { %v1466_v48 = vsel %vm1459_vm3, %v6547_v38, %v1456_v47  ;;  %v2132_v9 = vld [vmem:[#allocation3 + $0x1f0] sm:$0xff] }
 0x23f   : > { %1482 = vst [vmem:[#allocation3 + $0x230] sm:$0xf0] %v1466_v48  ;;  %v1458_v42 = vpop.permute.xlu1 %1457  ;;  %v5397_v0 = vpack.c.bf16 %v2132_v9, %v2124_v45 }
 0x240   : > { %v1467_v40 = vsel %vm1459_vm3, %v1456_v47, %v1458_v42  ;;  %v2133_v17 = vld [vmem:[#allocation3 + $0x1f8] sm:$0xff] }
 0x241   : > { %1483 = vst [vmem:[#allocation3 + $0x238] sm:$0xf0] %v1467_v40  ;;  %v1517_v28 = vpop.permute.xlu0 %1516  ;;  %v5395_v61 = vpack.c.bf16 %v2133_v17, %v2125_v4 }
 0x242   : > { %v1527_v18 = vsel %vm1520_vm1, %v6555_v26, %v1517_v28 }
 0x243   : > { %1543 = vst [vmem:[#allocation3 + $0x270] sm:$0xf] %v1527_v18  ;;  %5396 = vmatprep.subr.bf16.mxu1 %v5395_v61  ;;  %v1519_v57 = vpop.permute.xlu1 %1518  ;;  %v2510_v18 = vlaneseq }
 0x244   : > { %v1528_v38 = vsel %vm1520_vm1, %v1517_v28, %v1519_v57  ;;  %5398 = vmatpush1.bf16.msra.mxu1 %v5397_v0 }
 0x245   : > { %1544 = vst [vmem:[#allocation3 + $0x278] sm:$0xf] %v1528_v38  ;;  %v1587_v24 = vpop.permute.xlu0 %1586  ;;  %v6709_v38 = vshrl.u32 %v2510_v18, 7  ;;  %v4390_v18 = vld [vmem:[#allocation3 + $0x2d8] sm:$0xff] }
 0x246   : > { %v1597_v43 = vsel %vm7608_vm0, %v6563_v49, %v1587_v24  ;;  %v2140_v55 = vld [vmem:[#allocation3 + $0x230] sm:$0xff]  ;;  %vm7612_vm0 = vcmask 220160  }
 0x247   : > { %1613 = vst [vmem:[#allocation3 + $0x270] sm:$0xf0] %v1597_v43  ;;  %v1589_v60 = vpop.permute.xlu1 %1588  ;;  %v4310_v43 = vld [vmem:[#allocation3 + $0x58] sm:$0xff] }
 0x248   : > { %v1598_v29 = vsel %vm7609_vm4, %v1587_v24, %v1589_v60  ;;  %v2141_v25 = vld [vmem:[#allocation3 + $0x238] sm:$0xff]  ;;  %vm7613_vm4 = vmmov %vm7612_vm0 }
 0x249   : > { %1614 = vst [vmem:[#allocation3 + $0x278] sm:$0xf0] %v1598_v29  ;;  %v1648_v14 = vpop.permute.xlu0 %1647  ;;  %v6684_v30 = vpop.f32.mrb[0].mxu0 }
 0x24a   : > { %v1658_v26 = vsel %vm1651_vm7, %v6571_v58, %v1648_v14  ;;  %v6688_v36 = vpop.f32.mrb[1].mxu0 }
 0x24b   : > { %1674 = vst [vmem:[#allocation3 + $0x2b0] sm:$0xf] %v1658_v26  ;;  %v1650_v8 = vpop.permute.xlu1 %1649  ;;  %v4302_v26 = vld [vmem:[#allocation3 + $0x18] sm:$0xff] }
 0x24c   : > { %v1659_v37 = vsel %vm1651_vm7, %v1648_v14, %v1650_v8  ;;  %v2512_v8 = vsub.s32 0, %v6709_v38 }
 0x24d   : > { %1675 = vst [vmem:[#allocation3 + $0x2b8] sm:$0xf] %v1659_v37  ;;  %v1718_v41 = vpop.permute.xlu0 %1717  ;;  %v4309_v37 = vld [vmem:[#allocation3 + $0x50] sm:$0xff] }
 0x24e   : > { %v1728_v49 = vsel %vm1721_vm6, %v6579_v39, %v1718_v41  ;;  %v2148_v20 = vld [vmem:[#allocation3 + $0x270] sm:$0xff] }
 0x24f   : > { %1744 = vst [vmem:[#allocation3 + $0x2b0] sm:$0xf0] %v1728_v49  ;;  %v1720_v11 = vpop.permute.xlu1 %1719  ;;  %v5401_v33 = vpack.c.bf16 %v2148_v20, %v2140_v55  ;;  %v2516_v49 = vsub.s32 1, %v6709_v38  ;;  %v4318_v20 = vld [vmem:[#allocation3 + $0x98] sm:$0xff] }
 0x250   : > { %v1729_v13 = vsel %vm1721_vm6, %v1718_v41, %v1720_v11  ;;  %v2149_v5 = vld [vmem:[#allocation3 + $0x278] sm:$0xff]  ;;  %v4301_v11 = vld [vmem:[#allocation3 + $0x10] sm:$0xff] }
 0x251   : > { %1745 = vst [vmem:[#allocation3 + $0x2b8] sm:$0xf0] %v1729_v13  ;;  %v1779_v58 = vpop.permute.xlu0 %1778  ;;  %v5399_v56 = vpack.c.bf16 %v2149_v5, %v2141_v25  ;;  %v4326_v41 = vld [vmem:[#allocation3 + $0xd8] sm:$0xff]  ;;  %v6720_v25 = vld [vmem:[%s7616_s0] sm:$0xff]  ;;  %v5467_v5 = vpack.c.bf16 %v4309_v37, %v4301_v11  ;;  %v2520_v11 = vsub.s32 2, %v6709_v38  ;;  %s7640_s0 = smov 117  }
 0x252   : > { %v1789_v44 = vsel %vm7610_vm9, %v6587_v34, %v1779_v58  ;;  %vm7614_vm9 = vcmask 138240   ;;  %v6727_v55 = vrot.slane %v6720_v25, %v2512_v8  ;;  %v4389_v8 = vld [vmem:[#allocation3 + $0x2d0] sm:$0xff] }
 0x253   : > { %1805 = vst [vmem:[#allocation3 + $0x2f0] sm:$0xf] %v1789_v44  ;;  %5400 = vmatprep.subr.bf16.mxu1 %v5399_v56  ;;  %v1781_v22 = vpop.permute.xlu1 %1780  ;;  %v5710_v44 = vld [vmem:[%s7541_s2] sm:$0xf]  ;;  %s7649_s2 = smov 37  }
 0x254   : > { %v1790_v39 = vsel %vm7611_vm2, %v1779_v58, %v1781_v22  ;;  %5402 = vmatpush1.bf16.msra.mxu1 %v5401_v33  ;;  %vm7615_vm2 = vmmov %vm7614_vm9  ;;  %v5469_v58 = vpack.c.bf16 %v4326_v41, %v4318_v20  ;;  %v6736_v22 = vrot.slane %v6720_v25, %v2516_v49  ;;  %v4381_v41 = vld [vmem:[#allocation3 + $0x290] sm:$0xff]  ;;  %v2524_v20 = vsub.s32 3, %v6709_v38 }
 0x255   : > { %1806 = vst [vmem:[#allocation3 + $0x2f8] sm:$0xf] %v1790_v39  ;;  %v1849_v63 = vpop.permute.xlu0 %1848  ;;  %v4325_v39 = vld [vmem:[#allocation3 + $0xd0] sm:$0xff]  ;;  %v5487_v49 = vpack.c.bf16 %v4389_v8, %v4381_v41  ;;  %v2779_v8 = vld [vmem:[#allocation2] sm:$0xf0] }
 0x256   : > { %v1859_v54 = vsel %vm7612_vm0, %v6595_v52, %v1849_v63 }
 0x257   : > { %1875 = vst [vmem:[#allocation3 + $0x2f0] sm:$0xf0] %v1859_v54  ;;  %v1851_v15 = vpop.permute.xlu1 %1850 }
 0x258   : > { %v1860_v59 = vsel %vm7613_vm4, %v1849_v63, %v1851_v15  ;;  %v2157_v48 = vld [vmem:[#allocation3 + $0x2b8] sm:$0xff]  ;;  %v4317_v15 = vld [vmem:[#allocation3 + $0x90] sm:$0xff] }
 0x259   : > { %1876 = vst [vmem:[#allocation3 + $0x2f8] sm:$0xf0] %v1860_v59  ;;  %v1910_v16 = vpop.permute.xlu0 %1909  ;;  %v4342_v63 = vld [vmem:[#allocation3 + $0x158] sm:$0xff]  ;;  %v5471_v59 = vpack.c.bf16 %v4325_v39, %v4317_v15  ;;  %v6750_v39 = vrot.slane %v6720_v25, %v2524_v20 }
 0x25a   : > { %v1920_v34 = vsel %vm1913_vm11, %v6605_v53, %v1910_v16  ;;  %v2156_v53 = vld [vmem:[#allocation3 + $0x2b0] sm:$0xff] }
 0x25b   : > { %1936 = vst [vmem:[#allocation3 + $0x330] sm:$0xf] %v1920_v34  ;;  %v1912_v27 = vpop.permute.xlu1 %1911 }
 0x25c   : > { %v1921_v12 = vsel %vm1913_vm11, %v1910_v16, %v1912_v27  ;;  %v4334_v16 = vld [vmem:[#allocation3 + $0x118] sm:$0xff] }
 0x25d   : > { %1937 = vst [vmem:[#allocation3 + $0x338] sm:$0xf] %v1921_v12  ;;  %v1980_v50 = vpop.permute.xlu0 %1979  ;;  %v5473_v12 = vpack.c.bf16 %v4342_v63, %v4334_v16 }
 0x25e   : > { %v1990_v47 = vsel %vm1983_vm10, %v6611_v35, %v1980_v50  ;;  %v2164_v4 = vld [vmem:[#allocation3 + $0x2f0] sm:$0xff] }
 0x25f   : > { %2006 = vst [vmem:[#allocation3 + $0x330] sm:$0xf0] %v1990_v47  ;;  %v1982_v52 = vpop.permute.xlu1 %1981  ;;  %v5405_v61 = vpack.c.bf16 %v2164_v4, %v2156_v53  ;;  %v4349_v53 = vld [vmem:[#allocation3 + $0x190] sm:$0xff] }
 0x260   : > { %v1991_v42 = vsel %vm1983_vm10, %v1980_v50, %v1982_v52  ;;  %v2165_v9 = vld [vmem:[#allocation3 + $0x2f8] sm:$0xff]  ;;  %v4341_v50 = vld [vmem:[#allocation3 + $0x150] sm:$0xff] }
 0x261   : > { %2007 = vst [vmem:[#allocation3 + $0x338] sm:$0xf0] %v1991_v42  ;;  %v2041_v40 = vpop.permute.xlu0 %2040  ;;  %v5403_v17 = vpack.c.bf16 %v2165_v9, %v2157_v48  ;;  %v4333_v52 = vld [vmem:[#allocation3 + $0x110] sm:$0xff]  ;;  %v4350_v42 = vld [vmem:[#allocation3 + $0x198] sm:$0xff] }
 0x262   : > { %v2051_v28 = vsel %vm7614_vm9, %v6617_v31, %v2041_v40  ;;  %v5465_v31 = vpack.c.bf16 %v4310_v43, %v4302_v26  ;;  %v5475_v4 = vpack.c.bf16 %v4341_v50, %v4333_v52 }
 0x263   : > { %2067 = vst [vmem:[#allocation3 + $0x370] sm:$0xf] %v2051_v28  ;;  %5404 = vmatprep.subr.bf16.mxu1 %v5403_v17  ;;  %v2043_v45 = vpop.permute.xlu1 %2042  ;;  %v4374_v17 = vld [vmem:[#allocation3 + $0x258] sm:$0xff] }
 0x264   : > { %v2052_v35 = vsel %vm7615_vm2, %v2041_v40, %v2043_v45  ;;  %5406 = vmatpush1.bf16.msra.mxu1 %v5405_v61  ;;  %v4357_v40 = vld [vmem:[#allocation3 + $0x1d0] sm:$0xff]  ;;  %v4366_v61 = vld [vmem:[#allocation3 + $0x218] sm:$0xff]  ;;  %vm7623_vm2 = vcmask 900096  }
 0x265   : > { %2068 = vst [vmem:[#allocation3 + $0x378] sm:$0xf] %v2052_v35  ;;  %v5479_v28 = vpack.c.bf16 %v4357_v40, %v4349_v53  ;;  %v5481_v45 = vpack.c.bf16 %v4374_v17, %v4366_v61  ;;  %v4373_v35 = vld [vmem:[#allocation3 + $0x250] sm:$0xff] }
 0x266   : > { %v2172_v29 = vld [vmem:[#allocation3 + $0x330] sm:$0xff] }
 0x268   : > { %v2173_v0 = vld [vmem:[#allocation3 + $0x338] sm:$0xff] }
 0x26a   : > { %v2180_v57 = vld [vmem:[#allocation3 + $0x370] sm:$0xf] }
 0x26b   : > { %v5410_v14 = vpack.c.bf16 %v2180_v57, %v2172_v29  ;;  %v4382_v57 = vld [vmem:[#allocation3 + $0x298] sm:$0xff] }
 0x26c   : > { %v2181_v24 = vld [vmem:[#allocation3 + $0x378] sm:$0xf] }
 0x26d   : > { %v5407_v60 = vpack.c.bf16 %v2181_v24, %v2173_v0  ;;  %v4365_v0 = vld [vmem:[#allocation3 + $0x210] sm:$0xff] }
 0x26e   : > { %v5483_v29 = vpack.c.bf16 %v4373_v35, %v4365_v0 }
 0x26f   : > { %5409 = vmatprep.subr.msk.bf16.mxu1 %vm6283_vm5, %v5407_v60 }
 0x270   : > { %5412 = vmatpush1.bf16.msk.msra.mxu1 %vm6283_vm5, %v5410_v14 }
 0x271   : > { %5466 = vmatprep.subr.bf16.mxu1 %v5465_v31  ;;  %v5485_v31 = vpack.c.bf16 %v4390_v18, %v4382_v57 }
 0x272   : > { %v6722_v13 = vpop.permute.xlu0 %2185 }
 0x273   : > { %v2284_v56 = vadd.f32 %v6684_v30, %v6722_v13  ;;  %5272 = vmatmul.mubr.msk.f32.vlgmr.msra.gmra.mrb[2].mxu1 %vm2188_vm8, %v5710_v44  ;;  %v2286_v33 = vadd.f32 %v6688_v36, %v6722_v13  ;;  %v4358_v36 = vld [vmem:[#allocation3 + $0x1d8] sm:$0xff]  ;;  %vm7617_vm8 = vcmask 908288  }
 0x274   : > { %5468 = vmatpush1.bf16.msra.mxu1 %v5467_v5  ;;  %v5477_v9 = vpack.c.bf16 %v4358_v36, %v4350_v42  ;;  %vm7618_vm0 = vmmov %vm7617_vm8 }
 0x275   : > { %v2501_v54 = vmax.f32 %v2284_v56, 0.0  ;;  %5470 = vmatprep.subr.bf16.mxu1 %v5469_v58  ;;  %v2502_v30 = vmax.f32 %v2286_v33, 0.0  ;;  %v6746_v56 = vrot.slane %v6720_v25, %v2520_v11  ;;  %vm7620_vm4 = vmmov %vm7618_vm0 }
 0x276   : > { %vm7621_vm9 = vmmov %vm7618_vm0 }
 0x277   : > { %v2550_v34 = vmul.f32 %v6727_v55, %v2501_v54  ;;  %v2551_v27 = vmul.f32 %v6736_v22, %v2502_v30 }
 0x278   : > { %5472 = vmatpush1.bf16.msra.mxu1 %v5471_v59 }
 0x279   : > { %v2566_v47 = vrot.slane %v2550_v34, 4  ;;  %v2567_v48 = vrot.slane %v2551_v27, 4  ;;  %5474 = vmatprep.subr.bf16.mxu1 %v5473_v12 }
 0x27b   : > { %2582 = vst [vmem:[#allocation2 + $0x8] sm:$0xf0] %v2566_v47  ;;  %2583 = vst [vmem:[#allocation2 + $0x10] sm:$0xf0] %v2567_v48 }
 0x27c   : > { %5476 = vmatpush1.bf16.msra.mxu1 %v5475_v4 }
 0x27d   : > { %5478 = vmatprep.subr.bf16.mxu1 %v5477_v9 }
 0x280   : > { %5480 = vmatpush1.bf16.msra.mxu1 %v5479_v28 }
 0x281   : > { %5482 = vmatprep.subr.bf16.mxu1 %v5481_v45 }
 0x282   : > { %v3424_v24 = vld [vmem:[#allocation2 + $0x8] sm:$0xf0]  ;;  %v3425_v43 = vld [vmem:[#allocation2 + $0x10] sm:$0xf0] }
 0x283   : > { %v2591_v60 = vld [vmem:[#allocation2 + $0x8] sm:$0xf0]  ;;  %v3440_v14 = vrot.slane %v3424_v24, 4  ;;  %v3441_v26 = vrot.slane %v3425_v43, 4  ;;  %v2592_v37 = vld [vmem:[#allocation2 + $0x10] sm:$0xf0] }
 0x284   : > { %2610 = vrot.lane.b32.xlu1 %v2591_v60, %s7546_s29  ;;  %5484 = vmatpush1.bf16.msra.mxu1 %v5483_v29  ;;  %v2651_v34 = vld [vmem:[#allocation2 + $0x8] sm:$0xf0]  ;;  %v2652_v50 = vld [vmem:[#allocation2 + $0x10] sm:$0xf0] }
 0x285   : > { %3456 = vst [vmem:[#allocation3 + $0x500] sm:$0xf] %v3440_v14  ;;  %3457 = vst [vmem:[#allocation3 + $0x508] sm:$0xf] %v3441_v26  ;;  %5486 = vmatprep.subr.bf16.mxu1 %v5485_v31  ;;  %v2669_v4 = vrot.slane %v2651_v34, 4  ;;  %v2670_v42 = vrot.slane %v2652_v50, 4 }
 0x286   : > { %v2720_v28 = vld [vmem:[#allocation2 + $0x8] sm:$0xf0]  ;;  %v2721_v61 = vld [vmem:[#allocation2 + $0x10] sm:$0xf0] }
 0x287   : > { %v2780_v35 = vld [vmem:[#allocation2 + $0x8] sm:$0xf0]  ;;  %v2781_v0 = vld [vmem:[#allocation2 + $0x10] sm:$0xf0] }
 0x288   : > { %2612 = vrot.lane.b32.xlu1 %v2592_v37, %s7546_s29  ;;  %5488 = vmatpush1.bf16.msra.mxu1 %v5487_v49  ;;  %v2798_v57 = vrot.slane %v2780_v35, 4  ;;  %v2799_v24 = vrot.slane %v2781_v0, 4  ;;  %v2849_v26 = vld [vmem:[#allocation2 + $0x8] sm:$0xf0]  ;;  %v2850_v31 = vld [vmem:[#allocation2 + $0x10] sm:$0xf0] }
 0x289   : > { %v2797_v49 = vrot.slane %v2779_v8, 4  ;;  %v2909_v11 = vld [vmem:[#allocation2 + $0x8] sm:$0xf0] }
 0x28a   : > { %v2927_v20 = vrot.slane %v2909_v11, 4 }
 0x2a6   : > { %v2354_v5 = vpop.f32.mrb[0].mxu1 }
 0x2a7   : > { %v2355_v58 = vadd.f32 %v2354_v5, %v6722_v13  ;;  %v2356_v44 = vpop.f32.mrb[1].mxu1  ;;  %v2910_v5 = vld [vmem:[#allocation2 + $0x10] sm:$0xf0] }
 0x2a8   : > { %v2357_v33 = vadd.f32 %v2356_v44, %v6722_v13 }
 0x2a9   : > { %v2503_v63 = vmax.f32 %v2355_v58, 0.0  ;;  %v2528_v58 = vsub.s32 4, %v6709_v38 }
 0x2aa   : > { %v2504_v54 = vmax.f32 %v2357_v33, 0.0  ;;  %v2532_v33 = vsub.s32 5, %v6709_v38 }
 0x2ab   : > { %v2552_v30 = vmul.f32 %v6746_v56, %v2503_v63  ;;  %v2928_v63 = vrot.slane %v2910_v5, 4 }
 0x2ac   : > { %v2553_v15 = vmul.f32 %v6750_v39, %v2504_v54 }
 0x2ad   : > { %v2568_v59 = vrot.slane %v2552_v30, 4 }
 0x2ae   : > { %v2569_v16 = vrot.slane %v2553_v15, 4 }
 0x2af   : > { %2584 = vst [vmem:[#allocation2 + $0x18] sm:$0xf0] %v2568_v59 }
 0x2b0   : > { %2585 = vst [vmem:[#allocation2 + $0x20] sm:$0xf0] %v2569_v16  ;;  %v6778_v16 = vrot.slane %v6720_v25, %v2528_v58  ;;  %v3037_v58 = vld [vmem:[#allocation2] sm:$0xf0] }
 0x2b6   : > { %v3426_v27 = vld [vmem:[#allocation2 + $0x18] sm:$0xf0] }
 0x2b7   : > { %v2593_v12 = vld [vmem:[#allocation2 + $0x18] sm:$0xf0]  ;;  %v3442_v36 = vrot.slane %v3426_v27, 4  ;;  %v3427_v47 = vld [vmem:[#allocation2 + $0x20] sm:$0xf0] }
 0x2b8   : > { %2614 = vrot.lane.b32.xlu0 %v2593_v12, %s7546_s29  ;;  %v2594_v48 = vld [vmem:[#allocation2 + $0x20] sm:$0xf0]  ;;  %v3443_v52 = vrot.slane %v3427_v47, 4  ;;  %v2653_v9 = vld [vmem:[#allocation2 + $0x18] sm:$0xf0]  ;;  %v6783_v12 = vrot.slane %v6720_v25, %v2532_v33 }
 0x2b9   : > { %2616 = vrot.lane.b32.xlu1 %v2594_v48, %s7546_s29  ;;  %3458 = vst [vmem:[#allocation3 + $0x510] sm:$0xf] %v3442_v36  ;;  %v2654_v40 = vld [vmem:[#allocation2 + $0x20] sm:$0xf0]  ;;  %v2671_v17 = vrot.slane %v2653_v9, 4 }
 0x2ba   : > { %3459 = vst [vmem:[#allocation3 + $0x518] sm:$0xf] %v3443_v52  ;;  %v2672_v53 = vrot.slane %v2654_v40, 4  ;;  %v2722_v45 = vld [vmem:[#allocation2 + $0x18] sm:$0xf0] }
 0x2bb   : > { %v2723_v18 = vld [vmem:[#allocation2 + $0x20] sm:$0xf0]  ;;  %v2782_v43 = vld [vmem:[#allocation2 + $0x18] sm:$0xf0]  ;;  %v2978_v52 = vld [vmem:[#allocation2 + $0x8] sm:$0xf0] }
 0x2bc   : > { %2679 = vrot.lane.b32.xlu0 %v2669_v4, %s7549_s9  ;;  %v2783_v60 = vld [vmem:[#allocation2 + $0x20] sm:$0xf0]  ;;  %v2800_v29 = vrot.slane %v2782_v43, 4  ;;  %v2851_v37 = vld [vmem:[#allocation2 + $0x18] sm:$0xf0] }
 0x2bd   : > { %2681 = vrot.lane.b32.xlu1 %v2670_v42, %s7549_s9  ;;  %v2801_v14 = vrot.slane %v2783_v60, 4  ;;  %v2852_v41 = vld [vmem:[#allocation2 + $0x20] sm:$0xf0]  ;;  %v2911_v44 = vld [vmem:[#allocation2 + $0x18] sm:$0xf0] }
 0x2be   : > { %v2929_v30 = vrot.slane %v2911_v44, 4  ;;  %v2912_v15 = vld [vmem:[#allocation2 + $0x20] sm:$0xf0]  ;;  %v2979_v40 = vld [vmem:[#allocation2 + $0x10] sm:$0xf0] }
 0x2bf   : > { %v2930_v36 = vrot.slane %v2912_v15, 4  ;;  %v3040_v35 = vld [vmem:[#allocation2 + $0x18] sm:$0xf0]  ;;  %v3110_v44 = vld [vmem:[#allocation2 + $0x20] sm:$0xf0] }
 0x2c0   : > { %2683 = vrot.lane.b32.xlu0 %v2671_v17, %s7549_s9  ;;  %v2980_v17 = vld [vmem:[#allocation2 + $0x18] sm:$0xf0]  ;;  %v2977_v33 = vld [vmem:[#allocation2] sm:$0xf0] }
 0x2c1   : > { %2685 = vrot.lane.b32.xlu1 %v2672_v53, %s7549_s9  ;;  %v3038_v53 = vld [vmem:[#allocation2 + $0x8] sm:$0xf0]  ;;  %v3109_v11 = vld [vmem:[#allocation2 + $0x18] sm:$0xf0] }
 0x2c4   : > { %2739 = vrot.lane.b32.xlu0 %v2720_v28, %s7552_s21  ;;  %v2981_v28 = vld [vmem:[#allocation2 + $0x20] sm:$0xf0] }
 0x2c5   : > { %2741 = vrot.lane.b32.xlu1 %v2721_v61, %s7552_s21  ;;  %v3056_v61 = vrot.slane %v3038_v53, 4  ;;  %v3237_v53 = vld [vmem:[#allocation2 + $0x10] sm:$0xf0] }
 0x2c8   : > { %2743 = vrot.lane.b32.xlu0 %v2722_v45, %s7552_s21  ;;  %v3039_v45 = vld [vmem:[#allocation2 + $0x10] sm:$0xf0] }
 0x2c9   : > { %2745 = vrot.lane.b32.xlu1 %v2723_v18, %s7552_s21  ;;  %v3057_v18 = vrot.slane %v3039_v45, 4  ;;  %v3239_v45 = vld [vmem:[#allocation2 + $0x20] sm:$0xf0] }
 0x2cc   : > { %2808 = vrot.lane.b32.xlu0 %v2798_v57, %s7555_s22  ;;  %v3058_v57 = vrot.slane %v3040_v35, 4 }
 0x2cd   : > { %2810 = vrot.lane.b32.xlu1 %v2799_v24, %s7555_s22  ;;  %v3041_v24 = vld [vmem:[#allocation2 + $0x20] sm:$0xf0] }
 0x2d0   : > { %2812 = vrot.lane.b32.xlu0 %v2800_v29, %s7555_s22 }
 0x2d1   : > { %2814 = vrot.lane.b32.xlu1 %v2801_v14, %s7555_s22  ;;  %v3059_v14 = vrot.slane %v3041_v24, 4 }
 0x2d4   : > { %2868 = vrot.lane.b32.xlu0 %v2849_v26, %s7530_s14  ;;  %v3107_v26 = vld [vmem:[#allocation2 + $0x8] sm:$0xf0] }
 0x2d5   : > { %2870 = vrot.lane.b32.xlu1 %v2850_v31, %s7530_s14  ;;  %v5686_v31 = vunpack.i.h.bf16 %v5897_v46 }
 0x2d8   : > { %2872 = vrot.lane.b32.xlu0 %v2851_v37, %s7530_s14  ;;  %v2908_v37 = vld [vmem:[#allocation2] sm:$0xf0] }
 0x2d9   : > { %2874 = vrot.lane.b32.xlu1 %v2852_v41, %s7530_s14 }
 0x2dc   : > { %2806 = vrot.lane.b32.xlu0 %v2797_v49, %s7555_s22  ;;  %v3108_v49 = vld [vmem:[#allocation2 + $0x10] sm:$0xf0] }
 0x2dd   : > { %2937 = vrot.lane.b32.xlu1 %v2927_v20, %s7531_s13  ;;  %v2926_v20 = vrot.slane %v2908_v37, 4  ;;  %v3295_v37 = vld [vmem:[#allocation2] sm:$0xf0] }
 0x2de   : > { %v2425_v54 = vpop.f32.mrb[2].mxu0 }
 0x2df   : > { %v2426_v59 = vadd.f32 %v2425_v54, %v6722_v13  ;;  %v2427_v34 = vpop.f32.mrb[3].mxu0  ;;  %v3167_v54 = vld [vmem:[#allocation2 + $0x8] sm:$0xf0] }
 0x2e0   : > { %2939 = vrot.lane.b32.xlu0 %v2928_v63, %s7531_s13  ;;  %v2428_v27 = vadd.f32 %v2427_v34, %v6722_v13  ;;  %v3055_v63 = vrot.slane %v3037_v58, 4  ;;  %v4396_v34 = vld [vmem:[#allocation3 + $0x308] sm:$0xff] }
 0x2e1   : > { %2941 = vrot.lane.b32.xlu1 %v2929_v30, %s7531_s13  ;;  %v2505_v50 = vmax.f32 %v2426_v59, 0.0  ;;  %v3106_v30 = vld [vmem:[#allocation2] sm:$0xf0]  ;;  %v3185_v59 = vrot.slane %v3167_v54, 4  ;;  %v5691_v54 = vunpack.i.h.bf16 %v5901_v51 }
 0x2e2   : > { %v2506_v47 = vmax.f32 %v2428_v27, 0.0 }
 0x2e3   : > { %v2554_v48 = vmul.f32 %v6778_v16, %v2505_v50  ;;  %v3168_v50 = vld [vmem:[#allocation2 + $0x10] sm:$0xf0] }
 0x2e4   : > { %2943 = vrot.lane.b32.xlu0 %v2930_v36, %s7531_s13  ;;  %v2555_v4 = vmul.f32 %v6783_v12, %v2506_v47  ;;  %v4395_v47 = vld [vmem:[#allocation3 + $0x300] sm:$0xff] }
 0x2e5   : > { %2997 = vrot.lane.b32.xlu1 %v2978_v52, %s7532_s12  ;;  %v2570_v42 = vrot.slane %v2554_v48, 4  ;;  %v3169_v48 = vld [vmem:[#allocation2 + $0x18] sm:$0xf0] }
 0x2e6   : > { %v2571_v9 = vrot.slane %v2555_v4, 4  ;;  %v3186_v4 = vrot.slane %v3168_v50, 4  ;;  %v3525_v50 = vld [vmem:[#allocation2 + $0x10] sm:$0xf0] }
 0x2e7   : > { %2586 = vst [vmem:[#allocation2 + $0x28] sm:$0xf0] %v2570_v42  ;;  %v3187_v42 = vrot.slane %v3169_v48, 4 }
 0x2e8   : > { %2999 = vrot.lane.b32.xlu0 %v2979_v40, %s7532_s12  ;;  %2587 = vst [vmem:[#allocation2 + $0x30] sm:$0xf0] %v2571_v9  ;;  %v3170_v9 = vld [vmem:[#allocation2 + $0x20] sm:$0xf0] }
 0x2e9   : > { %3001 = vrot.lane.b32.xlu1 %v2980_v17, %s7532_s12  ;;  %v3188_v40 = vrot.slane %v3170_v9, 4  ;;  %v3236_v17 = vld [vmem:[#allocation2 + $0x8] sm:$0xf0] }
 0x2ec   : > { %3003 = vrot.lane.b32.xlu0 %v2981_v28, %s7532_s12  ;;  %v3238_v28 = vld [vmem:[#allocation2 + $0x18] sm:$0xf0] }
 0x2ed   : > { %3066 = vrot.lane.b32.xlu1 %v3056_v61, %s7533_s11  ;;  %v3296_v61 = vld [vmem:[#allocation2 + $0x8] sm:$0xf0] }
 0x2ee   : > { %v3428_v0 = vld [vmem:[#allocation2 + $0x28] sm:$0xf0]  ;;  %v3314_v35 = vrot.slane %v3296_v61, 4 }
 0x2ef   : > { %v3444_v43 = vrot.slane %v3428_v0, 4  ;;  %v3429_v60 = vld [vmem:[#allocation2 + $0x30] sm:$0xf0]  ;;  %v3298_v0 = vld [vmem:[#allocation2 + $0x18] sm:$0xf0] }
 0x2f0   : > { %3068 = vrot.lane.b32.xlu0 %v3057_v18, %s7533_s11  ;;  %v3445_v29 = vrot.slane %v3429_v60, 4  ;;  %v3297_v18 = vld [vmem:[#allocation2 + $0x10] sm:$0xf0]  ;;  %v3316_v24 = vrot.slane %v3298_v0, 4  ;;  %v3468_v48 = vld [vmem:[#allocation2 + $0x28] sm:$0xf0] }
 0x2f1   : > { %3070 = vrot.lane.b32.xlu1 %v3058_v57, %s7533_s11  ;;  %3460 = vst [vmem:[#allocation3 + $0x520] sm:$0xf] %v3444_v43  ;;  %v3315_v57 = vrot.slane %v3297_v18, 4  ;;  %v3299_v43 = vld [vmem:[#allocation2 + $0x20] sm:$0xf0] }
 0x2f2   : > { %3461 = vst [vmem:[#allocation3 + $0x528] sm:$0xf] %v3445_v29  ;;  %v3317_v60 = vrot.slane %v3299_v43, 4  ;;  %v3365_v29 = vld [vmem:[#allocation2 + $0x8] sm:$0xf0] }
 0x2f4   : > { %3072 = vrot.lane.b32.xlu0 %v3059_v14, %s7533_s11  ;;  %v3166_v14 = vld [vmem:[#allocation2] sm:$0xf0] }
 0x2f5   : > { %3126 = vrot.lane.b32.xlu1 %v3107_v26, %s7562_s10  ;;  %v3366_v26 = vld [vmem:[#allocation2 + $0x10] sm:$0xf0] }
 0x2f6   : > { %v2611_v8 = vpop.permute.xlu1 %2610 }
 0x2f7   : > { %v2626_v41 = vsel %vm7617_vm8, %v5686_v31, %v2611_v8  ;;  %v3367_v31 = vld [vmem:[#allocation2 + $0x18] sm:$0xf0]  ;;  %vm7624_vm8 = vmmov %vm7623_vm2 }
 0x2f8   : > { %2642 = vst [vmem:[#allocation3 + $0x340] sm:$0xf0] %v2626_v41  ;;  %3128 = vrot.lane.b32.xlu0 %v3108_v49, %s7562_s10  ;;  %v3368_v41 = vld [vmem:[#allocation2 + $0x20] sm:$0xf0] }
 0x2f9   : > { %3130 = vrot.lane.b32.xlu1 %v3109_v11, %s7562_s10  ;;  %v3235_v49 = vld [vmem:[#allocation2] sm:$0xf0]  ;;  %v3313_v11 = vrot.slane %v3295_v37, 4  ;;  %v3594_v37 = vld [vmem:[#allocation2 + $0x10] sm:$0xf0] }
 0x2fa   : > { %v6802_v5 = vpop.permute.xlu1 %2612 }
 0x2fb   : > { %v2627_v46 = vsel %vm7618_vm0, %v2611_v8, %v6802_v5  ;;  %v3184_v8 = vrot.slane %v3166_v14, 4  ;;  %vm7625_vm0 = vmmov %vm7623_vm2 }
 0x2fc   : > { %2643 = vst [vmem:[#allocation3 + $0x348] sm:$0xf0] %v2627_v46  ;;  %3132 = vrot.lane.b32.xlu0 %v3110_v44, %s7562_s10 }
 0x2fd   : > { %2935 = vrot.lane.b32.xlu1 %v2926_v20, %s7531_s13  ;;  %v3364_v20 = vld [vmem:[#allocation2] sm:$0xf0] }
 0x2ff   : > { %v4403_v15 = vld [vmem:[#allocation3 + $0x340] sm:$0xff] }
 0x300   : > { %2995 = vrot.lane.b32.xlu0 %v2977_v33, %s7532_s12  ;;  %v5439_v52 = vpack.c.bf16 %v4403_v15, %v4395_v47 }
 0x301   : > { %3064 = vrot.lane.b32.xlu1 %v3055_v63, %s7533_s11  ;;  %v3465_v63 = vld [vmem:[#allocation2 + $0x10] sm:$0xf0] }
 0x303   : > { %v4404_v27 = vld [vmem:[#allocation3 + $0x348] sm:$0xff] }
 0x304   : > { %3124 = vrot.lane.b32.xlu0 %v3106_v30, %s7562_s10  ;;  %v5437_v36 = vpack.c.bf16 %v4404_v27, %v4396_v34  ;;  %v3466_v34 = vld [vmem:[#allocation2 + $0x18] sm:$0xf0]  ;;  %v3467_v27 = vld [vmem:[#allocation2 + $0x20] sm:$0xf0] }
 0x305   : > { %3195 = vrot.lane.b32.xlu1 %v3185_v59, %s7565_s15 }
 0x306   : > { %5438 = vmatprep.subr.bf16.mxu0 %v5437_v36 }
 0x307   : > { %5440 = vmatpush1.bf16.msra.mxu0 %v5439_v52  ;;  %v3543_v52 = vrot.slane %v3525_v50, 4 }
 0x308   : > { %3197 = vrot.lane.b32.xlu0 %v3186_v4, %s7565_s15  ;;  %v3526_v4 = vld [vmem:[#allocation2 + $0x18] sm:$0xf0] }
 0x309   : > { %3199 = vrot.lane.b32.xlu1 %v3187_v42, %s7565_s15  ;;  %v3544_v18 = vrot.slane %v3526_v4, 4  ;;  %v3654_v4 = vld [vmem:[#allocation2 + $0x10] sm:$0xf0] }
 0x30c   : > { %3201 = vrot.lane.b32.xlu0 %v3188_v40, %s7565_s15  ;;  %v4398_v40 = vld [vmem:[#allocation3 + $0x318] sm:$0xff] }
 0x30d   : > { %3255 = vrot.lane.b32.xlu1 %v3236_v17, %s7534_s19 }
 0x310   : > { %3257 = vrot.lane.b32.xlu0 %v3237_v53, %s7534_s19  ;;  %v3527_v53 = vld [vmem:[#allocation2 + $0x20] sm:$0xf0] }
 0x311   : > { %3259 = vrot.lane.b32.xlu1 %v3238_v28, %s7534_s19  ;;  %v5696_v28 = vunpack.i.h.bf16 %v5931_v23  ;;  %v3545_v43 = vrot.slane %v3527_v53, 4 }
 0x314   : > { %3261 = vrot.lane.b32.xlu0 %v3239_v45, %s7534_s19  ;;  %v4397_v45 = vld [vmem:[#allocation3 + $0x310] sm:$0xff] }
 0x315   : > { %3324 = vrot.lane.b32.xlu1 %v3314_v35, %s7535_s20 }
 0x318   : > { %3326 = vrot.lane.b32.xlu0 %v3315_v57, %s7535_s20 }
 0x319   : > { %3328 = vrot.lane.b32.xlu1 %v3316_v24, %s7535_s20 }
 0x31c   : > { %3330 = vrot.lane.b32.xlu0 %v3317_v60, %s7535_s20  ;;  %v3528_v60 = vld [vmem:[#allocation2 + $0x28] sm:$0xf0] }
 0x31d   : > { %3384 = vrot.lane.b32.xlu1 %v3365_v29, %s7619_s1  ;;  %v3546_v14 = vrot.slane %v3528_v60, 4 }
 0x320   : > { %3386 = vrot.lane.b32.xlu0 %v3366_v26, %s7619_s1 }
 0x321   : > { %3388 = vrot.lane.b32.xlu1 %v3367_v31, %s7619_s1 }
 0x324   : > { %3390 = vrot.lane.b32.xlu0 %v3368_v41, %s7619_s1 }
 0x325   : > { %3193 = vrot.lane.b32.xlu1 %v3184_v8, %s7565_s15 }
 0x328   : > { %3253 = vrot.lane.b32.xlu0 %v3235_v49, %s7534_s19 }
 0x329   : > { %3322 = vrot.lane.b32.xlu1 %v3313_v11, %s7535_s20  ;;  %v3595_v11 = vld [vmem:[#allocation2 + $0x18] sm:$0xf0] }
 0x32a   : > { %v2615_v58 = vpop.permute.xlu0 %2614 }
 0x32b   : > { %v2628_v46 = vsel %vm7620_vm4, %v6802_v5, %v2615_v58  ;;  %v6832_v44 = vpop.permute.xlu1 %2616  ;;  %vm7626_vm4 = vmmov %vm7625_vm0 }
 0x32c   : > { %2644 = vst [vmem:[#allocation3 + $0x350] sm:$0xf0] %v2628_v46  ;;  %v2629_v33 = vsel %vm7621_vm9, %v2615_v58, %v6832_v44  ;;  %3382 = vrot.lane.b32.xlu0 %v3364_v20, %s7619_s1  ;;  %vm7628_vm9 = vcmask 891904   ;;  %v3596_v58 = vld [vmem:[#allocation2 + $0x20] sm:$0xf0] }
 0x32d   : > { %2645 = vst [vmem:[#allocation3 + $0x358] sm:$0xf0] %v2629_v33  ;;  %3484 = vrot.lane.b32.xlu1 %v3465_v63, %s7622_s3 }
 0x32e   : > { %v2680_v30 = vpop.permute.xlu0 %2679 }
 0x32f   : > { %v2695_v15 = vsel %vm7623_vm2, %v5691_v54, %v2680_v30  ;;  %v2682_v59 = vpop.permute.xlu1 %2681  ;;  %vm7629_vm2 = vmmov %vm7628_vm9  ;;  %v3597_v54 = vld [vmem:[#allocation2 + $0x28] sm:$0xf0] }
 0x330   : > { %2711 = vst [vmem:[#allocation3 + $0x380] sm:$0xf] %v2695_v15  ;;  %v2696_v5 = vsel %vm7624_vm8, %v2680_v30, %v2682_v59  ;;  %3486 = vrot.lane.b32.xlu0 %v3466_v34, %s7622_s3  ;;  %vm7630_vm8 = vmmov %vm7629_vm2  ;;  %v3524_v30 = vld [vmem:[#allocation2 + $0x8] sm:$0xf0]  ;;  %v2536_v34 = vsub.s32 6, %v6709_v38 }
 0x331   : > { %2712 = vst [vmem:[#allocation3 + $0x388] sm:$0xf] %v2696_v5  ;;  %3488 = vrot.lane.b32.xlu1 %v3467_v27, %s7622_s3  ;;  %v5701_v5 = vunpack.i.h.bf16 %v5962_v3  ;;  %v2540_v27 = vsub.s32 7, %v6709_v38  ;;  %v3655_v38 = vld [vmem:[#allocation2 + $0x18] sm:$0xf0] }
 0x332   : > { %v2684_v36 = vpop.permute.xlu0 %2683 }
 0x333   : > { %v2697_v51 = vsel %vm7625_vm0, %v2682_v59, %v2684_v36  ;;  %v6844_v47 = vpop.permute.xlu1 %2685  ;;  %v4405_v42 = vld [vmem:[#allocation3 + $0x350] sm:$0xff]  ;;  %vm7631_vm0 = vmmov %vm7629_vm2  ;;  %v3464_v59 = vld [vmem:[#allocation2 + $0x8] sm:$0xf0] }
 0x334   : > { %2713 = vst [vmem:[#allocation3 + $0x390] sm:$0xf] %v2697_v51  ;;  %v2698_v9 = vsel %vm7626_vm4, %v2684_v36, %v6844_v47  ;;  %3490 = vrot.lane.b32.xlu0 %v3468_v48, %s7622_s3  ;;  %v4406_v17 = vld [vmem:[#allocation3 + $0x358] sm:$0xff]  ;;  %v5491_v0 = vpack.c.bf16 %v4405_v42, %v4397_v45  ;;  %vm7633_vm4 = vcmask 826368   ;;  %v3542_v36 = vrot.slane %v3524_v30, 4 }
 0x335   : > { %2714 = vst [vmem:[#allocation3 + $0x398] sm:$0xf] %v2698_v9  ;;  %3553 = vrot.lane.b32.xlu1 %v3543_v52, %s7627_s23  ;;  %v5489_v61 = vpack.c.bf16 %v4406_v17, %v4398_v40  ;;  %v6878_v9 = vrot.slane %v6720_v25, %v2536_v34  ;;  %v3593_v17 = vld [vmem:[#allocation2 + $0x8] sm:$0xf0]  ;;  %v3724_v34 = vld [vmem:[#allocation2 + $0x18] sm:$0xf0] }
 0x336   : > { %v2740_v35 = vpop.permute.xlu0 %2739 }
 0x337   : > { %v2755_v57 = vsel %vm7628_vm9, %v5696_v28, %v2740_v35  ;;  %5490 = vmatprep.subr.bf16.mxu1 %v5489_v61  ;;  %v2742_v24 = vpop.permute.xlu1 %2741  ;;  %vm7634_vm9 = vmmov %vm7633_vm4  ;;  %v6884_v28 = vrot.slane %v6720_v25, %v2540_v27  ;;  %v3657_v25 = vld [vmem:[#allocation2 + $0x28] sm:$0xf0] }
 0x338   : > { %2771 = vst [vmem:[#allocation3 + $0x380] sm:$0xf0] %v2755_v57  ;;  %v2756_v29 = vsel %vm7629_vm2, %v2740_v35, %v2742_v24  ;;  %3555 = vrot.lane.b32.xlu0 %v3544_v18, %s7627_s23  ;;  %5492 = vmatpush1.bf16.msra.mxu1 %v5491_v0  ;;  %vm7635_vm2 = vmmov %vm7633_vm4  ;;  %v3672_v35 = vrot.slane %v3654_v4, 4  ;;  %v3783_v4 = vld [vmem:[#allocation2 + $0x10] sm:$0xf0] }
 0x339   : > { %2772 = vst [vmem:[#allocation3 + $0x388] sm:$0xf0] %v2756_v29  ;;  %3557 = vrot.lane.b32.xlu1 %v3545_v43, %s7627_s23  ;;  %v3656_v43 = vld [vmem:[#allocation2 + $0x20] sm:$0xf0] }
 0x33a   : > { %v2744_v23 = vpop.permute.xlu0 %2743 }
 0x33b   : > { %v2757_v26 = vsel %vm7630_vm8, %v2742_v24, %v2744_v23  ;;  %v6856_v31 = vpop.permute.xlu1 %2745  ;;  %vm7636_vm8 = vcmask 818176   ;;  %v3673_v24 = vrot.slane %v3655_v38, 4 }
 0x33c   : > { %2773 = vst [vmem:[#allocation3 + $0x390] sm:$0xf0] %v2757_v26  ;;  %v2758_v8 = vsel %vm7631_vm0, %v2744_v23, %v6856_v31  ;;  %3559 = vrot.lane.b32.xlu0 %v3546_v14, %s7627_s23  ;;  %vm7637_vm0 = vmmov %vm7636_vm8  ;;  %v3674_v26 = vrot.slane %v3656_v43, 4  ;;  %v3801_v43 = vrot.slane %v3783_v4, 4 }
 0x33d   : > { %2774 = vst [vmem:[#allocation3 + $0x398] sm:$0xf0] %v2758_v8  ;;  %3613 = vrot.lane.b32.xlu1 %v3594_v37, %s7632_s24 }
 0x33e   : > { %v2809_v41 = vpop.permute.xlu0 %2808 }
 0x33f   : > { %v2811_v49 = vpop.permute.xlu1 %2810  ;;  %v4411_v38 = vld [vmem:[#allocation3 + $0x380] sm:$0xff] }
 0x340   : > { %v2825_v20 = vsel %vm7633_vm4, %v2809_v41, %v2811_v49  ;;  %3615 = vrot.lane.b32.xlu0 %v3595_v11, %s7632_s24  ;;  %vm7638_vm4 = vmmov %vm7637_vm0  ;;  %v3675_v11 = vrot.slane %v3657_v25, 4 }
 0x341   : > { %2841 = vst [vmem:[#allocation3 + $0x3c8] sm:$0xf] %v2825_v20  ;;  %3617 = vrot.lane.b32.xlu1 %v3596_v58, %s7632_s24  ;;  %v4412_v20 = vld [vmem:[#allocation3 + $0x388] sm:$0xff] }
 0x342   : > { %v2813_v46 = vpop.permute.xlu0 %2812 }
 0x343   : > { %v2826_v33 = vsel %vm7634_vm9, %v2811_v49, %v2813_v46  ;;  %v6866_v63 = vpop.permute.xlu1 %2814  ;;  %vm7639_vm9 = vmmov %vm7637_vm0 }
 0x344   : > { %2842 = vst [vmem:[#allocation3 + $0x3d0] sm:$0xf] %v2826_v33  ;;  %v2827_v15 = vsel %vm7635_vm2, %v2813_v46, %v6866_v63  ;;  %3619 = vrot.lane.b32.xlu0 %v3597_v54, %s7632_s24 }
 0x345   : > { %2843 = vst [vmem:[#allocation3 + $0x3d8] sm:$0xf] %v2827_v15  ;;  %3482 = vrot.lane.b32.xlu1 %v3464_v59, %s7622_s3 }
 0x346   : > { %v2869_v50 = vpop.permute.xlu0 %2868  ;;  %v2496_v48 = vpop.f32.mrb[2].mxu1 }
 0x347   : > { %v2884_v51 = vsel %vm7636_vm8, %v5701_v5, %v2869_v50  ;;  %v2871_v52 = vpop.permute.xlu1 %2870  ;;  %v2497_v42 = vadd.f32 %v2496_v48, %v6722_v13  ;;  %v2498_v40 = vpop.f32.mrb[3].mxu1  ;;  %vm7641_vm8 = vcmask 809984   ;;  %v4414_v5 = vld [vmem:[#allocation3 + $0x398] sm:$0xff]  ;;  %v3725_v48 = vld [vmem:[#allocation2 + $0x20] sm:$0xf0] }
 0x348   : > { %2900 = vst [vmem:[#allocation3 + $0x3c0] sm:$0xf0] %v2884_v51  ;;  %v2885_v3 = vsel %vm7637_vm0, %v2869_v50, %v2871_v52  ;;  %3551 = vrot.lane.b32.xlu0 %v3542_v36, %s7627_s23  ;;  %v2499_v53 = vadd.f32 %v2498_v40, %v6722_v13  ;;  %vm7642_vm0 = vmmov %vm7641_vm8  ;;  %v4413_v36 = vld [vmem:[#allocation3 + $0x390] sm:$0xff] }
 0x349   : > { %2901 = vst [vmem:[#allocation3 + $0x3c8] sm:$0xf0] %v2885_v3  ;;  %3611 = vrot.lane.b32.xlu1 %v3593_v17, %s7632_s24  ;;  %v2507_v61 = vmax.f32 %v2497_v42, 0.0  ;;  %v3784_v42 = vld [vmem:[#allocation2 + $0x18] sm:$0xf0] }
 0x34a   : > { %v2873_v45 = vpop.permute.xlu0 %2872  ;;  %v2508_v18 = vmax.f32 %v2499_v53, 0.0  ;;  %v3802_v25 = vrot.slane %v3784_v42, 4  ;;  %v3782_v42 = vld [vmem:[#allocation2 + $0x8] sm:$0xf0] }
 0x34b   : > { %v2886_v0 = vsel %vm7638_vm4, %v2871_v52, %v2873_v45  ;;  %v6888_v57 = vpop.permute.xlu1 %2874  ;;  %v2556_v60 = vmul.f32 %v6878_v9, %v2507_v61  ;;  %vm7643_vm4 = vmmov %vm7642_vm0 }
 0x34c   : > { %2902 = vst [vmem:[#allocation3 + $0x3d0] sm:$0xf0] %v2886_v0  ;;  %v2887_v13 = vsel %vm7639_vm9, %v2873_v45, %v6888_v57  ;;  %3682 = vrot.lane.b32.xlu0 %v3672_v35, %s7640_s0  ;;  %v2557_v29 = vmul.f32 %v6884_v28, %v2508_v18  ;;  %v3726_v35 = vld [vmem:[#allocation2 + $0x28] sm:$0xf0]  ;;  %vm7644_vm9 = vcmask 744448  }
 0x34d   : > { %2903 = vst [vmem:[#allocation3 + $0x3d8] sm:$0xf0] %v2887_v13  ;;  %3684 = vrot.lane.b32.xlu1 %v3673_v24, %s7640_s0  ;;  %v2572_v23 = vrot.slane %v2556_v60, 4 }
 0x34e   : > { %v2807_v14 = vpop.permute.xlu0 %2806  ;;  %v2573_v8 = vrot.slane %v2557_v29, 4  ;;  %v3785_v29 = vld [vmem:[#allocation2 + $0x20] sm:$0xf0] }
 0x34f   : > { %v2824_v37 = vsel %vm7635_vm2, %v2807_v14, %v2809_v41  ;;  %v6897_v49 = vpop.permute.xlu1 %2937  ;;  %2588 = vst [vmem:[#allocation2 + $0x38] sm:$0xf0] %v2572_v23  ;;  %v3723_v41 = vld [vmem:[#allocation2 + $0x10] sm:$0xf0]  ;;  %vm7645_vm2 = vmmov %vm7644_vm9  ;;  %v3786_v14 = vld [vmem:[#allocation2 + $0x28] sm:$0xf0] }
 0x350   : > { %2840 = vst [vmem:[#allocation3 + $0x3c0] sm:$0xf] %v2824_v37  ;;  %3686 = vrot.lane.b32.xlu0 %v3674_v26, %s7640_s0  ;;  %v4420_v58 = vld [vmem:[#allocation3 + $0x3c8] sm:$0xff]  ;;  %2589 = vst [vmem:[#allocation2 + $0x40] sm:$0xf0] %v2573_v8  ;;  %v3803_v8 = vrot.slane %v3785_v29, 4 }
 0x351   : > { %3688 = vrot.lane.b32.xlu1 %v3675_v11, %s7640_s0  ;;  %v5441_v46 = vpack.c.bf16 %v4420_v58, %v4412_v20  ;;  %v3804_v20 = vrot.slane %v3786_v14, 4 }
 0x352   : > { %v2940_v33 = vpop.permute.xlu0 %2939 }
 0x353   : > { %v2954_v54 = vsel %vm7641_vm8, %v6897_v49, %v2940_v33  ;;  %5442 = vmatprep.subr.bf16.mxu0 %v5441_v46  ;;  %v2942_v30 = vpop.permute.xlu1 %2941  ;;  %v4421_v15 = vld [vmem:[#allocation3 + $0x3d0] sm:$0xff]  ;;  %vm7646_vm8 = vmmov %vm7645_vm2 }
 0x354   : > { %2970 = vst [vmem:[#allocation3 + $0x408] sm:$0xf] %v2954_v54  ;;  %v2955_v59 = vsel %vm7642_vm0, %v2940_v33, %v2942_v30  ;;  %3742 = vrot.lane.b32.xlu0 %v3723_v41, %s7571_s26  ;;  %v4422_v27 = vld [vmem:[#allocation3 + $0x3d8] sm:$0xff]  ;;  %v5495_v52 = vpack.c.bf16 %v4421_v15, %v4413_v36  ;;  %vm7647_vm0 = vcmask 736256   ;;  %v3852_v54 = vld [vmem:[#allocation2 + $0x10] sm:$0xf0] }
 0x355   : > { %2971 = vst [vmem:[#allocation3 + $0x410] sm:$0xf] %v2955_v59  ;;  %3744 = vrot.lane.b32.xlu1 %v3724_v34, %s7571_s26  ;;  %v5493_v50 = vpack.c.bf16 %v4422_v27, %v4414_v5  ;;  %v3853_v41 = vld [vmem:[#allocation2 + $0x18] sm:$0xf0]  ;;  %v3854_v5 = vld [vmem:[#allocation2 + $0x20] sm:$0xf0] }
 0x356   : > { %v6906_v51 = vpop.permute.xlu0 %2943  ;;  %v3430_v3 = vld [vmem:[#allocation2 + $0x38] sm:$0xf0]  ;;  %v3653_v27 = vld [vmem:[#allocation2 + $0x8] sm:$0xf0] }
 0x357   : > { %v2956_v40 = vsel %vm7643_vm4, %v2942_v30, %v6906_v51  ;;  %5494 = vmatprep.subr.bf16.mxu1 %v5493_v50  ;;  %v6910_v17 = vpop.permute.xlu1 %2997  ;;  %v4419_v53 = vld [vmem:[#allocation3 + $0x3c0] sm:$0xff]  ;;  %v3446_v61 = vrot.slane %v3430_v3, 4  ;;  %vm7648_vm4 = vmmov %vm7647_vm0  ;;  %v3855_v50 = vld [vmem:[#allocation2 + $0x28] sm:$0xf0] }
 0x358   : > { %v3431_v45 = vld [vmem:[#allocation2 + $0x40] sm:$0xf0]  ;;  %2972 = vst [vmem:[#allocation3 + $0x418] sm:$0xf] %v2956_v40  ;;  %3746 = vrot.lane.b32.xlu0 %v3725_v48, %s7571_s26  ;;  %5496 = vmatpush1.bf16.msra.mxu1 %v5495_v52  ;;  %v5443_v18 = vpack.c.bf16 %v4419_v53, %v4411_v38  ;;  %v3671_v48 = vrot.slane %v3653_v27, 4  ;;  %v3800_v53 = vrot.slane %v3782_v42, 4 }
 0x359   : > { %v3447_v0 = vrot.slane %v3431_v45, 4  ;;  %3748 = vrot.lane.b32.xlu1 %v3726_v35, %s7571_s26  ;;  %3462 = vst [vmem:[#allocation3 + $0x530] sm:$0xf] %v3446_v61  ;;  %v3722_v40 = vld [vmem:[#allocation2 + $0x8] sm:$0xf0] }
 0x35a   : > { %v3000_v24 = vpop.permute.xlu0 %2999  ;;  %5444 = vmatpush1.bf16.msra.mxu0 %v5443_v18  ;;  %v3912_v35 = vld [vmem:[#allocation2 + $0x10] sm:$0xf0] }
 0x35b   : > { %3463 = vst [vmem:[#allocation3 + $0x538] sm:$0xf] %v3447_v0  ;;  %v3014_v60 = vsel %vm7644_vm9, %v6910_v17, %v3000_v24  ;;  %v3002_v13 = vpop.permute.xlu1 %3001  ;;  %vm7650_vm9 = vmmov %vm7647_vm0  ;;  %v3851_v0 = vld [vmem:[#allocation2 + $0x8] sm:$0xf0] }
 0x35c   : > { %3030 = vst [vmem:[#allocation3 + $0x408] sm:$0xf0] %v3014_v60  ;;  %v3015_v23 = vsel %vm7645_vm2, %v3000_v24, %v3002_v13  ;;  %3811 = vrot.lane.b32.xlu0 %v3801_v43, %s7572_s30  ;;  %vm7651_vm2 = vcmask 728064   ;;  %v3913_v24 = vld [vmem:[#allocation2 + $0x18] sm:$0xf0]  ;;  %v3930_v60 = vrot.slane %v3912_v35, 4 }
 0x35d   : > { %3031 = vst [vmem:[#allocation3 + $0x410] sm:$0xf0] %v3015_v23  ;;  %3813 = vrot.lane.b32.xlu1 %v3802_v25, %s7572_s30  ;;  %v3931_v29 = vrot.slane %v3913_v24, 4  ;;  %v4042_v24 = vld [vmem:[#allocation2 + $0x18] sm:$0xf0] }
 0x35e   : > { %v6919_v26 = vpop.permute.xlu0 %3003 }
 0x35f   : > { %v3016_v37 = vsel %vm7646_vm8, %v3002_v13, %v6919_v26  ;;  %v3067_v11 = vpop.permute.xlu1 %3066  ;;  %vm7652_vm8 = vmmov %vm7651_vm2 }
 0x360   : > { %3032 = vst [vmem:[#allocation3 + $0x418] sm:$0xf0] %v3016_v37  ;;  %3815 = vrot.lane.b32.xlu0 %v3803_v8, %s7572_s30  ;;  %v3914_v8 = vld [vmem:[#allocation2 + $0x20] sm:$0xf0] }
 0x361   : > { %3817 = vrot.lane.b32.xlu1 %v3804_v20, %s7572_s30  ;;  %v3915_v20 = vld [vmem:[#allocation2 + $0x28] sm:$0xf0] }
 0x362   : > { %v3069_v58 = vpop.permute.xlu0 %3068 }
 0x363   : > { %v3083_v46 = vsel %vm7647_vm0, %v3067_v11, %v3069_v58  ;;  %v3071_v33 = vpop.permute.xlu1 %3070  ;;  %vm7653_vm0 = vmmov %vm7651_vm2  ;;  %v4428_v23 = vld [vmem:[#allocation3 + $0x408] sm:$0xff] }
 0x364   : > { %3099 = vst [vmem:[#allocation3 + $0x448] sm:$0xf] %v3083_v46  ;;  %v3084_v30 = vsel %vm7648_vm4, %v3069_v58, %v3071_v33  ;;  %3871 = vrot.lane.b32.xlu0 %v3852_v54, %s7649_s2  ;;  %vm7654_vm4 = vcmask 809984   ;;  %v3932_v46 = vrot.slane %v3914_v8, 4  ;;  %v4044_v8 = vld [vmem:[#allocation2 + $0x28] sm:$0xf0] }
 0x365   : > { %3100 = vst [vmem:[#allocation3 + $0x450] sm:$0xf] %v3084_v30  ;;  %3873 = vrot.lane.b32.xlu1 %v3853_v41, %s7649_s2  ;;  %v3933_v30 = vrot.slane %v3915_v20, 4 }
 0x366   : > { %v6929_v15 = vpop.permute.xlu0 %3072 }
 0x367   : > { %v3085_v59 = vsel %vm7650_vm9, %v3071_v33, %v6929_v15  ;;  %v3127_v34 = vpop.permute.xlu1 %3126  ;;  %vm7655_vm9 = vcmask 744448   ;;  %v4430_v41 = vld [vmem:[#allocation3 + $0x418] sm:$0xff] }
 0x368   : > { %3101 = vst [vmem:[#allocation3 + $0x458] sm:$0xf] %v3085_v59  ;;  %3875 = vrot.lane.b32.xlu0 %v3854_v5, %s7649_s2  ;;  %v4429_v5 = vld [vmem:[#allocation3 + $0x410] sm:$0xff] }
 0x369   : > { %3877 = vrot.lane.b32.xlu1 %v3855_v50, %s7649_s2 }
 0x36a   : > { %v3129_v36 = vpop.permute.xlu0 %3128 }
 0x36b   : > { %v3143_v52 = vsel %vm7651_vm2, %v3127_v34, %v3129_v36  ;;  %v3131_v4 = vpop.permute.xlu1 %3130  ;;  %vm7656_vm2 = vcmask 736256  }
 0x36c   : > { %3159 = vst [vmem:[#allocation3 + $0x448] sm:$0xf0] %v3143_v52  ;;  %v3144_v3 = vsel %vm7652_vm8, %v3129_v36, %v3131_v4  ;;  %3680 = vrot.lane.b32.xlu0 %v3671_v48, %s7640_s0  ;;  %vm7658_vm8 = vmmov %vm7653_vm0  ;;  %v3981_v48 = vld [vmem:[#allocation2 + $0x10] sm:$0xf0] }
 0x36d   : > { %3160 = vst [vmem:[#allocation3 + $0x450] sm:$0xf0] %v3144_v3  ;;  %3740 = vrot.lane.b32.xlu1 %v3722_v40, %s7571_s26  ;;  %v4041_v3 = vld [vmem:[#allocation2 + $0x10] sm:$0xf0] }
 0x36e   : > { %v6939_v38 = vpop.permute.xlu0 %3132 }
 0x36f   : > { %v3145_v61 = vsel %vm7653_vm0, %v3131_v4, %v6939_v38  ;;  %v2936_v45 = vpop.permute.xlu1 %2935  ;;  %vm7659_vm0 = vcmask 89088   ;;  %v3982_v4 = vld [vmem:[#allocation2 + $0x18] sm:$0xf0] }
 0x370   : > { %3161 = vst [vmem:[#allocation3 + $0x458] sm:$0xf0] %v3145_v61  ;;  %v2953_v18 = vsel %vm7654_vm4, %v2936_v45, %v6897_v49  ;;  %3809 = vrot.lane.b32.xlu0 %v3800_v53, %s7572_s30  ;;  %vm7660_vm4 = vmmov %vm7659_vm0  ;;  %v3983_v61 = vld [vmem:[#allocation2 + $0x20] sm:$0xf0] }
 0x371   : > { %2969 = vst [vmem:[#allocation3 + $0x400] sm:$0xf] %v2953_v18  ;;  %3869 = vrot.lane.b32.xlu1 %v3851_v0, %s7649_s2  ;;  %v3984_v18 = vld [vmem:[#allocation2 + $0x28] sm:$0xf0] }
 0x372   : > { %v2996_v43 = vpop.permute.xlu0 %2995 }
 0x373   : > { %v3013_v13 = vsel %vm7655_vm9, %v2996_v43, %v6910_v17  ;;  %v3065_v25 = vpop.permute.xlu1 %3064  ;;  %v4436_v14 = vld [vmem:[#allocation3 + $0x448] sm:$0xff]  ;;  %vm7662_vm9 = vmmov %vm7659_vm0 }
 0x374   : > { %3029 = vst [vmem:[#allocation3 + $0x400] sm:$0xf0] %v3013_v13  ;;  %v3082_v49 = vsel %vm7656_vm2, %v3065_v25, %v3067_v11  ;;  %3940 = vrot.lane.b32.xlu0 %v3930_v60, %s7657_s27  ;;  %v5445_v37 = vpack.c.bf16 %v4436_v14, %v4428_v23  ;;  %v4437_v33 = vld [vmem:[#allocation3 + $0x450] sm:$0xff]  ;;  %v4059_v60 = vrot.slane %v4041_v3, 4  ;;  %vm7663_vm2 = vcmask 80896  }
 0x375   : > { %3098 = vst [vmem:[#allocation3 + $0x440] sm:$0xf] %v3082_v49  ;;  %3942 = vrot.lane.b32.xlu1 %v3931_v29, %s7657_s27  ;;  %v5499_v27 = vpack.c.bf16 %v4437_v33, %v4429_v5  ;;  %v4060_v29 = vrot.slane %v4042_v24, 4  ;;  %v4043_v23 = vld [vmem:[#allocation2 + $0x20] sm:$0xf0] }
 0x376   : > { %v3125_v58 = vpop.permute.xlu0 %3124  ;;  %5446 = vmatprep.subr.bf16.mxu0 %v5445_v37  ;;  %v4061_v37 = vrot.slane %v4043_v23, 4 }
 0x377   : > { %v3142_v17 = vsel %vm7658_vm8, %v3125_v58, %v3127_v34  ;;  %v6953_v54 = vpop.permute.xlu1 %3195  ;;  %v4438_v59 = vld [vmem:[#allocation3 + $0x458] sm:$0xff]  ;;  %vm7664_vm8 = vmmov %vm7663_vm2 }
 0x378   : > { %3158 = vst [vmem:[#allocation3 + $0x440] sm:$0xf0] %v3142_v17  ;;  %3944 = vrot.lane.b32.xlu0 %v3932_v46, %s7657_s27  ;;  %v5497_v11 = vpack.c.bf16 %v4438_v59, %v4430_v41  ;;  %v4062_v46 = vrot.slane %v4044_v8, 4  ;;  %v4110_v41 = vld [vmem:[#allocation2 + $0x10] sm:$0xf0] }
 0x379   : > { %3946 = vrot.lane.b32.xlu1 %v3933_v30, %s7657_s27 }
 0x37a   : > { %v3198_v50 = vpop.permute.xlu0 %3197  ;;  %5498 = vmatprep.subr.bf16.mxu1 %v5497_v11  ;;  %v4111_v11 = vld [vmem:[#allocation2 + $0x18] sm:$0xf0] }
 0x37b   : > { %v3212_v36 = vsel %vm7659_vm0, %v6953_v54, %v3198_v50  ;;  %5500 = vmatpush1.bf16.msra.mxu1 %v5499_v27  ;;  %v3200_v34 = vpop.permute.xlu1 %3199  ;;  %v4427_v45 = vld [vmem:[#allocation3 + $0x400] sm:$0xff]  ;;  %vm7665_vm0 = vmmov %vm7663_vm2 }
 0x37c   : > { %3228 = vst [vmem:[#allocation3 + $0x488] sm:$0xf] %v3212_v36  ;;  %v3213_v52 = vsel %vm7660_vm4, %v3198_v50, %v3200_v34  ;;  %4000 = vrot.lane.b32.xlu0 %v3981_v48, %s7661_s8  ;;  %vm7666_vm4 = vcmask 72704   ;;  %v4112_v36 = vld [vmem:[#allocation2 + $0x20] sm:$0xf0] }
 0x37d   : > { %3229 = vst [vmem:[#allocation3 + $0x490] sm:$0xf] %v3213_v52  ;;  %4002 = vrot.lane.b32.xlu1 %v3982_v4, %s7661_s8  ;;  %v4113_v48 = vld [vmem:[#allocation2 + $0x28] sm:$0xf0] }
 0x37e   : > { %v6962_v42 = vpop.permute.xlu0 %3201 }
 0x37f   : > { %v3214_v40 = vsel %vm7662_vm9, %v3200_v34, %v6962_v42  ;;  %v6966_v53 = vpop.permute.xlu1 %3255  ;;  %v4435_v35 = vld [vmem:[#allocation3 + $0x440] sm:$0xff]  ;;  %vm7667_vm9 = vmmov %vm7666_vm4  ;;  %v3911_v34 = vld [vmem:[#allocation2 + $0x8] sm:$0xf0] }
 0x380   : > { %3230 = vst [vmem:[#allocation3 + $0x498] sm:$0xf] %v3214_v40  ;;  %4004 = vrot.lane.b32.xlu0 %v3983_v61, %s7661_s8  ;;  %v5447_v0 = vpack.c.bf16 %v4435_v35, %v4427_v45  ;;  %v3929_v4 = vrot.slane %v3911_v34, 4  ;;  %v4040_v61 = vld [vmem:[#allocation2 + $0x8] sm:$0xf0] }
 0x381   : > { %4006 = vrot.lane.b32.xlu1 %v3984_v18, %s7661_s8  ;;  %v3980_v35 = vld [vmem:[#allocation2 + $0x8] sm:$0xf0] }
 0x382   : > { %v3258_v43 = vpop.permute.xlu0 %3257  ;;  %5448 = vmatpush1.bf16.msra.mxu0 %v5447_v0  ;;  %v4058_v0 = vrot.slane %v4040_v61, 4 }
 0x383   : > { %v3272_v13 = vsel %vm7663_vm2, %v6966_v53, %v3258_v43  ;;  %v3260_v25 = vpop.permute.xlu1 %3259  ;;  %vm7668_vm2 = vmmov %vm7666_vm4 }
 0x384   : > { %3288 = vst [vmem:[#allocation3 + $0x488] sm:$0xf0] %v3272_v13  ;;  %v3273_v14 = vsel %vm7664_vm8, %v3258_v43, %v3260_v25  ;;  %4069 = vrot.lane.b32.xlu0 %v4059_v60, %s7575_s17  ;;  %v4170_v60 = vld [vmem:[#allocation2 + $0x10] sm:$0xf0]  ;;  %vm7669_vm8 = vcmask 89088  }
 0x385   : > { %3289 = vst [vmem:[#allocation3 + $0x490] sm:$0xf0] %v3273_v14  ;;  %4071 = vrot.lane.b32.xlu1 %v4060_v29, %s7575_s17  ;;  %v4171_v29 = vld [vmem:[#allocation2 + $0x18] sm:$0xf0]  ;;  %v4188_v14 = vrot.slane %v4170_v60, 4 }
 0x386   : > { %v6975_v49 = vpop.permute.xlu0 %3261 }
 0x387   : > { %v3274_v20 = vsel %vm7665_vm0, %v3260_v25, %v6975_v49  ;;  %v3325_v58 = vpop.permute.xlu1 %3324  ;;  %v4109_v25 = vld [vmem:[#allocation2 + $0x8] sm:$0xf0] }
 0x388   : > { %3290 = vst [vmem:[#allocation3 + $0x498] sm:$0xf0] %v3274_v20  ;;  %4073 = vrot.lane.b32.xlu0 %v4061_v37, %s7575_s17  ;;  %v4189_v20 = vrot.slane %v4171_v29, 4 }
 0x389   : > { %4075 = vrot.lane.b32.xlu1 %v4062_v46, %s7575_s17 }
 0x38a   : > { %v3327_v33 = vpop.permute.xlu0 %3326 }
 0x38b   : > { %v3341_v17 = vsel %vm7666_vm4, %v3325_v58, %v3327_v33  ;;  %v3329_v30 = vpop.permute.xlu1 %3328  ;;  %v4444_v46 = vld [vmem:[#allocation3 + $0x488] sm:$0xff]  ;;  %vm7670_vm4 = vmmov %vm7668_vm2 }
 0x38c   : > { %3357 = vst [vmem:[#allocation3 + $0x4c8] sm:$0xf] %v3341_v17  ;;  %v3342_v59 = vsel %vm7667_vm9, %v3327_v33, %v3329_v30  ;;  %4129 = vrot.lane.b32.xlu0 %v4110_v41, %s7576_s16  ;;  %v4172_v17 = vld [vmem:[#allocation2 + $0x20] sm:$0xf0]  ;;  %v4173_v41 = vld [vmem:[#allocation2 + $0x28] sm:$0xf0] }
 0x38d   : > { %3358 = vst [vmem:[#allocation3 + $0x4d0] sm:$0xf] %v3342_v59  ;;  %4131 = vrot.lane.b32.xlu1 %v4111_v11, %s7576_s16  ;;  %v4190_v11 = vrot.slane %v4172_v17, 4  ;;  %v4191_v34 = vrot.slane %v4173_v41, 4  ;;  %vm4523_vm9 = vcmask 719872  }
 0x38e   : > { %v6985_v5 = vpop.permute.xlu0 %3330  ;;  %v4238_v41 = vld [vmem:[#allocation2 + $0x8] sm:$0xf0] }
 0x38f   : > { %v3343_v27 = vsel %vm7668_vm2, %v3329_v30, %v6985_v5  ;;  %v3385_v50 = vpop.permute.xlu1 %3384  ;;  %vm7671_vm2 = vcmask 310272  }
 0x390   : > { %3359 = vst [vmem:[#allocation3 + $0x4d8] sm:$0xf] %v3343_v27  ;;  %4133 = vrot.lane.b32.xlu0 %v4112_v36, %s7576_s16 }
 0x391   : > { %4135 = vrot.lane.b32.xlu1 %v4113_v48, %s7576_s16  ;;  %v4446_v48 = vld [vmem:[#allocation3 + $0x498] sm:$0xff] }
 0x392   : > { %v3387_v52 = vpop.permute.xlu0 %3386 }
 0x393   : > { %v3401_v3 = vsel %vm1157_vm12, %v3385_v50, %v3387_v52  ;;  %v3389_v40 = vpop.permute.xlu1 %3388 }
 0x394   : > { %3417 = vst [vmem:[#allocation3 + $0x4c8] sm:$0xf0] %v3401_v3  ;;  %v3402_v45 = vsel %vm1157_vm12, %v3387_v52, %v3389_v40  ;;  %3938 = vrot.lane.b32.xlu0 %v3929_v4, %s7657_s27  ;;  %v4445_v4 = vld [vmem:[#allocation3 + $0x490] sm:$0xff] }
 0x395   : > { %3418 = vst [vmem:[#allocation3 + $0x4d0] sm:$0xf0] %v3402_v45  ;;  %3998 = vrot.lane.b32.xlu1 %v3980_v35, %s7661_s8  ;;  %v4239_v45 = vld [vmem:[#allocation2 + $0x10] sm:$0xf0] }
 0x396   : > { %v6995_v18 = vpop.permute.xlu0 %3390 }
 0x397   : > { %v3403_v24 = vsel %vm1157_vm12, %v3389_v40, %v6995_v18  ;;  %v3194_v43 = vpop.permute.xlu1 %3193 }
 0x398   : > { %3419 = vst [vmem:[#allocation3 + $0x4d8] sm:$0xf0] %v3403_v24  ;;  %v3211_v13 = vsel %vm7669_vm8, %v3194_v43, %v6953_v54  ;;  %4067 = vrot.lane.b32.xlu0 %v4058_v0, %s7575_s17  ;;  %v4240_v0 = vld [vmem:[#allocation2 + $0x18] sm:$0xf0]  ;;  %v4169_v43 = vld [vmem:[#allocation2 + $0x8] sm:$0xf0]  ;;  %vm7672_vm8 = vmmov %vm7671_vm2 }
 0x399   : > { %3227 = vst [vmem:[#allocation3 + $0x480] sm:$0xf] %v3211_v13  ;;  %4127 = vrot.lane.b32.xlu1 %v4109_v25, %s7576_s16  ;;  %v4241_v25 = vld [vmem:[#allocation2 + $0x20] sm:$0xf0] }
 0x39a   : > { %v3254_v23 = vpop.permute.xlu0 %3253 }
 0x39b   : > { %v3271_v8 = vsel %vm7665_vm0, %v3254_v23, %v6966_v53  ;;  %v3323_v37 = vpop.permute.xlu1 %3322  ;;  %v4452_v33 = vld [vmem:[#allocation3 + $0x4c8] sm:$0xff]  ;;  %vm7673_vm0 = vmmov %vm7671_vm2 }
 0x39c   : > { %3287 = vst [vmem:[#allocation3 + $0x480] sm:$0xf0] %v3271_v8  ;;  %v3340_v54 = vsel %vm7670_vm4, %v3323_v37, %v3325_v58  ;;  %4198 = vrot.lane.b32.xlu0 %v4188_v14, %s7578_s18  ;;  %v5449_v30 = vpack.c.bf16 %v4452_v33, %v4444_v46  ;;  %v4453_v27 = vld [vmem:[#allocation3 + $0x4d0] sm:$0xff]  ;;  %v4242_v14 = vld [vmem:[#allocation2 + $0x28] sm:$0xf0]  ;;  %v7026_v37 = vld [vmem:[%s7441_s4] sm:$0xff] }
 0x39d   : > { %3356 = vst [vmem:[#allocation3 + $0x4c0] sm:$0xf] %v3340_v54  ;;  %4200 = vrot.lane.b32.xlu1 %v4189_v20, %s7578_s18  ;;  %v5503_v3 = vpack.c.bf16 %v4453_v27, %v4445_v4  ;;  %v7031_v20 = vcombine.high %v7026_v37, %v7026_v37  ;;  %v4187_v33 = vrot.slane %v4169_v43, 4  ;;  %v2597_v4 = vld [vmem:[#allocation2 + $0x38] sm:$0xf0]  ;;  %vm7674_vm4 = vmmov %vm7673_vm0 }
 0x39e   : > { %v3383_v59 = vpop.permute.xlu0 %3382  ;;  %5450 = vmatprep.subr.bf16.mxu0 %v5449_v30 }
 0x39f   : > { %v3400_v53 = vsel %vm1157_vm12, %v3383_v59, %v3385_v50  ;;  %v7009_v36 = vpop.permute.xlu1 %3484  ;;  %v4454_v52 = vld [vmem:[#allocation3 + $0x4d8] sm:$0xff]  ;;  %5274 = vmatprep.mubr.msk.f32.mxu1 %vm4523_vm9, %v7031_v20  ;;  %5273 = vmatprep.mubr.msk.f32.mxu0 %vm4523_vm9, %v7031_v20 }
 0x3a0   : > { %3416 = vst [vmem:[#allocation3 + $0x4c0] sm:$0xf0] %v3400_v53  ;;  %4202 = vrot.lane.b32.xlu0 %v4190_v11, %s7578_s18  ;;  %v5501_v58 = vpack.c.bf16 %v4454_v52, %v4446_v48  ;;  %v2595_v53 = vld [vmem:[#allocation2 + $0x28] sm:$0xf0] }
 0x3a1   : > { %4204 = vrot.lane.b32.xlu1 %v4191_v34, %s7578_s18  ;;  %v2596_v34 = vld [vmem:[#allocation2 + $0x30] sm:$0xf0] }
 0x3a2   : > { %v3487_v40 = vpop.permute.xlu0 %3486  ;;  %5502 = vmatprep.subr.bf16.mxu1 %v5501_v58 }
 0x3a3   : > { %v3501_v61 = vsel %vm1258_vm13, %v7009_v36, %v3487_v40  ;;  %5504 = vmatpush1.bf16.msra.mxu1 %v5503_v3  ;;  %v3489_v50 = vpop.permute.xlu1 %3488  ;;  %v4443_v29 = vld [vmem:[#allocation3 + $0x480] sm:$0xff]  ;;  %v2655_v3 = vld [vmem:[#allocation2 + $0x28] sm:$0xf0] }
 0x3a4   : > { %3517 = vst [vmem:[#allocation3 + $0x508] sm:$0xf0] %v3501_v61  ;;  %v3502_v35 = vsel %vm1258_vm13, %v3487_v40, %v3489_v50  ;;  %4258 = vrot.lane.b32.xlu0 %v4239_v45, %s7581_s25  ;;  %v2598_v61 = vld [vmem:[#allocation2 + $0x40] sm:$0xf0] }
 0x3a5   : > { %3518 = vst [vmem:[#allocation3 + $0x510] sm:$0xf0] %v3502_v35  ;;  %4260 = vrot.lane.b32.xlu1 %v4240_v0, %s7581_s25  ;;  %v2673_v35 = vrot.slane %v2655_v3, 4 }
 0x3a6   : > { %v7018_v24 = vpop.permute.xlu0 %3490 }
 0x3a7   : > { %v3503_v60 = vsel %vm1258_vm13, %v3489_v50, %v7018_v24  ;;  %v3554_v13 = vpop.permute.xlu1 %3553  ;;  %v4451_v23 = vld [vmem:[#allocation3 + $0x4c0] sm:$0xff]  ;;  %v2656_v50 = vld [vmem:[#allocation2 + $0x30] sm:$0xf0] }
 0x3a8   : > { %3519 = vst [vmem:[#allocation3 + $0x518] sm:$0xf0] %v3503_v60  ;;  %4262 = vrot.lane.b32.xlu0 %v4241_v25, %s7581_s25  ;;  %v5451_v8 = vpack.c.bf16 %v4451_v23, %v4443_v29  ;;  %v2674_v60 = vrot.slane %v2656_v50, 4  ;;  %v2657_v25 = vld [vmem:[#allocation2 + $0x38] sm:$0xf0] }
 0x3a9   : > { %4264 = vrot.lane.b32.xlu1 %v4242_v14, %s7581_s25  ;;  %v2658_v23 = vld [vmem:[#allocation2 + $0x40] sm:$0xf0] }
 0x3aa   : > { %v3556_v46 = vpop.permute.xlu0 %3555  ;;  %5452 = vmatpush1.bf16.msra.mxu0 %v5451_v8  ;;  %v2675_v8 = vrot.slane %v2657_v25, 4 }
 0x3ab   : > { %v3570_v17 = vsel %vm1328_vm14, %v3554_v13, %v3556_v46  ;;  %v3558_v54 = vpop.permute.xlu1 %3557 }
 0x3ac   : > { %3586 = vst [vmem:[#allocation3 + $0x548] sm:$0xf] %v3570_v17  ;;  %v3571_v30 = vsel %vm1328_vm14, %v3556_v46, %v3558_v54  ;;  %4196 = vrot.lane.b32.xlu0 %v4187_v33, %s7578_s18  ;;  %v2676_v17 = vrot.slane %v2658_v23, 4  ;;  %v4461_v3 = vld [vmem:[#allocation3 + $0x510] sm:$0xff] }
 0x3ad   : > { %3587 = vst [vmem:[#allocation3 + $0x550] sm:$0xf] %v3571_v30  ;;  %4256 = vrot.lane.b32.xlu1 %v4238_v41, %s7581_s25 }
 0x3ae   : > { %v7041_v59 = vpop.permute.xlu0 %3559 }
 0x3af   : > { %v3572_v11 = vsel %vm1328_vm14, %v3558_v54, %v7041_v59  ;;  %v3614_v27 = vpop.permute.xlu1 %3613  ;;  %v4460_v54 = vld [vmem:[#allocation3 + $0x508] sm:$0xff] }
 0x3b0   : > { %3588 = vst [vmem:[#allocation3 + $0x558] sm:$0xf] %v3572_v11  ;;  %2618 = vrot.lane.b32.xlu0 %v2595_v53, %s7546_s29 }
 0x3b1   : > { %2620 = vrot.lane.b32.xlu1 %v2596_v34, %s7546_s29 }
 0x3b2   : > { %v3616_v48 = vpop.permute.xlu0 %3615 }
 0x3b3   : > { %v3630_v52 = vsel %vm1389_vm15, %v3614_v27, %v3616_v48  ;;  %v3618_v58 = vpop.permute.xlu1 %3617 }
 0x3b4   : > { %3646 = vst [vmem:[#allocation3 + $0x548] sm:$0xf0] %v3630_v52  ;;  %v3631_v40 = vsel %vm1389_vm15, %v3616_v48, %v3618_v58  ;;  %2622 = vrot.lane.b32.xlu0 %v2597_v4, %s7546_s29  ;;  %v2724_v48 = vld [vmem:[#allocation2 + $0x28] sm:$0xf0] }
 0x3b5   : > { %3647 = vst [vmem:[#allocation3 + $0x550] sm:$0xf0] %v3631_v40  ;;  %2624 = vrot.lane.b32.xlu1 %v2598_v61, %s7546_s29 }
 0x3b6   : > { %v7051_v45 = vpop.permute.xlu0 %3619 }
 0x3b7   : > { %v3632_v0 = vsel %vm1389_vm15, %v3618_v58, %v7051_v45  ;;  %v3483_v43 = vpop.permute.xlu1 %3482 }
 0x3b8   : > { %3648 = vst [vmem:[#allocation3 + $0x558] sm:$0xf0] %v3632_v0  ;;  %v3500_v29 = vsel %vm1258_vm13, %v3483_v43, %v7009_v36  ;;  %2687 = vrot.lane.b32.xlu0 %v2673_v35, %s7549_s9  ;;  %v2726_v0 = vld [vmem:[#allocation2 + $0x38] sm:$0xf0]  ;;  %v2784_v43 = vld [vmem:[#allocation2 + $0x28] sm:$0xf0] }
 0x3b9   : > { %3516 = vst [vmem:[#allocation3 + $0x500] sm:$0xf0] %v3500_v29  ;;  %2689 = vrot.lane.b32.xlu1 %v2674_v60, %s7549_s9  ;;  %v2785_v60 = vld [vmem:[#allocation2 + $0x30] sm:$0xf0]  ;;  %v2727_v29 = vld [vmem:[#allocation2 + $0x40] sm:$0xf0] }
 0x3ba   : > { %v3552_v14 = vpop.permute.xlu0 %3551 }
 0x3bb   : > { %v3569_v46 = vsel %vm1328_vm14, %v3552_v14, %v3554_v13  ;;  %v3612_v33 = vpop.permute.xlu1 %3611  ;;  %v4468_v30 = vld [vmem:[#allocation3 + $0x548] sm:$0xff]  ;;  %v4462_v13 = vld [vmem:[#allocation3 + $0x518] sm:$0xff] }
 0x3bc   : > { %3585 = vst [vmem:[#allocation3 + $0x540] sm:$0xf] %v3569_v46  ;;  %v3629_v41 = vsel %vm1389_vm15, %v3612_v33, %v3614_v27  ;;  %2691 = vrot.lane.b32.xlu0 %v2675_v8, %s7549_s9  ;;  %v5453_v36 = vpack.c.bf16 %v4468_v30, %v4460_v54  ;;  %v4469_v53 = vld [vmem:[#allocation3 + $0x550] sm:$0xff]  ;;  %v2802_v33 = vrot.slane %v2784_v43, 4  ;;  %v2803_v54 = vrot.slane %v2785_v60, 4 }
 0x3bd   : > { %3645 = vst [vmem:[#allocation3 + $0x540] sm:$0xf0] %v3629_v41  ;;  %2693 = vrot.lane.b32.xlu1 %v2676_v17, %s7549_s9  ;;  %v2725_v27 = vld [vmem:[#allocation2 + $0x30] sm:$0xf0]  ;;  %v5507_v40 = vpack.c.bf16 %v4469_v53, %v4461_v3  ;;  %v2786_v30 = vld [vmem:[#allocation2 + $0x38] sm:$0xf0] }
 0x3be   : > { %v7063_v11 = vpop.permute.xlu0 %3682  ;;  %5454 = vmatprep.subr.bf16.mxu0 %v5453_v36  ;;  %v2787_v36 = vld [vmem:[#allocation2 + $0x40] sm:$0xf0]  ;;  %v2853_v3 = vld [vmem:[#allocation2 + $0x28] sm:$0xf0]  ;;  %v2855_v60 = vld [vmem:[#allocation2 + $0x38] sm:$0xf0] }
 0x3bf   : > { %v3685_v34 = vpop.permute.xlu1 %3684  ;;  %v4470_v52 = vld [vmem:[#allocation3 + $0x558] sm:$0xff] }
 0x3c0   : > { %v3699_v58 = vsel %vm1459_vm3, %v7063_v11, %v3685_v34  ;;  %2747 = vrot.lane.b32.xlu0 %v2724_v48, %s7552_s21  ;;  %v5505_v4 = vpack.c.bf16 %v4470_v52, %v4462_v13  ;;  %v4459_v23 = vld [vmem:[#allocation3 + $0x500] sm:$0xff]  ;;  %v2805_v52 = vrot.slane %v2787_v36, 4 }
 0x3c1   : > { %3715 = vst [vmem:[#allocation3 + $0x588] sm:$0xf] %v3699_v58  ;;  %2749 = vrot.lane.b32.xlu1 %v2725_v27, %s7552_s21  ;;  %v2916_v36 = vld [vmem:[#allocation2 + $0x40] sm:$0xf0] }
 0x3c2   : > { %v3687_v61 = vpop.permute.xlu0 %3686  ;;  %5506 = vmatprep.subr.bf16.mxu1 %v5505_v4 }
 0x3c3   : > { %v3700_v50 = vsel %vm1459_vm3, %v3685_v34, %v3687_v61  ;;  %5508 = vmatpush1.bf16.msra.mxu1 %v5507_v40  ;;  %v7070_v35 = vpop.permute.xlu1 %3688  ;;  %v2804_v34 = vrot.slane %v2786_v30, 4  ;;  %v2915_v30 = vld [vmem:[#allocation2 + $0x38] sm:$0xf0] }
 0x3c4   : > { %3716 = vst [vmem:[#allocation3 + $0x590] sm:$0xf] %v3700_v50  ;;  %v3701_v25 = vsel %vm1459_vm3, %v3687_v61, %v7070_v35  ;;  %2751 = vrot.lane.b32.xlu0 %v2726_v0, %s7552_s21  ;;  %v4467_v14 = vld [vmem:[#allocation3 + $0x540] sm:$0xff]  ;;  %v2854_v61 = vld [vmem:[#allocation2 + $0x30] sm:$0xf0] }
 0x3c5   : > { %3717 = vst [vmem:[#allocation3 + $0x598] sm:$0xf] %v3701_v25  ;;  %2753 = vrot.lane.b32.xlu1 %v2727_v29, %s7552_s21  ;;  %v5455_v8 = vpack.c.bf16 %v4467_v14, %v4459_v23  ;;  %v2913_v25 = vld [vmem:[#allocation2 + $0x28] sm:$0xf0]  ;;  %v2856_v23 = vld [vmem:[#allocation2 + $0x40] sm:$0xf0] }
 0x3c6   : > { %v7076_v46 = vpop.permute.xlu0 %3742  ;;  %v2914_v14 = vld [vmem:[#allocation2 + $0x30] sm:$0xf0] }
 0x3c7   : > { %5456 = vmatpush1.bf16.msra.mxu0 %v5455_v8  ;;  %v3745_v17 = vpop.permute.xlu1 %3744 }
 0x3c8   : > { %v3759_v41 = vsel %vm1520_vm1, %v7076_v46, %v3745_v17  ;;  %2816 = vrot.lane.b32.xlu0 %v2802_v33, %s7555_s22  ;;  %v2931_v33 = vrot.slane %v2913_v25, 4 }
 0x3c9   : > { %3775 = vst [vmem:[#allocation3 + $0x588] sm:$0xf0] %v3759_v41  ;;  %2818 = vrot.lane.b32.xlu1 %v2803_v54, %s7555_s22  ;;  %v2932_v54 = vrot.slane %v2914_v14, 4 }
 0x3ca   : > { %v3747_v53 = vpop.permute.xlu0 %3746 }
 0x3cb   : > { %v3760_v48 = vsel %vm1520_vm1, %v3745_v17, %v3747_v53  ;;  %v7083_v13 = vpop.permute.xlu1 %3748 }
 0x3cc   : > { %3776 = vst [vmem:[#allocation3 + $0x590] sm:$0xf0] %v3760_v48  ;;  %v3761_v58 = vsel %vm1520_vm1, %v3747_v53, %v7083_v13  ;;  %2820 = vrot.lane.b32.xlu0 %v2804_v34, %s7555_s22  ;;  %v2933_v34 = vrot.slane %v2915_v30, 4 }
 0x3cd   : > { %3777 = vst [vmem:[#allocation3 + $0x598] sm:$0xf0] %v3761_v58  ;;  %2822 = vrot.lane.b32.xlu1 %v2805_v52, %s7555_s22  ;;  %v2934_v58 = vrot.slane %v2916_v36, 4  ;;  %v2985_v36 = vld [vmem:[#allocation2 + $0x40] sm:$0xf0] }
 0x3ce   : > { %v3812_v27 = vpop.permute.xlu0 %3811 }
 0x3cf   : > { %v3814_v4 = vpop.permute.xlu1 %3813 }
 0x3d0   : > { %v3828_v40 = vsel %vm7671_vm2, %v3812_v27, %v3814_v4  ;;  %2876 = vrot.lane.b32.xlu0 %v2853_v3, %s7530_s14  ;;  %v4476_v25 = vld [vmem:[#allocation3 + $0x588] sm:$0xff]  ;;  %vm7675_vm2 = vcmask 228352  }
 0x3d1   : > { %3844 = vst [vmem:[#allocation3 + $0x5c8] sm:$0xf] %v3828_v40  ;;  %2878 = vrot.lane.b32.xlu1 %v2854_v61, %s7530_s14 }
 0x3d2   : > { %v3816_v50 = vpop.permute.xlu0 %3815 }
 0x3d3   : > { %v3829_v0 = vsel %vm7672_vm8, %v3814_v4, %v3816_v50  ;;  %v7093_v43 = vpop.permute.xlu1 %3817  ;;  %vm7676_vm8 = vmmov %vm7675_vm2 }
 0x3d4   : > { %3845 = vst [vmem:[#allocation3 + $0x5d0] sm:$0xf] %v3829_v0  ;;  %v3830_v29 = vsel %vm7673_vm0, %v3816_v50, %v7093_v43  ;;  %2880 = vrot.lane.b32.xlu0 %v2855_v60, %s7530_s14  ;;  %v2982_v50 = vld [vmem:[#allocation2 + $0x28] sm:$0xf0]  ;;  %v2983_v60 = vld [vmem:[#allocation2 + $0x30] sm:$0xf0]  ;;  %vm7677_vm0 = vmmov %vm7675_vm2 }
 0x3d5   : > { %3846 = vst [vmem:[#allocation3 + $0x5d8] sm:$0xf] %v3830_v29  ;;  %2882 = vrot.lane.b32.xlu1 %v2856_v23, %s7530_s14  ;;  %s7751_s14 = sld [smem:[#allocation5_spill]] }
 0x3d6   : > { %v3872_v8 = vpop.permute.xlu0 %3871 }
 0x3d7   : > { %v3874_v17 = vpop.permute.xlu1 %3873 }
 0x3d8   : > { %v3888_v41 = vsel %vm1651_vm7, %v3872_v8, %v3874_v17  ;;  %2945 = vrot.lane.b32.xlu0 %v2931_v33, %s7531_s13  ;;  %v3042_v33 = vld [vmem:[#allocation2 + $0x28] sm:$0xf0] }
 0x3d9   : > { %3904 = vst [vmem:[#allocation3 + $0x5c8] sm:$0xf0] %v3888_v41  ;;  %2947 = vrot.lane.b32.xlu1 %v2932_v54, %s7531_s13  ;;  %v2984_v54 = vld [vmem:[#allocation2 + $0x38] sm:$0xf0]  ;;  %v3043_v41 = vld [vmem:[#allocation2 + $0x30] sm:$0xf0] }
 0x3da   : > { %v3876_v53 = vpop.permute.xlu0 %3875 }
 0x3db   : > { %v3889_v48 = vsel %vm1651_vm7, %v3874_v17, %v3876_v53  ;;  %v7103_v52 = vpop.permute.xlu1 %3877 }
 0x3dc   : > { %3905 = vst [vmem:[#allocation3 + $0x5d0] sm:$0xf0] %v3889_v48  ;;  %v3890_v4 = vsel %vm1651_vm7, %v3876_v53, %v7103_v52  ;;  %2949 = vrot.lane.b32.xlu0 %v2933_v34, %s7531_s13  ;;  %v4478_v53 = vld [vmem:[#allocation3 + $0x598] sm:$0xff] }
 0x3dd   : > { %3906 = vst [vmem:[#allocation3 + $0x5d8] sm:$0xf0] %v3890_v4  ;;  %2951 = vrot.lane.b32.xlu1 %v2934_v58, %s7531_s13  ;;  %v4477_v58 = vld [vmem:[#allocation3 + $0x590] sm:$0xff]  ;;  %s7750_s13 = sld [smem:[#allocation12_spill]] }
 0x3de   : > { %v3681_v3 = vpop.permute.xlu0 %3680 }
 0x3df   : > { %v3698_v40 = vsel %vm1459_vm3, %v3681_v3, %v7063_v11  ;;  %v3741_v61 = vpop.permute.xlu1 %3740 }
 0x3e0   : > { %3714 = vst [vmem:[#allocation3 + $0x580] sm:$0xf] %v3698_v40  ;;  %v3758_v0 = vsel %vm1520_vm1, %v3741_v61, %v7076_v46  ;;  %3005 = vrot.lane.b32.xlu0 %v2982_v50, %s7532_s12  ;;  %v4484_v29 = vld [vmem:[#allocation3 + $0x5c8] sm:$0xff]  ;;  %v3061_v61 = vrot.slane %v3043_v41, 4  ;;  %v3044_v50 = vld [vmem:[#allocation2 + $0x38] sm:$0xf0] }
 0x3e1   : > { %3774 = vst [vmem:[#allocation3 + $0x580] sm:$0xf0] %v3758_v0  ;;  %3007 = vrot.lane.b32.xlu1 %v2983_v60, %s7532_s12  ;;  %v5457_v23 = vpack.c.bf16 %v4484_v29, %v4476_v25  ;;  %v3045_v0 = vld [vmem:[#allocation2 + $0x40] sm:$0xf0]  ;;  %v3062_v25 = vrot.slane %v3044_v50, 4 }
 0x3e2   : > { %v3810_v14 = vpop.permute.xlu0 %3809  ;;  %v3172_v50 = vld [vmem:[#allocation2 + $0x30] sm:$0xf0] }
 0x3e3   : > { %v3827_v17 = vsel %vm7674_vm4, %v3810_v14, %v3812_v27  ;;  %5458 = vmatprep.subr.bf16.mxu0 %v5457_v23  ;;  %v3870_v11 = vpop.permute.xlu1 %3869  ;;  %v4485_v30 = vld [vmem:[#allocation3 + $0x5d0] sm:$0xff]  ;;  %v3060_v27 = vrot.slane %v3042_v33, 4  ;;  %v3063_v14 = vrot.slane %v3045_v0, 4  ;;  %vm7678_vm4 = vcmask 220160  }
 0x3e4   : > { %3843 = vst [vmem:[#allocation3 + $0x5c0] sm:$0xf] %v3827_v17  ;;  %v3887_v46 = vsel %vm1651_vm7, %v3870_v11, %v3872_v8  ;;  %3009 = vrot.lane.b32.xlu0 %v2984_v54, %s7532_s12  ;;  %v4486_v34 = vld [vmem:[#allocation3 + $0x5d8] sm:$0xff]  ;;  %v5511_v3 = vpack.c.bf16 %v4485_v30, %v4477_v58 }
 0x3e5   : > { %3903 = vst [vmem:[#allocation3 + $0x5c0] sm:$0xf0] %v3887_v46  ;;  %3011 = vrot.lane.b32.xlu1 %v2985_v36, %s7532_s12  ;;  %v5509_v48 = vpack.c.bf16 %v4486_v34, %v4478_v53  ;;  %v3111_v46 = vld [vmem:[#allocation2 + $0x28] sm:$0xf0]  ;;  %v3112_v53 = vld [vmem:[#allocation2 + $0x30] sm:$0xf0] }
 0x3e6   : > { %v7119_v4 = vpop.permute.xlu0 %3940 }
 0x3e7   : > { %5510 = vmatprep.subr.bf16.mxu1 %v5509_v48  ;;  %v3943_v40 = vpop.permute.xlu1 %3942 }
 0x3e8   : > { %v3957_v8 = vsel %vm1721_vm6, %v7119_v4, %v3943_v40  ;;  %3074 = vrot.lane.b32.xlu0 %v3060_v27, %s7533_s11  ;;  %5512 = vmatpush1.bf16.msra.mxu1 %v5511_v3  ;;  %v4475_v17 = vld [vmem:[#allocation3 + $0x580] sm:$0xff]  ;;  %v3113_v27 = vld [vmem:[#allocation2 + $0x38] sm:$0xf0]  ;;  %v3171_v3 = vld [vmem:[#allocation2 + $0x28] sm:$0xf0] }
 0x3e9   : > { %3973 = vst [vmem:[#allocation3 + $0x608] sm:$0xf] %v3957_v8  ;;  %3076 = vrot.lane.b32.xlu1 %v3061_v61, %s7533_s11  ;;  %v3114_v61 = vld [vmem:[#allocation2 + $0x40] sm:$0xf0]  ;;  %v3189_v0 = vrot.slane %v3171_v3, 4 }
 0x3ea   : > { %v3945_v60 = vpop.permute.xlu0 %3944  ;;  %v3241_v3 = vld [vmem:[#allocation2 + $0x30] sm:$0xf0] }
 0x3eb   : > { %v3958_v29 = vsel %vm1721_vm6, %v3943_v40, %v3945_v60  ;;  %v7126_v23 = vpop.permute.xlu1 %3946 }
 0x3ec   : > { %3974 = vst [vmem:[#allocation3 + $0x610] sm:$0xf] %v3958_v29  ;;  %v3959_v33 = vsel %vm1721_vm6, %v3945_v60, %v7126_v23  ;;  %3078 = vrot.lane.b32.xlu0 %v3062_v25, %s7533_s11  ;;  %v4483_v11 = vld [vmem:[#allocation3 + $0x5c0] sm:$0xff]  ;;  %v3190_v25 = vrot.slane %v3172_v50, 4  ;;  %v3173_v29 = vld [vmem:[#allocation2 + $0x38] sm:$0xf0] }
 0x3ed   : > { %3975 = vst [vmem:[#allocation3 + $0x618] sm:$0xf] %v3959_v33  ;;  %3080 = vrot.lane.b32.xlu1 %v3063_v14, %s7533_s11  ;;  %v5459_v54 = vpack.c.bf16 %v4483_v11, %v4475_v17  ;;  %v3174_v33 = vld [vmem:[#allocation2 + $0x40] sm:$0xf0]  ;;  %v3191_v11 = vrot.slane %v3173_v29, 4 }
 0x3ee   : > { %v7132_v30 = vpop.permute.xlu0 %4000  ;;  %v3243_v29 = vld [vmem:[#allocation2 + $0x40] sm:$0xf0] }
 0x3ef   : > { %5460 = vmatpush1.bf16.msra.mxu0 %v5459_v54  ;;  %v4003_v41 = vpop.permute.xlu1 %4002 }
 0x3f0   : > { %v4017_v36 = vsel %vm7675_vm2, %v7132_v30, %v4003_v41  ;;  %3134 = vrot.lane.b32.xlu0 %v3111_v46, %s7562_s10  ;;  %vm7679_vm2 = vmmov %vm7678_vm4  ;;  %v3192_v46 = vrot.slane %v3174_v33, 4 }
 0x3f1   : > { %4033 = vst [vmem:[#allocation3 + $0x608] sm:$0xf0] %v4017_v36  ;;  %3136 = vrot.lane.b32.xlu1 %v3112_v53, %s7562_s10 }
 0x3f2   : > { %v4005_v34 = vpop.permute.xlu0 %4004 }
 0x3f3   : > { %v4018_v48 = vsel %vm7676_vm8, %v4003_v41, %v4005_v34  ;;  %v7139_v58 = vpop.permute.xlu1 %4006  ;;  %vm7680_vm8 = vmmov %vm7679_vm2 }
 0x3f4   : > { %4034 = vst [vmem:[#allocation3 + $0x610] sm:$0xf0] %v4018_v48  ;;  %v4019_v40 = vsel %vm7677_vm0, %v4005_v34, %v7139_v58  ;;  %3138 = vrot.lane.b32.xlu0 %v3113_v27, %s7562_s10  ;;  %v3240_v48 = vld [vmem:[#allocation2 + $0x28] sm:$0xf0] }
 0x3f5   : > { %4035 = vst [vmem:[#allocation3 + $0x618] sm:$0xf0] %v4019_v40  ;;  %3140 = vrot.lane.b32.xlu1 %v3114_v61, %s7562_s10 }
 0x3f6   : > { %v4070_v8 = vpop.permute.xlu0 %4069 }
 0x3f7   : > { %v4072_v60 = vpop.permute.xlu1 %4071 }
 0x3f8   : > { %v4086_v14 = vsel %vm7678_vm4, %v4070_v8, %v4072_v60  ;;  %3203 = vrot.lane.b32.xlu0 %v3189_v0, %s7565_s15  ;;  %v3242_v0 = vld [vmem:[#allocation2 + $0x38] sm:$0xf0]  ;;  %vm7681_vm4 = vmmov %vm7679_vm2 }
 0x3f9   : > { %4102 = vst [vmem:[#allocation3 + $0x648] sm:$0xf] %v4086_v14  ;;  %3205 = vrot.lane.b32.xlu1 %v3190_v25, %s7565_s15  ;;  %v3301_v14 = vld [vmem:[#allocation2 + $0x30] sm:$0xf0] }
 0x3fa   : > { %v4074_v17 = vpop.permute.xlu0 %4073 }
 0x3fb   : > { %v4087_v54 = vsel %vm7679_vm2, %v4072_v60, %v4074_v17  ;;  %v7149_v41 = vpop.permute.xlu1 %4075  ;;  %v3300_v60 = vld [vmem:[#allocation2 + $0x28] sm:$0xf0]  ;;  %vm7682_vm2 = vcmask 138240  }
 0x3fc   : > { %4103 = vst [vmem:[#allocation3 + $0x650] sm:$0xf] %v4087_v54  ;;  %v4088_v36 = vsel %vm7680_vm8, %v4074_v17, %v7149_v41  ;;  %3207 = vrot.lane.b32.xlu0 %v3191_v11, %s7565_s15  ;;  %v3318_v17 = vrot.slane %v3300_v60, 4  ;;  %vm7683_vm8 = vmmov %vm7682_vm2 }
 0x3fd   : > { %4104 = vst [vmem:[#allocation3 + $0x658] sm:$0xf] %v4088_v36  ;;  %3209 = vrot.lane.b32.xlu1 %v3192_v46, %s7565_s15  ;;  %v3319_v46 = vrot.slane %v3301_v14, 4  ;;  %v3302_v36 = vld [vmem:[#allocation2 + $0x38] sm:$0xf0]  ;;  %s7752_s15 = sshll.u32 %s7751_s14, 5 }
 0x3fe   : > { %v4130_v53 = vpop.permute.xlu0 %4129  ;;  %v4494_v14 = vld [vmem:[#allocation3 + $0x618] sm:$0xff] }
 0x3ff   : > { %v4132_v34 = vpop.permute.xlu1 %4131 }
 0x400   : > { %v4146_v27 = vsel %vm1913_vm11, %v4130_v53, %v4132_v34  ;;  %3263 = vrot.lane.b32.xlu0 %v3240_v48, %s7534_s19  ;;  %v4492_v48 = vld [vmem:[#allocation3 + $0x608] sm:$0xff] }
 0x401   : > { %4162 = vst [vmem:[#allocation3 + $0x648] sm:$0xf0] %v4146_v27  ;;  %3265 = vrot.lane.b32.xlu1 %v3241_v3, %s7534_s19  ;;  %v3303_v3 = vld [vmem:[#allocation2 + $0x40] sm:$0xf0] }
 0x402   : > { %v4134_v40 = vpop.permute.xlu0 %4133 }
 0x403   : > { %v4147_v61 = vsel %vm1913_vm11, %v4132_v34, %v4134_v40  ;;  %v7159_v50 = vpop.permute.xlu1 %4135 }
 0x404   : > { %4163 = vst [vmem:[#allocation3 + $0x650] sm:$0xf0] %v4147_v61  ;;  %v4148_v25 = vsel %vm1913_vm11, %v4134_v40, %v7159_v50  ;;  %3267 = vrot.lane.b32.xlu0 %v3242_v0, %s7534_s19  ;;  %v3320_v0 = vrot.slane %v3302_v36, 4  ;;  %v3369_v36 = vld [vmem:[#allocation2 + $0x28] sm:$0xf0] }
 0x405   : > { %4164 = vst [vmem:[#allocation3 + $0x658] sm:$0xf0] %v4148_v25  ;;  %3269 = vrot.lane.b32.xlu1 %v3243_v29, %s7534_s19  ;;  %v3321_v25 = vrot.slane %v3303_v3, 4 }
 0x406   : > { %v3939_v33 = vpop.permute.xlu0 %3938 }
 0x407   : > { %v3956_v11 = vsel %vm1721_vm6, %v3939_v33, %v7119_v4  ;;  %v3999_v54 = vpop.permute.xlu1 %3998 }
 0x408   : > { %3972 = vst [vmem:[#allocation3 + $0x600] sm:$0xf] %v3956_v11  ;;  %v4016_v34 = vsel %vm7677_vm0, %v3999_v54, %v7132_v30  ;;  %3332 = vrot.lane.b32.xlu0 %v3318_v17, %s7535_s20  ;;  %v4500_v27 = vld [vmem:[#allocation3 + $0x648] sm:$0xff]  ;;  %v4493_v11 = vld [vmem:[#allocation3 + $0x610] sm:$0xff]  ;;  %vm7684_vm0 = vmmov %vm7682_vm2 }
 0x409   : > { %4032 = vst [vmem:[#allocation3 + $0x600] sm:$0xf0] %v4016_v34  ;;  %3334 = vrot.lane.b32.xlu1 %v3319_v46, %s7535_s20  ;;  %v5461_v40 = vpack.c.bf16 %v4500_v27, %v4492_v48 }
 0x40a   : > { %v4068_v61 = vpop.permute.xlu0 %4067 }
 0x40b   : > { %v4085_v4 = vsel %vm7681_vm4, %v4068_v61, %v4070_v8  ;;  %5462 = vmatprep.subr.bf16.mxu0 %v5461_v40  ;;  %v4128_v60 = vpop.permute.xlu1 %4127  ;;  %v4501_v29 = vld [vmem:[#allocation3 + $0x650] sm:$0xff]  ;;  %v3371_v40 = vld [vmem:[#allocation2 + $0x38] sm:$0xf0]  ;;  %vm7685_vm4 = vmmov %vm7684_vm0 }
 0x40c   : > { %4101 = vst [vmem:[#allocation3 + $0x640] sm:$0xf] %v4085_v4  ;;  %v4145_v30 = vsel %vm1913_vm11, %v4128_v60, %v4130_v53  ;;  %3336 = vrot.lane.b32.xlu0 %v3320_v0, %s7535_s20  ;;  %v4502_v33 = vld [vmem:[#allocation3 + $0x658] sm:$0xff]  ;;  %v5515_v46 = vpack.c.bf16 %v4501_v29, %v4493_v11  ;;  %v3370_v53 = vld [vmem:[#allocation2 + $0x30] sm:$0xf0] }
 0x40d   : > { %4161 = vst [vmem:[#allocation3 + $0x640] sm:$0xf0] %v4145_v30  ;;  %3338 = vrot.lane.b32.xlu1 %v3321_v25, %s7535_s20  ;;  %v5513_v17 = vpack.c.bf16 %v4502_v33, %v4494_v14  ;;  %v3372_v0 = vld [vmem:[#allocation2 + $0x40] sm:$0xf0]  ;;  %v3469_v14 = vld [vmem:[#allocation2 + $0x30] sm:$0xf0] }
 0x40e   : > { %v4199_v54 = vpop.permute.xlu0 %4198 }
 0x40f   : > { %5514 = vmatprep.subr.bf16.mxu1 %v5513_v17  ;;  %v4201_v8 = vpop.permute.xlu1 %4200  ;;  %v3470_v17 = vld [vmem:[#allocation2 + $0x38] sm:$0xf0] }
 0x410   : > { %v4215_v34 = vsel %vm1983_vm10, %v4199_v54, %v4201_v8  ;;  %3392 = vrot.lane.b32.xlu0 %v3369_v36, %s7619_s1  ;;  %5516 = vmatpush1.bf16.msra.mxu1 %v5515_v46  ;;  %v4491_v4 = vld [vmem:[#allocation3 + $0x600] sm:$0xff]  ;;  %v3472_v46 = vld [vmem:[#allocation2 + $0x48] sm:$0xf0] }
 0x411   : > { %4231 = vst [vmem:[#allocation3 + $0x688] sm:$0xf] %v4215_v34  ;;  %3394 = vrot.lane.b32.xlu1 %v3370_v53, %s7619_s1  ;;  %v3471_v34 = vld [vmem:[#allocation2 + $0x40] sm:$0xf0]  ;;  %v3529_v53 = vld [vmem:[#allocation2 + $0x30] sm:$0xf0] }
 0x412   : > { %v4203_v48 = vpop.permute.xlu0 %4202 }
 0x413   : > { %v4216_v27 = vsel %vm1983_vm10, %v4201_v8, %v4203_v48  ;;  %v7179_v3 = vpop.permute.xlu1 %4204 }
 0x414   : > { %4232 = vst [vmem:[#allocation3 + $0x690] sm:$0xf] %v4216_v27  ;;  %v4217_v61 = vsel %vm1983_vm10, %v4203_v48, %v7179_v3  ;;  %3396 = vrot.lane.b32.xlu0 %v3371_v40, %s7619_s1  ;;  %v4499_v60 = vld [vmem:[#allocation3 + $0x640] sm:$0xff]  ;;  %v3530_v27 = vld [vmem:[#allocation2 + $0x38] sm:$0xf0] }
 0x415   : > { %4233 = vst [vmem:[#allocation3 + $0x698] sm:$0xf] %v4217_v61  ;;  %3398 = vrot.lane.b32.xlu1 %v3372_v0, %s7619_s1  ;;  %v5463_v25 = vpack.c.bf16 %v4499_v60, %v4491_v4  ;;  %v3547_v61 = vrot.slane %v3529_v53, 4  ;;  %v3532_v0 = vld [vmem:[#allocation2 + $0x48] sm:$0xf0] }
 0x416   : > { %v4259_v29 = vpop.permute.xlu0 %4258 }
 0x417   : > { %5464 = vmatpush1.bf16.msra.mxu0 %v5463_v25  ;;  %v4261_v30 = vpop.permute.xlu1 %4260  ;;  %v3548_v25 = vrot.slane %v3530_v27, 4 }
 0x418   : > { %v4275_v33 = vsel %vm7682_vm2, %v4259_v29, %v4261_v30  ;;  %3492 = vrot.lane.b32.xlu0 %v3469_v14, %s7622_s3  ;;  %vm7686_vm2 = vcmask 908288  }
 0x419   : > { %4291 = vst [vmem:[#allocation3 + $0x688] sm:$0xf0] %v4275_v33  ;;  %3494 = vrot.lane.b32.xlu1 %v3470_v17, %s7622_s3  ;;  %v3550_v17 = vrot.slane %v3532_v0, 4 }
 0x41a   : > { %v4263_v11 = vpop.permute.xlu0 %4262 }
 0x41b   : > { %v4276_v8 = vsel %vm7683_vm8, %v4261_v30, %v4263_v11  ;;  %v7189_v36 = vpop.permute.xlu1 %4264  ;;  %v3531_v30 = vld [vmem:[#allocation2 + $0x40] sm:$0xf0]  ;;  %vm7687_vm8 = vmmov %vm7686_vm2 }
 0x41c   : > { %4292 = vst [vmem:[#allocation3 + $0x690] sm:$0xf0] %v4276_v8  ;;  %v4277_v48 = vsel %vm7684_vm0, %v4263_v11, %v7189_v36  ;;  %3496 = vrot.lane.b32.xlu0 %v3471_v34, %s7622_s3  ;;  %v4306_v8 = vld [vmem:[#allocation3 + $0x38] sm:$0xff]  ;;  %vm7688_vm0 = vmmov %vm7686_vm2 }
 0x41d   : > { %4293 = vst [vmem:[#allocation3 + $0x698] sm:$0xf0] %v4277_v48  ;;  %3498 = vrot.lane.b32.xlu1 %v3472_v46, %s7622_s3  ;;  %v3549_v46 = vrot.slane %v3531_v30, 4  ;;  %v4314_v34 = vld [vmem:[#allocation3 + $0x78] sm:$0xff]  ;;  %v4313_v48 = vld [vmem:[#allocation3 + $0x70] sm:$0xff] }
 0x41e   : > { %v4197_v40 = vpop.permute.xlu0 %4196 }
 0x41f   : > { %v4214_v4 = vsel %vm1983_vm10, %v4197_v40, %v4199_v54  ;;  %v4257_v60 = vpop.permute.xlu1 %4256  ;;  %v4305_v40 = vld [vmem:[#allocation3 + $0x30] sm:$0xff] }
 0x420   : > { %4230 = vst [vmem:[#allocation3 + $0x680] sm:$0xf] %v4214_v4  ;;  %v4274_v14 = vsel %vm7685_vm4, %v4257_v60, %v4259_v29  ;;  %3561 = vrot.lane.b32.xlu0 %v3547_v61, %s7627_s23  ;;  %v4508_v33 = vld [vmem:[#allocation3 + $0x688] sm:$0xff]  ;;  %v5569_v4 = vpack.c.bf16 %v4314_v34, %v4306_v8  ;;  %v4322_v60 = vld [vmem:[#allocation3 + $0xb8] sm:$0xff]  ;;  %vm7689_vm4 = vmmov %vm7688_vm0 }
 0x421   : > { %4290 = vst [vmem:[#allocation3 + $0x680] sm:$0xf0] %v4274_v14  ;;  %3563 = vrot.lane.b32.xlu1 %v3548_v25, %s7627_s23  ;;  %4578 = vmatprep.subr.mxu0 %v4508_v33  ;;  %v4312_v61 = vld [vmem:[#allocation3 + $0x68] sm:$0xff]  ;;  %v4330_v25 = vld [vmem:[#allocation3 + $0xf8] sm:$0xff] }
 0x422   : > { %v2619_v11 = vpop.permute.xlu0 %2618  ;;  %v4304_v14 = vld [vmem:[#allocation3 + $0x28] sm:$0xff]  ;;  %v3599_v8 = vld [vmem:[#allocation2 + $0x38] sm:$0xf0] }
 0x423   : > { %v2630_v54 = vsel %vm7686_vm2, %v6832_v44, %v2619_v11  ;;  %v2621_v53 = vpop.permute.xlu1 %2620  ;;  %v4509_v0 = vld [vmem:[#allocation3 + $0x690] sm:$0xff]  ;;  %v5571_v44 = vpack.c.bf16 %v4313_v48, %v4305_v40  ;;  %v5517_v48 = vpack.c.bf16 %v4312_v61, %v4304_v14  ;;  %vm7690_vm2 = vcmask 900096  }
 0x424   : > { %2646 = vst [vmem:[#allocation3 + $0x360] sm:$0xf0] %v2630_v54  ;;  %v2631_v29 = vsel %vm7687_vm8, %v2619_v11, %v2621_v53  ;;  %3565 = vrot.lane.b32.xlu0 %v3549_v46, %s7627_s23  ;;  %v4510_v27 = vld [vmem:[#allocation3 + $0x698] sm:$0xff]  ;;  %v3598_v46 = vld [vmem:[#allocation2 + $0x30] sm:$0xf0]  ;;  %v4311_v54 = vld [vmem:[#allocation3 + $0x60] sm:$0xff] }
 0x425   : > { %2647 = vst [vmem:[#allocation3 + $0x368] sm:$0xf0] %v2631_v29  ;;  %3567 = vrot.lane.b32.xlu1 %v3550_v17, %s7627_s23  ;;  %4649 = vmatprep.subr.mxu1 %v4510_v27  ;;  %v4328_v29 = vld [vmem:[#allocation3 + $0xe8] sm:$0xff]  ;;  %v5573_v27 = vpack.c.bf16 %v4330_v25, %v4322_v60  ;;  %v4329_v40 = vld [vmem:[#allocation3 + $0xf0] sm:$0xff]  ;;  %v3600_v60 = vld [vmem:[#allocation2 + $0x40] sm:$0xf0] }
 0x426   : > { %v2623_v30 = vpop.permute.xlu0 %2622  ;;  %4650 = vmatpush1.msra.mxu1 %v4509_v0  ;;  %v4338_v0 = vld [vmem:[#allocation3 + $0x138] sm:$0xff]  ;;  %vm7691_vm8 = vmmov %vm7690_vm2 }
 0x427   : > { %v2632_v33 = vsel %vm7688_vm0, %v2621_v53, %v2623_v30  ;;  %5570 = vmatprep.subr.bf16.mxu1 %v5569_v4  ;;  %v2625_v11 = vpop.permute.xlu1 %2624  ;;  %4662 = vmatmul.mubr.f32.vlgmr.msra.gmra.mrb[4].mxu1 %v7026_v37  ;;  %v4303_v53 = vld [vmem:[#allocation3 + $0x20] sm:$0xff]  ;;  %v4346_v4 = vld [vmem:[#allocation3 + $0x178] sm:$0xff]  ;;  %vm7692_vm0 = vmmov %vm7690_vm2 }
 0x428   : > { %2648 = vst [vmem:[#allocation3 + $0x370] sm:$0xf0] %v2632_v33  ;;  %v2633_v17 = vsel %vm7689_vm4, %v2623_v30, %v2625_v11  ;;  %3621 = vrot.lane.b32.xlu0 %v3598_v46, %s7632_s24  ;;  %5572 = vmatpush1.bf16.msra.mxu1 %v5571_v44  ;;  %v4507_v34 = vld [vmem:[#allocation3 + $0x680] sm:$0xff]  ;;  %v5519_v33 = vpack.c.bf16 %v4311_v54, %v4303_v53  ;;  %v4320_v30 = vld [vmem:[#allocation3 + $0xa8] sm:$0xff]  ;;  %v4321_v11 = vld [vmem:[#allocation3 + $0xb0] sm:$0xff] }
 0x429   : > { %2649 = vst [vmem:[#allocation3 + $0x378] sm:$0xf0] %v2633_v17  ;;  %3623 = vrot.lane.b32.xlu1 %v3599_v8, %s7632_s24  ;;  %4579 = vmatpush1.msra.mxu0 %v4507_v34  ;;  %v4327_v46 = vld [vmem:[#allocation3 + $0xe0] sm:$0xff]  ;;  %v5521_v25 = vpack.c.bf16 %v4328_v29, %v4320_v30  ;;  %v5575_v14 = vpack.c.bf16 %v4329_v40, %v4321_v11  ;;  %v3601_v17 = vld [vmem:[#allocation2 + $0x48] sm:$0xf0]  ;;  %v4354_v29 = vld [vmem:[#allocation3 + $0x1b8] sm:$0xff] }
 0x42a   : > { %5574 = vmatprep.subr.bf16.mxu1 %v5573_v27  ;;  %v2688_v32 = vpop.permute.xlu0 %2687  ;;  %5518 = vmatprep.subr.bf16.mxu0 %v5517_v48  ;;  %v3658_v8 = vld [vmem:[#allocation2 + $0x30] sm:$0xf0]  ;;  %v5577_v34 = vpack.c.bf16 %v4346_v4, %v4338_v0  ;;  %v4319_v27 = vld [vmem:[#allocation3 + $0xa0] sm:$0xff]  ;;  %v4362_v40 = vld [vmem:[#allocation3 + $0x1f8] sm:$0xff] }
 0x42b   : > { %v2699_v44 = vsel %vm7690_vm2, %v6844_v47, %v2688_v32  ;;  %4591 = vmatmul.mubr.f32.vlgmr.msra.gmra.mrb[4].mxu0 %v7026_v37  ;;  %v2690_v61 = vpop.permute.xlu1 %2689  ;;  %5276 = vmatprep.mubr.msk.f32.mxu1 %vm4523_vm9, %v7031_v20  ;;  %v4344_v47 = vld [vmem:[#allocation3 + $0x168] sm:$0xff]  ;;  %v4345_v48 = vld [vmem:[#allocation3 + $0x170] sm:$0xff]  ;;  %v3659_v37 = vld [vmem:[#allocation2 + $0x38] sm:$0xf0]  ;;  %v5523_v30 = vpack.c.bf16 %v4327_v46, %v4319_v27 }
 0x42c   : > { %2715 = vst [vmem:[#allocation3 + $0x3a0] sm:$0xf] %v2699_v44  ;;  %5520 = vmatpush1.bf16.msra.mxu0 %v5519_v33  ;;  %v2700_v54 = vsel %vm7691_vm8, %v2688_v32, %v2690_v61  ;;  %3625 = vrot.lane.b32.xlu0 %v3600_v60, %s7632_s24  ;;  %v3676_v33 = vrot.slane %v3658_v8, 4  ;;  %v4336_v11 = vld [vmem:[#allocation3 + $0x128] sm:$0xff]  ;;  %v4337_v32 = vld [vmem:[#allocation3 + $0x130] sm:$0xff]  ;;  %vm7693_vm4 = vmmov %vm7692_vm0  ;;  %v3677_v46 = vrot.slane %v3659_v37, 4 }
 0x42d   : > { %2716 = vst [vmem:[#allocation3 + $0x3a8] sm:$0xf] %v2700_v54  ;;  %5522 = vmatprep.subr.bf16.mxu0 %v5521_v25  ;;  %5576 = vmatpush1.bf16.msra.mxu1 %v5575_v14  ;;  %v5525_v4 = vpack.c.bf16 %v4344_v47, %v4336_v11  ;;  %v5579_v60 = vpack.c.bf16 %v4345_v48, %v4337_v32  ;;  %v3660_v54 = vld [vmem:[#allocation2 + $0x40] sm:$0xf0]  ;;  %v3661_v25 = vld [vmem:[#allocation2 + $0x48] sm:$0xf0] }
 0x42e   : > { %3627 = vrot.lane.b32.xlu1 %v3601_v17, %s7632_s24  ;;  %5578 = vmatprep.subr.bf16.mxu1 %v5577_v34  ;;  %v2692_v53 = vpop.permute.xlu0 %2691  ;;  %v5581_v17 = vpack.c.bf16 %v4362_v40, %v4354_v29  ;;  %v4352_v8 = vld [vmem:[#allocation3 + $0x1a8] sm:$0xff]  ;;  %v4335_v27 = vld [vmem:[#allocation3 + $0x120] sm:$0xff]  ;;  %v4370_v47 = vld [vmem:[#allocation3 + $0x238] sm:$0xff]  ;;  %v3678_v11 = vrot.slane %v3660_v54, 4  ;;  %v3679_v32 = vrot.slane %v3661_v25, 4 }
 0x42f   : > { %v2701_v44 = vsel %vm7692_vm0, %v2690_v61, %v2692_v53  ;;  %v2694_v0 = vpop.permute.xlu1 %2693  ;;  %5275 = vmatprep.mubr.msk.f32.mxu0 %vm4523_vm9, %v7031_v20  ;;  %v4360_v34 = vld [vmem:[#allocation3 + $0x1e8] sm:$0xff]  ;;  %v4361_v61 = vld [vmem:[#allocation3 + $0x1f0] sm:$0xff]  ;;  %v4378_v48 = vld [vmem:[#allocation3 + $0x278] sm:$0xff]  ;;  %vm7694_vm9 = vcmask 891904  }
 0x430   : > { %2717 = vst [vmem:[#allocation3 + $0x3b0] sm:$0xf] %v2701_v44  ;;  %5524 = vmatpush1.bf16.msra.mxu0 %v5523_v30  ;;  %v2702_v14 = vsel %vm7693_vm4, %v2692_v53, %v2694_v0  ;;  %3690 = vrot.lane.b32.xlu0 %v3676_v33, %s7640_s0  ;;  %v5527_v30 = vpack.c.bf16 %v4343_v62, %v4335_v27  ;;  %v4353_v53 = vld [vmem:[#allocation3 + $0x1b0] sm:$0xff]  ;;  %v4359_v44 = vld [vmem:[#allocation3 + $0x1e0] sm:$0xff]  ;;  %vm7695_vm2 = vmmov %vm7694_vm9  ;;  %vm7698_vm4 = vcmask 826368  }
 0x431   : > { %2718 = vst [vmem:[#allocation3 + $0x3b8] sm:$0xf] %v2702_v14  ;;  %5526 = vmatprep.subr.bf16.mxu0 %v5525_v4  ;;  %5580 = vmatpush1.bf16.msra.mxu1 %v5579_v60  ;;  %v5529_v40 = vpack.c.bf16 %v4360_v34, %v4352_v8  ;;  %v5583_v33 = vpack.c.bf16 %v4361_v61, %v4353_v53  ;;  %v4368_v60 = vld [vmem:[#allocation3 + $0x228] sm:$0xff]  ;;  %v4377_v62 = vld [vmem:[#allocation3 + $0x270] sm:$0xff]  ;;  %v4351_v54 = vld [vmem:[#allocation3 + $0x1a0] sm:$0xff] }
 0x432   : > { %3692 = vrot.lane.b32.xlu1 %v3677_v46, %s7640_s0  ;;  %5582 = vmatprep.subr.bf16.mxu1 %v5581_v17  ;;  %v2748_v20 = vpop.permute.xlu0 %2747  ;;  %v5585_v4 = vpack.c.bf16 %v4378_v48, %v4370_v47  ;;  %v4376_v14 = vld [vmem:[#allocation3 + $0x268] sm:$0xff]  ;;  %v4386_v25 = vld [vmem:[#allocation3 + $0x2b8] sm:$0xff]  ;;  %v5531_v17 = vpack.c.bf16 %v4359_v44, %v4351_v54  ;;  %v4369_v8 = vld [vmem:[#allocation3 + $0x230] sm:$0xff] }
 0x433   : > { %v2759_v37 = vsel %vm7694_vm9, %v6856_v31, %v2748_v20  ;;  %v2750_v29 = vpop.permute.xlu1 %2749  ;;  %v4394_v31 = vld [vmem:[#allocation3 + $0x2f8] sm:$0xff]  ;;  %vm7696_vm8 = vmmov %vm7695_vm2  ;;  %v3727_v27 = vld [vmem:[#allocation2 + $0x30] sm:$0xf0]  ;;  %v5533_v47 = vpack.c.bf16 %v4376_v14, %v4368_v60  ;;  %v5587_v48 = vpack.c.bf16 %v4377_v62, %v4369_v8 }
 0x434   : > { %2775 = vst [vmem:[#allocation3 + $0x3a0] sm:$0xf0] %v2759_v37  ;;  %5528 = vmatpush1.bf16.msra.mxu0 %v5527_v30  ;;  %v2760_v0 = vsel %vm7695_vm2, %v2748_v20, %v2750_v29  ;;  %3694 = vrot.lane.b32.xlu0 %v3678_v11, %s7640_s0  ;;  %v4375_v20 = vld [vmem:[#allocation3 + $0x260] sm:$0xff]  ;;  %vm7697_vm0 = vmmov %vm7695_vm2  ;;  %v5589_v11 = vpack.c.bf16 %v4394_v31, %v4386_v25  ;;  %v4384_v53 = vld [vmem:[#allocation3 + $0x2a8] sm:$0xff] }
 0x435   : > { %2776 = vst [vmem:[#allocation3 + $0x3a8] sm:$0xf0] %v2760_v0  ;;  %5530 = vmatprep.subr.bf16.mxu0 %v5529_v40  ;;  %5584 = vmatpush1.bf16.msra.mxu1 %v5583_v33  ;;  %v4393_v37 = vld [vmem:[#allocation3 + $0x2f0] sm:$0xff]  ;;  %v3728_v40 = vld [vmem:[#allocation2 + $0x38] sm:$0xf0]  ;;  %v4391_v14 = vld [vmem:[#allocation3 + $0x2e0] sm:$0xff] }
 0x436   : > { %3696 = vrot.lane.b32.xlu1 %v3679_v32, %s7640_s0  ;;  %5586 = vmatprep.subr.bf16.mxu1 %v5585_v4  ;;  %v2752_v46 = vpop.permute.xlu0 %2751  ;;  %v4392_v32 = vld [vmem:[#allocation3 + $0x2e8] sm:$0xff]  ;;  %v4410_v33 = vld [vmem:[#allocation3 + $0x378] sm:$0xff]  ;;  %v4385_v4 = vld [vmem:[#allocation3 + $0x2b0] sm:$0xff] }
 0x437   : > { %v2761_v34 = vsel %vm7696_vm8, %v2750_v29, %v2752_v46  ;;  %v2754_v61 = vpop.permute.xlu1 %2753  ;;  %v4367_v29 = vld [vmem:[#allocation3 + $0x220] sm:$0xff]  ;;  %v4402_v60 = vld [vmem:[#allocation3 + $0x338] sm:$0xff]  ;;  %v5537_v31 = vpack.c.bf16 %v4392_v32, %v4384_v53  ;;  %v3787_v8 = vld [vmem:[#allocation2 + $0x30] sm:$0xf0] }
 0x438   : > { %2777 = vst [vmem:[#allocation3 + $0x3b0] sm:$0xf0] %v2761_v34  ;;  %5532 = vmatpush1.bf16.msra.mxu0 %v5531_v17  ;;  %v2762_v30 = vsel %vm7697_vm0, %v2752_v46, %v2754_v61  ;;  %3750 = vrot.lane.b32.xlu0 %v3727_v27, %s7571_s26  ;;  %v5535_v0 = vpack.c.bf16 %v4375_v20, %v4367_v29  ;;  %v3729_v25 = vld [vmem:[#allocation2 + $0x40] sm:$0xf0]  ;;  %v3730_v17 = vld [vmem:[#allocation2 + $0x48] sm:$0xf0]  ;;  %vm7699_vm9 = vmmov %vm7698_vm4 }
 0x439   : > { %2778 = vst [vmem:[#allocation3 + $0x3b8] sm:$0xf0] %v2762_v30  ;;  %5534 = vmatprep.subr.bf16.mxu0 %v5533_v47  ;;  %5588 = vmatpush1.bf16.msra.mxu1 %v5587_v48  ;;  %v5591_v46 = vpack.c.bf16 %v4393_v37, %v4385_v4  ;;  %v5593_v61 = vpack.c.bf16 %v4410_v33, %v4402_v60  ;;  %v4408_v27 = vld [vmem:[#allocation3 + $0x368] sm:$0xff]  ;;  %v4409_v47 = vld [vmem:[#allocation3 + $0x370] sm:$0xff]  ;;  %v4383_v48 = vld [vmem:[#allocation3 + $0x2a0] sm:$0xff]  ;;  %vm7702_vm0 = vcmask 818176  }
 0x43a   : > { %3752 = vrot.lane.b32.xlu1 %v3728_v40, %s7571_s26  ;;  %5590 = vmatprep.subr.bf16.mxu1 %v5589_v11  ;;  %v2817_v44 = vpop.permute.xlu0 %2816  ;;  %v5539_v30 = vpack.c.bf16 %v4391_v14, %v4383_v48  ;;  %v3805_v11 = vrot.slane %v3787_v8, 4  ;;  %v4400_v53 = vld [vmem:[#allocation3 + $0x328] sm:$0xff]  ;;  %v4401_v32 = vld [vmem:[#allocation3 + $0x330] sm:$0xff]  ;;  %vm7700_vm2 = vmmov %vm7698_vm4 }
 0x43b   : > { %v2828_v62 = vsel %vm7698_vm4, %v6866_v63, %v2817_v44  ;;  %v2819_v54 = vpop.permute.xlu1 %2818  ;;  %v3788_v63 = vld [vmem:[#allocation2 + $0x38] sm:$0xf0]  ;;  %v5541_v29 = vpack.c.bf16 %v4408_v27, %v4400_v53  ;;  %v5595_v33 = vpack.c.bf16 %v4409_v47, %v4401_v32  ;;  %v3790_v4 = vld [vmem:[#allocation2 + $0x48] sm:$0xf0]  ;;  %vm7701_vm8 = vmmov %vm7700_vm2 }
 0x43c   : > { %2844 = vst [vmem:[#allocation3 + $0x3e0] sm:$0xf] %v2828_v62  ;;  %5536 = vmatpush1.bf16.msra.mxu0 %v5535_v0  ;;  %v2829_v34 = vsel %vm7699_vm9, %v2817_v44, %v2819_v54  ;;  %3754 = vrot.lane.b32.xlu0 %v3729_v25, %s7571_s26  ;;  %v4407_v44 = vld [vmem:[#allocation3 + $0x360] sm:$0xff]  ;;  %v3806_v62 = vrot.slane %v3788_v63, 4  ;;  %vm7703_vm4 = vmmov %vm7702_vm0  ;;  %v3856_v48 = vld [vmem:[#allocation2 + $0x30] sm:$0xf0] }
 0x43d   : > { %2845 = vst [vmem:[#allocation3 + $0x3e8] sm:$0xf] %v2829_v34  ;;  %5538 = vmatprep.subr.bf16.mxu0 %v5537_v31  ;;  %5592 = vmatpush1.bf16.msra.mxu1 %v5591_v46  ;;  %v3789_v0 = vld [vmem:[#allocation2 + $0x40] sm:$0xf0]  ;;  %v3808_v46 = vrot.slane %v3790_v4, 4  ;;  %vm7704_vm9 = vmmov %vm7702_vm0 }
 0x43e   : > { %3756 = vrot.lane.b32.xlu1 %v3730_v17, %s7571_s26  ;;  %5594 = vmatprep.subr.bf16.mxu1 %v5593_v61  ;;  %v2821_v20 = vpop.permute.xlu0 %2820  ;;  %v4399_v14 = vld [vmem:[#allocation3 + $0x320] sm:$0xff]  ;;  %v3807_v31 = vrot.slane %v3789_v0, 4 }
 0x43f   : > { %v2830_v37 = vsel %vm7700_vm2, %v2819_v54, %v2821_v20  ;;  %v2823_v40 = vpop.permute.xlu1 %2822  ;;  %v5543_v25 = vpack.c.bf16 %v4407_v44, %v4399_v14  ;;  %vm7705_vm2 = vmmov %vm7702_vm0  ;;  %v3858_v32 = vld [vmem:[#allocation2 + $0x40] sm:$0xf0] }
 0x440   : > { %2846 = vst [vmem:[#allocation3 + $0x3f0] sm:$0xf] %v2830_v37  ;;  %5540 = vmatpush1.bf16.msra.mxu0 %v5539_v30  ;;  %v2831_v60 = vsel %vm7701_vm8, %v2821_v20, %v2823_v40  ;;  %3819 = vrot.lane.b32.xlu0 %v3805_v11, %s7572_s30  ;;  %v3916_v30 = vld [vmem:[#allocation2 + $0x30] sm:$0xf0]  ;;  %vm7706_vm8 = vcmask 809984   ;;  %v4415_v4 = vld [vmem:[#allocation3 + $0x3a0] sm:$0xff] }
 0x441   : > { %2847 = vst [vmem:[#allocation3 + $0x3f8] sm:$0xf] %v2831_v60  ;;  %5542 = vmatprep.subr.bf16.mxu0 %v5541_v29  ;;  %5596 = vmatpush1.bf16.msra.mxu1 %v5595_v33  ;;  %v3859_v37 = vld [vmem:[#allocation2 + $0x48] sm:$0xf0]  ;;  %v3917_v60 = vld [vmem:[#allocation2 + $0x38] sm:$0xf0] }
 0x442   : > { %3821 = vrot.lane.b32.xlu1 %v3806_v62, %s7572_s30  ;;  %v2877_v54 = vpop.permute.xlu0 %2876  ;;  %v4416_v33 = vld [vmem:[#allocation3 + $0x3a8] sm:$0xff]  ;;  %v3934_v14 = vrot.slane %v3916_v30, 4 }
 0x443   : > { %v2888_v17 = vsel %vm7702_vm0, %v6888_v57, %v2877_v54  ;;  %v2879_v8 = vpop.permute.xlu1 %2878  ;;  %v3857_v57 = vld [vmem:[#allocation2 + $0x38] sm:$0xf0]  ;;  %vm7707_vm0 = vmmov %vm7706_vm8 }
 0x444   : > { %2904 = vst [vmem:[#allocation3 + $0x3e0] sm:$0xf0] %v2888_v17  ;;  %5544 = vmatpush1.bf16.msra.mxu0 %v5543_v25  ;;  %v2889_v34 = vsel %vm7703_vm4, %v2877_v54, %v2879_v8  ;;  %3823 = vrot.lane.b32.xlu0 %v3807_v31, %s7572_s30  ;;  %vm7708_vm4 = vmmov %vm7707_vm0  ;;  %v3918_v31 = vld [vmem:[#allocation2 + $0x40] sm:$0xf0]  ;;  %v3919_v17 = vld [vmem:[#allocation2 + $0x48] sm:$0xf0] }
 0x445   : > { %2905 = vst [vmem:[#allocation3 + $0x3e8] sm:$0xf0] %v2889_v34  ;;  %v3935_v34 = vrot.slane %v3917_v60, 4  ;;  %v3937_v30 = vrot.slane %v3919_v17, 4 }
 0x446   : > { %3825 = vrot.lane.b32.xlu1 %v3808_v46, %s7572_s30  ;;  %v2881_v61 = vpop.permute.xlu0 %2880 }
 0x447   : > { %v2890_v27 = vsel %vm7704_vm9, %v2879_v8, %v2881_v61  ;;  %v2883_v47 = vpop.permute.xlu1 %2882  ;;  %vm7709_vm9 = vmmov %vm7707_vm0 }
 0x448   : > { %2906 = vst [vmem:[#allocation3 + $0x3f0] sm:$0xf0] %v2890_v27  ;;  %v2891_v63 = vsel %vm7705_vm2, %v2881_v61, %v2883_v47  ;;  %3879 = vrot.lane.b32.xlu0 %v3856_v48, %s7649_s2  ;;  %v4418_v61 = vld [vmem:[#allocation3 + $0x3b8] sm:$0xff]  ;;  %v4417_v48 = vld [vmem:[#allocation3 + $0x3b0] sm:$0xff]  ;;  %vm7710_vm2 = vcmask 744448  }
 0x449   : > { %2907 = vst [vmem:[#allocation3 + $0x3f8] sm:$0xf0] %v2891_v63 }
 0x44a   : > { %3881 = vrot.lane.b32.xlu1 %v3857_v57, %s7649_s2  ;;  %v2946_v20 = vpop.permute.xlu0 %2945  ;;  %v3936_v57 = vrot.slane %v3918_v31, 4 }
 0x44b   : > { %v2957_v11 = vsel %vm7706_vm8, %v6906_v51, %v2946_v20  ;;  %v2948_v53 = vpop.permute.xlu1 %2947  ;;  %v4423_v40 = vld [vmem:[#allocation3 + $0x3e0] sm:$0xff]  ;;  %vm7711_vm8 = vmmov %vm7710_vm2 }
 0x44c   : > { %2973 = vst [vmem:[#allocation3 + $0x420] sm:$0xf] %v2957_v11  ;;  %v2958_v29 = vsel %vm7707_vm0, %v2946_v20, %v2948_v53  ;;  %3883 = vrot.lane.b32.xlu0 %v3858_v32, %s7649_s2  ;;  %v4424_v44 = vld [vmem:[#allocation3 + $0x3e8] sm:$0xff]  ;;  %v5547_v51 = vpack.c.bf16 %v4423_v40, %v4415_v4  ;;  %vm7712_vm0 = vmmov %vm7710_vm2 }
 0x44d   : > { %2974 = vst [vmem:[#allocation3 + $0x428] sm:$0xf] %v2958_v29  ;;  %v5545_v0 = vpack.c.bf16 %v4424_v44, %v4416_v33  ;;  %v3985_v33 = vld [vmem:[#allocation2 + $0x30] sm:$0xf0] }
 0x44e   : > { %3885 = vrot.lane.b32.xlu1 %v3859_v37, %s7649_s2  ;;  %v2950_v62 = vpop.permute.xlu0 %2949 }
 0x44f   : > { %v2959_v54 = vsel %vm7708_vm4, %v2948_v53, %v2950_v62  ;;  %5546 = vmatprep.subr.bf16.mxu0 %v5545_v0  ;;  %v2952_v25 = vpop.permute.xlu1 %2951  ;;  %v4425_v46 = vld [vmem:[#allocation3 + $0x3f0] sm:$0xff]  ;;  %vm7713_vm4 = vmmov %vm7712_vm0 }
 0x450   : > { %2975 = vst [vmem:[#allocation3 + $0x430] sm:$0xf] %v2959_v54  ;;  %v2960_v8 = vsel %vm7709_vm9, %v2950_v62, %v2952_v25  ;;  %3948 = vrot.lane.b32.xlu0 %v3934_v14, %s7657_s27  ;;  %5548 = vmatpush1.bf16.msra.mxu0 %v5547_v51  ;;  %v4426_v27 = vld [vmem:[#allocation3 + $0x3f8] sm:$0xff]  ;;  %v5599_v20 = vpack.c.bf16 %v4425_v46, %v4417_v48  ;;  %vm7714_vm9 = vcmask 736256   ;;  %v3987_v62 = vld [vmem:[#allocation2 + $0x40] sm:$0xf0] }
 0x451   : > { %2976 = vst [vmem:[#allocation3 + $0x438] sm:$0xf] %v2960_v8  ;;  %v5597_v47 = vpack.c.bf16 %v4426_v27, %v4418_v61  ;;  %v3988_v14 = vld [vmem:[#allocation2 + $0x48] sm:$0xf0]  ;;  %v4045_v51 = vld [vmem:[#allocation2 + $0x30] sm:$0xf0] }
 0x452   : > { %3950 = vrot.lane.b32.xlu1 %v3935_v34, %s7657_s27  ;;  %v3006_v63 = vpop.permute.xlu0 %3005  ;;  %v4046_v25 = vld [vmem:[#allocation2 + $0x38] sm:$0xf0]  ;;  %v4063_v46 = vrot.slane %v4045_v51, 4  ;;  %v4047_v34 = vld [vmem:[#allocation2 + $0x40] sm:$0xf0] }
 0x453   : > { %v3017_v11 = vsel %vm7710_vm2, %v6919_v26, %v3006_v63  ;;  %5598 = vmatprep.subr.bf16.mxu1 %v5597_v47  ;;  %v3008_v53 = vpop.permute.xlu1 %3007  ;;  %v3986_v26 = vld [vmem:[#allocation2 + $0x38] sm:$0xf0]  ;;  %vm7715_vm2 = vmmov %vm7714_vm9  ;;  %v4064_v27 = vrot.slane %v4046_v25, 4  ;;  %v4065_v48 = vrot.slane %v4047_v34, 4 }
 0x454   : > { %3033 = vst [vmem:[#allocation3 + $0x420] sm:$0xf0] %v3017_v11  ;;  %v3018_v32 = vsel %vm7711_vm8, %v3006_v63, %v3008_v53  ;;  %3952 = vrot.lane.b32.xlu0 %v3936_v57, %s7657_s27  ;;  %5600 = vmatpush1.bf16.msra.mxu1 %v5599_v20  ;;  %vm7716_vm8 = vmmov %vm7715_vm2 }
 0x455   : > { %3034 = vst [vmem:[#allocation3 + $0x428] sm:$0xf0] %v3018_v32 }
 0x456   : > { %3954 = vrot.lane.b32.xlu1 %v3937_v30, %s7657_s27  ;;  %v3010_v37 = vpop.permute.xlu0 %3009 }
 0x457   : > { %v3019_v40 = vsel %vm7712_vm0, %v3008_v53, %v3010_v37  ;;  %v3012_v29 = vpop.permute.xlu1 %3011  ;;  %vm7717_vm0 = vmmov %vm7715_vm2 }
 0x458   : > { %3035 = vst [vmem:[#allocation3 + $0x430] sm:$0xf0] %v3019_v40  ;;  %v3020_v44 = vsel %vm7713_vm4, %v3010_v37, %v3012_v29  ;;  %4008 = vrot.lane.b32.xlu0 %v3985_v33, %s7661_s8  ;;  %vm7718_vm4 = vcmask 728064   ;;  %v4114_v37 = vld [vmem:[#allocation2 + $0x30] sm:$0xf0] }
 0x459   : > { %3036 = vst [vmem:[#allocation3 + $0x438] sm:$0xf0] %v3020_v44  ;;  %v4174_v33 = vld [vmem:[#allocation2 + $0x30] sm:$0xf0] }
 0x45a   : > { %4010 = vrot.lane.b32.xlu1 %v3986_v26, %s7661_s8  ;;  %v3075_v0 = vpop.permute.xlu0 %3074 }
 0x45b   : > { %v3086_v4 = vsel %vm7714_vm9, %v6929_v15, %v3075_v0  ;;  %v3077_v60 = vpop.permute.xlu1 %3076  ;;  %v4048_v15 = vld [vmem:[#allocation2 + $0x48] sm:$0xf0]  ;;  %vm7719_vm9 = vmmov %vm7718_vm4  ;;  %v4431_v25 = vld [vmem:[#allocation3 + $0x420] sm:$0xff] }
 0x45c   : > { %3102 = vst [vmem:[#allocation3 + $0x460] sm:$0xf] %v3086_v4  ;;  %v3087_v54 = vsel %vm7715_vm2, %v3075_v0, %v3077_v60  ;;  %4012 = vrot.lane.b32.xlu0 %v3987_v62, %s7661_s8  ;;  %v4066_v63 = vrot.slane %v4048_v15, 4  ;;  %vm7720_vm2 = vmmov %vm7718_vm4  ;;  %v4116_v0 = vld [vmem:[#allocation2 + $0x40] sm:$0xf0] }
 0x45d   : > { %3103 = vst [vmem:[#allocation3 + $0x468] sm:$0xf] %v3087_v54  ;;  %v4117_v4 = vld [vmem:[#allocation2 + $0x48] sm:$0xf0]  ;;  %v4176_v15 = vld [vmem:[#allocation2 + $0x40] sm:$0xf0] }
 0x45e   : > { %4014 = vrot.lane.b32.xlu1 %v3988_v14, %s7661_s8  ;;  %v3079_v31 = vpop.permute.xlu0 %3078  ;;  %v4432_v14 = vld [vmem:[#allocation3 + $0x428] sm:$0xff] }
 0x45f   : > { %v3088_v17 = vsel %vm7716_vm8, %v3077_v60, %v3079_v31  ;;  %v3081_v8 = vpop.permute.xlu1 %3080  ;;  %vm7721_vm8 = vmmov %vm7720_vm2 }
 0x460   : > { %3104 = vst [vmem:[#allocation3 + $0x470] sm:$0xf] %v3088_v17  ;;  %v3089_v61 = vsel %vm7717_vm0, %v3079_v31, %v3081_v8  ;;  %4077 = vrot.lane.b32.xlu0 %v4063_v46, %s7575_s17  ;;  %vm7722_vm0 = vcmask 89088   ;;  %v4175_v31 = vld [vmem:[#allocation2 + $0x38] sm:$0xf0]  ;;  %v4192_v17 = vrot.slane %v4174_v33, 4 }
 0x461   : > { %3105 = vst [vmem:[#allocation3 + $0x478] sm:$0xf] %v3089_v61 }
 0x462   : > { %4079 = vrot.lane.b32.xlu1 %v4064_v27, %s7575_s17  ;;  %v3135_v47 = vpop.permute.xlu0 %3134  ;;  %v4177_v27 = vld [vmem:[#allocation2 + $0x48] sm:$0xf0] }
 0x463   : > { %v3146_v57 = vsel %vm7718_vm4, %v6939_v38, %v3135_v47  ;;  %v3137_v20 = vpop.permute.xlu1 %3136  ;;  %v4115_v38 = vld [vmem:[#allocation2 + $0x38] sm:$0xf0]  ;;  %vm7723_vm4 = vmmov %vm7722_vm0 }
 0x464   : > { %3162 = vst [vmem:[#allocation3 + $0x460] sm:$0xf0] %v3146_v57  ;;  %v3147_v30 = vsel %vm7719_vm9, %v3135_v47, %v3137_v20  ;;  %4081 = vrot.lane.b32.xlu0 %v4065_v48, %s7575_s17  ;;  %vm7724_vm9 = vmmov %vm7722_vm0  ;;  %v4193_v48 = vrot.slane %v4175_v31, 4  ;;  %v4515_v31 = vld [vmem:[%s7442_s5] sm:$0xf] }
 0x465   : > { %3163 = vst [vmem:[#allocation3 + $0x468] sm:$0xf0] %v3147_v30  ;;  %v4433_v30 = vld [vmem:[#allocation3 + $0x430] sm:$0xff] }
 0x466   : > { %4083 = vrot.lane.b32.xlu1 %v4066_v63, %s7575_s17  ;;  %v3139_v11 = vpop.permute.xlu0 %3138  ;;  %v4434_v63 = vld [vmem:[#allocation3 + $0x438] sm:$0xff] }
 0x467   : > { %v3148_v53 = vsel %vm7720_vm2, %v3137_v20, %v3139_v11  ;;  %v3141_v32 = vpop.permute.xlu1 %3140  ;;  %vm7725_vm2 = vmmov %vm7722_vm0 }
 0x468   : > { %3164 = vst [vmem:[#allocation3 + $0x470] sm:$0xf0] %v3148_v53  ;;  %v3149_v40 = vsel %vm7721_vm8, %v3139_v11, %v3141_v32  ;;  %4137 = vrot.lane.b32.xlu0 %v4114_v37, %s7576_s16  ;;  %v4194_v53 = vrot.slane %v4176_v15, 4  ;;  %v4195_v37 = vrot.slane %v4177_v27, 4  ;;  %vm7726_vm8 = vcmask 80896  }
 0x469   : > { %3165 = vst [vmem:[#allocation3 + $0x478] sm:$0xf0] %v3149_v40 }
 0x46a   : > { %4139 = vrot.lane.b32.xlu1 %v4115_v38, %s7576_s16  ;;  %v3204_v29 = vpop.permute.xlu0 %3203 }
 0x46b   : > { %v3215_v44 = vsel %vm7722_vm0, %v6962_v42, %v3204_v29  ;;  %v3206_v26 = vpop.permute.xlu1 %3205  ;;  %v4439_v60 = vld [vmem:[#allocation3 + $0x460] sm:$0xff]  ;;  %vm7727_vm0 = vmmov %vm7726_vm8 }
 0x46c   : > { %3231 = vst [vmem:[#allocation3 + $0x4a0] sm:$0xf] %v3215_v44  ;;  %v3216_v62 = vsel %vm7723_vm4, %v3204_v29, %v3206_v26  ;;  %4141 = vrot.lane.b32.xlu0 %v4116_v0, %s7576_s16  ;;  %v4440_v51 = vld [vmem:[#allocation3 + $0x468] sm:$0xff]  ;;  %v5551_v42 = vpack.c.bf16 %v4439_v60, %v4431_v25  ;;  %vm7728_vm4 = vmmov %vm7727_vm0  ;;  %v4243_v0 = vld [vmem:[#allocation2 + $0x30] sm:$0xf0] }
 0x46d   : > { %3232 = vst [vmem:[#allocation3 + $0x4a8] sm:$0xf] %v3216_v62  ;;  %v5549_v54 = vpack.c.bf16 %v4440_v51, %v4432_v14  ;;  %v4245_v51 = vld [vmem:[#allocation2 + $0x40] sm:$0xf0] }
 0x46e   : > { %4143 = vrot.lane.b32.xlu1 %v4117_v4, %s7576_s16  ;;  %v3208_v46 = vpop.permute.xlu0 %3207 }
 0x46f   : > { %v3217_v8 = vsel %vm7724_vm9, %v3206_v26, %v3208_v46  ;;  %5550 = vmatprep.subr.bf16.mxu0 %v5549_v54  ;;  %v3210_v34 = vpop.permute.xlu1 %3209  ;;  %v4441_v61 = vld [vmem:[#allocation3 + $0x470] sm:$0xff]  ;;  %vm7729_vm9 = vmmov %vm7727_vm0  ;;  %v4246_v54 = vld [vmem:[#allocation2 + $0x48] sm:$0xf0] }
 0x470   : > { %3233 = vst [vmem:[#allocation3 + $0x4b0] sm:$0xf] %v3217_v8  ;;  %v3218_v47 = vsel %vm7725_vm2, %v3208_v46, %v3210_v34  ;;  %4206 = vrot.lane.b32.xlu0 %v4192_v17, %s7578_s18  ;;  %5552 = vmatpush1.bf16.msra.mxu0 %v5551_v42  ;;  %v4442_v57 = vld [vmem:[#allocation3 + $0x478] sm:$0xff]  ;;  %v5603_v32 = vpack.c.bf16 %v4441_v61, %v4433_v30  ;;  %vm7730_vm2 = vcmask 72704  }
 0x471   : > { %3234 = vst [vmem:[#allocation3 + $0x4b8] sm:$0xf] %v3218_v47  ;;  %v5601_v20 = vpack.c.bf16 %v4442_v57, %v4434_v63 }
 0x472   : > { %4208 = vrot.lane.b32.xlu1 %v4193_v48, %s7578_s18  ;;  %v3264_v11 = vpop.permute.xlu0 %3263 }
 0x473   : > { %v3275_v40 = vsel %vm7726_vm8, %v6975_v49, %v3264_v11  ;;  %5602 = vmatprep.subr.bf16.mxu1 %v5601_v20  ;;  %v3266_v38 = vpop.permute.xlu1 %3265  ;;  %v4244_v49 = vld [vmem:[#allocation2 + $0x38] sm:$0xf0]  ;;  %vm7731_vm8 = vmmov %vm7730_vm2 }
 0x474   : > { %3291 = vst [vmem:[#allocation3 + $0x4a0] sm:$0xf0] %v3275_v40  ;;  %v3276_v29 = vsel %vm7727_vm0, %v3264_v11, %v3266_v38  ;;  %4210 = vrot.lane.b32.xlu0 %v4194_v53, %s7578_s18  ;;  %5604 = vmatpush1.bf16.msra.mxu1 %v5603_v32  ;;  %vm7732_vm0 = vmmov %vm7730_vm2 }
 0x475   : > { %3292 = vst [vmem:[#allocation3 + $0x4a8] sm:$0xf0] %v3276_v29 }
 0x476   : > { %4212 = vrot.lane.b32.xlu1 %v4195_v37, %s7578_s18  ;;  %v3268_v33 = vpop.permute.xlu0 %3267  ;;  %s7753_s18 = sld [smem:[#allocation13_spill]] }
 0x477   : > { %v3277_v44 = vsel %vm7728_vm4, %v3266_v38, %v3268_v33  ;;  %v3270_v26 = vpop.permute.xlu1 %3269  ;;  %vm7733_vm4 = vmmov %vm7732_vm0 }
 0x478   : > { %3293 = vst [vmem:[#allocation3 + $0x4b0] sm:$0xf0] %v3277_v44  ;;  %v3278_v4 = vsel %vm7729_vm9, %v3268_v33, %v3270_v26  ;;  %4266 = vrot.lane.b32.xlu0 %v4243_v0, %s7581_s25  ;;  %vm7742_vm9 = vcmask 220160  }
 0x479   : > { %3294 = vst [vmem:[#allocation3 + $0x4b8] sm:$0xf0] %v3278_v4 }
 0x47a   : > { %4268 = vrot.lane.b32.xlu1 %v4244_v49, %s7581_s25  ;;  %v3333_v60 = vpop.permute.xlu0 %3332 }
 0x47b   : > { %v3344_v62 = vsel %vm7730_vm2, %v6985_v5, %v3333_v60  ;;  %v3335_v14 = vpop.permute.xlu1 %3334  ;;  %v4447_v40 = vld [vmem:[#allocation3 + $0x4a0] sm:$0xff]  ;;  %vm7743_vm2 = vmmov %vm7742_vm9 }
 0x47c   : > { %3360 = vst [vmem:[#allocation3 + $0x4e0] sm:$0xf] %v3344_v62  ;;  %v3345_v25 = vsel %vm7731_vm8, %v3333_v60, %v3335_v14  ;;  %4270 = vrot.lane.b32.xlu0 %v4245_v51, %s7581_s25  ;;  %v4448_v53 = vld [vmem:[#allocation3 + $0x4a8] sm:$0xff]  ;;  %vm7744_vm8 = vmmov %vm7743_vm2  ;;  %s305_s19 = scalar_lea.vmem %s7753_s18, %s7752_s15 }
 0x47d   : > { %3361 = vst [vmem:[#allocation3 + $0x4e8] sm:$0xf] %v3345_v25 }
 0x47e   : > { %4272 = vrot.lane.b32.xlu1 %v4246_v54, %s7581_s25  ;;  %v3337_v46 = vpop.permute.xlu0 %3336 }
 0x47f   : > { %v3346_v17 = vsel %vm7732_vm0, %v3335_v14, %v3337_v46  ;;  %v3339_v42 = vpop.permute.xlu1 %3338  ;;  %v4449_v60 = vld [vmem:[#allocation3 + $0x4b0] sm:$0xff]  ;;  %vm7745_vm0 = vmmov %vm7743_vm2 }
 0x480   : > { %3362 = vst [vmem:[#allocation3 + $0x4f0] sm:$0xf] %v3346_v17  ;;  %v3347_v5 = vsel %vm7733_vm4, %v3337_v46, %v3339_v42  ;;  %4518 = vperm.xlu0 %5702, %v4515_v31   ;;  %v4450_v0 = vld [vmem:[#allocation3 + $0x4b8] sm:$0xff] }
 0x481   : > { %3363 = vst [vmem:[#allocation3 + $0x4f8] sm:$0xf] %v3347_v5 }
 0x482   : > { %v3393_v8 = vpop.permute.xlu0 %3392 }
 0x483   : > { %v3404_v34 = vsel %vm1157_vm12, %v6995_v18, %v3393_v8  ;;  %v3395_v15 = vpop.permute.xlu1 %3394 }
 0x484   : > { %3420 = vst [vmem:[#allocation3 + $0x4e0] sm:$0xf0] %v3404_v34  ;;  %v3405_v61 = vsel %vm1157_vm12, %v3393_v8, %v3395_v15 }
 0x485   : > { %3421 = vst [vmem:[#allocation3 + $0x4e8] sm:$0xf0] %v3405_v61 }
 0x486   : > { %v3397_v27 = vpop.permute.xlu0 %3396 }
 0x487   : > { %v3406_v47 = vsel %vm1157_vm12, %v3395_v15, %v3397_v27  ;;  %v3399_v48 = vpop.permute.xlu1 %3398 }
 0x488   : > { %3422 = vst [vmem:[#allocation3 + $0x4f0] sm:$0xf0] %v3406_v47  ;;  %v3407_v63 = vsel %vm1157_vm12, %v3397_v27, %v3399_v48 }
 0x489   : > { %3423 = vst [vmem:[#allocation3 + $0x4f8] sm:$0xf0] %v3407_v63 }
 0x48a   : > { %v3493_v57 = vpop.permute.xlu0 %3492 }
 0x48b   : > { %v3504_v20 = vsel %vm1258_vm13, %v7018_v24, %v3493_v57  ;;  %v3495_v30 = vpop.permute.xlu1 %3494  ;;  %v4455_v11 = vld [vmem:[#allocation3 + $0x4e0] sm:$0xff] }
 0x48c   : > { %3520 = vst [vmem:[#allocation3 + $0x520] sm:$0xf0] %v3504_v20  ;;  %v3505_v18 = vsel %vm1258_vm13, %v3493_v57, %v3495_v30  ;;  %v4456_v32 = vld [vmem:[#allocation3 + $0x4e8] sm:$0xff]  ;;  %v5555_v29 = vpack.c.bf16 %v4455_v11, %v4447_v40 }
 0x48d   : > { %3521 = vst [vmem:[#allocation3 + $0x528] sm:$0xf0] %v3505_v18  ;;  %v5553_v37 = vpack.c.bf16 %v4456_v32, %v4448_v53 }
 0x48e   : > { %v3497_v38 = vpop.permute.xlu0 %3496 }
 0x48f   : > { %v3506_v33 = vsel %vm1258_vm13, %v3495_v30, %v3497_v38  ;;  %5554 = vmatprep.subr.bf16.mxu0 %v5553_v37  ;;  %v3499_v44 = vpop.permute.xlu1 %3498  ;;  %v4457_v26 = vld [vmem:[#allocation3 + $0x4f0] sm:$0xff] }
 0x490   : > { %3522 = vst [vmem:[#allocation3 + $0x530] sm:$0xf0] %v3506_v33  ;;  %v3507_v24 = vsel %vm1258_vm13, %v3497_v38, %v3499_v44  ;;  %5556 = vmatpush1.bf16.msra.mxu0 %v5555_v29  ;;  %v4458_v4 = vld [vmem:[#allocation3 + $0x4f8] sm:$0xff]  ;;  %v5607_v14 = vpack.c.bf16 %v4457_v26, %v4449_v60 }
 0x491   : > { %3523 = vst [vmem:[#allocation3 + $0x538] sm:$0xf0] %v3507_v24  ;;  %v5605_v49 = vpack.c.bf16 %v4458_v4, %v4450_v0 }
 0x492   : > { %v3562_v62 = vpop.permute.xlu0 %3561 }
 0x493   : > { %v3573_v51 = vsel %vm1328_vm14, %v7041_v59, %v3562_v62  ;;  %5606 = vmatprep.subr.bf16.mxu1 %v5605_v49  ;;  %v3564_v54 = vpop.permute.xlu1 %3563  ;;  %v4463_v53 = vld [vmem:[#allocation3 + $0x520] sm:$0xff] }
 0x494   : > { %3589 = vst [vmem:[#allocation3 + $0x560] sm:$0xf] %v3573_v51  ;;  %v3574_v25 = vsel %vm1328_vm14, %v3562_v62, %v3564_v54  ;;  %5608 = vmatpush1.bf16.msra.mxu1 %v5607_v14  ;;  %v4464_v20 = vld [vmem:[#allocation3 + $0x528] sm:$0xff] }
 0x495   : > { %3590 = vst [vmem:[#allocation3 + $0x568] sm:$0xf] %v3574_v25 }
 0x496   : > { %v3566_v31 = vpop.permute.xlu0 %3565 }
 0x497   : > { %v3575_v46 = vsel %vm1328_vm14, %v3564_v54, %v3566_v31  ;;  %v3568_v17 = vpop.permute.xlu1 %3567  ;;  %v4465_v0 = vld [vmem:[#allocation3 + $0x530] sm:$0xff] }
 0x498   : > { %3591 = vst [vmem:[#allocation3 + $0x570] sm:$0xf] %v3575_v46  ;;  %v3576_v42 = vsel %vm1328_vm14, %v3566_v31, %v3568_v17  ;;  %v4466_v33 = vld [vmem:[#allocation3 + $0x538] sm:$0xff] }
 0x499   : > { %3592 = vst [vmem:[#allocation3 + $0x578] sm:$0xf] %v3576_v42 }
 0x49a   : > { %v3622_v5 = vpop.permute.xlu0 %3621 }
 0x49b   : > { %v3633_v8 = vsel %vm1389_vm15, %v7051_v45, %v3622_v5  ;;  %v3624_v59 = vpop.permute.xlu1 %3623 }
 0x49c   : > { %3649 = vst [vmem:[#allocation3 + $0x560] sm:$0xf0] %v3633_v8  ;;  %v3634_v34 = vsel %vm1389_vm15, %v3622_v5, %v3624_v59 }
 0x49d   : > { %3650 = vst [vmem:[#allocation3 + $0x568] sm:$0xf0] %v3634_v34 }
 0x49e   : > { %v3626_v15 = vpop.permute.xlu0 %3625 }
 0x49f   : > { %v3635_v61 = vsel %vm1389_vm15, %v3624_v59, %v3626_v15 }
 0x4a0   : > { %3651 = vst [vmem:[#allocation3 + $0x570] sm:$0xf0] %v3635_v61  ;;  %v3628_v27 = vpop.permute.xlu1 %3627 }
 0x4a1   : > { %v3636_v47 = vsel %vm1389_vm15, %v3626_v15, %v3628_v27 }
 0x4a2   : > { %3652 = vst [vmem:[#allocation3 + $0x578] sm:$0xf0] %v3636_v47  ;;  %v3691_v48 = vpop.permute.xlu0 %3690 }
 0x4a3   : > { %v3702_v63 = vsel %vm1459_vm3, %v7070_v35, %v3691_v48  ;;  %v4471_v57 = vld [vmem:[#allocation3 + $0x560] sm:$0xff] }
 0x4a4   : > { %3718 = vst [vmem:[#allocation3 + $0x5a0] sm:$0xf] %v3702_v63  ;;  %v3693_v45 = vpop.permute.xlu1 %3692  ;;  %v4472_v30 = vld [vmem:[#allocation3 + $0x568] sm:$0xff]  ;;  %v5559_v37 = vpack.c.bf16 %v4471_v57, %v4463_v53 }
 0x4a5   : > { %v3703_v11 = vsel %vm1459_vm3, %v3691_v48, %v3693_v45  ;;  %v5557_v18 = vpack.c.bf16 %v4472_v30, %v4464_v20 }
 0x4a6   : > { %3719 = vst [vmem:[#allocation3 + $0x5a8] sm:$0xf] %v3703_v11  ;;  %v3695_v32 = vpop.permute.xlu0 %3694 }
 0x4a7   : > { %v3704_v40 = vsel %vm1459_vm3, %v3693_v45, %v3695_v32  ;;  %5558 = vmatprep.subr.bf16.mxu0 %v5557_v18  ;;  %v4473_v29 = vld [vmem:[#allocation3 + $0x570] sm:$0xff] }
 0x4a8   : > { %3720 = vst [vmem:[#allocation3 + $0x5b0] sm:$0xf] %v3704_v40  ;;  %v3697_v38 = vpop.permute.xlu1 %3696  ;;  %5560 = vmatpush1.bf16.msra.mxu0 %v5559_v37  ;;  %v5611_v49 = vpack.c.bf16 %v4473_v29, %v4465_v0 }
 0x4a9   : > { %v3705_v35 = vsel %vm1459_vm3, %v3695_v32, %v3697_v38  ;;  %v4474_v44 = vld [vmem:[#allocation3 + $0x578] sm:$0xff]  ;;  %vm7734_vm3 = vcmask 310272  }
 0x4aa   : > { %3721 = vst [vmem:[#allocation3 + $0x5b8] sm:$0xf] %v3705_v35  ;;  %v3751_v26 = vpop.permute.xlu0 %3750  ;;  %v5609_v24 = vpack.c.bf16 %v4474_v44, %v4466_v33  ;;  %vm7735_vm12 = vmmov %vm7734_vm3 }
 0x4ab   : > { %v3762_v4 = vsel %vm1520_vm1, %v7083_v13, %v3751_v26  ;;  %vm7736_vm13 = vmmov %vm7734_vm3 }
 0x4ac   : > { %3778 = vst [vmem:[#allocation3 + $0x5a0] sm:$0xf0] %v3762_v4  ;;  %5610 = vmatprep.subr.bf16.mxu1 %v5609_v24  ;;  %v3753_v60 = vpop.permute.xlu1 %3752  ;;  %vm7737_vm14 = vmmov %vm7734_vm3 }
 0x4ad   : > { %v3763_v62 = vsel %vm1520_vm1, %v3751_v26, %v3753_v60  ;;  %5612 = vmatpush1.bf16.msra.mxu1 %v5611_v49 }
 0x4ae   : > { %3779 = vst [vmem:[#allocation3 + $0x5a8] sm:$0xf0] %v3763_v62  ;;  %v3755_v14 = vpop.permute.xlu0 %3754 }
 0x4af   : > { %v3764_v51 = vsel %vm1520_vm1, %v3753_v60, %v3755_v14 }
 0x4b0   : > { %3780 = vst [vmem:[#allocation3 + $0x5b0] sm:$0xf0] %v3764_v51  ;;  %v3757_v54 = vpop.permute.xlu1 %3756 }
 0x4b1   : > { %v3765_v25 = vsel %vm1520_vm1, %v3755_v14, %v3757_v54  ;;  %vm7738_vm1 = vcmask 228352  }
 0x4b2   : > { %3781 = vst [vmem:[#allocation3 + $0x5b8] sm:$0xf0] %v3765_v25  ;;  %v3820_v31 = vpop.permute.xlu0 %3819  ;;  %vm7741_vm15 = vmmov %vm7738_vm1 }
 0x4b3   : > { %v3831_v13 = vsel %vm7734_vm3, %v7093_v43, %v3820_v31  ;;  %v4479_v37 = vld [vmem:[#allocation3 + $0x5a0] sm:$0xff] }
 0x4b4   : > { %3847 = vst [vmem:[#allocation3 + $0x5e0] sm:$0xf] %v3831_v13  ;;  %v3822_v46 = vpop.permute.xlu1 %3821 }
 0x4b5   : > { %v3832_v17 = vsel %vm7735_vm12, %v3820_v31, %v3822_v46  ;;  %v4480_v11 = vld [vmem:[#allocation3 + $0x5a8] sm:$0xff]  ;;  %vm4857_vm12 = vcmask 97280  }
 0x4b6   : > { %3848 = vst [vmem:[#allocation3 + $0x5e8] sm:$0xf] %v3832_v17  ;;  %v3824_v42 = vpop.permute.xlu0 %3823 }
 0x4b7   : > { %v3833_v5 = vsel %vm7736_vm13, %v3822_v46, %v3824_v42  ;;  %v4481_v0 = vld [vmem:[#allocation3 + $0x5b0] sm:$0xff] }
 0x4b8   : > { %3849 = vst [vmem:[#allocation3 + $0x5f0] sm:$0xf] %v3833_v5  ;;  %v3826_v8 = vpop.permute.xlu1 %3825 }
 0x4b9   : > { %v3834_v59 = vsel %vm7737_vm14, %v3824_v42, %v3826_v8  ;;  %v4482_v33 = vld [vmem:[#allocation3 + $0x5b8] sm:$0xff] }
 0x4ba   : > { %3850 = vst [vmem:[#allocation3 + $0x5f8] sm:$0xf] %v3834_v59  ;;  %v3880_v34 = vpop.permute.xlu0 %3879 }
 0x4bb   : > { %v3891_v15 = vsel %vm1651_vm7, %v7103_v52, %v3880_v34 }
 0x4bc   : > { %3907 = vst [vmem:[#allocation3 + $0x5e0] sm:$0xf0] %v3891_v15  ;;  %v3882_v61 = vpop.permute.xlu1 %3881 }
 0x4bd   : > { %v3892_v43 = vsel %vm1651_vm7, %v3880_v34, %v3882_v61 }
 0x4be   : > { %3908 = vst [vmem:[#allocation3 + $0x5e8] sm:$0xf0] %v3892_v43  ;;  %v3884_v27 = vpop.permute.xlu0 %3883 }
 0x4bf   : > { %v3893_v47 = vsel %vm1651_vm7, %v3882_v61, %v3884_v27 }
 0x4c0   : > { %3909 = vst [vmem:[#allocation3 + $0x5f0] sm:$0xf0] %v3893_v47  ;;  %v3886_v48 = vpop.permute.xlu1 %3885 }
 0x4c1   : > { %v3894_v63 = vsel %vm1651_vm7, %v3884_v27, %v3886_v48  ;;  %vm7739_vm7 = vmmov %vm7738_vm1 }
 0x4c2   : > { %3910 = vst [vmem:[#allocation3 + $0x5f8] sm:$0xf0] %v3894_v63  ;;  %v3949_v57 = vpop.permute.xlu0 %3948 }
 0x4c3   : > { %v3960_v45 = vsel %vm1721_vm6, %v7126_v23, %v3949_v57  ;;  %v4487_v52 = vld [vmem:[#allocation3 + $0x5e0] sm:$0xff] }
 0x4c4   : > { %3976 = vst [vmem:[#allocation3 + $0x620] sm:$0xf] %v3960_v45  ;;  %v3951_v20 = vpop.permute.xlu1 %3950  ;;  %v5563_v38 = vpack.c.bf16 %v4487_v52, %v4479_v37 }
 0x4c5   : > { %v3961_v30 = vsel %vm1721_vm6, %v3949_v57, %v3951_v20  ;;  %v4488_v18 = vld [vmem:[#allocation3 + $0x5e8] sm:$0xff] }
 0x4c6   : > { %3977 = vst [vmem:[#allocation3 + $0x628] sm:$0xf] %v3961_v30  ;;  %v3953_v53 = vpop.permute.xlu0 %3952  ;;  %v5561_v32 = vpack.c.bf16 %v4488_v18, %v4480_v11 }
 0x4c7   : > { %v3962_v40 = vsel %vm1721_vm6, %v3951_v20, %v3953_v53  ;;  %v4489_v35 = vld [vmem:[#allocation3 + $0x5f0] sm:$0xff] }
 0x4c8   : > { %3978 = vst [vmem:[#allocation3 + $0x630] sm:$0xf] %v3962_v40  ;;  %5562 = vmatprep.subr.bf16.mxu0 %v5561_v32  ;;  %v3955_v29 = vpop.permute.xlu1 %3954  ;;  %v5615_v49 = vpack.c.bf16 %v4489_v35, %v4481_v0 }
 0x4c9   : > { %v3963_v23 = vsel %vm1721_vm6, %v3953_v53, %v3955_v29  ;;  %5564 = vmatpush1.bf16.msra.mxu0 %v5563_v38  ;;  %v4490_v44 = vld [vmem:[#allocation3 + $0x5f8] sm:$0xff]  ;;  %vm7740_vm6 = vmmov %vm7738_vm1 }
 0x4ca   : > { %3979 = vst [vmem:[#allocation3 + $0x638] sm:$0xf] %v3963_v23  ;;  %v4009_v26 = vpop.permute.xlu0 %4008  ;;  %v5613_v24 = vpack.c.bf16 %v4490_v44, %v4482_v33 }
 0x4cb   : > { %v4020_v4 = vsel %vm7738_vm1, %v7139_v58, %v4009_v26 }
 0x4cc   : > { %4036 = vst [vmem:[#allocation3 + $0x620] sm:$0xf0] %v4020_v4  ;;  %5614 = vmatprep.subr.bf16.mxu1 %v5613_v24  ;;  %v4011_v60 = vpop.permute.xlu1 %4010 }
 0x4cd   : > { %v4021_v62 = vsel %vm7739_vm7, %v4009_v26, %v4011_v60  ;;  %5616 = vmatpush1.bf16.msra.mxu1 %v5615_v49 }
 0x4ce   : > { %4037 = vst [vmem:[#allocation3 + $0x628] sm:$0xf0] %v4021_v62  ;;  %v4013_v14 = vpop.permute.xlu0 %4012 }
 0x4cf   : > { %v4022_v51 = vsel %vm7740_vm6, %v4011_v60, %v4013_v14 }
 0x4d0   : > { %4038 = vst [vmem:[#allocation3 + $0x630] sm:$0xf0] %v4022_v51  ;;  %v4015_v54 = vpop.permute.xlu1 %4014 }
 0x4d1   : > { %v4023_v25 = vsel %vm7741_vm15, %v4013_v14, %v4015_v54 }
 0x4d2   : > { %4039 = vst [vmem:[#allocation3 + $0x638] sm:$0xf0] %v4023_v25  ;;  %v4078_v31 = vpop.permute.xlu0 %4077  ;;  %v5712_v25 = vld [vmem:[#allocation2] sm:$0xff] }
 0x4d3   : > { %v4089_v58 = vsel %vm7742_vm9, %v7149_v41, %v4078_v31  ;;  %v4495_v18 = vld [vmem:[#allocation3 + $0x620] sm:$0xff] }
 0x4d4   : > { %4105 = vst [vmem:[#allocation3 + $0x660] sm:$0xf] %v4089_v58  ;;  %v4080_v13 = vpop.permute.xlu1 %4079 }
 0x4d5   : > { %v4090_v46 = vsel %vm7743_vm2, %v4078_v31, %v4080_v13  ;;  %v4496_v20 = vld [vmem:[#allocation3 + $0x628] sm:$0xff] }
 0x4d6   : > { %4106 = vst [vmem:[#allocation3 + $0x668] sm:$0xf] %v4090_v46  ;;  %v4082_v17 = vpop.permute.xlu0 %4081 }
 0x4d7   : > { %v4091_v42 = vsel %vm7744_vm8, %v4080_v13, %v4082_v17  ;;  %v4497_v33 = vld [vmem:[#allocation3 + $0x630] sm:$0xff] }
 0x4d8   : > { %4107 = vst [vmem:[#allocation3 + $0x670] sm:$0xf] %v4091_v42  ;;  %v4084_v5 = vpop.permute.xlu1 %4083 }
 0x4d9   : > { %v4092_v8 = vsel %vm7745_vm0, %v4082_v17, %v4084_v5  ;;  %v4498_v38 = vld [vmem:[#allocation3 + $0x638] sm:$0xff] }
 0x4da   : > { %4108 = vst [vmem:[#allocation3 + $0x678] sm:$0xf] %v4092_v8  ;;  %v4138_v59 = vpop.permute.xlu0 %4137 }
 0x4db   : > { %v4149_v34 = vsel %vm1913_vm11, %v7159_v50, %v4138_v59 }
 0x4dc   : > { %4165 = vst [vmem:[#allocation3 + $0x660] sm:$0xf0] %v4149_v34  ;;  %v4140_v15 = vpop.permute.xlu1 %4139 }
 0x4dd   : > { %v4150_v41 = vsel %vm1913_vm11, %v4138_v59, %v4140_v15 }
 0x4de   : > { %4166 = vst [vmem:[#allocation3 + $0x668] sm:$0xf0] %v4150_v41  ;;  %v4142_v61 = vpop.permute.xlu0 %4141 }
 0x4df   : > { %v4151_v43 = vsel %vm1913_vm11, %v4140_v15, %v4142_v61 }
 0x4e0   : > { %4167 = vst [vmem:[#allocation3 + $0x670] sm:$0xf0] %v4151_v43  ;;  %v4144_v27 = vpop.permute.xlu1 %4143 }
 0x4e1   : > { %v4152_v47 = vsel %vm1913_vm11, %v4142_v61, %v4144_v27  ;;  %vm7746_vm11 = vcmask 138240  }
 0x4e2   : > { %4168 = vst [vmem:[#allocation3 + $0x678] sm:$0xf0] %v4152_v47  ;;  %v4207_v48 = vpop.permute.xlu0 %4206  ;;  %vm7747_vm4 = vmmov %vm7746_vm11 }
 0x4e3   : > { %v4218_v63 = vsel %vm1983_vm10, %v7179_v3, %v4207_v48  ;;  %v4503_v50 = vld [vmem:[#allocation3 + $0x660] sm:$0xff]  ;;  %vm7749_vm3 = vmmov %vm7747_vm4 }
 0x4e4   : > { %4234 = vst [vmem:[#allocation3 + $0x6a0] sm:$0xf] %v4218_v63  ;;  %v4209_v57 = vpop.permute.xlu1 %4208  ;;  %v5567_v32 = vpack.c.bf16 %v4503_v50, %v4495_v18  ;;  %v4837_v50 = vld [vmem:[#allocation2 + $0x20] sm:$0xff] }
 0x4e5   : > { %v4219_v45 = vsel %vm1983_vm10, %v4207_v48, %v4209_v57  ;;  %v4504_v52 = vld [vmem:[#allocation3 + $0x668] sm:$0xff] }
 0x4e6   : > { %4235 = vst [vmem:[#allocation3 + $0x6a8] sm:$0xf] %v4219_v45  ;;  %v4211_v30 = vpop.permute.xlu0 %4210  ;;  %v5565_v11 = vpack.c.bf16 %v4504_v52, %v4496_v20  ;;  %v4834_v45 = vld [vmem:[#allocation2 + $0x8] sm:$0xff] }
 0x4e7   : > { %v4220_v53 = vsel %vm1983_vm10, %v4209_v57, %v4211_v30  ;;  %v4505_v40 = vld [vmem:[#allocation3 + $0x670] sm:$0xff] }
 0x4e8   : > { %4236 = vst [vmem:[#allocation3 + $0x6b0] sm:$0xf] %v4220_v53  ;;  %5566 = vmatprep.subr.bf16.mxu0 %v5565_v11  ;;  %v4213_v37 = vpop.permute.xlu1 %4212  ;;  %v5619_v26 = vpack.c.bf16 %v4505_v40, %v4497_v33  ;;  %v4835_v57 = vld [vmem:[#allocation2 + $0x10] sm:$0xff] }
 0x4e9   : > { %v4221_v3 = vsel %vm1983_vm10, %v4211_v30, %v4213_v37  ;;  %5568 = vmatpush1.bf16.msra.mxu0 %v5567_v32  ;;  %v4506_v29 = vld [vmem:[#allocation3 + $0x678] sm:$0xff]  ;;  %vm7748_vm10 = vmmov %vm7747_vm4 }
 0x4ea   : > { %4237 = vst [vmem:[#allocation3 + $0x6b8] sm:$0xf] %v4221_v3  ;;  %v4267_v35 = vpop.permute.xlu0 %4266  ;;  %v5617_v23 = vpack.c.bf16 %v4506_v29, %v4498_v38 }
 0x4eb   : > { %v4278_v44 = vsel %vm7746_vm11, %v7189_v36, %v4267_v35  ;;  %v5711_v36 = vld [vmem:[%s7441_s4] sm:$0xff] }
 0x4ec   : > { %4294 = vst [vmem:[#allocation3 + $0x6a0] sm:$0xf0] %v4278_v44  ;;  %5618 = vmatprep.subr.bf16.mxu1 %v5617_v23  ;;  %v4269_v24 = vpop.permute.xlu1 %4268 }
 0x4ed   : > { %v4279_v0 = vsel %vm7747_vm4, %v4267_v35, %v4269_v24  ;;  %5620 = vmatpush1.bf16.msra.mxu1 %v5619_v26 }
 0x4ee   : > { %4295 = vst [vmem:[#allocation3 + $0x6a8] sm:$0xf0] %v4279_v0  ;;  %v4271_v4 = vpop.permute.xlu0 %4270 }
 0x4ef   : > { %v4280_v49 = vsel %vm7748_vm10, %v4269_v24, %v4271_v4 }
 0x4f0   : > { %4296 = vst [vmem:[#allocation3 + $0x6b0] sm:$0xf0] %v4280_v49  ;;  %v4273_v60 = vpop.permute.xlu1 %4272 }
 0x4f1   : > { %v4281_v62 = vsel %vm7749_vm3, %v4271_v4, %v4273_v60 }
 0x4f2   : > { %4297 = vst [vmem:[#allocation3 + $0x6b8] sm:$0xf0] %v4281_v62 }
 0x4f3   : > { %v4511_v51 = vld [vmem:[#allocation3 + $0x6a0] sm:$0xff] }
 0x4f5   : > { %v4512_v14 = vld [vmem:[#allocation3 + $0x6a8] sm:$0xff] }
 0x4f6   : > { %4720 = vmatprep.subr.mxu0 %v4512_v14 }
 0x4f7   : > { %4721 = vmatpush1.msra.mxu0 %v4511_v51  ;;  %v4513_v31 = vld [vmem:[#allocation3 + $0x6b0] sm:$0xff] }
 0x4f8   : > { %4733 = vmatmul.mubr.f32.vlgmr.msra.gmra.mrb[6].mxu0 %v5711_v36  ;;  %v4839_v51 = vld [vmem:[#allocation2 + $0x30] sm:$0xff] }
 0x4f9   : > { %v4514_v54 = vld [vmem:[#allocation3 + $0x6b8] sm:$0xff]  ;;  %4949 = vmatprep.mubr.f32.mxu0 %v5712_v25 }
 0x4fa   : > { %4791 = vmatprep.subr.mxu1 %v4514_v54  ;;  %v4663_v58 = vpop.f32.mrb[4].mxu1 }
 0x4fb   : > { %4792 = vmatpush1.msra.mxu1 %v4513_v31  ;;  %v4665_v13 = vpop.f32.mrb[5].mxu1  ;;  %v4841_v31 = vld [vmem:[#allocation2 + $0x40] sm:$0xff] }
 0x4fc   : > { %4804 = vmatmul.mubr.f32.vlgmr.msra.gmra.mrb[6].mxu1 %v5711_v36 }
 0x4fd   : > { %5020 = vmatprep.mubr.f32.mxu1 %v5712_v25 }
 0x4fe   : > { %v4592_v46 = vpop.f32.mrb[4].mxu0 }
 0x4ff   : > { %v4519_v17 = vpop.permute.xlu0 %4518  ;;  %v4594_v42 = vpop.f32.mrb[5].mxu0 }
 0x500   : > { %v4593_v5 = vadd.f32 %v4592_v46, %v4519_v17  ;;  %v4664_v8 = vadd.f32 %v4663_v58, %v4519_v17  ;;  %v4595_v59 = vadd.f32 %v4594_v42, %v4519_v17  ;;  %v4666_v34 = vadd.f32 %v4665_v13, %v4519_v17  ;;  %v4840_v13 = vld [vmem:[#allocation2 + $0x38] sm:$0xff] }
 0x502   : > { %v4810_v15 = vmax.f32 %v4593_v5, 0.0  ;;  %v4812_v41 = vmax.f32 %v4664_v8, 0.0  ;;  %v4811_v61 = vmax.f32 %v4595_v59, 0.0  ;;  %v4813_v43 = vmax.f32 %v4666_v34, 0.0 }
 0x504   : > { %v4818_v27 = vmul.f32 %v4810_v15, %v6727_v55  ;;  %v4820_v47 = vmul.f32 %v4812_v41, %v6746_v56  ;;  %v4819_v48 = vmul.f32 %v4811_v61, %v6736_v22  ;;  %v4821_v63 = vmul.f32 %v4813_v43, %v6750_v39  ;;  %v4836_v55 = vld [vmem:[#allocation2 + $0x18] sm:$0xff]  ;;  %v4850_v22 = vld [vmem:[%s7443_s6] sm:$0xf] }
 0x505   : > { %v4851_v39 = vld [vmem:[%s7750_s13] sm:$0xf] }
 0x506   : > { %4826 = vst [vmem:[#allocation2 + $0x58] sm:$0xf] %v4818_v27  ;;  %4828 = vst [vmem:[#allocation2 + $0x68] sm:$0xf] %v4820_v47  ;;  %4854 = vperm.xlu1 %5703, %v4851_v39  }
 0x507   : > { %4827 = vst [vmem:[#allocation2 + $0x60] sm:$0xf] %v4819_v48  ;;  %4829 = vst [vmem:[#allocation2 + $0x70] sm:$0xf] %v4821_v63 }
 0x50d   : > { %v4842_v30 = vld [vmem:[#allocation2 + $0x58] sm:$0xf]  ;;  %v4844_v32 = vld [vmem:[#allocation2 + $0x68] sm:$0xf] }
 0x50e   : > { %v4843_v20 = vld [vmem:[#allocation2 + $0x60] sm:$0xf]  ;;  %v4845_v52 = vld [vmem:[#allocation2 + $0x70] sm:$0xf]  ;;  %v5624_v53 = vpack.c.bf16 %v4842_v30, %v4834_v45  ;;  %v5630_v56 = vpack.c.bf16 %v4844_v32, %v4836_v55 }
 0x50f   : > { %v5621_v11 = vpack.c.bf16 %v4843_v20, %v4835_v57  ;;  %v5627_v18 = vpack.c.bf16 %v4845_v52, %v4837_v50 }
 0x511   : > { %5623 = vmatprep.subr.msk.bf16.mxu0 %vm6283_vm5, %v5621_v11  ;;  %5629 = vmatprep.subr.msk.bf16.mxu1 %vm6283_vm5, %v5627_v18  ;;  %v7754_v11 = vld [vmem:[#allocation6_spill] sm:$0xff] }
 0x512   : > { %5626 = vmatpush1.bf16.msk.msra.mxu0 %vm6283_vm5, %v5624_v53  ;;  %5632 = vmatpush1.bf16.msk.msra.mxu1 %vm6283_vm5, %v5630_v56  ;;  %v7755_v53 = vld [vmem:[#allocation7_spill] sm:$0xff] }
 0x515   : > { %5279 = vmatmul.mubr.msk.f32.vlgmr.msra.gmra.mrb[8].mxu0 %vm4857_vm12, %v4850_v22  ;;  %5282 = vmatmul.mubr.msk.f32.vlgmr.msra.gmra.mrb[8].mxu1 %vm4857_vm12, %v4850_v22 }
 0x516   : > { %5091 = vmatprep.mubr.f32.mxu0 %v5712_v25  ;;  %5162 = vmatprep.mubr.f32.mxu1 %v5712_v25 }
 0x585   : > { %v4855_v46 = vpop.permute.xlu1 %4854 }
 0x5cb   : > { %v4734_v37 = vpop.f32.mrb[6].mxu0 }
 0x5cc   : > { %v4735_v40 = vadd.f32 %v4734_v37, %v4519_v17  ;;  %v4736_v3 = vpop.f32.mrb[7].mxu0 }
 0x5cd   : > { %v4737_v38 = vadd.f32 %v4736_v3, %v4519_v17 }
 0x5ce   : > { %v4814_v29 = vmax.f32 %v4735_v40, 0.0 }
 0x5cf   : > { %v4815_v35 = vmax.f32 %v4737_v38, 0.0  ;;  %v4805_v23 = vpop.f32.mrb[6].mxu1 }
 0x5d0   : > { %v4822_v33 = vmul.f32 %v4814_v29, %v6778_v16  ;;  %v4806_v44 = vadd.f32 %v4805_v23, %v4519_v17  ;;  %v4807_v26 = vpop.f32.mrb[7].mxu1  ;;  %v4838_v16 = vld [vmem:[#allocation2 + $0x28] sm:$0xff] }
 0x5d1   : > { %v4823_v24 = vmul.f32 %v4815_v35, %v6783_v12  ;;  %v4808_v0 = vadd.f32 %v4807_v26, %v4519_v17 }
 0x5d2   : > { %4830 = vst [vmem:[#allocation2 + $0x78] sm:$0xf] %v4822_v33  ;;  %v4816_v4 = vmax.f32 %v4806_v44, 0.0 }
 0x5d3   : > { %4831 = vst [vmem:[#allocation2 + $0x80] sm:$0xf] %v4823_v24  ;;  %v4817_v49 = vmax.f32 %v4808_v0, 0.0 }
 0x5d4   : > { %v4824_v60 = vmul.f32 %v4816_v4, %v6878_v9 }
 0x5d5   : > { %v4825_v62 = vmul.f32 %v4817_v49, %v6884_v28 }
 0x5d6   : > { %4832 = vst [vmem:[#allocation2 + $0x88] sm:$0xf] %v4824_v60 }
 0x5d7   : > { %4833 = vst [vmem:[#allocation2 + $0x90] sm:$0xf] %v4825_v62 }
 0x5d9   : > { %v4846_v14 = vld [vmem:[#allocation2 + $0x78] sm:$0xf] }
 0x5da   : > { %v4847_v36 = vld [vmem:[#allocation2 + $0x80] sm:$0xf]  ;;  %v5636_v25 = vpack.c.bf16 %v4846_v14, %v4838_v16 }
 0x5db   : > { %v5633_v54 = vpack.c.bf16 %v4847_v36, %v4839_v51 }
 0x5dd   : > { %5635 = vmatprep.subr.msk.bf16.mxu0 %vm6283_vm5, %v5633_v54  ;;  %v4848_v12 = vld [vmem:[#allocation2 + $0x88] sm:$0xf] }
 0x5de   : > { %5638 = vmatpush1.bf16.msk.msra.mxu0 %vm6283_vm5, %v5636_v25  ;;  %v4849_v58 = vld [vmem:[#allocation2 + $0x90] sm:$0xf]  ;;  %v5642_v28 = vpack.c.bf16 %v4848_v12, %v4840_v13 }
 0x5df   : > { %v5639_v9 = vpack.c.bf16 %v4849_v58, %v4841_v31 }
 0x5e1   : > { %5641 = vmatprep.subr.msk.bf16.mxu1 %vm6283_vm5, %v5639_v9  ;;  %5285 = vmatmul.mubr.msk.f32.vlgmr.msra.gmra.mrb[10].mxu0 %vm4857_vm12, %v4850_v22 }
 0x5e2   : > { %5644 = vmatpush1.bf16.msk.msra.mxu1 %vm6283_vm5, %v5642_v28 }
 0x5e5   : > { %5288 = vmatmul.mubr.msk.f32.vlgmr.msra.gmra.mrb[10].mxu1 %vm4857_vm12, %v4850_v22 }
 0x5e8   : > { %v4951_v17 = vpop.f32.mrb[8].mxu0  ;;  %v5022_v42 = vpop.f32.mrb[8].mxu1 }
 0x5e9   : > { %v4953_v5 = vpop.f32.mrb[9].mxu0  ;;  %v5024_v8 = vpop.f32.mrb[9].mxu1  ;;  %v4952_v59 = vadd.f32 %v4951_v17, %v4855_v46  ;;  %v5023_v15 = vadd.f32 %v5022_v42, %v4855_v46 }
 0x5ea   : > { %v4954_v34 = vadd.f32 %v4953_v5, %v4855_v46  ;;  %v5025_v41 = vadd.f32 %v5024_v8, %v4855_v46 }
 0x5eb   : > { %v5169_v61 = vadd.f32 %v4952_v59, %v5814_v1  ;;  %v5171_v27 = vadd.f32 %v5023_v15, %v5817_v2 }
 0x5ec   : > { %v5170_v43 = vadd.f32 %v4954_v34, %v5822_v6  ;;  %v5172_v21 = vadd.f32 %v5025_v41, %v5827_v7 }
 0x5ee   : > { %v5185_v47 = vcombine.low %v5169_v61, %v5170_v43  ;;  %v5186_v48 = vcombine.low %v5171_v27, %v5172_v21 }
 0x5f0   : > { %5193 = vst [vmem:[%s305_s19] sm:$0xff] %v5185_v47  ;;  %5194 = vst [vmem:[%s305_s19 + $0x8] sm:$0xff] %v5186_v48 }
 0x6b4   : > { %v5093_v63 = vpop.f32.mrb[10].mxu0 }
 0x6b5   : > { %v5094_v57 = vadd.f32 %v5093_v63, %v4855_v46  ;;  %v5095_v50 = vpop.f32.mrb[11].mxu0 }
 0x6b6   : > { %v5096_v45 = vadd.f32 %v5095_v50, %v4855_v46 }
 0x6b7   : > { %v5173_v1 = vadd.f32 %v5094_v57, %v5866_v10 }
 0x6b8   : > { %v5164_v6 = vpop.f32.mrb[10].mxu1  ;;  %v5174_v2 = vadd.f32 %v5096_v45, %v5878_v19 }
 0x6b9   : > { %v5165_v20 = vadd.f32 %v5164_v6, %v4855_v46  ;;  %v5166_v7 = vpop.f32.mrb[11].mxu1 }
 0x6ba   : > { %v5187_v52 = vcombine.low %v5173_v1, %v5174_v2  ;;  %v5167_v30 = vadd.f32 %v5166_v7, %v4855_v46 }
 0x6bb   : > { %v5175_v18 = vadd.f32 %v5165_v20, %v7754_v11 }
 0x6bc   : > { %5195 = vst [vmem:[%s305_s19 + $0x10] sm:$0xff] %v5187_v52  ;;  %v5176_v55 = vadd.f32 %v5167_v30, %v7755_v53 }
 0x6be   : > { %v5188_v32 = vcombine.low %v5175_v18, %v5176_v55 }
 0x6c0   : > { %5196 = vst [vmem:[%s305_s19 + $0x18] sm:$0xff] %v5188_v32 }
 0x6c1 PF: > { %s7756_s20 = sld [smem:[#allocation4_spill]] }
 0x6c7   : > { %s18_s27 = sadd.s32 1, %s7756_s20  }
 0x6c8   : > { %p15_p4 = scmp.ge.s32.totalorder %s18_s27, 4  }
 0x6ca   :  { %17 = sbr.rel (!%p15_p4) target bundleno = 7 (0x7), region = 82 }

</bundles_post_ra>
